<compile_context>
chip_gen: v7x
topology: tpu7x:2x2x1
jax: 0.10.0
libtpu: 0.0.40
codegen_flags: <defaults>
</compile_context>

<pallas_src>
import functools
import math

import jax
import jax.numpy as jnp
from jax.experimental import pallas as pl
from jax.experimental.pallas import tpu as pltpu


_LBL_PAD = 128  # label head padded from 3 -> 128 lanes (lane-dense stores)


# ----------------------------------------------------------------------------
# Packed bias/gamma/beta layout (every segment a multiple of 128 lanes)
# ----------------------------------------------------------------------------
def _bias_layout(E, mlp_dim):
    segs = [
        ("proj_b", E), ("sa_bqkv", 3 * E), ("sa_bo", E),
        ("attn_g", E), ("attn_b", E),
        ("mlp_b1", mlp_dim), ("mlp_b2", E),
        ("filt_g", E), ("filt_b", E),
        ("sp_bq", E), ("sp_bk", E), ("sp_bv", E), ("sp_bo", E),
        ("samp_g", E), ("samp_b", E),
        ("lbl_b", _LBL_PAD), ("lbl_g", _LBL_PAD), ("lbl_bb", _LBL_PAD),
    ]
    off, cur = {}, 0
    for name, size in segs:
        assert size % 128 == 0
        off[name] = (cur, size)
        cur += size
    return off, cur


# ----------------------------------------------------------------------------
# Fused kernel (one grid step == BB stacked batch elements)
# ----------------------------------------------------------------------------
def _prompt_encoder_kernel(
    # inputs
    x_ref, dpe_ref,
    proj_w_ref, sa_w_ref, mlp_w1_ref, mlp_w2_ref, sp_w_ref, lbl_w_ref,
    bias_ref,
    # outputs
    point_ref, sampled_ref,
    *, BB, S, E, num_heads, eps, bias_off, Np,
):
    f32 = jnp.float32
    bf16 = jnp.bfloat16
    hd = E // num_heads
    scale = 1.0 / math.sqrt(hd)

    def b_(name):
        off, size = bias_off[name]
        return bias_ref[:, off:off + size]               # (1, size) f32

    def ln(xv, gname, bname):
        mu = jnp.mean(xv, axis=-1, keepdims=True)
        xc = xv - mu
        var = jnp.mean(xc * xc, axis=-1, keepdims=True)
        return xc * jax.lax.rsqrt(var + eps) * b_(gname) + b_(bname)

    def mha(q, k, v, w_ref, wo_col0):
        # q, k, v: [M, E] f32 with heads packed along lanes.  The output
        # projection (wo lives at w_ref[:, wo_col0:wo_col0+E]) is folded into
        # the per-head loop -> no lane-wise concat/relayout.
        outs = []
        for bb in range(BB):                              # attention is per-batch
            r0 = bb * S
            acc = jnp.zeros((S, E), f32)
            for h in range(num_heads):                    # static unroll
                c0 = h * hd
                # TODO(synk): 32-lane head slices cost vreg relayouts; repack
                # QKV so heads land on 128-lane boundaries if a bundle dump
                # shows VPU-slot pressure (second-order vs weight DMA).
                qh = q[r0:r0 + S, c0:c0 + hd].astype(bf16)
                kh = k[r0:r0 + S, c0:c0 + hd].astype(bf16)
                vh = v[r0:r0 + S, c0:c0 + hd].astype(bf16)
                s = jax.lax.dot_general(
                    qh, kh, (((1,), (1,)), ((), ())),
                    preferred_element_type=f32) * scale           # [S, S]
                s = s - jnp.max(s, axis=-1, keepdims=True)
                p = jnp.exp(s)
                p = p / jnp.sum(p, axis=-1, keepdims=True)         # exact softmax
                oh = jnp.dot(p.astype(bf16), vh,
                             preferred_element_type=f32)           # [S, hd]
                wo_h = w_ref[c0:c0 + hd, wo_col0:wo_col0 + E]      # bf16 [hd, E]
                acc = acc + jnp.dot(oh.astype(bf16), wo_h,
                                    preferred_element_type=f32)
            outs.append(acc)
        return outs[0] if BB == 1 else jnp.concatenate(outs, axis=0)

    x = x_ref[...].astype(bf16)                           # [M, C]
    dpe = dpe_ref[...].astype(f32)                        # [M, E]

    # project_embed(clipseg) + dpe
    emb = (jnp.dot(x, proj_w_ref[...], preferred_element_type=f32)
           + b_("proj_b") + dpe)

    # --- self-attention (fused QKV matmul, wo folded into the head loop) ---
    qkv = (jnp.dot(emb.astype(bf16), sa_w_ref[:, 0:3 * E],
                   preferred_element_type=f32) + b_("sa_bqkv"))    # [M, 3E]
    attn = mha(qkv[:, 0:E], qkv[:, E:2 * E], qkv[:, 2 * E:3 * E],
               sa_w_ref, 3 * E) + b_("sa_bo")
    # LayerNorm, then += dpe (matches: attn = LN(attn); attn += dpe)
    attn_ln = ln(attn, "attn_g", "attn_b") + dpe
    attn_b16 = attn_ln.astype(bf16)

    # --- filtering MLP: Linear -> exact GELU(erf) -> Linear -> LayerNorm ---
    h1 = (jnp.dot(attn_b16, mlp_w1_ref[...], preferred_element_type=f32)
          + b_("mlp_b1"))
    h1 = 0.5 * h1 * (1.0 + jax.lax.erf(h1 * 0.7071067811865476))
    filt = (jnp.dot(h1.astype(bf16), mlp_w2_ref[...],
                    preferred_element_type=f32) + b_("mlp_b2"))
    filt_ln = ln(filt, "filt_g", "filt_b")

    # --- sampler attention: q = filtered, k = attn_ln, v = dpe ---
    q = (jnp.dot(filt_ln.astype(bf16), sp_w_ref[:, 0:E],
                 preferred_element_type=f32) + b_("sp_bq"))
    k = (jnp.dot(attn_b16, sp_w_ref[:, E:2 * E],
                 preferred_element_type=f32) + b_("sp_bk"))
    v = (jnp.dot(dpe.astype(bf16), sp_w_ref[:, 2 * E:3 * E],
                 preferred_element_type=f32) + b_("sp_bv"))
    sampled = mha(q, k, v, sp_w_ref, 3 * E) + b_("sp_bo")
    sampled_ln = ln(sampled, "samp_g", "samp_b")
    sampled_ref[...] = sampled_ln.astype(sampled_ref.dtype)

    # --- label head (E -> Np, padded to 128 lanes) + masked LayerNorm(Np) ---
    logits = (jnp.dot(sampled_ln.astype(bf16), lbl_w_ref[...],
                      preferred_element_type=f32) + b_("lbl_b"))   # [M, 128]
    mask = (jax.lax.broadcasted_iota(jnp.int32, (1, _LBL_PAD), 1)
            < Np).astype(f32)
    inv_np = 1.0 / Np
    mu = jnp.sum(logits * mask, axis=-1, keepdims=True) * inv_np
    xc = (logits - mu) * mask
    var = jnp.sum(xc * xc, axis=-1, keepdims=True) * inv_np
    point = xc * jax.lax.rsqrt(var + eps) * b_("lbl_g") + b_("lbl_bb")
    point_ref[...] = point.astype(point_ref.dtype)


# ----------------------------------------------------------------------------
# Host-side weight packing (bf16 weight slabs + one packed f32 bias vector)
# ----------------------------------------------------------------------------
def pack_params(params):
    E = params["embedding_dim"]
    mlp_dim = params["mlp_w1"].shape[1]
    bias_off, total = _bias_layout(E, mlp_dim)
    sa, sp = params["self_attn"], params["sampler_attn"]
    bf16 = jnp.bfloat16

    def pad_lbl(v):
        return jnp.pad(v, (0, _LBL_PAD - v.shape[0]))

    pieces = {
        "proj_b": params["proj_b"], "sa_bqkv": sa["bqkv"], "sa_bo": sa["bo"],
        "attn_g": params["attn_ln_g"], "attn_b": params["attn_ln_b"],
        "mlp_b1": params["mlp_b1"], "mlp_b2": params["mlp_b2"],
        "filt_g": params["filt_ln_g"], "filt_b": params["filt_ln_b"],
        "sp_bq": sp["bq"], "sp_bk": sp["bk"], "sp_bv": sp["bv"], "sp_bo": sp["bo"],
        "samp_g": params["samp_ln_g"], "samp_b": params["samp_ln_b"],
        "lbl_b": pad_lbl(params["label_b"]),
        "lbl_g": pad_lbl(params["label_ln_g"]),
        "lbl_bb": pad_lbl(params["label_ln_b"]),
    }
    bias = jnp.zeros((total,), jnp.float32)
    for name, v in pieces.items():
        off, size = bias_off[name]
        bias = bias.at[off:off + size].set(v.astype(jnp.float32))

    lbl_w = jnp.pad(params["label_w"],
                    ((0, 0), (0, _LBL_PAD - params["label_w"].shape[1])))

    # NOTE: weights are stored [in, out]; PyTorch's in_proj_weight [3E,E] must
    # be transposed & packed column-wise (q|k|v) to match "sa_w"/"sp_w".
    return {
        "embedding_dim": E,
        "num_heads": params["num_heads"],
        "mlp_dim": mlp_dim,
        "bias_off": bias_off,
        "proj_w": params["proj_w"].astype(bf16),
        "sa_w": jnp.concatenate([sa["wqkv"], sa["wo"]], axis=1).astype(bf16),
        "mlp_w1": params["mlp_w1"].astype(bf16),
        "mlp_w2": params["mlp_w2"].astype(bf16),
        "sp_w": jnp.concatenate([sp["wq"], sp["wk"], sp["wv"], sp["wo"]],
                                axis=1).astype(bf16),
        "lbl_w": lbl_w.astype(bf16),
        "bias": bias.reshape(1, total),
    }


def _choose_bb(B, S, max_rows=256):
    # Largest batch stacking BB that (a) divides B, (b) keeps M = BB*S <= 256
    # (fills the 256-tall v6e/v7x MXU), and (c) keeps >= 2 grid steps when
    # B >= 2 so both v7x TensorCores get work.
    best = 1
    for bb in range(1, B + 1):
        if B % bb:
            continue
        if bb * S > max_rows:
            continue
        if B >= 2 and B // bb < 2:
            continue
        best = bb
    return best


# ----------------------------------------------------------------------------
# Forward wrapper
# ----------------------------------------------------------------------------
def prompt_encoder_forward(clipseg_embedding, dpe, params):
    B, H, W, C = clipseg_embedding.shape
    E = params["embedding_dim"]
    nh = params["num_heads"]
    mlp_dim = params["mlp_dim"]
    S = H * W
    hd = E // nh
    BB = _choose_bb(B, S)
    G = B // BB
    M = BB * S

    x = clipseg_embedding.reshape(G, M, C)
    dpe3 = dpe.reshape(G, M, E)

    def act_spec(last):
        return pl.BlockSpec((None, M, last), lambda g: (g, 0, 0))

    def full_spec(a):
        return pl.BlockSpec(a.shape, lambda g, _nd=a.ndim: (0,) * _nd)

    weights = [params["proj_w"], params["sa_w"], params["mlp_w1"],
               params["mlp_w2"], params["sp_w"], params["lbl_w"],
               params["bias"]]

    in_specs = [act_spec(C), act_spec(E)] + [full_spec(w) for w in weights]
    out_shape = (
        jax.ShapeDtypeStruct((G, M, _LBL_PAD), clipseg_embedding.dtype),
        jax.ShapeDtypeStruct((G, M, E), clipseg_embedding.dtype),
    )
    out_specs = (act_spec(_LBL_PAD), act_spec(E))

    # Advisory cost for XLA scheduling around the custom call.
    flops_elem = 2 * S * (
        C * E + E * 3 * E + 3 * E * E + 2 * E * mlp_dim + E * _LBL_PAD
        + 2 * (nh * (2 * S * hd) + E * E))
    trans_elem = 2 * nh * S * S + S * mlp_dim
    w_bytes = sum(int(w.size) * w.dtype.itemsize for w in weights)
    act_bytes = B * S * 4 * (C + 2 * E + _LBL_PAD)
    cost = pl.CostEstimate(flops=int(B * flops_elem),
                           transcendentals=int(B * trans_elem),
                           bytes_accessed=int(w_bytes + act_bytes))

    kernel = functools.partial(
        _prompt_encoder_kernel, BB=BB, S=S, E=E, num_heads=nh, eps=1e-5,
        bias_off=params["bias_off"], Np=3)

    point_pad, sampled = pl.pallas_call(
        kernel,
        grid=(G,),
        in_specs=in_specs,
        out_specs=out_specs,
        out_shape=out_shape,
        compiler_params=pltpu.CompilerParams(
            dimension_semantics=("parallel",)),
        cost_estimate=cost,
    )(x, dpe3, *weights)

    point_embeddings = point_pad.reshape(B, S, _LBL_PAD)[:, :, :3]
    embeddings_sampled = sampled.reshape(B, S, E)
    return point_embeddings, embeddings_sampled


# ----------------------------------------------------------------------------
# Deterministic parameter init (synthetic; weights stored as [in, out])
# ----------------------------------------------------------------------------
def init_params(key, embedding_dim=256, num_heads=8, mlp_dim=1024, in_dim=64):
    kit = iter(jax.random.split(key, 24))

    def w(shape, scale=0.02):
        return scale * jax.random.normal(next(kit), shape, dtype=jnp.float32)

    E = embedding_dim
    return {
        "embedding_dim": E,
        "num_heads": num_heads,
        "proj_w": w((in_dim, E)), "proj_b": w((E,)),
        "self_attn": {
            "wqkv": w((E, 3 * E)), "bqkv": w((3 * E,)),   # fused Q|K|V
            "wo": w((E, E)), "bo": w((E,)),
        },
        "attn_ln_g": jnp.ones((E,), jnp.float32),
        "attn_ln_b": jnp.zeros((E,), jnp.float32),
        "mlp_w1": w((E, mlp_dim)), "mlp_b1": w((mlp_dim,)),
        "mlp_w2": w((mlp_dim, E)), "mlp_b2": w((E,)),
        "filt_ln_g": jnp.ones((E,), jnp.float32),
        "filt_ln_b": jnp.zeros((E,), jnp.float32),
        "sampler_attn": {
            "wq": w((E, E)), "bq": w((E,)),
            "wk": w((E, E)), "bk": w((E,)),
            "wv": w((E, E)), "bv": w((E,)),
            "wo": w((E, E)), "bo": w((E,)),
        },
        "samp_ln_g": jnp.ones((E,), jnp.float32),
        "samp_ln_b": jnp.zeros((E,), jnp.float32),
        "label_w": w((E, 3)), "label_b": w((3,)),
        "label_ln_g": jnp.ones((3,), jnp.float32),
        "label_ln_b": jnp.zeros((3,), jnp.float32),
    }


if __name__ == "__main__":
    B, H, W = 2, 8, 8
    E, HEADS, MLP = 256, 8, 1024

    key = jax.random.PRNGKey(0)
    k_in, k_dpe, k_par = jax.random.split(key, 3)
    clipseg_embedding = jax.random.normal(k_in, (B, H, W, 64), dtype=jnp.float32)
    dpe = jax.random.normal(k_dpe, (B, H, W, E), dtype=jnp.float32)
    params = init_params(k_par, embedding_dim=E, num_heads=HEADS, mlp_dim=MLP)
    packed = pack_params(params)   # bf16 weight slabs + packed f32 biases

    fwd = jax.jit(functools.partial(prompt_encoder_forward, params=packed))
    point_embeddings, embeddings_sampled = fwd(clipseg_embedding, dpe)
    jax.block_until_ready((point_embeddings, embeddings_sampled))

    assert point_embeddings.shape == (B, H * W, 3)
    assert embeddings_sampled.shape == (B, H * W, E)
    print("KERNEL_OK")
</pallas_src>

<mosaic_0001>
module attributes {stable_mosaic.version = 11 : i64} {
  func.func @_prompt_encoder_kernel(%arg0: i32, %arg1: memref<1x64x64xf32, #tpu.memory_space<vmem>>, %arg2: memref<1x64x256xf32, #tpu.memory_space<vmem>>, %arg3: memref<64x256xbf16, #tpu.memory_space<vmem>>, %arg4: memref<256x1024xbf16, #tpu.memory_space<vmem>>, %arg5: memref<256x1024xbf16, #tpu.memory_space<vmem>>, %arg6: memref<1024x256xbf16, #tpu.memory_space<vmem>>, %arg7: memref<256x1024xbf16, #tpu.memory_space<vmem>>, %arg8: memref<256x128xbf16, #tpu.memory_space<vmem>>, %arg9: memref<1x5504xf32, #tpu.memory_space<vmem>>, %arg10: memref<1x64x128xf32, #tpu.memory_space<vmem>>, %arg11: memref<1x64x256xf32, #tpu.memory_space<vmem>>) attributes {dimension_semantics = [#tpu.dimension_semantics<parallel>], iteration_bounds = array<i64: 2>, scalar_prefetch = 0 : i64, scratch_operands = 0 : i64, tpu.core_type = #tpu.core_type<tc>, window_params = [{transform_indices = @transform_0, window_bounds = array<i64: 1, 64, 64>}, {transform_indices = @transform_1, window_bounds = array<i64: 1, 64, 256>}, {pipeline_mode = #tpu.pipeline_mode<synchronous>, transform_indices = @transform_2, window_bounds = array<i64: 64, 256>}, {pipeline_mode = #tpu.pipeline_mode<synchronous>, transform_indices = @transform_3, window_bounds = array<i64: 256, 1024>}, {pipeline_mode = #tpu.pipeline_mode<synchronous>, transform_indices = @transform_4, window_bounds = array<i64: 256, 1024>}, {pipeline_mode = #tpu.pipeline_mode<synchronous>, transform_indices = @transform_5, window_bounds = array<i64: 1024, 256>}, {pipeline_mode = #tpu.pipeline_mode<synchronous>, transform_indices = @transform_6, window_bounds = array<i64: 256, 1024>}, {pipeline_mode = #tpu.pipeline_mode<synchronous>, transform_indices = @transform_7, window_bounds = array<i64: 256, 128>}, {pipeline_mode = #tpu.pipeline_mode<synchronous>, transform_indices = @transform_8, window_bounds = array<i64: 1, 5504>}, {transform_indices = @transform_9, window_bounds = array<i64: 1, 64, 128>}, {transform_indices = @transform_10, window_bounds = array<i64: 1, 64, 256>}]} {
    %c0 = arith.constant 0 : index
    %c0_0 = arith.constant 0 : index
    %c0_1 = arith.constant 0 : index
    %0 = vector.load %arg1[%c0, %c0_0, %c0_1] : memref<1x64x64xf32, #tpu.memory_space<vmem>>, vector<1x64x64xf32>
    %1 = vector.shape_cast %0 : vector<1x64x64xf32> to vector<64x64xf32>
    %2 = arith.truncf %1 : vector<64x64xf32> to vector<64x64xbf16>
    %c0_2 = arith.constant 0 : index
    %c0_3 = arith.constant 0 : index
    %c0_4 = arith.constant 0 : index
    %3 = vector.load %arg2[%c0_2, %c0_3, %c0_4] : memref<1x64x256xf32, #tpu.memory_space<vmem>>, vector<1x64x256xf32>
    %4 = vector.shape_cast %3 : vector<1x64x256xf32> to vector<64x256xf32>
    %c0_5 = arith.constant 0 : index
    %c0_6 = arith.constant 0 : index
    %5 = vector.load %arg3[%c0_5, %c0_6] : memref<64x256xbf16, #tpu.memory_space<vmem>>, vector<64x256xbf16>
    %cst = arith.constant dense<0.000000e+00> : vector<64x256xf32>
    %6 = tpu.matmul %2, %5, %cst {dimension_numbers = #tpu.dot_dimension_numbers<[1], [0], [0], [1], [0, 0, 1, 1], [], []>} : vector<64x64xbf16>, vector<64x256xbf16>, vector<64x256xf32> -> vector<64x256xf32>
    %c0_7 = arith.constant 0 : index
    %c0_8 = arith.constant 0 : index
    %7 = vector.load %arg9[%c0_7, %c0_8] : memref<1x5504xf32, #tpu.memory_space<vmem>>, vector<1x256xf32>
    %8 = vector.broadcast %7 : vector<1x256xf32> to vector<64x256xf32>
    %9 = arith.addf %6, %8 : vector<64x256xf32>
    %10 = arith.addf %9, %4 : vector<64x256xf32>
    %11 = arith.truncf %10 : vector<64x256xf32> to vector<64x256xbf16>
    %c0_9 = arith.constant 0 : index
    %c0_10 = arith.constant 0 : index
    %12 = vector.load %arg4[%c0_9, %c0_10] : memref<256x1024xbf16, #tpu.memory_space<vmem>>, vector<256x768xbf16>
    %cst_11 = arith.constant dense<0.000000e+00> : vector<64x768xf32>
    %13 = tpu.matmul %11, %12, %cst_11 {dimension_numbers = #tpu.dot_dimension_numbers<[1], [0], [0], [1], [0, 0, 1, 1], [], []>} : vector<64x256xbf16>, vector<256x768xbf16>, vector<64x768xf32> -> vector<64x768xf32>
    %c0_12 = arith.constant 0 : index
    %c256 = arith.constant 256 : index
    %14 = vector.load %arg9[%c0_12, %c256] : memref<1x5504xf32, #tpu.memory_space<vmem>>, vector<1x768xf32>
    %15 = vector.broadcast %14 : vector<1x768xf32> to vector<64x768xf32>
    %16 = arith.addf %13, %15 : vector<64x768xf32>
    %17 = vector.extract_strided_slice %16 {offsets = [0, 0], sizes = [64, 256], strides = [1, 1]} : vector<64x768xf32> to vector<64x256xf32>
    %18 = vector.extract_strided_slice %16 {offsets = [0, 256], sizes = [64, 256], strides = [1, 1]} : vector<64x768xf32> to vector<64x256xf32>
    %19 = vector.extract_strided_slice %16 {offsets = [0, 512], sizes = [64, 256], strides = [1, 1]} : vector<64x768xf32> to vector<64x256xf32>
    %cst_13 = arith.constant 0.000000e+00 : f32
    %20 = vector.broadcast %cst_13 : f32 to vector<64x256xf32>
    %21 = vector.extract_strided_slice %17 {offsets = [0, 0], sizes = [64, 32], strides = [1, 1]} : vector<64x256xf32> to vector<64x32xf32>
    %22 = arith.truncf %21 : vector<64x32xf32> to vector<64x32xbf16>
    %23 = vector.extract_strided_slice %18 {offsets = [0, 0], sizes = [64, 32], strides = [1, 1]} : vector<64x256xf32> to vector<64x32xf32>
    %24 = arith.truncf %23 : vector<64x32xf32> to vector<64x32xbf16>
    %25 = vector.extract_strided_slice %19 {offsets = [0, 0], sizes = [64, 32], strides = [1, 1]} : vector<64x256xf32> to vector<64x32xf32>
    %26 = arith.truncf %25 : vector<64x32xf32> to vector<64x32xbf16>
    %cst_14 = arith.constant dense<0.000000e+00> : vector<64x64xf32>
    %27 = tpu.matmul %22, %24, %cst_14 {dimension_numbers = #tpu.dot_dimension_numbers<[1], [1], [0], [0], [0, 0, 1, 0], [], []>} : vector<64x32xbf16>, vector<64x32xbf16>, vector<64x64xf32> -> vector<64x64xf32>
    %cst_15 = arith.constant 0.176776692 : f32
    %28 = vector.broadcast %cst_15 : f32 to vector<64x64xf32>
    %29 = arith.mulf %27, %28 : vector<64x64xf32>
    %cst_16 = arith.constant dense<0xFF800000> : vector<64xf32>
    %30 = vector.multi_reduction <maximumf>, %29, %cst_16 [1] : vector<64x64xf32> to vector<64xf32>
    %31 = vector.shape_cast %30 : vector<64xf32> to vector<64x1xf32>
    %32 = vector.broadcast %31 : vector<64x1xf32> to vector<64x64xf32>
    %33 = arith.subf %29, %32 : vector<64x64xf32>
    %34 = math.exp %33 : vector<64x64xf32>
    %cst_17 = arith.constant dense<0.000000e+00> : vector<64xf32>
    %35 = vector.multi_reduction <add>, %34, %cst_17 [1] : vector<64x64xf32> to vector<64xf32>
    %36 = vector.shape_cast %35 : vector<64xf32> to vector<64x1xf32>
    %37 = vector.broadcast %36 : vector<64x1xf32> to vector<64x64xf32>
    %38 = arith.divf %34, %37 : vector<64x64xf32>
    %39 = arith.truncf %38 : vector<64x64xf32> to vector<64x64xbf16>
    %cst_18 = arith.constant dense<0.000000e+00> : vector<64x32xf32>
    %40 = tpu.matmul %39, %26, %cst_18 {dimension_numbers = #tpu.dot_dimension_numbers<[1], [0], [0], [1], [0, 0, 1, 1], [], []>} : vector<64x64xbf16>, vector<64x32xbf16>, vector<64x32xf32> -> vector<64x32xf32>
    %c0_19 = arith.constant 0 : index
    %c768 = arith.constant 768 : index
    %41 = vector.load %arg4[%c0_19, %c768] : memref<256x1024xbf16, #tpu.memory_space<vmem>>, vector<32x256xbf16>
    %42 = arith.truncf %40 : vector<64x32xf32> to vector<64x32xbf16>
    %cst_20 = arith.constant dense<0.000000e+00> : vector<64x256xf32>
    %43 = tpu.matmul %42, %41, %cst_20 {dimension_numbers = #tpu.dot_dimension_numbers<[1], [0], [0], [1], [0, 0, 1, 1], [], []>} : vector<64x32xbf16>, vector<32x256xbf16>, vector<64x256xf32> -> vector<64x256xf32>
    %44 = arith.addf %20, %43 : vector<64x256xf32>
    %45 = vector.extract_strided_slice %17 {offsets = [0, 32], sizes = [64, 32], strides = [1, 1]} : vector<64x256xf32> to vector<64x32xf32>
    %46 = arith.truncf %45 : vector<64x32xf32> to vector<64x32xbf16>
    %47 = vector.extract_strided_slice %18 {offsets = [0, 32], sizes = [64, 32], strides = [1, 1]} : vector<64x256xf32> to vector<64x32xf32>
    %48 = arith.truncf %47 : vector<64x32xf32> to vector<64x32xbf16>
    %49 = vector.extract_strided_slice %19 {offsets = [0, 32], sizes = [64, 32], strides = [1, 1]} : vector<64x256xf32> to vector<64x32xf32>
    %50 = arith.truncf %49 : vector<64x32xf32> to vector<64x32xbf16>
    %cst_21 = arith.constant dense<0.000000e+00> : vector<64x64xf32>
    %51 = tpu.matmul %46, %48, %cst_21 {dimension_numbers = #tpu.dot_dimension_numbers<[1], [1], [0], [0], [0, 0, 1, 0], [], []>} : vector<64x32xbf16>, vector<64x32xbf16>, vector<64x64xf32> -> vector<64x64xf32>
    %cst_22 = arith.constant 0.176776692 : f32
    %52 = vector.broadcast %cst_22 : f32 to vector<64x64xf32>
    %53 = arith.mulf %51, %52 : vector<64x64xf32>
    %cst_23 = arith.constant dense<0xFF800000> : vector<64xf32>
    %54 = vector.multi_reduction <maximumf>, %53, %cst_23 [1] : vector<64x64xf32> to vector<64xf32>
    %55 = vector.shape_cast %54 : vector<64xf32> to vector<64x1xf32>
    %56 = vector.broadcast %55 : vector<64x1xf32> to vector<64x64xf32>
    %57 = arith.subf %53, %56 : vector<64x64xf32>
    %58 = math.exp %57 : vector<64x64xf32>
    %cst_24 = arith.constant dense<0.000000e+00> : vector<64xf32>
    %59 = vector.multi_reduction <add>, %58, %cst_24 [1] : vector<64x64xf32> to vector<64xf32>
    %60 = vector.shape_cast %59 : vector<64xf32> to vector<64x1xf32>
    %61 = vector.broadcast %60 : vector<64x1xf32> to vector<64x64xf32>
    %62 = arith.divf %58, %61 : vector<64x64xf32>
    %63 = arith.truncf %62 : vector<64x64xf32> to vector<64x64xbf16>
    %cst_25 = arith.constant dense<0.000000e+00> : vector<64x32xf32>
    %64 = tpu.matmul %63, %50, %cst_25 {dimension_numbers = #tpu.dot_dimension_numbers<[1], [0], [0], [1], [0, 0, 1, 1], [], []>} : vector<64x64xbf16>, vector<64x32xbf16>, vector<64x32xf32> -> vector<64x32xf32>
    %c32 = arith.constant 32 : index
    %c768_26 = arith.constant 768 : index
    %65 = vector.load %arg4[%c32, %c768_26] : memref<256x1024xbf16, #tpu.memory_space<vmem>>, vector<32x256xbf16>
    %66 = arith.truncf %64 : vector<64x32xf32> to vector<64x32xbf16>
    %cst_27 = arith.constant dense<0.000000e+00> : vector<64x256xf32>
    %67 = tpu.matmul %66, %65, %cst_27 {dimension_numbers = #tpu.dot_dimension_numbers<[1], [0], [0], [1], [0, 0, 1, 1], [], []>} : vector<64x32xbf16>, vector<32x256xbf16>, vector<64x256xf32> -> vector<64x256xf32>
    %68 = arith.addf %44, %67 : vector<64x256xf32>
    %69 = vector.extract_strided_slice %17 {offsets = [0, 64], sizes = [64, 32], strides = [1, 1]} : vector<64x256xf32> to vector<64x32xf32>
    %70 = arith.truncf %69 : vector<64x32xf32> to vector<64x32xbf16>
    %71 = vector.extract_strided_slice %18 {offsets = [0, 64], sizes = [64, 32], strides = [1, 1]} : vector<64x256xf32> to vector<64x32xf32>
    %72 = arith.truncf %71 : vector<64x32xf32> to vector<64x32xbf16>
    %73 = vector.extract_strided_slice %19 {offsets = [0, 64], sizes = [64, 32], strides = [1, 1]} : vector<64x256xf32> to vector<64x32xf32>
    %74 = arith.truncf %73 : vector<64x32xf32> to vector<64x32xbf16>
    %cst_28 = arith.constant dense<0.000000e+00> : vector<64x64xf32>
    %75 = tpu.matmul %70, %72, %cst_28 {dimension_numbers = #tpu.dot_dimension_numbers<[1], [1], [0], [0], [0, 0, 1, 0], [], []>} : vector<64x32xbf16>, vector<64x32xbf16>, vector<64x64xf32> -> vector<64x64xf32>
    %cst_29 = arith.constant 0.176776692 : f32
    %76 = vector.broadcast %cst_29 : f32 to vector<64x64xf32>
    %77 = arith.mulf %75, %76 : vector<64x64xf32>
    %cst_30 = arith.constant dense<0xFF800000> : vector<64xf32>
    %78 = vector.multi_reduction <maximumf>, %77, %cst_30 [1] : vector<64x64xf32> to vector<64xf32>
    %79 = vector.shape_cast %78 : vector<64xf32> to vector<64x1xf32>
    %80 = vector.broadcast %79 : vector<64x1xf32> to vector<64x64xf32>
    %81 = arith.subf %77, %80 : vector<64x64xf32>
    %82 = math.exp %81 : vector<64x64xf32>
    %cst_31 = arith.constant dense<0.000000e+00> : vector<64xf32>
    %83 = vector.multi_reduction <add>, %82, %cst_31 [1] : vector<64x64xf32> to vector<64xf32>
    %84 = vector.shape_cast %83 : vector<64xf32> to vector<64x1xf32>
    %85 = vector.broadcast %84 : vector<64x1xf32> to vector<64x64xf32>
    %86 = arith.divf %82, %85 : vector<64x64xf32>
    %87 = arith.truncf %86 : vector<64x64xf32> to vector<64x64xbf16>
    %cst_32 = arith.constant dense<0.000000e+00> : vector<64x32xf32>
    %88 = tpu.matmul %87, %74, %cst_32 {dimension_numbers = #tpu.dot_dimension_numbers<[1], [0], [0], [1], [0, 0, 1, 1], [], []>} : vector<64x64xbf16>, vector<64x32xbf16>, vector<64x32xf32> -> vector<64x32xf32>
    %c64 = arith.constant 64 : index
    %c768_33 = arith.constant 768 : index
    %89 = vector.load %arg4[%c64, %c768_33] : memref<256x1024xbf16, #tpu.memory_space<vmem>>, vector<32x256xbf16>
    %90 = arith.truncf %88 : vector<64x32xf32> to vector<64x32xbf16>
    %cst_34 = arith.constant dense<0.000000e+00> : vector<64x256xf32>
    %91 = tpu.matmul %90, %89, %cst_34 {dimension_numbers = #tpu.dot_dimension_numbers<[1], [0], [0], [1], [0, 0, 1, 1], [], []>} : vector<64x32xbf16>, vector<32x256xbf16>, vector<64x256xf32> -> vector<64x256xf32>
    %92 = arith.addf %68, %91 : vector<64x256xf32>
    %93 = vector.extract_strided_slice %17 {offsets = [0, 96], sizes = [64, 32], strides = [1, 1]} : vector<64x256xf32> to vector<64x32xf32>
    %94 = arith.truncf %93 : vector<64x32xf32> to vector<64x32xbf16>
    %95 = vector.extract_strided_slice %18 {offsets = [0, 96], sizes = [64, 32], strides = [1, 1]} : vector<64x256xf32> to vector<64x32xf32>
    %96 = arith.truncf %95 : vector<64x32xf32> to vector<64x32xbf16>
    %97 = vector.extract_strided_slice %19 {offsets = [0, 96], sizes = [64, 32], strides = [1, 1]} : vector<64x256xf32> to vector<64x32xf32>
    %98 = arith.truncf %97 : vector<64x32xf32> to vector<64x32xbf16>
    %cst_35 = arith.constant dense<0.000000e+00> : vector<64x64xf32>
    %99 = tpu.matmul %94, %96, %cst_35 {dimension_numbers = #tpu.dot_dimension_numbers<[1], [1], [0], [0], [0, 0, 1, 0], [], []>} : vector<64x32xbf16>, vector<64x32xbf16>, vector<64x64xf32> -> vector<64x64xf32>
    %cst_36 = arith.constant 0.176776692 : f32
    %100 = vector.broadcast %cst_36 : f32 to vector<64x64xf32>
    %101 = arith.mulf %99, %100 : vector<64x64xf32>
    %cst_37 = arith.constant dense<0xFF800000> : vector<64xf32>
    %102 = vector.multi_reduction <maximumf>, %101, %cst_37 [1] : vector<64x64xf32> to vector<64xf32>
    %103 = vector.shape_cast %102 : vector<64xf32> to vector<64x1xf32>
    %104 = vector.broadcast %103 : vector<64x1xf32> to vector<64x64xf32>
    %105 = arith.subf %101, %104 : vector<64x64xf32>
    %106 = math.exp %105 : vector<64x64xf32>
    %cst_38 = arith.constant dense<0.000000e+00> : vector<64xf32>
    %107 = vector.multi_reduction <add>, %106, %cst_38 [1] : vector<64x64xf32> to vector<64xf32>
    %108 = vector.shape_cast %107 : vector<64xf32> to vector<64x1xf32>
    %109 = vector.broadcast %108 : vector<64x1xf32> to vector<64x64xf32>
    %110 = arith.divf %106, %109 : vector<64x64xf32>
    %111 = arith.truncf %110 : vector<64x64xf32> to vector<64x64xbf16>
    %cst_39 = arith.constant dense<0.000000e+00> : vector<64x32xf32>
    %112 = tpu.matmul %111, %98, %cst_39 {dimension_numbers = #tpu.dot_dimension_numbers<[1], [0], [0], [1], [0, 0, 1, 1], [], []>} : vector<64x64xbf16>, vector<64x32xbf16>, vector<64x32xf32> -> vector<64x32xf32>
    %c96 = arith.constant 96 : index
    %c768_40 = arith.constant 768 : index
    %113 = vector.load %arg4[%c96, %c768_40] : memref<256x1024xbf16, #tpu.memory_space<vmem>>, vector<32x256xbf16>
    %114 = arith.truncf %112 : vector<64x32xf32> to vector<64x32xbf16>
    %cst_41 = arith.constant dense<0.000000e+00> : vector<64x256xf32>
    %115 = tpu.matmul %114, %113, %cst_41 {dimension_numbers = #tpu.dot_dimension_numbers<[1], [0], [0], [1], [0, 0, 1, 1], [], []>} : vector<64x32xbf16>, vector<32x256xbf16>, vector<64x256xf32> -> vector<64x256xf32>
    %116 = arith.addf %92, %115 : vector<64x256xf32>
    %117 = vector.extract_strided_slice %17 {offsets = [0, 128], sizes = [64, 32], strides = [1, 1]} : vector<64x256xf32> to vector<64x32xf32>
    %118 = arith.truncf %117 : vector<64x32xf32> to vector<64x32xbf16>
    %119 = vector.extract_strided_slice %18 {offsets = [0, 128], sizes = [64, 32], strides = [1, 1]} : vector<64x256xf32> to vector<64x32xf32>
    %120 = arith.truncf %119 : vector<64x32xf32> to vector<64x32xbf16>
    %121 = vector.extract_strided_slice %19 {offsets = [0, 128], sizes = [64, 32], strides = [1, 1]} : vector<64x256xf32> to vector<64x32xf32>
    %122 = arith.truncf %121 : vector<64x32xf32> to vector<64x32xbf16>
    %cst_42 = arith.constant dense<0.000000e+00> : vector<64x64xf32>
    %123 = tpu.matmul %118, %120, %cst_42 {dimension_numbers = #tpu.dot_dimension_numbers<[1], [1], [0], [0], [0, 0, 1, 0], [], []>} : vector<64x32xbf16>, vector<64x32xbf16>, vector<64x64xf32> -> vector<64x64xf32>
    %cst_43 = arith.constant 0.176776692 : f32
    %124 = vector.broadcast %cst_43 : f32 to vector<64x64xf32>
    %125 = arith.mulf %123, %124 : vector<64x64xf32>
    %cst_44 = arith.constant dense<0xFF800000> : vector<64xf32>
    %126 = vector.multi_reduction <maximumf>, %125, %cst_44 [1] : vector<64x64xf32> to vector<64xf32>
    %127 = vector.shape_cast %126 : vector<64xf32> to vector<64x1xf32>
    %128 = vector.broadcast %127 : vector<64x1xf32> to vector<64x64xf32>
    %129 = arith.subf %125, %128 : vector<64x64xf32>
    %130 = math.exp %129 : vector<64x64xf32>
    %cst_45 = arith.constant dense<0.000000e+00> : vector<64xf32>
    %131 = vector.multi_reduction <add>, %130, %cst_45 [1] : vector<64x64xf32> to vector<64xf32>
    %132 = vector.shape_cast %131 : vector<64xf32> to vector<64x1xf32>
    %133 = vector.broadcast %132 : vector<64x1xf32> to vector<64x64xf32>
    %134 = arith.divf %130, %133 : vector<64x64xf32>
    %135 = arith.truncf %134 : vector<64x64xf32> to vector<64x64xbf16>
    %cst_46 = arith.constant dense<0.000000e+00> : vector<64x32xf32>
    %136 = tpu.matmul %135, %122, %cst_46 {dimension_numbers = #tpu.dot_dimension_numbers<[1], [0], [0], [1], [0, 0, 1, 1], [], []>} : vector<64x64xbf16>, vector<64x32xbf16>, vector<64x32xf32> -> vector<64x32xf32>
    %c128 = arith.constant 128 : index
    %c768_47 = arith.constant 768 : index
    %137 = vector.load %arg4[%c128, %c768_47] : memref<256x1024xbf16, #tpu.memory_space<vmem>>, vector<32x256xbf16>
    %138 = arith.truncf %136 : vector<64x32xf32> to vector<64x32xbf16>
    %cst_48 = arith.constant dense<0.000000e+00> : vector<64x256xf32>
    %139 = tpu.matmul %138, %137, %cst_48 {dimension_numbers = #tpu.dot_dimension_numbers<[1], [0], [0], [1], [0, 0, 1, 1], [], []>} : vector<64x32xbf16>, vector<32x256xbf16>, vector<64x256xf32> -> vector<64x256xf32>
    %140 = arith.addf %116, %139 : vector<64x256xf32>
    %141 = vector.extract_strided_slice %17 {offsets = [0, 160], sizes = [64, 32], strides = [1, 1]} : vector<64x256xf32> to vector<64x32xf32>
    %142 = arith.truncf %141 : vector<64x32xf32> to vector<64x32xbf16>
    %143 = vector.extract_strided_slice %18 {offsets = [0, 160], sizes = [64, 32], strides = [1, 1]} : vector<64x256xf32> to vector<64x32xf32>
    %144 = arith.truncf %143 : vector<64x32xf32> to vector<64x32xbf16>
    %145 = vector.extract_strided_slice %19 {offsets = [0, 160], sizes = [64, 32], strides = [1, 1]} : vector<64x256xf32> to vector<64x32xf32>
    %146 = arith.truncf %145 : vector<64x32xf32> to vector<64x32xbf16>
    %cst_49 = arith.constant dense<0.000000e+00> : vector<64x64xf32>
    %147 = tpu.matmul %142, %144, %cst_49 {dimension_numbers = #tpu.dot_dimension_numbers<[1], [1], [0], [0], [0, 0, 1, 0], [], []>} : vector<64x32xbf16>, vector<64x32xbf16>, vector<64x64xf32> -> vector<64x64xf32>
    %cst_50 = arith.constant 0.176776692 : f32
    %148 = vector.broadcast %cst_50 : f32 to vector<64x64xf32>
    %149 = arith.mulf %147, %148 : vector<64x64xf32>
    %cst_51 = arith.constant dense<0xFF800000> : vector<64xf32>
    %150 = vector.multi_reduction <maximumf>, %149, %cst_51 [1] : vector<64x64xf32> to vector<64xf32>
    %151 = vector.shape_cast %150 : vector<64xf32> to vector<64x1xf32>
    %152 = vector.broadcast %151 : vector<64x1xf32> to vector<64x64xf32>
    %153 = arith.subf %149, %152 : vector<64x64xf32>
    %154 = math.exp %153 : vector<64x64xf32>
    %cst_52 = arith.constant dense<0.000000e+00> : vector<64xf32>
    %155 = vector.multi_reduction <add>, %154, %cst_52 [1] : vector<64x64xf32> to vector<64xf32>
    %156 = vector.shape_cast %155 : vector<64xf32> to vector<64x1xf32>
    %157 = vector.broadcast %156 : vector<64x1xf32> to vector<64x64xf32>
    %158 = arith.divf %154, %157 : vector<64x64xf32>
    %159 = arith.truncf %158 : vector<64x64xf32> to vector<64x64xbf16>
    %cst_53 = arith.constant dense<0.000000e+00> : vector<64x32xf32>
    %160 = tpu.matmul %159, %146, %cst_53 {dimension_numbers = #tpu.dot_dimension_numbers<[1], [0], [0], [1], [0, 0, 1, 1], [], []>} : vector<64x64xbf16>, vector<64x32xbf16>, vector<64x32xf32> -> vector<64x32xf32>
    %c160 = arith.constant 160 : index
    %c768_54 = arith.constant 768 : index
    %161 = vector.load %arg4[%c160, %c768_54] : memref<256x1024xbf16, #tpu.memory_space<vmem>>, vector<32x256xbf16>
    %162 = arith.truncf %160 : vector<64x32xf32> to vector<64x32xbf16>
    %cst_55 = arith.constant dense<0.000000e+00> : vector<64x256xf32>
    %163 = tpu.matmul %162, %161, %cst_55 {dimension_numbers = #tpu.dot_dimension_numbers<[1], [0], [0], [1], [0, 0, 1, 1], [], []>} : vector<64x32xbf16>, vector<32x256xbf16>, vector<64x256xf32> -> vector<64x256xf32>
    %164 = arith.addf %140, %163 : vector<64x256xf32>
    %165 = vector.extract_strided_slice %17 {offsets = [0, 192], sizes = [64, 32], strides = [1, 1]} : vector<64x256xf32> to vector<64x32xf32>
    %166 = arith.truncf %165 : vector<64x32xf32> to vector<64x32xbf16>
    %167 = vector.extract_strided_slice %18 {offsets = [0, 192], sizes = [64, 32], strides = [1, 1]} : vector<64x256xf32> to vector<64x32xf32>
    %168 = arith.truncf %167 : vector<64x32xf32> to vector<64x32xbf16>
    %169 = vector.extract_strided_slice %19 {offsets = [0, 192], sizes = [64, 32], strides = [1, 1]} : vector<64x256xf32> to vector<64x32xf32>
    %170 = arith.truncf %169 : vector<64x32xf32> to vector<64x32xbf16>
    %cst_56 = arith.constant dense<0.000000e+00> : vector<64x64xf32>
    %171 = tpu.matmul %166, %168, %cst_56 {dimension_numbers = #tpu.dot_dimension_numbers<[1], [1], [0], [0], [0, 0, 1, 0], [], []>} : vector<64x32xbf16>, vector<64x32xbf16>, vector<64x64xf32> -> vector<64x64xf32>
    %cst_57 = arith.constant 0.176776692 : f32
    %172 = vector.broadcast %cst_57 : f32 to vector<64x64xf32>
    %173 = arith.mulf %171, %172 : vector<64x64xf32>
    %cst_58 = arith.constant dense<0xFF800000> : vector<64xf32>
    %174 = vector.multi_reduction <maximumf>, %173, %cst_58 [1] : vector<64x64xf32> to vector<64xf32>
    %175 = vector.shape_cast %174 : vector<64xf32> to vector<64x1xf32>
    %176 = vector.broadcast %175 : vector<64x1xf32> to vector<64x64xf32>
    %177 = arith.subf %173, %176 : vector<64x64xf32>
    %178 = math.exp %177 : vector<64x64xf32>
    %cst_59 = arith.constant dense<0.000000e+00> : vector<64xf32>
    %179 = vector.multi_reduction <add>, %178, %cst_59 [1] : vector<64x64xf32> to vector<64xf32>
    %180 = vector.shape_cast %179 : vector<64xf32> to vector<64x1xf32>
    %181 = vector.broadcast %180 : vector<64x1xf32> to vector<64x64xf32>
    %182 = arith.divf %178, %181 : vector<64x64xf32>
    %183 = arith.truncf %182 : vector<64x64xf32> to vector<64x64xbf16>
    %cst_60 = arith.constant dense<0.000000e+00> : vector<64x32xf32>
    %184 = tpu.matmul %183, %170, %cst_60 {dimension_numbers = #tpu.dot_dimension_numbers<[1], [0], [0], [1], [0, 0, 1, 1], [], []>} : vector<64x64xbf16>, vector<64x32xbf16>, vector<64x32xf32> -> vector<64x32xf32>
    %c192 = arith.constant 192 : index
    %c768_61 = arith.constant 768 : index
    %185 = vector.load %arg4[%c192, %c768_61] : memref<256x1024xbf16, #tpu.memory_space<vmem>>, vector<32x256xbf16>
    %186 = arith.truncf %184 : vector<64x32xf32> to vector<64x32xbf16>
    %cst_62 = arith.constant dense<0.000000e+00> : vector<64x256xf32>
    %187 = tpu.matmul %186, %185, %cst_62 {dimension_numbers = #tpu.dot_dimension_numbers<[1], [0], [0], [1], [0, 0, 1, 1], [], []>} : vector<64x32xbf16>, vector<32x256xbf16>, vector<64x256xf32> -> vector<64x256xf32>
    %188 = arith.addf %164, %187 : vector<64x256xf32>
    %189 = vector.extract_strided_slice %17 {offsets = [0, 224], sizes = [64, 32], strides = [1, 1]} : vector<64x256xf32> to vector<64x32xf32>
    %190 = arith.truncf %189 : vector<64x32xf32> to vector<64x32xbf16>
    %191 = vector.extract_strided_slice %18 {offsets = [0, 224], sizes = [64, 32], strides = [1, 1]} : vector<64x256xf32> to vector<64x32xf32>
    %192 = arith.truncf %191 : vector<64x32xf32> to vector<64x32xbf16>
    %193 = vector.extract_strided_slice %19 {offsets = [0, 224], sizes = [64, 32], strides = [1, 1]} : vector<64x256xf32> to vector<64x32xf32>
    %194 = arith.truncf %193 : vector<64x32xf32> to vector<64x32xbf16>
    %cst_63 = arith.constant dense<0.000000e+00> : vector<64x64xf32>
    %195 = tpu.matmul %190, %192, %cst_63 {dimension_numbers = #tpu.dot_dimension_numbers<[1], [1], [0], [0], [0, 0, 1, 0], [], []>} : vector<64x32xbf16>, vector<64x32xbf16>, vector<64x64xf32> -> vector<64x64xf32>
    %cst_64 = arith.constant 0.176776692 : f32
    %196 = vector.broadcast %cst_64 : f32 to vector<64x64xf32>
    %197 = arith.mulf %195, %196 : vector<64x64xf32>
    %cst_65 = arith.constant dense<0xFF800000> : vector<64xf32>
    %198 = vector.multi_reduction <maximumf>, %197, %cst_65 [1] : vector<64x64xf32> to vector<64xf32>
    %199 = vector.shape_cast %198 : vector<64xf32> to vector<64x1xf32>
    %200 = vector.broadcast %199 : vector<64x1xf32> to vector<64x64xf32>
    %201 = arith.subf %197, %200 : vector<64x64xf32>
    %202 = math.exp %201 : vector<64x64xf32>
    %cst_66 = arith.constant dense<0.000000e+00> : vector<64xf32>
    %203 = vector.multi_reduction <add>, %202, %cst_66 [1] : vector<64x64xf32> to vector<64xf32>
    %204 = vector.shape_cast %203 : vector<64xf32> to vector<64x1xf32>
    %205 = vector.broadcast %204 : vector<64x1xf32> to vector<64x64xf32>
    %206 = arith.divf %202, %205 : vector<64x64xf32>
    %207 = arith.truncf %206 : vector<64x64xf32> to vector<64x64xbf16>
    %cst_67 = arith.constant dense<0.000000e+00> : vector<64x32xf32>
    %208 = tpu.matmul %207, %194, %cst_67 {dimension_numbers = #tpu.dot_dimension_numbers<[1], [0], [0], [1], [0, 0, 1, 1], [], []>} : vector<64x64xbf16>, vector<64x32xbf16>, vector<64x32xf32> -> vector<64x32xf32>
    %c224 = arith.constant 224 : index
    %c768_68 = arith.constant 768 : index
    %209 = vector.load %arg4[%c224, %c768_68] : memref<256x1024xbf16, #tpu.memory_space<vmem>>, vector<32x256xbf16>
    %210 = arith.truncf %208 : vector<64x32xf32> to vector<64x32xbf16>
    %cst_69 = arith.constant dense<0.000000e+00> : vector<64x256xf32>
    %211 = tpu.matmul %210, %209, %cst_69 {dimension_numbers = #tpu.dot_dimension_numbers<[1], [0], [0], [1], [0, 0, 1, 1], [], []>} : vector<64x32xbf16>, vector<32x256xbf16>, vector<64x256xf32> -> vector<64x256xf32>
    %212 = arith.addf %188, %211 : vector<64x256xf32>
    %c0_70 = arith.constant 0 : index
    %c1024 = arith.constant 1024 : index
    %213 = vector.load %arg9[%c0_70, %c1024] : memref<1x5504xf32, #tpu.memory_space<vmem>>, vector<1x256xf32>
    %214 = vector.broadcast %213 : vector<1x256xf32> to vector<64x256xf32>
    %215 = arith.addf %212, %214 : vector<64x256xf32>
    %cst_71 = arith.constant dense<0.000000e+00> : vector<64xf32>
    %216 = vector.multi_reduction <add>, %215, %cst_71 [1] : vector<64x256xf32> to vector<64xf32>
    %217 = vector.shape_cast %216 : vector<64xf32> to vector<64x1xf32>
    %cst_72 = arith.constant 2.560000e+02 : f32
    %218 = vector.broadcast %cst_72 : f32 to vector<64x1xf32>
    %219 = arith.divf %217, %218 : vector<64x1xf32>
    %220 = vector.broadcast %219 : vector<64x1xf32> to vector<64x256xf32>
    %221 = arith.subf %215, %220 : vector<64x256xf32>
    %222 = arith.mulf %221, %221 : vector<64x256xf32>
    %cst_73 = arith.constant dense<0.000000e+00> : vector<64xf32>
    %223 = vector.multi_reduction <add>, %222, %cst_73 [1] : vector<64x256xf32> to vector<64xf32>
    %224 = vector.shape_cast %223 : vector<64xf32> to vector<64x1xf32>
    %cst_74 = arith.constant 2.560000e+02 : f32
    %225 = vector.broadcast %cst_74 : f32 to vector<64x1xf32>
    %226 = arith.divf %224, %225 : vector<64x1xf32>
    %cst_75 = arith.constant 9.99999974E-6 : f32
    %227 = vector.broadcast %cst_75 : f32 to vector<64x1xf32>
    %228 = arith.addf %226, %227 : vector<64x1xf32>
    %229 = math.rsqrt %228 : vector<64x1xf32>
    %230 = vector.broadcast %229 : vector<64x1xf32> to vector<64x256xf32>
    %231 = arith.mulf %221, %230 : vector<64x256xf32>
    %c0_76 = arith.constant 0 : index
    %c1280 = arith.constant 1280 : index
    %232 = vector.load %arg9[%c0_76, %c1280] : memref<1x5504xf32, #tpu.memory_space<vmem>>, vector<1x256xf32>
    %233 = vector.broadcast %232 : vector<1x256xf32> to vector<64x256xf32>
    %234 = arith.mulf %231, %233 : vector<64x256xf32>
    %c0_77 = arith.constant 0 : index
    %c1536 = arith.constant 1536 : index
    %235 = vector.load %arg9[%c0_77, %c1536] : memref<1x5504xf32, #tpu.memory_space<vmem>>, vector<1x256xf32>
    %236 = vector.broadcast %235 : vector<1x256xf32> to vector<64x256xf32>
    %237 = arith.addf %234, %236 : vector<64x256xf32>
    %238 = arith.addf %237, %4 : vector<64x256xf32>
    %239 = arith.truncf %238 : vector<64x256xf32> to vector<64x256xbf16>
    %c0_78 = arith.constant 0 : index
    %c0_79 = arith.constant 0 : index
    %240 = vector.load %arg5[%c0_78, %c0_79] : memref<256x1024xbf16, #tpu.memory_space<vmem>>, vector<256x1024xbf16>
    %cst_80 = arith.constant dense<0.000000e+00> : vector<64x1024xf32>
    %241 = tpu.matmul %239, %240, %cst_80 {dimension_numbers = #tpu.dot_dimension_numbers<[1], [0], [0], [1], [0, 0, 1, 1], [], []>} : vector<64x256xbf16>, vector<256x1024xbf16>, vector<64x1024xf32> -> vector<64x1024xf32>
    %c0_81 = arith.constant 0 : index
    %c1792 = arith.constant 1792 : index
    %242 = vector.load %arg9[%c0_81, %c1792] : memref<1x5504xf32, #tpu.memory_space<vmem>>, vector<1x1024xf32>
    %243 = vector.broadcast %242 : vector<1x1024xf32> to vector<64x1024xf32>
    %244 = arith.addf %241, %243 : vector<64x1024xf32>
    %cst_82 = arith.constant 5.000000e-01 : f32
    %245 = vector.broadcast %cst_82 : f32 to vector<64x1024xf32>
    %246 = arith.mulf %245, %244 : vector<64x1024xf32>
    %cst_83 = arith.constant 0.707106769 : f32
    %247 = vector.broadcast %cst_83 : f32 to vector<64x1024xf32>
    %248 = arith.mulf %244, %247 : vector<64x1024xf32>
    %249 = math.erf %248 : vector<64x1024xf32>
    %cst_84 = arith.constant 1.000000e+00 : f32
    %250 = vector.broadcast %cst_84 : f32 to vector<64x1024xf32>
    %251 = arith.addf %250, %249 : vector<64x1024xf32>
    %252 = arith.mulf %246, %251 : vector<64x1024xf32>
    %253 = arith.truncf %252 : vector<64x1024xf32> to vector<64x1024xbf16>
    %c0_85 = arith.constant 0 : index
    %c0_86 = arith.constant 0 : index
    %254 = vector.load %arg6[%c0_85, %c0_86] : memref<1024x256xbf16, #tpu.memory_space<vmem>>, vector<1024x256xbf16>
    %cst_87 = arith.constant dense<0.000000e+00> : vector<64x256xf32>
    %255 = tpu.matmul %253, %254, %cst_87 {dimension_numbers = #tpu.dot_dimension_numbers<[1], [0], [0], [1], [0, 0, 1, 1], [], []>} : vector<64x1024xbf16>, vector<1024x256xbf16>, vector<64x256xf32> -> vector<64x256xf32>
    %c0_88 = arith.constant 0 : index
    %c2816 = arith.constant 2816 : index
    %256 = vector.load %arg9[%c0_88, %c2816] : memref<1x5504xf32, #tpu.memory_space<vmem>>, vector<1x256xf32>
    %257 = vector.broadcast %256 : vector<1x256xf32> to vector<64x256xf32>
    %258 = arith.addf %255, %257 : vector<64x256xf32>
    %cst_89 = arith.constant dense<0.000000e+00> : vector<64xf32>
    %259 = vector.multi_reduction <add>, %258, %cst_89 [1] : vector<64x256xf32> to vector<64xf32>
    %260 = vector.shape_cast %259 : vector<64xf32> to vector<64x1xf32>
    %cst_90 = arith.constant 2.560000e+02 : f32
    %261 = vector.broadcast %cst_90 : f32 to vector<64x1xf32>
    %262 = arith.divf %260, %261 : vector<64x1xf32>
    %263 = vector.broadcast %262 : vector<64x1xf32> to vector<64x256xf32>
    %264 = arith.subf %258, %263 : vector<64x256xf32>
    %265 = arith.mulf %264, %264 : vector<64x256xf32>
    %cst_91 = arith.constant dense<0.000000e+00> : vector<64xf32>
    %266 = vector.multi_reduction <add>, %265, %cst_91 [1] : vector<64x256xf32> to vector<64xf32>
    %267 = vector.shape_cast %266 : vector<64xf32> to vector<64x1xf32>
    %cst_92 = arith.constant 2.560000e+02 : f32
    %268 = vector.broadcast %cst_92 : f32 to vector<64x1xf32>
    %269 = arith.divf %267, %268 : vector<64x1xf32>
    %cst_93 = arith.constant 9.99999974E-6 : f32
    %270 = vector.broadcast %cst_93 : f32 to vector<64x1xf32>
    %271 = arith.addf %269, %270 : vector<64x1xf32>
    %272 = math.rsqrt %271 : vector<64x1xf32>
    %273 = vector.broadcast %272 : vector<64x1xf32> to vector<64x256xf32>
    %274 = arith.mulf %264, %273 : vector<64x256xf32>
    %c0_94 = arith.constant 0 : index
    %c3072 = arith.constant 3072 : index
    %275 = vector.load %arg9[%c0_94, %c3072] : memref<1x5504xf32, #tpu.memory_space<vmem>>, vector<1x256xf32>
    %276 = vector.broadcast %275 : vector<1x256xf32> to vector<64x256xf32>
    %277 = arith.mulf %274, %276 : vector<64x256xf32>
    %c0_95 = arith.constant 0 : index
    %c3328 = arith.constant 3328 : index
    %278 = vector.load %arg9[%c0_95, %c3328] : memref<1x5504xf32, #tpu.memory_space<vmem>>, vector<1x256xf32>
    %279 = vector.broadcast %278 : vector<1x256xf32> to vector<64x256xf32>
    %280 = arith.addf %277, %279 : vector<64x256xf32>
    %281 = arith.truncf %280 : vector<64x256xf32> to vector<64x256xbf16>
    %c0_96 = arith.constant 0 : index
    %c0_97 = arith.constant 0 : index
    %282 = vector.load %arg7[%c0_96, %c0_97] : memref<256x1024xbf16, #tpu.memory_space<vmem>>, vector<256x256xbf16>
    %cst_98 = arith.constant dense<0.000000e+00> : vector<64x256xf32>
    %283 = tpu.matmul %281, %282, %cst_98 {dimension_numbers = #tpu.dot_dimension_numbers<[1], [0], [0], [1], [0, 0, 1, 1], [], []>} : vector<64x256xbf16>, vector<256x256xbf16>, vector<64x256xf32> -> vector<64x256xf32>
    %c0_99 = arith.constant 0 : index
    %c3584 = arith.constant 3584 : index
    %284 = vector.load %arg9[%c0_99, %c3584] : memref<1x5504xf32, #tpu.memory_space<vmem>>, vector<1x256xf32>
    %285 = vector.broadcast %284 : vector<1x256xf32> to vector<64x256xf32>
    %286 = arith.addf %283, %285 : vector<64x256xf32>
    %c0_100 = arith.constant 0 : index
    %c256_101 = arith.constant 256 : index
    %287 = vector.load %arg7[%c0_100, %c256_101] : memref<256x1024xbf16, #tpu.memory_space<vmem>>, vector<256x256xbf16>
    %cst_102 = arith.constant dense<0.000000e+00> : vector<64x256xf32>
    %288 = tpu.matmul %239, %287, %cst_102 {dimension_numbers = #tpu.dot_dimension_numbers<[1], [0], [0], [1], [0, 0, 1, 1], [], []>} : vector<64x256xbf16>, vector<256x256xbf16>, vector<64x256xf32> -> vector<64x256xf32>
    %c0_103 = arith.constant 0 : index
    %c3840 = arith.constant 3840 : index
    %289 = vector.load %arg9[%c0_103, %c3840] : memref<1x5504xf32, #tpu.memory_space<vmem>>, vector<1x256xf32>
    %290 = vector.broadcast %289 : vector<1x256xf32> to vector<64x256xf32>
    %291 = arith.addf %288, %290 : vector<64x256xf32>
    %292 = arith.truncf %4 : vector<64x256xf32> to vector<64x256xbf16>
    %c0_104 = arith.constant 0 : index
    %c512 = arith.constant 512 : index
    %293 = vector.load %arg7[%c0_104, %c512] : memref<256x1024xbf16, #tpu.memory_space<vmem>>, vector<256x256xbf16>
    %cst_105 = arith.constant dense<0.000000e+00> : vector<64x256xf32>
    %294 = tpu.matmul %292, %293, %cst_105 {dimension_numbers = #tpu.dot_dimension_numbers<[1], [0], [0], [1], [0, 0, 1, 1], [], []>} : vector<64x256xbf16>, vector<256x256xbf16>, vector<64x256xf32> -> vector<64x256xf32>
    %c0_106 = arith.constant 0 : index
    %c4096 = arith.constant 4096 : index
    %295 = vector.load %arg9[%c0_106, %c4096] : memref<1x5504xf32, #tpu.memory_space<vmem>>, vector<1x256xf32>
    %296 = vector.broadcast %295 : vector<1x256xf32> to vector<64x256xf32>
    %297 = arith.addf %294, %296 : vector<64x256xf32>
    %cst_107 = arith.constant 0.000000e+00 : f32
    %298 = vector.broadcast %cst_107 : f32 to vector<64x256xf32>
    %299 = vector.extract_strided_slice %286 {offsets = [0, 0], sizes = [64, 32], strides = [1, 1]} : vector<64x256xf32> to vector<64x32xf32>
    %300 = arith.truncf %299 : vector<64x32xf32> to vector<64x32xbf16>
    %301 = vector.extract_strided_slice %291 {offsets = [0, 0], sizes = [64, 32], strides = [1, 1]} : vector<64x256xf32> to vector<64x32xf32>
    %302 = arith.truncf %301 : vector<64x32xf32> to vector<64x32xbf16>
    %303 = vector.extract_strided_slice %297 {offsets = [0, 0], sizes = [64, 32], strides = [1, 1]} : vector<64x256xf32> to vector<64x32xf32>
    %304 = arith.truncf %303 : vector<64x32xf32> to vector<64x32xbf16>
    %cst_108 = arith.constant dense<0.000000e+00> : vector<64x64xf32>
    %305 = tpu.matmul %300, %302, %cst_108 {dimension_numbers = #tpu.dot_dimension_numbers<[1], [1], [0], [0], [0, 0, 1, 0], [], []>} : vector<64x32xbf16>, vector<64x32xbf16>, vector<64x64xf32> -> vector<64x64xf32>
    %cst_109 = arith.constant 0.176776692 : f32
    %306 = vector.broadcast %cst_109 : f32 to vector<64x64xf32>
    %307 = arith.mulf %305, %306 : vector<64x64xf32>
    %cst_110 = arith.constant dense<0xFF800000> : vector<64xf32>
    %308 = vector.multi_reduction <maximumf>, %307, %cst_110 [1] : vector<64x64xf32> to vector<64xf32>
    %309 = vector.shape_cast %308 : vector<64xf32> to vector<64x1xf32>
    %310 = vector.broadcast %309 : vector<64x1xf32> to vector<64x64xf32>
    %311 = arith.subf %307, %310 : vector<64x64xf32>
    %312 = math.exp %311 : vector<64x64xf32>
    %cst_111 = arith.constant dense<0.000000e+00> : vector<64xf32>
    %313 = vector.multi_reduction <add>, %312, %cst_111 [1] : vector<64x64xf32> to vector<64xf32>
    %314 = vector.shape_cast %313 : vector<64xf32> to vector<64x1xf32>
    %315 = vector.broadcast %314 : vector<64x1xf32> to vector<64x64xf32>
    %316 = arith.divf %312, %315 : vector<64x64xf32>
    %317 = arith.truncf %316 : vector<64x64xf32> to vector<64x64xbf16>
    %cst_112 = arith.constant dense<0.000000e+00> : vector<64x32xf32>
    %318 = tpu.matmul %317, %304, %cst_112 {dimension_numbers = #tpu.dot_dimension_numbers<[1], [0], [0], [1], [0, 0, 1, 1], [], []>} : vector<64x64xbf16>, vector<64x32xbf16>, vector<64x32xf32> -> vector<64x32xf32>
    %c0_113 = arith.constant 0 : index
    %c768_114 = arith.constant 768 : index
    %319 = vector.load %arg7[%c0_113, %c768_114] : memref<256x1024xbf16, #tpu.memory_space<vmem>>, vector<32x256xbf16>
    %320 = arith.truncf %318 : vector<64x32xf32> to vector<64x32xbf16>
    %cst_115 = arith.constant dense<0.000000e+00> : vector<64x256xf32>
    %321 = tpu.matmul %320, %319, %cst_115 {dimension_numbers = #tpu.dot_dimension_numbers<[1], [0], [0], [1], [0, 0, 1, 1], [], []>} : vector<64x32xbf16>, vector<32x256xbf16>, vector<64x256xf32> -> vector<64x256xf32>
    %322 = arith.addf %298, %321 : vector<64x256xf32>
    %323 = vector.extract_strided_slice %286 {offsets = [0, 32], sizes = [64, 32], strides = [1, 1]} : vector<64x256xf32> to vector<64x32xf32>
    %324 = arith.truncf %323 : vector<64x32xf32> to vector<64x32xbf16>
    %325 = vector.extract_strided_slice %291 {offsets = [0, 32], sizes = [64, 32], strides = [1, 1]} : vector<64x256xf32> to vector<64x32xf32>
    %326 = arith.truncf %325 : vector<64x32xf32> to vector<64x32xbf16>
    %327 = vector.extract_strided_slice %297 {offsets = [0, 32], sizes = [64, 32], strides = [1, 1]} : vector<64x256xf32> to vector<64x32xf32>
    %328 = arith.truncf %327 : vector<64x32xf32> to vector<64x32xbf16>
    %cst_116 = arith.constant dense<0.000000e+00> : vector<64x64xf32>
    %329 = tpu.matmul %324, %326, %cst_116 {dimension_numbers = #tpu.dot_dimension_numbers<[1], [1], [0], [0], [0, 0, 1, 0], [], []>} : vector<64x32xbf16>, vector<64x32xbf16>, vector<64x64xf32> -> vector<64x64xf32>
    %cst_117 = arith.constant 0.176776692 : f32
    %330 = vector.broadcast %cst_117 : f32 to vector<64x64xf32>
    %331 = arith.mulf %329, %330 : vector<64x64xf32>
    %cst_118 = arith.constant dense<0xFF800000> : vector<64xf32>
    %332 = vector.multi_reduction <maximumf>, %331, %cst_118 [1] : vector<64x64xf32> to vector<64xf32>
    %333 = vector.shape_cast %332 : vector<64xf32> to vector<64x1xf32>
    %334 = vector.broadcast %333 : vector<64x1xf32> to vector<64x64xf32>
    %335 = arith.subf %331, %334 : vector<64x64xf32>
    %336 = math.exp %335 : vector<64x64xf32>
    %cst_119 = arith.constant dense<0.000000e+00> : vector<64xf32>
    %337 = vector.multi_reduction <add>, %336, %cst_119 [1] : vector<64x64xf32> to vector<64xf32>
    %338 = vector.shape_cast %337 : vector<64xf32> to vector<64x1xf32>
    %339 = vector.broadcast %338 : vector<64x1xf32> to vector<64x64xf32>
    %340 = arith.divf %336, %339 : vector<64x64xf32>
    %341 = arith.truncf %340 : vector<64x64xf32> to vector<64x64xbf16>
    %cst_120 = arith.constant dense<0.000000e+00> : vector<64x32xf32>
    %342 = tpu.matmul %341, %328, %cst_120 {dimension_numbers = #tpu.dot_dimension_numbers<[1], [0], [0], [1], [0, 0, 1, 1], [], []>} : vector<64x64xbf16>, vector<64x32xbf16>, vector<64x32xf32> -> vector<64x32xf32>
    %c32_121 = arith.constant 32 : index
    %c768_122 = arith.constant 768 : index
    %343 = vector.load %arg7[%c32_121, %c768_122] : memref<256x1024xbf16, #tpu.memory_space<vmem>>, vector<32x256xbf16>
    %344 = arith.truncf %342 : vector<64x32xf32> to vector<64x32xbf16>
    %cst_123 = arith.constant dense<0.000000e+00> : vector<64x256xf32>
    %345 = tpu.matmul %344, %343, %cst_123 {dimension_numbers = #tpu.dot_dimension_numbers<[1], [0], [0], [1], [0, 0, 1, 1], [], []>} : vector<64x32xbf16>, vector<32x256xbf16>, vector<64x256xf32> -> vector<64x256xf32>
    %346 = arith.addf %322, %345 : vector<64x256xf32>
    %347 = vector.extract_strided_slice %286 {offsets = [0, 64], sizes = [64, 32], strides = [1, 1]} : vector<64x256xf32> to vector<64x32xf32>
    %348 = arith.truncf %347 : vector<64x32xf32> to vector<64x32xbf16>
    %349 = vector.extract_strided_slice %291 {offsets = [0, 64], sizes = [64, 32], strides = [1, 1]} : vector<64x256xf32> to vector<64x32xf32>
    %350 = arith.truncf %349 : vector<64x32xf32> to vector<64x32xbf16>
    %351 = vector.extract_strided_slice %297 {offsets = [0, 64], sizes = [64, 32], strides = [1, 1]} : vector<64x256xf32> to vector<64x32xf32>
    %352 = arith.truncf %351 : vector<64x32xf32> to vector<64x32xbf16>
    %cst_124 = arith.constant dense<0.000000e+00> : vector<64x64xf32>
    %353 = tpu.matmul %348, %350, %cst_124 {dimension_numbers = #tpu.dot_dimension_numbers<[1], [1], [0], [0], [0, 0, 1, 0], [], []>} : vector<64x32xbf16>, vector<64x32xbf16>, vector<64x64xf32> -> vector<64x64xf32>
    %cst_125 = arith.constant 0.176776692 : f32
    %354 = vector.broadcast %cst_125 : f32 to vector<64x64xf32>
    %355 = arith.mulf %353, %354 : vector<64x64xf32>
    %cst_126 = arith.constant dense<0xFF800000> : vector<64xf32>
    %356 = vector.multi_reduction <maximumf>, %355, %cst_126 [1] : vector<64x64xf32> to vector<64xf32>
    %357 = vector.shape_cast %356 : vector<64xf32> to vector<64x1xf32>
    %358 = vector.broadcast %357 : vector<64x1xf32> to vector<64x64xf32>
    %359 = arith.subf %355, %358 : vector<64x64xf32>
    %360 = math.exp %359 : vector<64x64xf32>
    %cst_127 = arith.constant dense<0.000000e+00> : vector<64xf32>
    %361 = vector.multi_reduction <add>, %360, %cst_127 [1] : vector<64x64xf32> to vector<64xf32>
    %362 = vector.shape_cast %361 : vector<64xf32> to vector<64x1xf32>
    %363 = vector.broadcast %362 : vector<64x1xf32> to vector<64x64xf32>
    %364 = arith.divf %360, %363 : vector<64x64xf32>
    %365 = arith.truncf %364 : vector<64x64xf32> to vector<64x64xbf16>
    %cst_128 = arith.constant dense<0.000000e+00> : vector<64x32xf32>
    %366 = tpu.matmul %365, %352, %cst_128 {dimension_numbers = #tpu.dot_dimension_numbers<[1], [0], [0], [1], [0, 0, 1, 1], [], []>} : vector<64x64xbf16>, vector<64x32xbf16>, vector<64x32xf32> -> vector<64x32xf32>
    %c64_129 = arith.constant 64 : index
    %c768_130 = arith.constant 768 : index
    %367 = vector.load %arg7[%c64_129, %c768_130] : memref<256x1024xbf16, #tpu.memory_space<vmem>>, vector<32x256xbf16>
    %368 = arith.truncf %366 : vector<64x32xf32> to vector<64x32xbf16>
    %cst_131 = arith.constant dense<0.000000e+00> : vector<64x256xf32>
    %369 = tpu.matmul %368, %367, %cst_131 {dimension_numbers = #tpu.dot_dimension_numbers<[1], [0], [0], [1], [0, 0, 1, 1], [], []>} : vector<64x32xbf16>, vector<32x256xbf16>, vector<64x256xf32> -> vector<64x256xf32>
    %370 = arith.addf %346, %369 : vector<64x256xf32>
    %371 = vector.extract_strided_slice %286 {offsets = [0, 96], sizes = [64, 32], strides = [1, 1]} : vector<64x256xf32> to vector<64x32xf32>
    %372 = arith.truncf %371 : vector<64x32xf32> to vector<64x32xbf16>
    %373 = vector.extract_strided_slice %291 {offsets = [0, 96], sizes = [64, 32], strides = [1, 1]} : vector<64x256xf32> to vector<64x32xf32>
    %374 = arith.truncf %373 : vector<64x32xf32> to vector<64x32xbf16>
    %375 = vector.extract_strided_slice %297 {offsets = [0, 96], sizes = [64, 32], strides = [1, 1]} : vector<64x256xf32> to vector<64x32xf32>
    %376 = arith.truncf %375 : vector<64x32xf32> to vector<64x32xbf16>
    %cst_132 = arith.constant dense<0.000000e+00> : vector<64x64xf32>
    %377 = tpu.matmul %372, %374, %cst_132 {dimension_numbers = #tpu.dot_dimension_numbers<[1], [1], [0], [0], [0, 0, 1, 0], [], []>} : vector<64x32xbf16>, vector<64x32xbf16>, vector<64x64xf32> -> vector<64x64xf32>
    %cst_133 = arith.constant 0.176776692 : f32
    %378 = vector.broadcast %cst_133 : f32 to vector<64x64xf32>
    %379 = arith.mulf %377, %378 : vector<64x64xf32>
    %cst_134 = arith.constant dense<0xFF800000> : vector<64xf32>
    %380 = vector.multi_reduction <maximumf>, %379, %cst_134 [1] : vector<64x64xf32> to vector<64xf32>
    %381 = vector.shape_cast %380 : vector<64xf32> to vector<64x1xf32>
    %382 = vector.broadcast %381 : vector<64x1xf32> to vector<64x64xf32>
    %383 = arith.subf %379, %382 : vector<64x64xf32>
    %384 = math.exp %383 : vector<64x64xf32>
    %cst_135 = arith.constant dense<0.000000e+00> : vector<64xf32>
    %385 = vector.multi_reduction <add>, %384, %cst_135 [1] : vector<64x64xf32> to vector<64xf32>
    %386 = vector.shape_cast %385 : vector<64xf32> to vector<64x1xf32>
    %387 = vector.broadcast %386 : vector<64x1xf32> to vector<64x64xf32>
    %388 = arith.divf %384, %387 : vector<64x64xf32>
    %389 = arith.truncf %388 : vector<64x64xf32> to vector<64x64xbf16>
    %cst_136 = arith.constant dense<0.000000e+00> : vector<64x32xf32>
    %390 = tpu.matmul %389, %376, %cst_136 {dimension_numbers = #tpu.dot_dimension_numbers<[1], [0], [0], [1], [0, 0, 1, 1], [], []>} : vector<64x64xbf16>, vector<64x32xbf16>, vector<64x32xf32> -> vector<64x32xf32>
    %c96_137 = arith.constant 96 : index
    %c768_138 = arith.constant 768 : index
    %391 = vector.load %arg7[%c96_137, %c768_138] : memref<256x1024xbf16, #tpu.memory_space<vmem>>, vector<32x256xbf16>
    %392 = arith.truncf %390 : vector<64x32xf32> to vector<64x32xbf16>
    %cst_139 = arith.constant dense<0.000000e+00> : vector<64x256xf32>
    %393 = tpu.matmul %392, %391, %cst_139 {dimension_numbers = #tpu.dot_dimension_numbers<[1], [0], [0], [1], [0, 0, 1, 1], [], []>} : vector<64x32xbf16>, vector<32x256xbf16>, vector<64x256xf32> -> vector<64x256xf32>
    %394 = arith.addf %370, %393 : vector<64x256xf32>
    %395 = vector.extract_strided_slice %286 {offsets = [0, 128], sizes = [64, 32], strides = [1, 1]} : vector<64x256xf32> to vector<64x32xf32>
    %396 = arith.truncf %395 : vector<64x32xf32> to vector<64x32xbf16>
    %397 = vector.extract_strided_slice %291 {offsets = [0, 128], sizes = [64, 32], strides = [1, 1]} : vector<64x256xf32> to vector<64x32xf32>
    %398 = arith.truncf %397 : vector<64x32xf32> to vector<64x32xbf16>
    %399 = vector.extract_strided_slice %297 {offsets = [0, 128], sizes = [64, 32], strides = [1, 1]} : vector<64x256xf32> to vector<64x32xf32>
    %400 = arith.truncf %399 : vector<64x32xf32> to vector<64x32xbf16>
    %cst_140 = arith.constant dense<0.000000e+00> : vector<64x64xf32>
    %401 = tpu.matmul %396, %398, %cst_140 {dimension_numbers = #tpu.dot_dimension_numbers<[1], [1], [0], [0], [0, 0, 1, 0], [], []>} : vector<64x32xbf16>, vector<64x32xbf16>, vector<64x64xf32> -> vector<64x64xf32>
    %cst_141 = arith.constant 0.176776692 : f32
    %402 = vector.broadcast %cst_141 : f32 to vector<64x64xf32>
    %403 = arith.mulf %401, %402 : vector<64x64xf32>
    %cst_142 = arith.constant dense<0xFF800000> : vector<64xf32>
    %404 = vector.multi_reduction <maximumf>, %403, %cst_142 [1] : vector<64x64xf32> to vector<64xf32>
    %405 = vector.shape_cast %404 : vector<64xf32> to vector<64x1xf32>
    %406 = vector.broadcast %405 : vector<64x1xf32> to vector<64x64xf32>
    %407 = arith.subf %403, %406 : vector<64x64xf32>
    %408 = math.exp %407 : vector<64x64xf32>
    %cst_143 = arith.constant dense<0.000000e+00> : vector<64xf32>
    %409 = vector.multi_reduction <add>, %408, %cst_143 [1] : vector<64x64xf32> to vector<64xf32>
    %410 = vector.shape_cast %409 : vector<64xf32> to vector<64x1xf32>
    %411 = vector.broadcast %410 : vector<64x1xf32> to vector<64x64xf32>
    %412 = arith.divf %408, %411 : vector<64x64xf32>
    %413 = arith.truncf %412 : vector<64x64xf32> to vector<64x64xbf16>
    %cst_144 = arith.constant dense<0.000000e+00> : vector<64x32xf32>
    %414 = tpu.matmul %413, %400, %cst_144 {dimension_numbers = #tpu.dot_dimension_numbers<[1], [0], [0], [1], [0, 0, 1, 1], [], []>} : vector<64x64xbf16>, vector<64x32xbf16>, vector<64x32xf32> -> vector<64x32xf32>
    %c128_145 = arith.constant 128 : index
    %c768_146 = arith.constant 768 : index
    %415 = vector.load %arg7[%c128_145, %c768_146] : memref<256x1024xbf16, #tpu.memory_space<vmem>>, vector<32x256xbf16>
    %416 = arith.truncf %414 : vector<64x32xf32> to vector<64x32xbf16>
    %cst_147 = arith.constant dense<0.000000e+00> : vector<64x256xf32>
    %417 = tpu.matmul %416, %415, %cst_147 {dimension_numbers = #tpu.dot_dimension_numbers<[1], [0], [0], [1], [0, 0, 1, 1], [], []>} : vector<64x32xbf16>, vector<32x256xbf16>, vector<64x256xf32> -> vector<64x256xf32>
    %418 = arith.addf %394, %417 : vector<64x256xf32>
    %419 = vector.extract_strided_slice %286 {offsets = [0, 160], sizes = [64, 32], strides = [1, 1]} : vector<64x256xf32> to vector<64x32xf32>
    %420 = arith.truncf %419 : vector<64x32xf32> to vector<64x32xbf16>
    %421 = vector.extract_strided_slice %291 {offsets = [0, 160], sizes = [64, 32], strides = [1, 1]} : vector<64x256xf32> to vector<64x32xf32>
    %422 = arith.truncf %421 : vector<64x32xf32> to vector<64x32xbf16>
    %423 = vector.extract_strided_slice %297 {offsets = [0, 160], sizes = [64, 32], strides = [1, 1]} : vector<64x256xf32> to vector<64x32xf32>
    %424 = arith.truncf %423 : vector<64x32xf32> to vector<64x32xbf16>
    %cst_148 = arith.constant dense<0.000000e+00> : vector<64x64xf32>
    %425 = tpu.matmul %420, %422, %cst_148 {dimension_numbers = #tpu.dot_dimension_numbers<[1], [1], [0], [0], [0, 0, 1, 0], [], []>} : vector<64x32xbf16>, vector<64x32xbf16>, vector<64x64xf32> -> vector<64x64xf32>
    %cst_149 = arith.constant 0.176776692 : f32
    %426 = vector.broadcast %cst_149 : f32 to vector<64x64xf32>
    %427 = arith.mulf %425, %426 : vector<64x64xf32>
    %cst_150 = arith.constant dense<0xFF800000> : vector<64xf32>
    %428 = vector.multi_reduction <maximumf>, %427, %cst_150 [1] : vector<64x64xf32> to vector<64xf32>
    %429 = vector.shape_cast %428 : vector<64xf32> to vector<64x1xf32>
    %430 = vector.broadcast %429 : vector<64x1xf32> to vector<64x64xf32>
    %431 = arith.subf %427, %430 : vector<64x64xf32>
    %432 = math.exp %431 : vector<64x64xf32>
    %cst_151 = arith.constant dense<0.000000e+00> : vector<64xf32>
    %433 = vector.multi_reduction <add>, %432, %cst_151 [1] : vector<64x64xf32> to vector<64xf32>
    %434 = vector.shape_cast %433 : vector<64xf32> to vector<64x1xf32>
    %435 = vector.broadcast %434 : vector<64x1xf32> to vector<64x64xf32>
    %436 = arith.divf %432, %435 : vector<64x64xf32>
    %437 = arith.truncf %436 : vector<64x64xf32> to vector<64x64xbf16>
    %cst_152 = arith.constant dense<0.000000e+00> : vector<64x32xf32>
    %438 = tpu.matmul %437, %424, %cst_152 {dimension_numbers = #tpu.dot_dimension_numbers<[1], [0], [0], [1], [0, 0, 1, 1], [], []>} : vector<64x64xbf16>, vector<64x32xbf16>, vector<64x32xf32> -> vector<64x32xf32>
    %c160_153 = arith.constant 160 : index
    %c768_154 = arith.constant 768 : index
    %439 = vector.load %arg7[%c160_153, %c768_154] : memref<256x1024xbf16, #tpu.memory_space<vmem>>, vector<32x256xbf16>
    %440 = arith.truncf %438 : vector<64x32xf32> to vector<64x32xbf16>
    %cst_155 = arith.constant dense<0.000000e+00> : vector<64x256xf32>
    %441 = tpu.matmul %440, %439, %cst_155 {dimension_numbers = #tpu.dot_dimension_numbers<[1], [0], [0], [1], [0, 0, 1, 1], [], []>} : vector<64x32xbf16>, vector<32x256xbf16>, vector<64x256xf32> -> vector<64x256xf32>
    %442 = arith.addf %418, %441 : vector<64x256xf32>
    %443 = vector.extract_strided_slice %286 {offsets = [0, 192], sizes = [64, 32], strides = [1, 1]} : vector<64x256xf32> to vector<64x32xf32>
    %444 = arith.truncf %443 : vector<64x32xf32> to vector<64x32xbf16>
    %445 = vector.extract_strided_slice %291 {offsets = [0, 192], sizes = [64, 32], strides = [1, 1]} : vector<64x256xf32> to vector<64x32xf32>
    %446 = arith.truncf %445 : vector<64x32xf32> to vector<64x32xbf16>
    %447 = vector.extract_strided_slice %297 {offsets = [0, 192], sizes = [64, 32], strides = [1, 1]} : vector<64x256xf32> to vector<64x32xf32>
    %448 = arith.truncf %447 : vector<64x32xf32> to vector<64x32xbf16>
    %cst_156 = arith.constant dense<0.000000e+00> : vector<64x64xf32>
    %449 = tpu.matmul %444, %446, %cst_156 {dimension_numbers = #tpu.dot_dimension_numbers<[1], [1], [0], [0], [0, 0, 1, 0], [], []>} : vector<64x32xbf16>, vector<64x32xbf16>, vector<64x64xf32> -> vector<64x64xf32>
    %cst_157 = arith.constant 0.176776692 : f32
    %450 = vector.broadcast %cst_157 : f32 to vector<64x64xf32>
    %451 = arith.mulf %449, %450 : vector<64x64xf32>
    %cst_158 = arith.constant dense<0xFF800000> : vector<64xf32>
    %452 = vector.multi_reduction <maximumf>, %451, %cst_158 [1] : vector<64x64xf32> to vector<64xf32>
    %453 = vector.shape_cast %452 : vector<64xf32> to vector<64x1xf32>
    %454 = vector.broadcast %453 : vector<64x1xf32> to vector<64x64xf32>
    %455 = arith.subf %451, %454 : vector<64x64xf32>
    %456 = math.exp %455 : vector<64x64xf32>
    %cst_159 = arith.constant dense<0.000000e+00> : vector<64xf32>
    %457 = vector.multi_reduction <add>, %456, %cst_159 [1] : vector<64x64xf32> to vector<64xf32>
    %458 = vector.shape_cast %457 : vector<64xf32> to vector<64x1xf32>
    %459 = vector.broadcast %458 : vector<64x1xf32> to vector<64x64xf32>
    %460 = arith.divf %456, %459 : vector<64x64xf32>
    %461 = arith.truncf %460 : vector<64x64xf32> to vector<64x64xbf16>
    %cst_160 = arith.constant dense<0.000000e+00> : vector<64x32xf32>
    %462 = tpu.matmul %461, %448, %cst_160 {dimension_numbers = #tpu.dot_dimension_numbers<[1], [0], [0], [1], [0, 0, 1, 1], [], []>} : vector<64x64xbf16>, vector<64x32xbf16>, vector<64x32xf32> -> vector<64x32xf32>
    %c192_161 = arith.constant 192 : index
    %c768_162 = arith.constant 768 : index
    %463 = vector.load %arg7[%c192_161, %c768_162] : memref<256x1024xbf16, #tpu.memory_space<vmem>>, vector<32x256xbf16>
    %464 = arith.truncf %462 : vector<64x32xf32> to vector<64x32xbf16>
    %cst_163 = arith.constant dense<0.000000e+00> : vector<64x256xf32>
    %465 = tpu.matmul %464, %463, %cst_163 {dimension_numbers = #tpu.dot_dimension_numbers<[1], [0], [0], [1], [0, 0, 1, 1], [], []>} : vector<64x32xbf16>, vector<32x256xbf16>, vector<64x256xf32> -> vector<64x256xf32>
    %466 = arith.addf %442, %465 : vector<64x256xf32>
    %467 = vector.extract_strided_slice %286 {offsets = [0, 224], sizes = [64, 32], strides = [1, 1]} : vector<64x256xf32> to vector<64x32xf32>
    %468 = arith.truncf %467 : vector<64x32xf32> to vector<64x32xbf16>
    %469 = vector.extract_strided_slice %291 {offsets = [0, 224], sizes = [64, 32], strides = [1, 1]} : vector<64x256xf32> to vector<64x32xf32>
    %470 = arith.truncf %469 : vector<64x32xf32> to vector<64x32xbf16>
    %471 = vector.extract_strided_slice %297 {offsets = [0, 224], sizes = [64, 32], strides = [1, 1]} : vector<64x256xf32> to vector<64x32xf32>
    %472 = arith.truncf %471 : vector<64x32xf32> to vector<64x32xbf16>
    %cst_164 = arith.constant dense<0.000000e+00> : vector<64x64xf32>
    %473 = tpu.matmul %468, %470, %cst_164 {dimension_numbers = #tpu.dot_dimension_numbers<[1], [1], [0], [0], [0, 0, 1, 0], [], []>} : vector<64x32xbf16>, vector<64x32xbf16>, vector<64x64xf32> -> vector<64x64xf32>
    %cst_165 = arith.constant 0.176776692 : f32
    %474 = vector.broadcast %cst_165 : f32 to vector<64x64xf32>
    %475 = arith.mulf %473, %474 : vector<64x64xf32>
    %cst_166 = arith.constant dense<0xFF800000> : vector<64xf32>
    %476 = vector.multi_reduction <maximumf>, %475, %cst_166 [1] : vector<64x64xf32> to vector<64xf32>
    %477 = vector.shape_cast %476 : vector<64xf32> to vector<64x1xf32>
    %478 = vector.broadcast %477 : vector<64x1xf32> to vector<64x64xf32>
    %479 = arith.subf %475, %478 : vector<64x64xf32>
    %480 = math.exp %479 : vector<64x64xf32>
    %cst_167 = arith.constant dense<0.000000e+00> : vector<64xf32>
    %481 = vector.multi_reduction <add>, %480, %cst_167 [1] : vector<64x64xf32> to vector<64xf32>
    %482 = vector.shape_cast %481 : vector<64xf32> to vector<64x1xf32>
    %483 = vector.broadcast %482 : vector<64x1xf32> to vector<64x64xf32>
    %484 = arith.divf %480, %483 : vector<64x64xf32>
    %485 = arith.truncf %484 : vector<64x64xf32> to vector<64x64xbf16>
    %cst_168 = arith.constant dense<0.000000e+00> : vector<64x32xf32>
    %486 = tpu.matmul %485, %472, %cst_168 {dimension_numbers = #tpu.dot_dimension_numbers<[1], [0], [0], [1], [0, 0, 1, 1], [], []>} : vector<64x64xbf16>, vector<64x32xbf16>, vector<64x32xf32> -> vector<64x32xf32>
    %c224_169 = arith.constant 224 : index
    %c768_170 = arith.constant 768 : index
    %487 = vector.load %arg7[%c224_169, %c768_170] : memref<256x1024xbf16, #tpu.memory_space<vmem>>, vector<32x256xbf16>
    %488 = arith.truncf %486 : vector<64x32xf32> to vector<64x32xbf16>
    %cst_171 = arith.constant dense<0.000000e+00> : vector<64x256xf32>
    %489 = tpu.matmul %488, %487, %cst_171 {dimension_numbers = #tpu.dot_dimension_numbers<[1], [0], [0], [1], [0, 0, 1, 1], [], []>} : vector<64x32xbf16>, vector<32x256xbf16>, vector<64x256xf32> -> vector<64x256xf32>
    %490 = arith.addf %466, %489 : vector<64x256xf32>
    %c0_172 = arith.constant 0 : index
    %c4352 = arith.constant 4352 : index
    %491 = vector.load %arg9[%c0_172, %c4352] : memref<1x5504xf32, #tpu.memory_space<vmem>>, vector<1x256xf32>
    %492 = vector.broadcast %491 : vector<1x256xf32> to vector<64x256xf32>
    %493 = arith.addf %490, %492 : vector<64x256xf32>
    %cst_173 = arith.constant dense<0.000000e+00> : vector<64xf32>
    %494 = vector.multi_reduction <add>, %493, %cst_173 [1] : vector<64x256xf32> to vector<64xf32>
    %495 = vector.shape_cast %494 : vector<64xf32> to vector<64x1xf32>
    %cst_174 = arith.constant 2.560000e+02 : f32
    %496 = vector.broadcast %cst_174 : f32 to vector<64x1xf32>
    %497 = arith.divf %495, %496 : vector<64x1xf32>
    %498 = vector.broadcast %497 : vector<64x1xf32> to vector<64x256xf32>
    %499 = arith.subf %493, %498 : vector<64x256xf32>
    %500 = arith.mulf %499, %499 : vector<64x256xf32>
    %cst_175 = arith.constant dense<0.000000e+00> : vector<64xf32>
    %501 = vector.multi_reduction <add>, %500, %cst_175 [1] : vector<64x256xf32> to vector<64xf32>
    %502 = vector.shape_cast %501 : vector<64xf32> to vector<64x1xf32>
    %cst_176 = arith.constant 2.560000e+02 : f32
    %503 = vector.broadcast %cst_176 : f32 to vector<64x1xf32>
    %504 = arith.divf %502, %503 : vector<64x1xf32>
    %cst_177 = arith.constant 9.99999974E-6 : f32
    %505 = vector.broadcast %cst_177 : f32 to vector<64x1xf32>
    %506 = arith.addf %504, %505 : vector<64x1xf32>
    %507 = math.rsqrt %506 : vector<64x1xf32>
    %508 = vector.broadcast %507 : vector<64x1xf32> to vector<64x256xf32>
    %509 = arith.mulf %499, %508 : vector<64x256xf32>
    %c0_178 = arith.constant 0 : index
    %c4608 = arith.constant 4608 : index
    %510 = vector.load %arg9[%c0_178, %c4608] : memref<1x5504xf32, #tpu.memory_space<vmem>>, vector<1x256xf32>
    %511 = vector.broadcast %510 : vector<1x256xf32> to vector<64x256xf32>
    %512 = arith.mulf %509, %511 : vector<64x256xf32>
    %c0_179 = arith.constant 0 : index
    %c4864 = arith.constant 4864 : index
    %513 = vector.load %arg9[%c0_179, %c4864] : memref<1x5504xf32, #tpu.memory_space<vmem>>, vector<1x256xf32>
    %514 = vector.broadcast %513 : vector<1x256xf32> to vector<64x256xf32>
    %515 = arith.addf %512, %514 : vector<64x256xf32>
    %c0_180 = arith.constant 0 : index
    %c0_181 = arith.constant 0 : index
    %c0_182 = arith.constant 0 : index
    %516 = vector.load %arg11[%c0_180, %c0_181, %c0_182] : memref<1x64x256xf32, #tpu.memory_space<vmem>>, vector<1x64x256xf32>
    %517 = vector.shape_cast %516 : vector<1x64x256xf32> to vector<64x256xf32>
    %518 = vector.shape_cast %515 : vector<64x256xf32> to vector<1x64x256xf32>
    tpu.vector_store %arg11[%c0_180, %c0_181, %c0_182], %518 {strides = array<i32>} : memref<1x64x256xf32, #tpu.memory_space<vmem>>, vector<1x64x256xf32>,
    %519 = arith.truncf %515 : vector<64x256xf32> to vector<64x256xbf16>
    %c0_183 = arith.constant 0 : index
    %c0_184 = arith.constant 0 : index
    %520 = vector.load %arg8[%c0_183, %c0_184] : memref<256x128xbf16, #tpu.memory_space<vmem>>, vector<256x128xbf16>
    %cst_185 = arith.constant dense<0.000000e+00> : vector<64x128xf32>
    %521 = tpu.matmul %519, %520, %cst_185 {dimension_numbers = #tpu.dot_dimension_numbers<[1], [0], [0], [1], [0, 0, 1, 1], [], []>} : vector<64x256xbf16>, vector<256x128xbf16>, vector<64x128xf32> -> vector<64x128xf32>
    %c0_186 = arith.constant 0 : index
    %c5120 = arith.constant 5120 : index
    %522 = vector.load %arg9[%c0_186, %c5120] : memref<1x5504xf32, #tpu.memory_space<vmem>>, vector<1x128xf32>
    %523 = vector.broadcast %522 : vector<1x128xf32> to vector<64x128xf32>
    %524 = arith.addf %521, %523 : vector<64x128xf32>
    %525 = tpu.iota {dimensions = array<i32: 1>} : vector<1x128xi32>
    %c3_i32 = arith.constant 3 : i32
    %526 = vector.broadcast %c3_i32 : i32 to vector<1x128xi32>
    %527 = arith.cmpi slt, %525, %526 : vector<1x128xi32>
    %528 = arith.extui %527 : vector<1x128xi1> to vector<1x128xi32>
    %529 = arith.sitofp %528 : vector<1x128xi32> to vector<1x128xf32>
    %530 = vector.broadcast %529 : vector<1x128xf32> to vector<64x128xf32>
    %531 = arith.mulf %524, %530 : vector<64x128xf32>
    %cst_187 = arith.constant dense<0.000000e+00> : vector<64xf32>
    %532 = vector.multi_reduction <add>, %531, %cst_187 [1] : vector<64x128xf32> to vector<64xf32>
    %533 = vector.shape_cast %532 : vector<64xf32> to vector<64x1xf32>
    %cst_188 = arith.constant 0.333333343 : f32
    %534 = vector.broadcast %cst_188 : f32 to vector<64x1xf32>
    %535 = arith.mulf %533, %534 : vector<64x1xf32>
    %536 = vector.broadcast %535 : vector<64x1xf32> to vector<64x128xf32>
    %537 = arith.subf %524, %536 : vector<64x128xf32>
    %538 = vector.broadcast %529 : vector<1x128xf32> to vector<64x128xf32>
    %539 = arith.mulf %537, %538 : vector<64x128xf32>
    %540 = arith.mulf %539, %539 : vector<64x128xf32>
    %cst_189 = arith.constant dense<0.000000e+00> : vector<64xf32>
    %541 = vector.multi_reduction <add>, %540, %cst_189 [1] : vector<64x128xf32> to vector<64xf32>
    %542 = vector.shape_cast %541 : vector<64xf32> to vector<64x1xf32>
    %cst_190 = arith.constant 0.333333343 : f32
    %543 = vector.broadcast %cst_190 : f32 to vector<64x1xf32>
    %544 = arith.mulf %542, %543 : vector<64x1xf32>
    %cst_191 = arith.constant 9.99999974E-6 : f32
    %545 = vector.broadcast %cst_191 : f32 to vector<64x1xf32>
    %546 = arith.addf %544, %545 : vector<64x1xf32>
    %547 = math.rsqrt %546 : vector<64x1xf32>
    %548 = vector.broadcast %547 : vector<64x1xf32> to vector<64x128xf32>
    %549 = arith.mulf %539, %548 : vector<64x128xf32>
    %c0_192 = arith.constant 0 : index
    %c5248 = arith.constant 5248 : index
    %550 = vector.load %arg9[%c0_192, %c5248] : memref<1x5504xf32, #tpu.memory_space<vmem>>, vector<1x128xf32>
    %551 = vector.broadcast %550 : vector<1x128xf32> to vector<64x128xf32>
    %552 = arith.mulf %549, %551 : vector<64x128xf32>
    %c0_193 = arith.constant 0 : index
    %c5376 = arith.constant 5376 : index
    %553 = vector.load %arg9[%c0_193, %c5376] : memref<1x5504xf32, #tpu.memory_space<vmem>>, vector<1x128xf32>
    %554 = vector.broadcast %553 : vector<1x128xf32> to vector<64x128xf32>
    %555 = arith.addf %552, %554 : vector<64x128xf32>
    %c0_194 = arith.constant 0 : index
    %c0_195 = arith.constant 0 : index
    %c0_196 = arith.constant 0 : index
    %556 = vector.load %arg10[%c0_194, %c0_195, %c0_196] : memref<1x64x128xf32, #tpu.memory_space<vmem>>, vector<1x64x128xf32>
    %557 = vector.shape_cast %556 : vector<1x64x128xf32> to vector<64x128xf32>
    %558 = vector.shape_cast %555 : vector<64x128xf32> to vector<1x64x128xf32>
    tpu.vector_store %arg10[%c0_194, %c0_195, %c0_196], %558 {strides = array<i32>} : memref<1x64x128xf32, #tpu.memory_space<vmem>>, vector<1x64x128xf32>,
    return
  }
  func.func @transform_0(%arg0: i32) -> (i32, i32, i32) {
    %c0_i32 = arith.constant 0 : i32
    %c0_i32_0 = arith.constant 0 : i32
    %c0_i32_1 = arith.constant 0 : i32
    return %arg0, %c0_i32, %c0_i32_0 : i32, i32, i32
  }
  func.func @transform_1(%arg0: i32) -> (i32, i32, i32) {
    %c0_i32 = arith.constant 0 : i32
    %c0_i32_0 = arith.constant 0 : i32
    %c0_i32_1 = arith.constant 0 : i32
    return %arg0, %c0_i32, %c0_i32_0 : i32, i32, i32
  }
  func.func @transform_2(%arg0: i32) -> (i32, i32) {
    %c0_i32 = arith.constant 0 : i32
    %c0_i32_0 = arith.constant 0 : i32
    %c0_i32_1 = arith.constant 0 : i32
    return %c0_i32, %c0_i32_0 : i32, i32
  }
  func.func @transform_3(%arg0: i32) -> (i32, i32) {
    %c0_i32 = arith.constant 0 : i32
    %c0_i32_0 = arith.constant 0 : i32
    %c0_i32_1 = arith.constant 0 : i32
    return %c0_i32, %c0_i32_0 : i32, i32
  }
  func.func @transform_4(%arg0: i32) -> (i32, i32) {
    %c0_i32 = arith.constant 0 : i32
    %c0_i32_0 = arith.constant 0 : i32
    %c0_i32_1 = arith.constant 0 : i32
    return %c0_i32, %c0_i32_0 : i32, i32
  }
  func.func @transform_5(%arg0: i32) -> (i32, i32) {
    %c0_i32 = arith.constant 0 : i32
    %c0_i32_0 = arith.constant 0 : i32
    %c0_i32_1 = arith.constant 0 : i32
    return %c0_i32, %c0_i32_0 : i32, i32
  }
  func.func @transform_6(%arg0: i32) -> (i32, i32) {
    %c0_i32 = arith.constant 0 : i32
    %c0_i32_0 = arith.constant 0 : i32
    %c0_i32_1 = arith.constant 0 : i32
    return %c0_i32, %c0_i32_0 : i32, i32
  }
  func.func @transform_7(%arg0: i32) -> (i32, i32) {
    %c0_i32 = arith.constant 0 : i32
    %c0_i32_0 = arith.constant 0 : i32
    %c0_i32_1 = arith.constant 0 : i32
    return %c0_i32, %c0_i32_0 : i32, i32
  }
  func.func @transform_8(%arg0: i32) -> (i32, i32) {
    %c0_i32 = arith.constant 0 : i32
    %c0_i32_0 = arith.constant 0 : i32
    %c0_i32_1 = arith.constant 0 : i32
    return %c0_i32, %c0_i32_0 : i32, i32
  }
  func.func @transform_9(%arg0: i32) -> (i32, i32, i32) {
    %c0_i32 = arith.constant 0 : i32
    %c0_i32_0 = arith.constant 0 : i32
    %c0_i32_1 = arith.constant 0 : i32
    return %arg0, %c0_i32, %c0_i32_0 : i32, i32, i32
  }
  func.func @transform_10(%arg0: i32) -> (i32, i32, i32) {
    %c0_i32 = arith.constant 0 : i32
    %c0_i32_0 = arith.constant 0 : i32
    %c0_i32_1 = arith.constant 0 : i32
    return %arg0, %c0_i32, %c0_i32_0 : i32, i32, i32
  }
}

</mosaic_0001>

<bundles_post_ra>
// kernel: prompt_encoder_forward.1
= control target key start
LH: loop header
LB: loop body
LE: loop exit
PB: predicated region body
PF: predicated region fallthrough
CT: control target
= control target key end

     0   :  { %s20944_s0 = inlined_call_operand.vmem [shape: f32[2,64,64], index: 0, kind: input, shape index: {}]   ;;  %s20945_s1 = inlined_call_operand.vmem [shape: f32[2,64,256], index: 1, kind: input, shape index: {}]   ;;  %s20946_s2 = inlined_call_operand.vmem [shape: bf16[64,256], index: 2, kind: input, shape index: {}]   ;;  %s20947_s3 = inlined_call_operand.vmem [shape: bf16[256,1024], index: 3, kind: input, shape index: {}]   ;;  %s20948_s4 = inlined_call_operand.vmem [shape: bf16[256,1024], index: 4, kind: input, shape index: {}]   ;;  %s20949_s5 = inlined_call_operand.vmem [shape: bf16[1024,256], index: 5, kind: input, shape index: {}]   ;;  %s20950_s6 = inlined_call_operand.vmem [shape: bf16[256,1024], index: 6, kind: input, shape index: {}]   ;;  %s20951_s7 = inlined_call_operand.vmem [shape: bf16[256,128], index: 7, kind: input, shape index: {}]   ;;  %s20952_s8 = inlined_call_operand.vmem [shape: f32[1,5504], index: 8, kind: input, shape index: {}]   ;;  %s20953_s9 = inlined_call_operand.vmem [shape: f32[2,64,128], index: 9, kind: output, shape index: {0}]   ;;  %s20954_s10 = inlined_call_operand.hbm [shape: f32[2,64,256], index: 10, kind: output, shape index: {1}]  }
   0x1   :  { %20985 = sst [smem:[#allocation26_spill]] %s20944_s0 }
   0x2   :  { %16 = vsyncpa [#allocation3], 0 }
   0x3   :  { %18 = vsyncpa [#allocation3 + $0x1], 0  ;;  %s15665_s13 = smov 0   ;;  %s15667_s14 = smov 0  }
   0x4   :  { %s15669_s15 = smov 0   ;;  %s15671_s16 = smov 0  }
   0x5 LB: > { %s15686_s17 = sadd.s32 4294967295, %s15600_s16   ;;  %s12604_s18 = sadd.s32 4294967294, %s15600_s16   ;;  %s15600_s16 = sphi %s15671_s16, %s21051_s16   ;;  %s15596_s15 = sphi %s15669_s15, %s21050_s15   ;;  %s15592_s14 = sphi %s15667_s14, %s21049_s14   ;;  %s15588_s13 = sphi %s15665_s13, %s21048_s13  }
   0x6   : > { %s15690_s19 = sadd.s32 1, %s15600_s16   ;;  %s256_s20 = sadd.s32 1, %s15596_s15 }
   0x7   : > { %s253_s21 = ssub.s32 %s15600_s16, %s15690_s19  ;;  %p266_p0 = scmp.ne.s32.totalorder %s15596_s15, %s15592_s14 }
   0x8   : > { %p254_p1 = scmp.eq.s32.totalorder %s253_s21, 0  ;;  %p267_p2 = scmp.eq.s32.totalorder %s15686_s17, 1 }
   0x9   : > { %p272_p3 = scmp.ne.s32.totalorder %s15592_s14, %s15588_s13  ;;  %p273_p4 = scmp.eq.s32.totalorder %s12604_s18, 1 }
   0xa   : > { %s15701_s22 = scalar_select %p254_p1, %s15596_s15, %s256_s20  }
   0xb   : > { %p15703_p5 = por %p267_p2, %p266_p0  ;;  %p15707_p6 = por %p273_p4, %p272_p3 }
   0xc   : > { %20986 = sst [smem:[#allocation5_spill]] %s15701_s22  ;;  %p12607_p7 = scmp.ge.s32.totalorder %s15600_s16, 1 }
   0xd   : > { %p328_p8 = scmp.lt.s32.totalorder %s15600_s16, 3 }
   0xf   : > { %p329_p9 = pnand %p12607_p7, %p328_p8 }
  0x11   : > { %332 = sbr.rel (%p329_p9) target bundleno = 11314 (0x2c32), region = 56 }
  0x18   : > { %v14582_v0 = vld [vmem:[%s20946_s2 + $0x4] ss:$8 sps:$4 sm:$0xff]   ;;  %p376_p10 = scmp.lt.s32.totalorder %s15686_s17, 1  ;;  %v14584_v1 = vld [vmem:[%s20946_s2] ss:$8 sps:$4 sm:$0xff]   ;;  %v20967_v2 = vmov 0  }
  0x19   : > { %525 = vmatprep.mubr.bf16.mxu0 %v20967_v2  ;;  %493 = vmatprep.subr.bf16.mxu0 %v14582_v0  ;;  %v14585_v3 = vld [vmem:[%s20946_s2 + $0x14] ss:$8 sps:$4 sm:$0xff]   ;;  %v14587_v4 = vld [vmem:[%s20946_s2 + $0x10] ss:$8 sps:$4 sm:$0xff]   ;;  %v14588_v5 = vld [vmem:[%s20946_s2 + $0x24] ss:$8 sps:$4 sm:$0xff]  }
  0x1a   : > { %s15725_s11 = scalar_select %p376_p10, %s15686_s17, 1  ;;  %494 = vmatpush1.bf16.msra.mxu0 %v14584_v1  ;;  %v590_v6 = vld [vmem:[%s20947_s3] sm:$0xff]  ;;  %v14591_v11 = vld [vmem:[%s20946_s2 + $0x34] ss:$8 sps:$4 sm:$0xff]   ;;  %v591_v12 = vld [vmem:[%s20947_s3 + $0x8] sm:$0xff]  ;;  %vm480_vm0 = vcmask 523264  }
  0x1b   : > { %495 = vmatprep.subr.bf16.mxu0 %v14585_v3  ;;  %v593_v7 = vld [vmem:[%s20947_s3 + $0x20] sm:$0xff]  ;;  %s20989_s0 = sld [smem:[#allocation26_spill]]  ;;  %v594_v13 = vld [vmem:[%s20947_s3 + $0x28] sm:$0xff]  ;;  %v14593_v16 = vld [vmem:[%s20946_s2 + $0x30] ss:$8 sps:$4 sm:$0xff]   ;;  %vm1429_vm1 = vcmask 261120  }
  0x1c   : > { %s20955_s25 = sshll.u32 %s15725_s11, 6  ;;  %v12628_v8 = vcombine.high %v590_v6, %v593_v7  ;;  %v12627_v9 = vcombine.low %v590_v6, %v593_v7  ;;  %v14590_v10 = vld [vmem:[%s20946_s2 + $0x20] ss:$8 sps:$4 sm:$0xff]   ;;  %v12630_v23 = vcombine.high %v591_v12, %v594_v13  ;;  %v12629_v32 = vcombine.low %v591_v12, %v594_v13  ;;  %s13357_s18 = sshll.u32 %s15725_s11, 7 }
  0x1d   : > { %v596_v14 = vld [vmem:[%s20947_s3 + $0x40] sm:$0xff]  ;;  %v597_v27 = vld [vmem:[%s20947_s3 + $0x48] sm:$0xff]  ;;  %s15985_s21 = scalar_lea.vmem %s20945_s1, %s13357_s18  ;;  %s20965_s29 = smov 96  }
  0x1e   : > { %496 = vmatpush1.bf16.msra.mxu0 %v14587_v4  ;;  %1198 = vmatprep.subr.bf16.mxu1 %v12628_v8  ;;  %v599_v15 = vld [vmem:[%s20947_s3 + $0x60] sm:$0xff]  ;;  %v600_v28 = vld [vmem:[%s20947_s3 + $0x68] sm:$0xff]  ;;  %s20961_s30 = smov 64   ;;  %s20963_s12 = smov 32  }
  0x1f   : > { %497 = vmatprep.subr.bf16.mxu0 %v14588_v5  ;;  %1199 = vmatpush1.bf16.msra.mxu1 %v12627_v9  ;;  %v12634_v17 = vcombine.high %v596_v14, %v599_v15  ;;  %v12633_v18 = vcombine.low %v596_v14, %v599_v15  ;;  %v602_v19 = vld [vmem:[%s20947_s3 + $0x80] sm:$0xff]  ;;  %v12636_v35 = vcombine.high %v597_v27, %v600_v28  ;;  %v603_v36 = vld [vmem:[%s20947_s3 + $0x88] sm:$0xff]  ;;  %s13359_s22 = sshll.u32 %s15686_s17, 11  ;;  %s15607_s17 = smov [#allocation2]  }
  0x20   : > { %v605_v22 = vld [vmem:[%s20947_s3 + $0xa0] sm:$0xff]  ;;  %v606_v37 = vld [vmem:[%s20947_s3 + $0xa8] sm:$0xff]  ;;  %v12635_v42 = vcombine.low %v597_v27, %v600_v28  ;;  %s20868_s20 = scalar_lea.hbm %s20954_s10, %s13359_s22 }
  0x21   : > { %s15751_s27 = scalar_lea.vmem %s20989_s0, %s20955_s25  ;;  %1200 = vmatprep.subr.bf16.mxu1 %v12634_v17  ;;  %v12640_v24 = vcombine.high %v602_v19, %v605_v22  ;;  %v608_v25 = vld [vmem:[%s20947_s3 + $0xc0] sm:$0xff]  ;;  %v12639_v29 = vcombine.low %v602_v19, %v605_v22  ;;  %v12642_v45 = vcombine.high %v603_v36, %v606_v37  ;;  %v609_v46 = vld [vmem:[%s20947_s3 + $0xc8] sm:$0xff]  ;;  %v12641_v51 = vcombine.low %v603_v36, %v606_v37  ;;  %s21042_s25 = smov 96  }
  0x22   : > { %498 = vmatpush1.bf16.msra.mxu0 %v14590_v10  ;;  %v392_v20 = vld [vmem:[%s15751_s27] sm:$0xff]  ;;  %v393_v21 = vld [vmem:[%s15751_s27 + $0x8] sm:$0xff]  ;;  %v394_v39 = vld [vmem:[%s15751_s27 + $0x10] sm:$0xff] }
  0x23   : > { %499 = vmatprep.subr.bf16.mxu0 %v14591_v11  ;;  %v611_v26 = vld [vmem:[%s20947_s3 + $0xe0] sm:$0xff]  ;;  %1201 = vmatpush1.bf16.msra.mxu1 %v12633_v18  ;;  %v400_v30 = vpack.c.bf16 %v393_v21, %v392_v20  ;;  %v395_v41 = vld [vmem:[%s15751_s27 + $0x18] sm:$0xff]  ;;  %v612_v47 = vld [vmem:[%s20947_s3 + $0xe8] sm:$0xff] }
  0x24   : > { %1202 = vmatprep.subr.bf16.mxu1 %v12640_v24  ;;  %v12646_v31 = vcombine.high %v608_v25, %v611_v26  ;;  %v614_v33 = vld [vmem:[%s20947_s3 + $0x100] sm:$0xff]  ;;  %v12645_v38 = vcombine.low %v608_v25, %v611_v26  ;;  %v401_v49 = vpack.c.bf16 %v395_v41, %v394_v39  ;;  %v12648_v54 = vcombine.high %v609_v46, %v612_v47  ;;  %v615_v55 = vld [vmem:[%s20947_s3 + $0x108] sm:$0xff]  ;;  %v398_v13 = vld [vmem:[%s15751_s27 + $0x30] sm:$0xff] }
  0x25   : > { %v617_v34 = vld [vmem:[%s20947_s3 + $0x120] sm:$0xff]  ;;  %v618_v56 = vld [vmem:[%s20947_s3 + $0x128] sm:$0xff]  ;;  %v12647_v62 = vcombine.low %v609_v46, %v612_v47  ;;  %v399_v14 = vld [vmem:[%s15751_s27 + $0x38] sm:$0xff] }
  0x26   : > { %500 = vmatpush1.bf16.msra.mxu0 %v14593_v16  ;;  %v12652_v40 = vcombine.high %v614_v33, %v617_v34  ;;  %v620_v43 = vld [vmem:[%s20947_s3 + $0x140] sm:$0xff]  ;;  %v12651_v48 = vcombine.low %v614_v33, %v617_v34  ;;  %v397_v59 = vld [vmem:[%s15751_s27 + $0x28] sm:$0xff]  ;;  %v12654_v3 = vcombine.high %v615_v55, %v618_v56  ;;  %v12653_v9 = vcombine.low %v615_v55, %v618_v56 }
  0x27   : > { %1271 = vmatprep.subr.bf16.mxu0 %v12630_v23  ;;  %1203 = vmatpush1.bf16.msra.mxu1 %v12639_v29  ;;  %v623_v44 = vld [vmem:[%s20947_s3 + $0x160] sm:$0xff]  ;;  %v621_v63 = vld [vmem:[%s20947_s3 + $0x148] sm:$0xff]  ;;  %v403_v26 = vpack.c.bf16 %v399_v14, %v398_v13 }
  0x28   : > { %1204 = vmatprep.subr.bf16.mxu1 %v12646_v31  ;;  %v12658_v50 = vcombine.high %v620_v43, %v623_v44  ;;  %v626_v52 = vld [vmem:[%s20947_s3 + $0x180] sm:$0xff]  ;;  %v12657_v57 = vcombine.low %v620_v43, %v623_v44  ;;  %v624_v0 = vld [vmem:[%s20947_s3 + $0x168] sm:$0xff] }
  0x29   : > { %12623 = vmatmul.mubr.msk.bf16.vlgmr.msra.gmra.mrb[0].mxu0 %vm480_vm0, %v400_v30  ;;  %v629_v53 = vld [vmem:[%s20947_s3 + $0x1a0] sm:$0xff]  ;;  %v627_v10 = vld [vmem:[%s20947_s3 + $0x188] sm:$0xff]  ;;  %v12660_v12 = vcombine.high %v621_v63, %v624_v0  ;;  %v12659_v19 = vcombine.low %v621_v63, %v624_v0 }
  0x2a   : > { %535 = vmatprep.mubr.bf16.mxu0 %v20967_v2  ;;  %1272 = vmatpush1.bf16.msra.mxu0 %v12629_v32  ;;  %v396_v58 = vld [vmem:[%s15751_s27 + $0x20] sm:$0xff]  ;;  %v12664_v60 = vcombine.high %v626_v52, %v629_v53  ;;  %v12663_v4 = vcombine.low %v626_v52, %v629_v53  ;;  %v630_v11 = vld [vmem:[%s20947_s3 + $0x1a8] sm:$0xff] }
  0x2b   : > { %1273 = vmatprep.subr.bf16.mxu0 %v12636_v35  ;;  %1205 = vmatpush1.bf16.msra.mxu1 %v12645_v38  ;;  %v632_v61 = vld [vmem:[%s20947_s3 + $0x1c0] sm:$0xff]  ;;  %v402_v7 = vpack.c.bf16 %v397_v59, %v396_v58  ;;  %v633_v20 = vld [vmem:[%s20947_s3 + $0x1c8] sm:$0xff]  ;;  %v12666_v22 = vcombine.high %v627_v10, %v630_v11  ;;  %v12665_v28 = vcombine.low %v627_v10, %v630_v11 }
  0x2c   : > { %1206 = vmatprep.subr.bf16.mxu1 %v12652_v40  ;;  %v635_v1 = vld [vmem:[%s20947_s3 + $0x1e0] sm:$0xff]  ;;  %v636_v21 = vld [vmem:[%s20947_s3 + $0x1e8] sm:$0xff] }
  0x2d   : > { %v638_v5 = vld [vmem:[%s20947_s3 + $0x200] sm:$0xff]  ;;  %v12670_v8 = vcombine.high %v632_v61, %v635_v1  ;;  %v12669_v15 = vcombine.low %v632_v61, %v635_v1  ;;  %v639_v29 = vld [vmem:[%s20947_s3 + $0x208] sm:$0xff]  ;;  %v12672_v31 = vcombine.high %v633_v20, %v636_v21  ;;  %v12671_v36 = vcombine.low %v633_v20, %v636_v21 }
  0x2e   : > { %1274 = vmatpush1.bf16.msra.mxu0 %v12635_v42  ;;  %v641_v6 = vld [vmem:[%s20947_s3 + $0x220] sm:$0xff]  ;;  %v642_v30 = vld [vmem:[%s20947_s3 + $0x228] sm:$0xff] }
  0x2f   : > { %1275 = vmatprep.subr.bf16.mxu0 %v12642_v45  ;;  %1207 = vmatpush1.bf16.msra.mxu1 %v12651_v48  ;;  %v644_v16 = vld [vmem:[%s20947_s3 + $0x240] sm:$0xff]  ;;  %v12676_v18 = vcombine.high %v638_v5, %v641_v6  ;;  %v12675_v23 = vcombine.low %v638_v5, %v641_v6  ;;  %v645_v37 = vld [vmem:[%s20947_s3 + $0x248] sm:$0xff]  ;;  %v12678_v39 = vcombine.high %v639_v29, %v642_v30 }
  0x30   : > { %1208 = vmatprep.subr.bf16.mxu1 %v12658_v50  ;;  %v647_v17 = vld [vmem:[%s20947_s3 + $0x260] sm:$0xff]  ;;  %v648_v38 = vld [vmem:[%s20947_s3 + $0x268] sm:$0xff]  ;;  %v12677_v44 = vcombine.low %v639_v29, %v642_v30 }
  0x31   : > { %12624 = vmatmul.mubr.msk.bf16.gmra.mrb[4].mxu0 %vm480_vm0, %v401_v49  ;;  %v650_v24 = vld [vmem:[%s20947_s3 + $0x280] sm:$0xff]  ;;  %v12682_v27 = vcombine.high %v644_v16, %v647_v17  ;;  %v12681_v32 = vcombine.low %v644_v16, %v647_v17  ;;  %v651_v45 = vld [vmem:[%s20947_s3 + $0x288] sm:$0xff]  ;;  %v12684_v47 = vcombine.high %v645_v37, %v648_v38  ;;  %v12683_v52 = vcombine.low %v645_v37, %v648_v38 }
  0x32   : > { %545 = vmatprep.mubr.bf16.mxu0 %v20967_v2  ;;  %1276 = vmatpush1.bf16.msra.mxu0 %v12641_v51  ;;  %v653_v25 = vld [vmem:[%s20947_s3 + $0x2a0] sm:$0xff]  ;;  %v654_v46 = vld [vmem:[%s20947_s3 + $0x2a8] sm:$0xff] }
  0x33   : > { %1277 = vmatprep.subr.bf16.mxu0 %v12648_v54  ;;  %1209 = vmatpush1.bf16.msra.mxu1 %v12657_v57  ;;  %v656_v33 = vld [vmem:[%s20947_s3 + $0x2c0] sm:$0xff]  ;;  %v12688_v35 = vcombine.high %v650_v24, %v653_v25  ;;  %v12687_v40 = vcombine.low %v650_v24, %v653_v25  ;;  %v657_v53 = vld [vmem:[%s20947_s3 + $0x2c8] sm:$0xff]  ;;  %v12690_v55 = vcombine.high %v651_v45, %v654_v46  ;;  %v595_v24 = vld [vmem:[%s20947_s3 + $0x30] sm:$0xff] }
  0x34   : > { %1210 = vmatprep.subr.bf16.mxu1 %v12664_v60  ;;  %v659_v34 = vld [vmem:[%s20947_s3 + $0x2e0] sm:$0xff]  ;;  %v660_v54 = vld [vmem:[%s20947_s3 + $0x2e8] sm:$0xff]  ;;  %v12689_v58 = vcombine.low %v651_v45, %v654_v46 }
  0x35   : > { %v662_v41 = vld [vmem:[%s20947_s3 + $0x300] sm:$0xff]  ;;  %v12694_v43 = vcombine.high %v656_v33, %v659_v34  ;;  %v12693_v48 = vcombine.low %v656_v33, %v659_v34  ;;  %v663_v59 = vld [vmem:[%s20947_s3 + $0x308] sm:$0xff]  ;;  %v12696_v61 = vcombine.high %v657_v53, %v660_v54  ;;  %v12695_v63 = vcombine.low %v657_v53, %v660_v54 }
  0x36   : > { %1278 = vmatpush1.bf16.msra.mxu0 %v12647_v62  ;;  %v665_v42 = vld [vmem:[%s20947_s3 + $0x320] sm:$0xff]  ;;  %v666_v60 = vld [vmem:[%s20947_s3 + $0x328] sm:$0xff] }
  0x37   : > { %1279 = vmatprep.subr.bf16.mxu0 %v12654_v3  ;;  %1211 = vmatpush1.bf16.msra.mxu1 %v12663_v4  ;;  %v668_v49 = vld [vmem:[%s20947_s3 + $0x340] sm:$0xff]  ;;  %v12700_v51 = vcombine.high %v662_v41, %v665_v42  ;;  %v12699_v56 = vcombine.low %v662_v41, %v665_v42  ;;  %v669_v0 = vld [vmem:[%s20947_s3 + $0x348] sm:$0xff]  ;;  %v12702_v3 = vcombine.high %v663_v59, %v666_v60 }
  0x38   : > { %1212 = vmatprep.subr.bf16.mxu1 %v12670_v8  ;;  %v671_v50 = vld [vmem:[%s20947_s3 + $0x360] sm:$0xff]  ;;  %v672_v1 = vld [vmem:[%s20947_s3 + $0x368] sm:$0xff]  ;;  %v12701_v4 = vcombine.low %v663_v59, %v666_v60  ;;  %v410_v60 = vld [vmem:[%s15985_s21 + $0x30] sm:$0xff] }
  0x39   : > { %12625 = vmatmul.mubr.msk.bf16.gmra.mrb[8].mxu0 %vm480_vm0, %v402_v7  ;;  %v12706_v57 = vcombine.high %v668_v49, %v671_v50  ;;  %v12705_v62 = vcombine.low %v668_v49, %v671_v50  ;;  %v12708_v5 = vcombine.high %v669_v0, %v672_v1  ;;  %v12707_v6 = vcombine.low %v669_v0, %v672_v1  ;;  %v674_v7 = vld [vmem:[%s20947_s3 + $0x380] sm:$0xff]  ;;  %v675_v10 = vld [vmem:[%s20947_s3 + $0x388] sm:$0xff]  ;;  %v598_v50 = vld [vmem:[%s20947_s3 + $0x50] sm:$0xff] }
  0x3a   : > { %555 = vmatprep.mubr.bf16.mxu0 %v20967_v2  ;;  %1280 = vmatpush1.bf16.msra.mxu0 %v12653_v9  ;;  %v677_v8 = vld [vmem:[%s20947_s3 + $0x3a0] sm:$0xff]  ;;  %v678_v11 = vld [vmem:[%s20947_s3 + $0x3a8] sm:$0xff] }
  0x3b   : > { %1281 = vmatprep.subr.bf16.mxu0 %v12660_v12  ;;  %1213 = vmatpush1.bf16.msra.mxu1 %v12669_v15  ;;  %v12712_v9 = vcombine.high %v674_v7, %v677_v8  ;;  %v12711_v12 = vcombine.low %v674_v7, %v677_v8  ;;  %v12714_v13 = vcombine.high %v675_v10, %v678_v11  ;;  %v680_v15 = vld [vmem:[%s20947_s3 + $0x3c0] sm:$0xff]  ;;  %v405_v41 = vld [vmem:[%s15985_s21 + $0x8] sm:$0xff] }
  0x3c   : > { %1214 = vmatprep.subr.bf16.mxu1 %v12676_v18  ;;  %v12713_v14 = vcombine.low %v675_v10, %v678_v11  ;;  %v683_v16 = vld [vmem:[%s20947_s3 + $0x3e0] sm:$0xff]  ;;  %v681_v18 = vld [vmem:[%s20947_s3 + $0x3c8] sm:$0xff] }
  0x3d   : > { %v12718_v17 = vcombine.high %v680_v15, %v683_v16  ;;  %v12717_v20 = vcombine.low %v680_v15, %v683_v16  ;;  %v428_v30 = vld [vmem:[%s20952_s8] sm:$0x3]  ;;  %v409_v0 = vld [vmem:[%s15985_s21 + $0x28] sm:$0xff] }
  0x3e   : > { %1282 = vmatpush1.bf16.msra.mxu0 %v12659_v19  ;;  %v684_v19 = vld [vmem:[%s20947_s3 + $0x3e8] sm:$0xff]  ;;  %v404_v37 = vld [vmem:[%s15985_s21] sm:$0xff] }
  0x3f   : > { %1283 = vmatprep.subr.bf16.mxu0 %v12666_v22  ;;  %1215 = vmatpush1.bf16.msra.mxu1 %v12675_v23  ;;  %v12720_v21 = vcombine.high %v681_v18, %v684_v19  ;;  %v12719_v22 = vcombine.low %v681_v18, %v684_v19  ;;  %v592_v23 = vld [vmem:[%s20947_s3 + $0x10] sm:$0xff]  ;;  %v412_v18 = vld [vmem:[%s15985_s21 + $0x40] sm:$0xff] }
  0x40   : > { %1216 = vmatprep.subr.bf16.mxu1 %v12682_v27  ;;  %v12632_v25 = vcombine.high %v592_v23, %v595_v24  ;;  %v20956_v27 = vlaneseq }
  0x41   : > { %12626 = vmatmul.mubr.msk.bf16.gmra.mrb[12].mxu0 %vm480_vm0, %v403_v26  ;;  %v12631_v26 = vcombine.low %v592_v23, %v595_v24  ;;  %v414_v23 = vld [vmem:[%s15985_s21 + $0x50] sm:$0xff] }
  0x42   : > { %1284 = vmatpush1.bf16.msra.mxu0 %v12665_v28  ;;  %v15964_v28 = vshrl.u32 %v20956_v27, 7 }
  0x43   : > { %1285 = vmatprep.subr.bf16.mxu0 %v12672_v31  ;;  %1217 = vmatpush1.bf16.msra.mxu1 %v12681_v32 }
  0x44   : > { %1218 = vmatprep.subr.bf16.mxu1 %v12688_v35  ;;  %v15967_v29 = vsub.s32 0, %v15964_v28  ;;  %v15973_v31 = vsub.s32 1, %v15964_v28 }
  0x46   : > { %1286 = vmatpush1.bf16.msra.mxu0 %v12671_v36  ;;  %20990 = vst [vmem:[#allocation6_spill] sm:$0xff] %v15967_v29  ;;  %20991 = vst [vmem:[#allocation7_spill] sm:$0xff] %v15973_v31  ;;  %v15977_v32 = vrot.slane %v428_v30, %v15967_v29  ;;  %v15980_v33 = vrot.slane %v428_v30, %v15973_v31  ;;  %v413_v30 = vld [vmem:[%s15985_s21 + $0x48] sm:$0xff] }
  0x47   : > { %1287 = vmatprep.subr.bf16.mxu0 %v12678_v39  ;;  %1219 = vmatpush1.bf16.msra.mxu1 %v12687_v40  ;;  %v406_v39 = vld [vmem:[%s15985_s21 + $0x10] sm:$0xff] }
  0x48   : > { %1220 = vmatprep.subr.bf16.mxu1 %v12694_v43  ;;  %v407_v43 = vld [vmem:[%s15985_s21 + $0x18] sm:$0xff] }
  0x4a   : > { %1288 = vmatpush1.bf16.msra.mxu0 %v12677_v44 }
  0x4b   : > { %1289 = vmatprep.subr.bf16.mxu0 %v12684_v47  ;;  %1221 = vmatpush1.bf16.msra.mxu1 %v12693_v48 }
  0x4c   : > { %1222 = vmatprep.subr.bf16.mxu1 %v12700_v51  ;;  %v601_v51 = vld [vmem:[%s20947_s3 + $0x70] sm:$0xff] }
  0x4e   : > { %1290 = vmatpush1.bf16.msra.mxu0 %v12683_v52 }
  0x4f   : > { %1291 = vmatprep.subr.bf16.mxu0 %v12690_v55  ;;  %1223 = vmatpush1.bf16.msra.mxu1 %v12699_v56  ;;  %v408_v55 = vld [vmem:[%s15985_s21 + $0x20] sm:$0xff] }
  0x50   : > { %1224 = vmatprep.subr.bf16.mxu1 %v12706_v57 }
  0x52   : > { %1292 = vmatpush1.bf16.msra.mxu0 %v12689_v58  ;;  %v12638_v58 = vcombine.high %v598_v50, %v601_v51 }
  0x53   : > { %1293 = vmatprep.subr.bf16.mxu0 %v12696_v61  ;;  %1225 = vmatpush1.bf16.msra.mxu1 %v12705_v62  ;;  %v604_v62 = vld [vmem:[%s20947_s3 + $0x90] sm:$0xff] }
  0x54   : > { %1226 = vmatprep.subr.bf16.mxu1 %v12712_v9 }
  0x56   : > { %1294 = vmatpush1.bf16.msra.mxu0 %v12695_v63  ;;  %v607_v63 = vld [vmem:[%s20947_s3 + $0xb0] sm:$0xff] }
  0x57   : > { %1295 = vmatprep.subr.bf16.mxu0 %v12702_v3  ;;  %1227 = vmatpush1.bf16.msra.mxu1 %v12711_v12  ;;  %v411_v3 = vld [vmem:[%s15985_s21 + $0x38] sm:$0xff]  ;;  %v12644_v9 = vcombine.high %v604_v62, %v607_v63  ;;  %v610_v12 = vld [vmem:[%s20947_s3 + $0xd0] sm:$0xff] }
  0x58   : > { %1228 = vmatprep.subr.bf16.mxu1 %v12718_v17  ;;  %v12643_v17 = vcombine.low %v604_v62, %v607_v63  ;;  %v419_v63 = vld [vmem:[%s15985_s21 + $0x78] sm:$0xff] }
  0x5a   : > { %1296 = vmatpush1.bf16.msra.mxu0 %v12701_v4 }
  0x5b   : > { %1297 = vmatprep.subr.bf16.mxu0 %v12708_v5  ;;  %1229 = vmatpush1.bf16.msra.mxu1 %v12717_v20 }
  0x5c   : > { %1344 = vmatprep.subr.bf16.mxu1 %v12632_v25  ;;  %v616_v25 = vld [vmem:[%s20947_s3 + $0x110] sm:$0xff] }
  0x5e   : > { %1298 = vmatpush1.bf16.msra.mxu0 %v12707_v6  ;;  %v12637_v6 = vcombine.low %v598_v50, %v601_v51  ;;  %v416_v50 = vld [vmem:[%s15985_s21 + $0x60] sm:$0xff] }
  0x5f   : > { %1299 = vmatprep.subr.bf16.mxu0 %v12714_v13  ;;  %v613_v13 = vld [vmem:[%s20947_s3 + $0xf0] sm:$0xff] }
  0x62   : > { %1300 = vmatpush1.bf16.msra.mxu0 %v12713_v14 }
  0x63   : > { %1301 = vmatprep.subr.bf16.mxu0 %v12720_v21  ;;  %v12650_v21 = vcombine.high %v610_v12, %v613_v13 }
  0x66   : > { %1302 = vmatpush1.bf16.msra.mxu0 %v12719_v22 }
  0xfc   : > { %v527_v34 = vpop.f32.mrb[0].mxu0 }
  0xfd   : > { %v528_v35 = vadd.f32 %v527_v34, %v15977_v32  ;;  %v529_v36 = vpop.f32.mrb[1].mxu0 }
  0xfe   : > { %v530_v38 = vadd.f32 %v529_v36, %v15980_v33  ;;  %v531_v40 = vpop.f32.mrb[2].mxu0 }
  0xff   : > { %v532_v42 = vadd.f32 %v531_v40, %v15977_v32  ;;  %v533_v44 = vpop.f32.mrb[3].mxu0  ;;  %v566_v46 = vadd.f32 %v528_v35, %v404_v37  ;;  %v415_v35 = vld [vmem:[%s15985_s21 + $0x58] sm:$0xff] }
 0x100   : > { %v534_v45 = vadd.f32 %v533_v44, %v15980_v33  ;;  %v567_v48 = vadd.f32 %v530_v38, %v405_v41  ;;  %v12649_v38 = vcombine.low %v610_v12, %v613_v13  ;;  %v622_v44 = vld [vmem:[%s20947_s3 + $0x150] sm:$0xff] }
 0x101   : > { %v568_v47 = vadd.f32 %v532_v42, %v406_v39  ;;  %v640_v13 = vld [vmem:[%s20947_s3 + $0x210] sm:$0xff] }
 0x102   : > { %v569_v49 = vadd.f32 %v534_v45, %v407_v43  ;;  %v625_v45 = vld [vmem:[%s20947_s3 + $0x170] sm:$0xff] }
 0x103   : > { %v16001_v52 = vpack.c.bf16 %v568_v47, %v566_v46 }
 0x104   : > { %v537_v53 = vpop.f32.mrb[4].mxu0  ;;  %v16003_v54 = vpack.c.bf16 %v569_v49, %v567_v48 }
 0x105   : > { %v538_v56 = vadd.f32 %v537_v53, %v15977_v32  ;;  %v539_v57 = vpop.f32.mrb[5].mxu0 }
 0x106   : > { %v540_v59 = vadd.f32 %v539_v57, %v15980_v33  ;;  %v541_v61 = vpop.f32.mrb[6].mxu0  ;;  %1230 = vmatprep.mubr.bf16.mxu1 %v16003_v54  ;;  %1303 = vmatprep.mubr.bf16.mxu0 %v16003_v54  ;;  %v418_v57 = vld [vmem:[%s15985_s21 + $0x70] sm:$0xff] }
 0x107   : > { %v542_v1 = vadd.f32 %v541_v61, %v15977_v32  ;;  %v543_v4 = vpop.f32.mrb[7].mxu0  ;;  %1231 = vmatmul.mubr.bf16.vlgmr.msra.gmra.mrb[0].mxu1 %v16001_v52  ;;  %1304 = vmatmul.mubr.bf16.vlgmr.msra.gmra.mrb[16].mxu0 %v16001_v52  ;;  %v570_v7 = vadd.f32 %v538_v56, %v408_v55  ;;  %v12662_v55 = vcombine.high %v622_v44, %v625_v45  ;;  %v417_v61 = vld [vmem:[%s15985_s21 + $0x68] sm:$0xff] }
 0x108   : > { %v544_v5 = vadd.f32 %v543_v4, %v15980_v33  ;;  %1345 = vmatpush1.bf16.msra.mxu1 %v12631_v26  ;;  %v571_v10 = vadd.f32 %v540_v59, %v409_v0  ;;  %v619_v26 = vld [vmem:[%s20947_s3 + $0x130] sm:$0xff] }
 0x109   : > { %v572_v8 = vadd.f32 %v542_v1, %v410_v60  ;;  %1346 = vmatprep.subr.bf16.mxu1 %v12638_v58  ;;  %v12656_v41 = vcombine.high %v616_v25, %v619_v26  ;;  %v12655_v49 = vcombine.low %v616_v25, %v619_v26  ;;  %v628_v59 = vld [vmem:[%s20947_s3 + $0x190] sm:$0xff] }
 0x10a   : > { %v573_v11 = vadd.f32 %v544_v5, %v411_v3  ;;  %v631_v60 = vld [vmem:[%s20947_s3 + $0x1b0] sm:$0xff]  ;;  %v12661_v3 = vcombine.low %v622_v44, %v625_v45 }
 0x10b   : > { %v16029_v14 = vpack.c.bf16 %v572_v8, %v570_v7  ;;  %v658_v26 = vld [vmem:[%s20947_s3 + $0x2d0] sm:$0xff] }
 0x10c   : > { %1347 = vmatpush1.bf16.msra.mxu1 %v12637_v6  ;;  %v547_v15 = vpop.f32.mrb[8].mxu0  ;;  %v16031_v16 = vpack.c.bf16 %v573_v11, %v571_v10  ;;  %v12668_v6 = vcombine.high %v628_v59, %v631_v60  ;;  %v12667_v11 = vcombine.low %v628_v59, %v631_v60  ;;  %v676_v44 = vld [vmem:[%s20947_s3 + $0x390] sm:$0xff] }
 0x10d   : > { %v548_v19 = vadd.f32 %v547_v15, %v15977_v32  ;;  %v549_v20 = vpop.f32.mrb[9].mxu0  ;;  %1348 = vmatprep.subr.bf16.mxu1 %v12644_v9  ;;  %v637_v9 = vld [vmem:[%s20947_s3 + $0x1f0] sm:$0xff] }
 0x10e   : > { %v550_v22 = vadd.f32 %v549_v20, %v15980_v33  ;;  %v551_v24 = vpop.f32.mrb[10].mxu0  ;;  %1240 = vmatprep.mubr.bf16.mxu1 %v16031_v16  ;;  %1313 = vmatprep.mubr.bf16.mxu0 %v16031_v16  ;;  %v643_v15 = vld [vmem:[%s20947_s3 + $0x230] sm:$0xff] }
 0x10f   : > { %v552_v34 = vadd.f32 %v551_v24, %v15977_v32  ;;  %v553_v36 = vpop.f32.mrb[11].mxu0  ;;  %1241 = vmatmul.mubr.bf16.gmra.mrb[4].mxu1 %v16029_v14  ;;  %1314 = vmatmul.mubr.bf16.gmra.mrb[20].mxu0 %v16029_v14  ;;  %v574_v39 = vadd.f32 %v548_v19, %v412_v18  ;;  %v12680_v18 = vcombine.high %v640_v13, %v643_v15  ;;  %v646_v19 = vld [vmem:[%s20947_s3 + $0x250] sm:$0xff] }
 0x110   : > { %v554_v37 = vadd.f32 %v553_v36, %v15980_v33  ;;  %1349 = vmatpush1.bf16.msra.mxu1 %v12643_v17  ;;  %v575_v42 = vadd.f32 %v550_v22, %v413_v30  ;;  %v649_v20 = vld [vmem:[%s20947_s3 + $0x270] sm:$0xff] }
 0x111   : > { %v576_v40 = vadd.f32 %v552_v34, %v414_v23  ;;  %1350 = vmatprep.subr.bf16.mxu1 %v12650_v21  ;;  %v12679_v21 = vcombine.low %v640_v13, %v643_v15  ;;  %v12686_v22 = vcombine.high %v646_v19, %v649_v20  ;;  %v652_v23 = vld [vmem:[%s20947_s3 + $0x290] sm:$0xff]  ;;  %v12685_v24 = vcombine.low %v646_v19, %v649_v20 }
 0x112   : > { %v577_v43 = vadd.f32 %v554_v37, %v415_v35  ;;  %v661_v30 = vld [vmem:[%s20947_s3 + $0x2f0] sm:$0xff] }
 0x113   : > { %v16057_v46 = vpack.c.bf16 %v576_v40, %v574_v39  ;;  %v12698_v35 = vcombine.high %v658_v26, %v661_v30  ;;  %v664_v36 = vld [vmem:[%s20947_s3 + $0x310] sm:$0xff] }
 0x114   : > { %1351 = vmatpush1.bf16.msra.mxu1 %v12649_v38  ;;  %v557_v47 = vpop.f32.mrb[12].mxu0  ;;  %v16059_v48 = vpack.c.bf16 %v577_v43, %v575_v42  ;;  %v667_v37 = vld [vmem:[%s20947_s3 + $0x330] sm:$0xff]  ;;  %v12697_v38 = vcombine.low %v658_v26, %v661_v30 }
 0x115   : > { %v558_v51 = vadd.f32 %v557_v47, %v15977_v32  ;;  %v559_v53 = vpop.f32.mrb[13].mxu0  ;;  %1352 = vmatprep.subr.bf16.mxu1 %v12656_v41  ;;  %v12704_v39 = vcombine.high %v664_v36, %v667_v37  ;;  %v670_v40 = vld [vmem:[%s20947_s3 + $0x350] sm:$0xff]  ;;  %v12703_v42 = vcombine.low %v664_v36, %v667_v37 }
 0x116   : > { %v560_v56 = vadd.f32 %v559_v53, %v15980_v33  ;;  %v561_v58 = vpop.f32.mrb[14].mxu0  ;;  %1250 = vmatprep.mubr.bf16.mxu1 %v16059_v48  ;;  %1323 = vmatprep.mubr.bf16.mxu0 %v16059_v48  ;;  %v673_v41 = vld [vmem:[%s20947_s3 + $0x370] sm:$0xff] }
 0x117   : > { %v562_v62 = vadd.f32 %v561_v58, %v15977_v32  ;;  %v563_v0 = vpop.f32.mrb[15].mxu0  ;;  %1251 = vmatmul.mubr.bf16.gmra.mrb[8].mxu1 %v16057_v46  ;;  %1324 = vmatmul.mubr.bf16.gmra.mrb[24].mxu0 %v16057_v46  ;;  %v578_v4 = vadd.f32 %v558_v51, %v416_v50  ;;  %v634_v32 = vld [vmem:[%s20947_s3 + $0x1d0] sm:$0xff]  ;;  %v12710_v43 = vcombine.high %v670_v40, %v673_v41  ;;  %v16153_v58 = vld [vmem:[%s20952_s8 + $0x2] sm:$0x3f] }
 0x118   : > { %v564_v1 = vadd.f32 %v563_v0, %v15980_v33  ;;  %1353 = vmatpush1.bf16.msra.mxu1 %v12655_v49  ;;  %v579_v7 = vadd.f32 %v560_v56, %v417_v61  ;;  %v12674_v12 = vcombine.high %v634_v32, %v637_v9  ;;  %v12673_v17 = vcombine.low %v634_v32, %v637_v9  ;;  %v679_v45 = vld [vmem:[%s20947_s3 + $0x3b0] sm:$0xff] }
 0x119   : > { %v580_v5 = vadd.f32 %v562_v62, %v418_v57  ;;  %1354 = vmatprep.subr.bf16.mxu1 %v12662_v55  ;;  %v12709_v47 = vcombine.low %v670_v40, %v673_v41  ;;  %v12716_v49 = vcombine.high %v676_v44, %v679_v45  ;;  %v682_v50 = vld [vmem:[%s20947_s3 + $0x3d0] sm:$0xff]  ;;  %v12715_v53 = vcombine.low %v676_v44, %v679_v45 }
 0x11a   : > { %v581_v8 = vadd.f32 %v564_v1, %v419_v63  ;;  %v685_v51 = vld [vmem:[%s20947_s3 + $0x3f0] sm:$0xff]  ;;  %v20960_v57 = vsub.s32 2, %v15964_v28  ;;  %v16167_v59 = vrot.slane %v16153_v58, %v15973_v31 }
 0x11b   : > { %v16085_v10 = vpack.c.bf16 %v580_v5, %v578_v4  ;;  %v12722_v55 = vcombine.high %v682_v50, %v685_v51  ;;  %v12721_v56 = vcombine.low %v682_v50, %v685_v51 }
 0x11c   : > { %1355 = vmatpush1.bf16.msra.mxu1 %v12661_v3  ;;  %v16087_v33 = vpack.c.bf16 %v581_v8, %v579_v7 }
 0x11d   : > { %1356 = vmatprep.subr.bf16.mxu1 %v12668_v6 }
 0x11e   : > { %1260 = vmatprep.mubr.bf16.mxu1 %v16087_v33  ;;  %1333 = vmatprep.mubr.bf16.mxu0 %v16087_v33 }
 0x11f   : > { %1261 = vmatmul.mubr.bf16.gmra.mrb[12].mxu1 %v16085_v10  ;;  %1334 = vmatmul.mubr.bf16.gmra.mrb[28].mxu0 %v16085_v10 }
 0x120   : > { %1357 = vmatpush1.bf16.msra.mxu1 %v12667_v11  ;;  %1376 = vmatprep.mubr.bf16.mxu1 %v16003_v54  ;;  %v655_v54 = vld [vmem:[%s20947_s3 + $0x2b0] sm:$0xff] }
 0x121   : > { %1358 = vmatprep.subr.bf16.mxu1 %v12674_v12  ;;  %v12692_v25 = vcombine.high %v652_v23, %v655_v54  ;;  %v12691_v34 = vcombine.low %v652_v23, %v655_v54 }
 0x124   : > { %1359 = vmatpush1.bf16.msra.mxu1 %v12673_v17 }
 0x125   : > { %1360 = vmatprep.subr.bf16.mxu1 %v12680_v18 }
 0x128   : > { %1361 = vmatpush1.bf16.msra.mxu1 %v12679_v21 }
 0x129   : > { %1362 = vmatprep.subr.bf16.mxu1 %v12686_v22 }
 0x12c   : > { %1363 = vmatpush1.bf16.msra.mxu1 %v12685_v24 }
 0x12d   : > { %1364 = vmatprep.subr.bf16.mxu1 %v12692_v25 }
 0x130   : > { %1365 = vmatpush1.bf16.msra.mxu1 %v12691_v34 }
 0x131   : > { %1366 = vmatprep.subr.bf16.mxu1 %v12698_v35 }
 0x134   : > { %1367 = vmatpush1.bf16.msra.mxu1 %v12697_v38 }
 0x135   : > { %1368 = vmatprep.subr.bf16.mxu1 %v12704_v39 }
 0x138   : > { %1369 = vmatpush1.bf16.msra.mxu1 %v12703_v42 }
 0x139   : > { %1370 = vmatprep.subr.bf16.mxu1 %v12710_v43 }
 0x13c   : > { %1371 = vmatpush1.bf16.msra.mxu1 %v12709_v47 }
 0x13d   : > { %1372 = vmatprep.subr.bf16.mxu1 %v12716_v49 }
 0x140   : > { %1373 = vmatpush1.bf16.msra.mxu1 %v12715_v53 }
 0x141   : > { %1374 = vmatprep.subr.bf16.mxu1 %v12722_v55 }
 0x144   : > { %1375 = vmatpush1.bf16.msra.mxu1 %v12721_v56 }
 0x147   : > { %1377 = vmatmul.mubr.bf16.vlgmr.msra.gmra.mrb[16].mxu1 %v16001_v52  ;;  %v20959_v52 = vsub.s32 3, %v15964_v28 }
 0x148   : > { %1386 = vmatprep.mubr.bf16.mxu1 %v16031_v16  ;;  %v16163_v16 = vrot.slane %v16153_v58, %v20960_v57 }
 0x149   : > { %v16172_v60 = vrot.slane %v16153_v58, %v20959_v52 }
 0x14f   : > { %1387 = vmatmul.mubr.bf16.gmra.mrb[20].mxu1 %v16029_v14  ;;  %v16158_v14 = vrot.slane %v16153_v58, %v15967_v29 }
 0x150   : > { %1396 = vmatprep.mubr.bf16.mxu1 %v16059_v48 }
 0x157   : > { %1397 = vmatmul.mubr.bf16.gmra.mrb[24].mxu1 %v16057_v46 }
 0x158   : > { %1406 = vmatprep.mubr.bf16.mxu1 %v16087_v33 }
 0x15f   : > { %1407 = vmatmul.mubr.bf16.gmra.mrb[28].mxu1 %v16085_v10 }
 0x1da   : > { %v1232_v46 = vpop.f32.mrb[0].mxu1  ;;  %v1305_v48 = vpop.f32.mrb[16].mxu0 }
 0x1db   : > { %v1234_v61 = vpop.f32.mrb[1].mxu1  ;;  %v1307_v62 = vpop.f32.mrb[17].mxu0  ;;  %v1233_v1 = vadd.f32 %v1232_v46, %v16158_v14  ;;  %v1306_v3 = vadd.f32 %v1305_v48, %v16163_v16 }
 0x1dc   : > { %v1236_v63 = vpop.f32.mrb[2].mxu1  ;;  %v1309_v0 = vpop.f32.mrb[18].mxu0  ;;  %v1235_v8 = vadd.f32 %v1234_v61, %v16167_v59  ;;  %v1308_v32 = vadd.f32 %v1307_v62, %v16172_v60 }
 0x1dd   : > { %v1237_v4 = vadd.f32 %v1236_v63, %v16158_v14  ;;  %v1310_v5 = vadd.f32 %v1309_v0, %v16163_v16  ;;  %v1238_v6 = vpop.f32.mrb[3].mxu1  ;;  %v1311_v7 = vpop.f32.mrb[19].mxu0 }
 0x1de   : > { %v1239_v9 = vadd.f32 %v1238_v6, %v16167_v59  ;;  %v1312_v10 = vadd.f32 %v1311_v7, %v16172_v60 }
 0x1df   : > { %v16182_v33 = vpack.c.bf16 %v1237_v4, %v1233_v1  ;;  %v16184_v11 = vpack.c.bf16 %v1310_v5, %v1306_v3 }
 0x1e0   : > { %v16186_v12 = vpack.c.bf16 %v1239_v9, %v1235_v8  ;;  %v16188_v13 = vpack.c.bf16 %v1312_v10, %v1308_v32 }
 0x1e1   : > { %14472 = vmatprep.subr.msk.bf16.mxu0 %vm1429_vm1, %v16184_v11  ;;  %13664 = vmatprep.mubr.msk.bf16.mxu0 %vm1429_vm1, %v16182_v33  ;;  %v1443_v15 = vsel %vm1429_vm1, %v16184_v11, 0 }
 0x1e2   : > { %v1242_v17 = vpop.f32.mrb[4].mxu1  ;;  %v1315_v18 = vpop.f32.mrb[20].mxu0  ;;  %13657 = vmatpush3.bf16.xpose.msra.mxu0 %v1443_v15 }
 0x1e3   : > { %v1244_v19 = vpop.f32.mrb[5].mxu1  ;;  %v1317_v20 = vpop.f32.mrb[21].mxu0  ;;  %v1243_v23 = vadd.f32 %v1242_v17, %v16158_v14  ;;  %v1316_v54 = vadd.f32 %v1315_v18, %v16163_v16 }
 0x1e4   : > { %v1246_v21 = vpop.f32.mrb[6].mxu1  ;;  %v1319_v22 = vpop.f32.mrb[22].mxu0  ;;  %v1245_v34 = vadd.f32 %v1244_v19, %v16167_v59  ;;  %v1318_v35 = vadd.f32 %v1317_v20, %v16172_v60 }
 0x1e5   : > { %v1247_v24 = vadd.f32 %v1246_v21, %v16158_v14  ;;  %v1320_v25 = vadd.f32 %v1319_v22, %v16163_v16  ;;  %v1248_v26 = vpop.f32.mrb[7].mxu1  ;;  %v1321_v30 = vpop.f32.mrb[23].mxu0 }
 0x1e6   : > { %v1249_v36 = vadd.f32 %v1248_v26, %v16167_v59  ;;  %v1322_v37 = vadd.f32 %v1321_v30, %v16172_v60 }
 0x1e7   : > { %v16204_v38 = vpack.c.bf16 %v1247_v24, %v1243_v23  ;;  %v16206_v39 = vpack.c.bf16 %v1320_v25, %v1316_v54 }
 0x1e8   : > { %v16208_v40 = vpack.c.bf16 %v1249_v36, %v1245_v34  ;;  %v16210_v41 = vpack.c.bf16 %v1322_v37, %v1318_v35 }
 0x1e9   : > { %14473 = vmatprep.subr.msk.bf16.mxu0 %vm1429_vm1, %v16206_v39  ;;  %v1446_v42 = vsel %vm1429_vm1, %v16206_v39, 0 }
 0x1ea   : > { %v1252_v43 = vpop.f32.mrb[8].mxu1  ;;  %v1325_v44 = vpop.f32.mrb[24].mxu0  ;;  %13659 = vmatpush3.bf16.xpose.msra.mxu0 %v1446_v42 }
 0x1eb   : > { %v1254_v45 = vpop.f32.mrb[9].mxu1  ;;  %v1327_v47 = vpop.f32.mrb[25].mxu0  ;;  %v1253_v51 = vadd.f32 %v1252_v43, %v16158_v14  ;;  %v1326_v53 = vadd.f32 %v1325_v44, %v16163_v16 }
 0x1ec   : > { %v1256_v49 = vpop.f32.mrb[10].mxu1  ;;  %v1329_v50 = vpop.f32.mrb[26].mxu0  ;;  %v1255_v61 = vadd.f32 %v1254_v45, %v16167_v59  ;;  %v1328_v62 = vadd.f32 %v1327_v47, %v16172_v60 }
 0x1ed   : > { %v1257_v55 = vadd.f32 %v1256_v49, %v16158_v14  ;;  %v1330_v56 = vadd.f32 %v1329_v50, %v16163_v16  ;;  %v1258_v46 = vpop.f32.mrb[11].mxu1  ;;  %v1331_v48 = vpop.f32.mrb[27].mxu0 }
 0x1ee   : > { %v1259_v63 = vadd.f32 %v1258_v46, %v16167_v59  ;;  %v1332_v0 = vadd.f32 %v1331_v48, %v16172_v60 }
 0x1ef   : > { %v16224_v1 = vpack.c.bf16 %v1257_v55, %v1253_v51  ;;  %v16226_v3 = vpack.c.bf16 %v1330_v56, %v1326_v53 }
 0x1f0   : > { %v16228_v4 = vpack.c.bf16 %v1259_v63, %v1255_v61  ;;  %v16230_v5 = vpack.c.bf16 %v1332_v0, %v1328_v62 }
 0x1f1   : > { %14474 = vmatprep.subr.msk.bf16.mxu0 %vm1429_vm1, %v16226_v3  ;;  %v1449_v6 = vsel %vm1429_vm1, %v16226_v3, 0 }
 0x1f2   : > { %v1262_v7 = vpop.f32.mrb[12].mxu1  ;;  %v1335_v8 = vpop.f32.mrb[28].mxu0  ;;  %13661 = vmatpush3.bf16.xpose.msra.mxu0 %v1449_v6 }
 0x1f3   : > { %v1264_v32 = vpop.f32.mrb[13].mxu1  ;;  %v1337_v9 = vpop.f32.mrb[29].mxu0  ;;  %v1263_v17 = vadd.f32 %v1262_v7, %v16158_v14  ;;  %v1336_v18 = vadd.f32 %v1335_v8, %v16163_v16 }
 0x1f4   : > { %v1266_v10 = vpop.f32.mrb[14].mxu1  ;;  %v1339_v15 = vpop.f32.mrb[30].mxu0  ;;  %v1265_v23 = vadd.f32 %v1264_v32, %v16167_v59  ;;  %v1338_v54 = vadd.f32 %v1337_v9, %v16172_v60 }
 0x1f5   : > { %v1267_v19 = vadd.f32 %v1266_v10, %v16158_v14  ;;  %v1340_v20 = vadd.f32 %v1339_v15, %v16163_v16  ;;  %v1268_v21 = vpop.f32.mrb[15].mxu1  ;;  %v1341_v22 = vpop.f32.mrb[31].mxu0  ;;  %v20958_v16 = vsub.s32 4, %v15964_v28 }
 0x1f6   : > { %v1269_v24 = vadd.f32 %v1268_v21, %v16167_v59  ;;  %v1342_v25 = vadd.f32 %v1341_v22, %v16172_v60  ;;  %v20957_v59 = vsub.s32 5, %v15964_v28 }
 0x1f7   : > { %v16244_v26 = vpack.c.bf16 %v1267_v19, %v1263_v17  ;;  %v16246_v30 = vpack.c.bf16 %v1340_v20, %v1336_v18  ;;  %v707_v60 = vrot.slane %v16153_v58, %v20958_v16 }
 0x1f8   : > { %v16248_v34 = vpack.c.bf16 %v1269_v24, %v1265_v23  ;;  %v16250_v35 = vpack.c.bf16 %v1342_v25, %v1338_v54  ;;  %v711_v37 = vrot.slane %v16153_v58, %v20957_v59 }
 0x1f9   : > { %14475 = vmatprep.subr.msk.bf16.mxu0 %vm1429_vm1, %v16246_v30  ;;  %v1452_v14 = vsel %vm1429_vm1, %v16246_v30, 0 }
 0x1fa   : > { %13663 = vmatpush3.bf16.xpose.msra.mxu0 %v1452_v14 }
 0x201   : > { %13665 = vmatmul.mubr.msk.bf16.vlgmr.msra.gmra.mrb[32].mxu0 %vm1429_vm1, %v16204_v38 }
 0x202   : > { %13668 = vmatprep.mubr.msk.bf16.mxu0 %vm1429_vm1, %v16224_v1 }
 0x209   : > { %13669 = vmatmul.mubr.msk.bf16.gmra.mrb[36].mxu0 %vm1429_vm1, %v16244_v26 }
 0x21a   : > { %v1378_v36 = vpop.f32.mrb[16].mxu1 }
 0x21b   : > { %v1380_v42 = vpop.f32.mrb[17].mxu1  ;;  %v1379_v44 = vadd.f32 %v1378_v36, %v707_v60 }
 0x21c   : > { %v1382_v43 = vpop.f32.mrb[18].mxu1  ;;  %v1381_v49 = vadd.f32 %v1380_v42, %v711_v37 }
 0x21d   : > { %v1383_v45 = vadd.f32 %v1382_v43, %v707_v60  ;;  %v1384_v47 = vpop.f32.mrb[19].mxu1 }
 0x21e   : > { %v1385_v50 = vadd.f32 %v1384_v47, %v711_v37 }
 0x21f   : > { %v16270_v51 = vpack.c.bf16 %v1383_v45, %v1379_v44 }
 0x220   : > { %v16272_v53 = vpack.c.bf16 %v1385_v50, %v1381_v49 }
 0x221   : > { %13672 = vmatprep.subr.bf16.mxu0 %v16270_v51 }
 0x222   : > { %v1388_v55 = vpop.f32.mrb[20].mxu1  ;;  %13673 = vmatpush3.bf16.msra.mxu0 %v16270_v51 }
 0x223   : > { %v1390_v56 = vpop.f32.mrb[21].mxu1  ;;  %v1389_v58 = vadd.f32 %v1388_v55, %v707_v60 }
 0x224   : > { %v1391_v46 = vadd.f32 %v1390_v56, %v711_v37  ;;  %v1392_v48 = vpop.f32.mrb[22].mxu1 }
 0x225   : > { %v1393_v61 = vadd.f32 %v1392_v48, %v707_v60  ;;  %v1394_v62 = vpop.f32.mrb[23].mxu1 }
 0x226   : > { %v1395_v63 = vadd.f32 %v1394_v62, %v711_v37 }
 0x227   : > { %v16276_v0 = vpack.c.bf16 %v1393_v61, %v1389_v58 }
 0x228   : > { %v16278_v6 = vpack.c.bf16 %v1395_v63, %v1391_v46 }
 0x229   : > { %13674 = vmatprep.subr.bf16.mxu0 %v16276_v0 }
 0x22a   : > { %v1398_v7 = vpop.f32.mrb[24].mxu1  ;;  %13675 = vmatpush3.bf16.msra.mxu0 %v16276_v0 }
 0x22b   : > { %v1400_v8 = vpop.f32.mrb[25].mxu1  ;;  %v1399_v10 = vadd.f32 %v1398_v7, %v707_v60 }
 0x22c   : > { %v1401_v32 = vadd.f32 %v1400_v8, %v711_v37  ;;  %v1402_v9 = vpop.f32.mrb[26].mxu1 }
 0x22d   : > { %v1403_v15 = vadd.f32 %v1402_v9, %v707_v60  ;;  %v1404_v17 = vpop.f32.mrb[27].mxu1 }
 0x22e   : > { %v1405_v18 = vadd.f32 %v1404_v17, %v711_v37 }
 0x22f   : > { %v16282_v19 = vpack.c.bf16 %v1403_v15, %v1399_v10 }
 0x230   : > { %v16284_v20 = vpack.c.bf16 %v1405_v18, %v1401_v32 }
 0x231   : > { %13676 = vmatprep.subr.bf16.mxu0 %v16282_v19 }
 0x232   : > { %v1408_v21 = vpop.f32.mrb[28].mxu1  ;;  %13677 = vmatpush3.bf16.msra.mxu0 %v16282_v19 }
 0x233   : > { %v1410_v22 = vpop.f32.mrb[29].mxu1  ;;  %v1409_v24 = vadd.f32 %v1408_v21, %v707_v60 }
 0x234   : > { %v1411_v23 = vadd.f32 %v1410_v22, %v711_v37  ;;  %v1412_v54 = vpop.f32.mrb[30].mxu1 }
 0x235   : > { %v1413_v25 = vadd.f32 %v1412_v54, %v707_v60  ;;  %v1414_v14 = vpop.f32.mrb[31].mxu1 }
 0x236   : > { %v1415_v36 = vadd.f32 %v1414_v14, %v711_v37 }
 0x237   : > { %v16288_v42 = vpack.c.bf16 %v1413_v25, %v1409_v24 }
 0x238   : > { %v16290_v43 = vpack.c.bf16 %v1415_v36, %v1411_v23 }
 0x239   : > { %13678 = vmatprep.subr.bf16.mxu0 %v16288_v42 }
 0x23a   : > { %13679 = vmatpush3.bf16.msra.mxu0 %v16288_v42 }
 0x2d4   : > { %v13666_v44 = vpop.f32.mrb[32].mxu0 }
 0x2d5   : > { %v1521_v45 = vmul.f32 0.17677669, %v13666_v44  ;;  %v1488_v47 = vpop.f32.mrb[33].mxu0 }
 0x2d6   : > { %v1519_v49 = vmul.f32 0.17677669, %v1488_v47  ;;  %v13667_v50 = vpop.f32.mrb[34].mxu0 }
 0x2d7   : > { %v1522_v55 = vmul.f32 0.17677669, %v13667_v50  ;;  %v1491_v56 = vpop.f32.mrb[35].mxu0  ;;  %v1533_v46 = vsel %vm480_vm0, %v1521_v45, -inf }
 0x2d8   : > { %v1520_v60 = vmul.f32 0.17677669, %v1491_v56  ;;  %1534 = vmax.xlane.f32.xlu1 %v1533_v46  ;;  %v1527_v37 = vsel %vm480_vm0, %v1519_v49, -inf }
 0x2d9   : > { %1528 = vmax.xlane.f32.xlu0 %v1527_v37  ;;  %v1536_v48 = vsel %vm480_vm0, %v1522_v55, -inf }
 0x2da   : > { %v1530_v61 = vsel %vm480_vm0, %v1520_v60, -inf }
 0x2dc   : > { %1537 = vmax.xlane.f32.xlu1 %v1536_v48  ;;  %v13670_v58 = vpop.f32.mrb[36].mxu0 }
 0x2dd   : > { %1531 = vmax.xlane.f32.xlu0 %v1530_v61  ;;  %v1504_v62 = vpop.f32.mrb[37].mxu0  ;;  %v1525_v32 = vmul.f32 0.17677669, %v13670_v58 }
 0x2de   : > { %v1523_v63 = vmul.f32 0.17677669, %v1504_v62  ;;  %v13671_v7 = vpop.f32.mrb[38].mxu0 }
 0x2df   : > { %v1507_v8 = vpop.f32.mrb[39].mxu0  ;;  %v1526_v15 = vmul.f32 0.17677669, %v13671_v7  ;;  %v1545_v18 = vsel %vm480_vm0, %v1525_v32, -inf }
 0x2e0   : > { %v16298_v9 = vmul.f32 0.17677669, %v1507_v8  ;;  %v1539_v10 = vsel %vm480_vm0, %v1523_v63, -inf }
 0x2e1   : > { %1540 = vmax.xlane.f32.xlu0 %v1539_v10  ;;  %v1548_v21 = vsel %vm480_vm0, %v1526_v15, -inf }
 0x2e2   : > { %v1542_v17 = vsel %vm480_vm0, %v16298_v9, -inf }
 0x2e3   : > { %1543 = vmax.xlane.f32.xlu1 %v1542_v17 }
 0x2e5   : > { %1546 = vmax.xlane.f32.xlu0 %v1545_v18 }
 0x2e7   : > { %1549 = vmax.xlane.f32.xlu1 %v1548_v21 }
 0x365   : > { %v1535_v22 = vpop.xlane.xlu1 %1534 }
 0x366   : > { %v1553_v23 = vsub.f32 %v1521_v45, %v1535_v22  ;;  %v1529_v54 = vpop.xlane.xlu0 %1528 }
 0x367   : > { %v1551_v24 = vsub.f32 %v1519_v49, %v1529_v54 }
 0x368   : > { %v1563_v25 = vmul.f32 1.442695, %v1553_v23 }
 0x369   : > { %v1559_v14 = vmul.f32 1.442695, %v1551_v24  ;;  %v1538_v36 = vpop.xlane.xlu1 %1537 }
 0x36a   : > { %14802 = vpow2.f32 %v1563_v25  ;;  %v1554_v44 = vsub.f32 %v1522_v55, %v1538_v36  ;;  %v1532_v47 = vpop.xlane.xlu0 %1531 }
 0x36b   : > { %v1552_v50 = vsub.f32 %v1520_v60, %v1532_v47  ;;  %14804 = vpow2.f32 %v1559_v14 }
 0x36c   : > { %v1565_v56 = vmul.f32 1.442695, %v1554_v44 }
 0x36d   : > { %v1561_v46 = vmul.f32 1.442695, %v1552_v50 }
 0x36e   : > { %14806 = vpow2.f32 %v1565_v56  ;;  %v1541_v37 = vpop.xlane.xlu0 %1540 }
 0x36f   : > { %14808 = vpow2.f32 %v1561_v46  ;;  %v1555_v48 = vsub.f32 %v1523_v63, %v1541_v37 }
 0x370   : > { %v1544_v23 = vpop.xlane.xlu1 %1543 }
 0x371   : > { %v1567_v45 = vmul.f32 1.442695, %v1555_v48  ;;  %v1556_v25 = vsub.f32 %v16298_v9, %v1544_v23 }
 0x372   : > { %v1547_v58 = vpop.xlane.xlu0 %1546 }
 0x373   : > { %v1557_v61 = vsub.f32 %v1525_v32, %v1547_v58  ;;  %v1569_v36 = vmul.f32 1.442695, %v1556_v25 }
 0x374   : > { %v14803_v62 = vpop.eup %14802  ;;  %v1550_v54 = vpop.xlane.xlu1 %1549 }
 0x375   : > { %v1571_v7 = vmul.f32 1.442695, %v1557_v61  ;;  %v1581_v49 = vsel %vm480_vm0, %v14803_v62, 0.0  ;;  %v14805_v8 = vpop.eup %14804  ;;  %v1558_v24 = vsub.f32 %v1526_v15, %v1550_v54 }
 0x376   : > { %1582 = vadd.xlane.f32.xlu0 %v1581_v49  ;;  %v1575_v60 = vsel %vm480_vm0, %v14805_v8, 0.0 }
 0x377   : > { %14810 = vpow2.f32 %v1571_v7  ;;  %v1573_v14 = vmul.f32 1.442695, %v1558_v24 }
 0x378   : > { %v14807_v55 = vpop.eup %14806  ;;  %14812 = vpow2.f32 %v1567_v45 }
 0x379   : > { %v1584_v10 = vsel %vm480_vm0, %v14807_v55, 0.0  ;;  %v14809_v17 = vpop.eup %14808  ;;  %14814 = vpow2.f32 %v1573_v14 }
 0x37a   : > { %1576 = vadd.xlane.f32.xlu0 %v1575_v60  ;;  %1585 = vadd.xlane.f32.xlu1 %v1584_v10  ;;  %v1578_v63 = vsel %vm480_vm0, %v14809_v17, 0.0  ;;  %14816 = vpow2.f32 %v1569_v36 }
 0x37e   : > { %1579 = vadd.xlane.f32.xlu1 %v1578_v63 }
 0x381   : > { %v16309_v32 = vpop.eup %14810 }
 0x382   : > { %v1593_v18 = vsel %vm480_vm0, %v16309_v32, 0.0  ;;  %v16313_v21 = vpop.eup %14812 }
 0x383   : > { %1594 = vadd.xlane.f32.xlu0 %v1593_v18  ;;  %v1587_v22 = vsel %vm480_vm0, %v16313_v21, 0.0  ;;  %v14815_v44 = vpop.eup %14814 }
 0x384   : > { %v1596_v47 = vsel %vm480_vm0, %v14815_v44, 0.0  ;;  %v14817_v50 = vpop.eup %14816 }
 0x385   : > { %v1590_v56 = vsel %vm480_vm0, %v14817_v50, 0.0 }
 0x387   : > { %1588 = vadd.xlane.f32.xlu0 %v1587_v22 }
 0x38f   : > { %1722 = vrot.lane.b32.xlu1 %v16206_v39, %s20965_s29 }
 0x393   : > { %1724 = vrot.lane.b32.xlu1 %v16226_v3, %s20965_s29 }
 0x39d   : > { %1720 = vrot.lane.b32.xlu0 %v16184_v11, %s20965_s29 }
 0x3a1   : > { %1708 = vrot.lane.b32.xlu0 %v16182_v33, %s20965_s29 }
 0x3a5   : > { %1712 = vrot.lane.b32.xlu0 %v16224_v1, %s20965_s29 }
 0x3b7   : > { %1597 = vadd.xlane.f32.xlu1 %v1596_v47 }
 0x3bb   : > { %1591 = vadd.xlane.f32.xlu1 %v1590_v56 }
 0x3cc   : > { %1726 = vrot.lane.b32.xlu1 %v16246_v30, %s20965_s29 }
 0x3d0   : > { %1710 = vrot.lane.b32.xlu1 %v16204_v38, %s20965_s29 }
 0x3d4   : > { %1714 = vrot.lane.b32.xlu1 %v16244_v26, %s20965_s29 }
 0x403   : > { %v1583_v9 = vpop.xlane.xlu0 %1582 }
 0x407   : > { %v1577_v15 = vpop.xlane.xlu0 %1576  ;;  %v1586_v46 = vpop.xlane.xlu1 %1585 }
 0x408   : > { %14818 = vrcp.f32 %v1586_v46 }
 0x409   : > { %14820 = vrcp.f32 %v1577_v15 }
 0x40a   : > { %14822 = vrcp.f32 %v1583_v9 }
 0x40b   : > { %v1580_v37 = vpop.xlane.xlu1 %1579 }
 0x40c   : > { %14824 = vrcp.f32 %v1580_v37 }
 0x40f   : > { %v1723_v25 = vpop.permute.xlu1 %1722 }
 0x410   : > { %v1595_v48 = vpop.xlane.xlu0 %1594 }
 0x412   : > { %v14819_v58 = vpop.eup %14818 }
 0x413   : > { %v14821_v61 = vpop.eup %14820  ;;  %v1606_v60 = vmul.f32 %v14819_v58, %v14807_v55  ;;  %v1744_v55 = vsel %vm1429_vm1, %v1723_v25, 0 }
 0x414   : > { %v1589_v45 = vpop.xlane.xlu0 %1588  ;;  %v14823_v7 = vpop.eup %14822  ;;  %v1600_v10 = vmul.f32 %v14821_v61, %v14805_v8 }
 0x415   : > { %v1604_v18 = vmul.f32 %v14823_v7, %v14803_v62  ;;  %v1725_v8 = vpop.permute.xlu1 %1724 }
 0x416   : > { %v14825_v49 = vpop.eup %14824  ;;  %v1747_v62 = vsel %vm1429_vm1, %v1725_v8, 0 }
 0x417   : > { %v1602_v63 = vmul.f32 %v14825_v49, %v14809_v17  ;;  %v1616_v54 = vpack.c.bf16 %v1606_v60, %v1604_v18 }
 0x418   : > { %v1721_v22 = vpop.permute.xlu0 %1720 }
 0x419   : > { %14476 = vmatprep.subr.msk.bf16.mxu0 %vm1429_vm1, %v1721_v22  ;;  %v1615_v23 = vpack.c.bf16 %v1602_v63, %v1600_v10  ;;  %v1741_v24 = vsel %vm1429_vm1, %v1721_v22, 0 }
 0x41b   : > { %13680 = vmatprep.mubr.msk.bf16.mxu0 %vm480_vm0, %v1615_v23 }
 0x41c   : > { %13681 = vmatmul.mubr.msk.bf16.vlgmr.msra.gmra.mrb[40].mxu0 %vm480_vm0, %v1616_v54  ;;  %v1709_v49 = vpop.permute.xlu0 %1708 }
 0x41d   : > { %13689 = vmatpush3.bf16.xpose.msra.mxu0 %v1741_v24 }
 0x41e   : > { %14477 = vmatprep.subr.msk.bf16.mxu0 %vm1429_vm1, %v1723_v25 }
 0x420   : > { %v1713_v10 = vpop.permute.xlu0 %1712 }
 0x425   : > { %13691 = vmatpush3.bf16.xpose.msra.mxu0 %v1744_v55 }
 0x426   : > { %14478 = vmatprep.subr.msk.bf16.mxu0 %vm1429_vm1, %v1725_v8 }
 0x42d   : > { %13693 = vmatpush3.bf16.xpose.msra.mxu0 %v1747_v62 }
 0x444   : > { %v1598_v17 = vpop.xlane.xlu1 %1597 }
 0x445   : > { %14826 = vrcp.f32 %v1598_v17 }
 0x446   : > { %14828 = vrcp.f32 %v1589_v45 }
 0x447   : > { %14830 = vrcp.f32 %v1595_v48 }
 0x448   : > { %v1592_v14 = vpop.xlane.xlu1 %1591 }
 0x449   : > { %14832 = vrcp.f32 %v1592_v14 }
 0x44c   : > { %v1727_v36 = vpop.permute.xlu1 %1726 }
 0x44d   : > { %14479 = vmatprep.subr.msk.bf16.mxu0 %vm1429_vm1, %v1727_v36  ;;  %v1750_v47 = vsel %vm1429_vm1, %v1727_v36, 0 }
 0x44e   : > { %13695 = vmatpush3.bf16.xpose.msra.mxu0 %v1750_v47 }
 0x44f   : > { %v14827_v56 = vpop.eup %14826 }
 0x450   : > { %v14829_v9 = vpop.eup %14828  ;;  %v1614_v37 = vmul.f32 %v14827_v56, %v14815_v44  ;;  %v1711_v60 = vpop.permute.xlu1 %1710 }
 0x451   : > { %v14831_v15 = vpop.eup %14830  ;;  %v1608_v58 = vmul.f32 %v14829_v9, %v16313_v21 }
 0x452   : > { %v1612_v7 = vmul.f32 %v14831_v15, %v16309_v32 }
 0x453   : > { %v14833_v46 = vpop.eup %14832 }
 0x454   : > { %v1610_v61 = vmul.f32 %v14833_v46, %v14817_v50  ;;  %v1618_v48 = vpack.c.bf16 %v1614_v37, %v1612_v7  ;;  %v1715_v44 = vpop.permute.xlu1 %1714 }
 0x456   : > { %v1617_v45 = vpack.c.bf16 %v1610_v61, %v1608_v58 }
 0x458   : > { %13684 = vmatprep.mubr.msk.bf16.mxu0 %vm480_vm0, %v1617_v45 }
 0x459   : > { %13685 = vmatmul.mubr.msk.bf16.gmra.mrb[44].mxu0 %vm480_vm0, %v1618_v48 }
 0x45a   : > { %13696 = vmatprep.mubr.msk.bf16.mxu0 %vm1429_vm1, %v1709_v49 }
 0x461   : > { %13697 = vmatmul.mubr.msk.bf16.vlgmr.msra.gmra.mrb[48].mxu0 %vm1429_vm1, %v1711_v60 }
 0x462   : > { %13700 = vmatprep.mubr.msk.bf16.mxu0 %vm1429_vm1, %v1713_v10 }
 0x469   : > { %13701 = vmatmul.mubr.msk.bf16.gmra.mrb[52].mxu0 %vm1429_vm1, %v1715_v44 }
 0x46a   : > { %2082 = vmatprep.mubr.bf16.mxu0 %v20967_v2 }
 0x4ef   : > { %v16355_v32 = vpop.f32.mrb[40].mxu0 }
 0x4f0   : > { %v16357_v21 = vpop.f32.mrb[41].mxu0 }
 0x4f1   : > { %v16359_v50 = vpop.f32.mrb[42].mxu0 }
 0x4f2   : > { %v1701_v63 = vpack.c.bf16 %v16359_v50, %v16355_v32  ;;  %v16363_v18 = vpop.f32.mrb[43].mxu0 }
 0x4f3   : > { %v1700_v22 = vpack.c.bf16 %v16363_v18, %v16357_v21 }
 0x52c   : > { %v16367_v23 = vpop.f32.mrb[44].mxu0 }
 0x52d   : > { %v16369_v54 = vpop.f32.mrb[45].mxu0 }
 0x52e   : > { %v16371_v24 = vpop.f32.mrb[46].mxu0 }
 0x52f   : > { %v1703_v25 = vpack.c.bf16 %v16371_v24, %v16367_v23  ;;  %v16375_v55 = vpop.f32.mrb[47].mxu0 }
 0x530   : > { %v1702_v8 = vpack.c.bf16 %v16375_v55, %v16369_v54 }
 0x534   : > { %v13698_v62 = vpop.f32.mrb[48].mxu0 }
 0x535   : > { %v1819_v17 = vmul.f32 0.17677669, %v13698_v62  ;;  %v1786_v14 = vpop.f32.mrb[49].mxu0 }
 0x536   : > { %v13699_v36 = vpop.f32.mrb[50].mxu0  ;;  %v1817_v47 = vmul.f32 0.17677669, %v1786_v14 }
 0x537   : > { %v1789_v56 = vpop.f32.mrb[51].mxu0  ;;  %v1831_v9 = vsel %vm480_vm0, %v1819_v17, -inf  ;;  %v1820_v37 = vmul.f32 0.17677669, %v13699_v36 }
 0x538   : > { %v1818_v15 = vmul.f32 0.17677669, %v1789_v56  ;;  %1832 = vmax.xlane.f32.xlu0 %v1831_v9  ;;  %v1825_v58 = vsel %vm480_vm0, %v1817_v47, -inf }
 0x539   : > { %v1834_v60 = vsel %vm480_vm0, %v1820_v37, -inf }
 0x53a   : > { %v1828_v46 = vsel %vm480_vm0, %v1818_v15, -inf }
 0x53b   : > { %1829 = vmax.xlane.f32.xlu1 %v1828_v46 }
 0x53c   : > { %1826 = vmax.xlane.f32.xlu0 %v1825_v58  ;;  %v13702_v61 = vpop.f32.mrb[52].mxu0 }
 0x53d   : > { %v1802_v7 = vpop.f32.mrb[53].mxu0  ;;  %v1823_v48 = vmul.f32 0.17677669, %v13702_v61 }
 0x53e   : > { %v13703_v45 = vpop.f32.mrb[54].mxu0  ;;  %v1821_v10 = vmul.f32 0.17677669, %v1802_v7 }
 0x53f   : > { %v1805_v49 = vpop.f32.mrb[55].mxu0  ;;  %v1843_v44 = vsel %vm480_vm0, %v1823_v48, -inf  ;;  %v16391_v14 = vmul.f32 0.17677669, %v13703_v45 }
 0x540   : > { %1835 = vmax.xlane.f32.xlu0 %v1834_v60  ;;  %v1837_v62 = vsel %vm480_vm0, %v1821_v10, -inf  ;;  %v16393_v36 = vmul.f32 0.17677669, %v1805_v49 }
 0x541   : > { %v1846_v56 = vsel %vm480_vm0, %v16391_v14, -inf }
 0x542   : > { %v1840_v9 = vsel %vm480_vm0, %v16393_v36, -inf }
 0x544   : > { %1844 = vmax.xlane.f32.xlu0 %v1843_v44 }
 0x548   : > { %1838 = vmax.xlane.f32.xlu0 %v1837_v62 }
 0x54c   : > { %1923 = vrot.lane.b32.xlu1 %v16276_v0, %s20965_s29 }
 0x550   : > { %1925 = vrot.lane.b32.xlu1 %v16282_v19, %s20965_s29 }
 0x55e   : > { %1921 = vrot.lane.b32.xlu0 %v16270_v51, %s20965_s29 }
 0x574   : > { %1847 = vmax.xlane.f32.xlu1 %v1846_v56 }
 0x578   : > { %1841 = vmax.xlane.f32.xlu1 %v1840_v9 }
 0x589   : > { %1927 = vrot.lane.b32.xlu1 %v16288_v42, %s20965_s29 }
 0x5c5   : > { %v1833_v46 = vpop.xlane.xlu0 %1832 }
 0x5c6   : > { %v1851_v58 = vsub.f32 %v1819_v17, %v1833_v46 }
 0x5c8   : > { %v1861_v61 = vmul.f32 1.442695, %v1851_v58  ;;  %v1830_v7 = vpop.xlane.xlu1 %1829 }
 0x5c9   : > { %v1827_v60 = vpop.xlane.xlu0 %1826  ;;  %v1850_v49 = vsub.f32 %v1818_v15, %v1830_v7 }
 0x5ca   : > { %14834 = vpow2.f32 %v1861_v61  ;;  %v1849_v45 = vsub.f32 %v1817_v47, %v1827_v60 }
 0x5cb   : > { %v1859_v56 = vmul.f32 1.442695, %v1850_v49 }
 0x5cc   : > { %v1857_v44 = vmul.f32 1.442695, %v1849_v45 }
 0x5cd   : > { %v1836_v62 = vpop.xlane.xlu0 %1835 }
 0x5ce   : > { %14836 = vpow2.f32 %v1857_v44  ;;  %v1852_v27 = vsub.f32 %v1820_v37, %v1836_v62  ;;  %v1924_v37 = vpop.permute.xlu1 %1923 }
 0x5d0   : > { %v1863_v59 = vmul.f32 1.442695, %v1852_v27 }
 0x5d1   : > { %v1845_v16 = vpop.xlane.xlu0 %1844 }
 0x5d2   : > { %14838 = vpow2.f32 %v1863_v59  ;;  %v1855_v9 = vsub.f32 %v1823_v48, %v1845_v16 }
 0x5d3   : > { %14840 = vpow2.f32 %v1859_v56 }
 0x5d4   : > { %v16401_v52 = vpop.eup %14834  ;;  %v1869_v57 = vmul.f32 1.442695, %v1855_v9 }
 0x5d5   : > { %v1839_v17 = vpop.xlane.xlu0 %1838  ;;  %v1879_v46 = vsel %vm480_vm0, %v16401_v52, 0.0 }
 0x5d6   : > { %14842 = vpow2.f32 %v1869_v57  ;;  %v1853_v47 = vsub.f32 %v1821_v10, %v1839_v17  ;;  %1880 = vadd.xlane.f32.xlu0 %v1879_v46  ;;  %v1926_v57 = vpop.permute.xlu1 %1925 }
 0x5d8   : > { %v16405_v15 = vpop.eup %14836  ;;  %v1865_v58 = vmul.f32 1.442695, %v1853_v47 }
 0x5d9   : > { %v1922_v61 = vpop.permute.xlu0 %1921  ;;  %v1873_v27 = vsel %vm480_vm0, %v16405_v15, 0.0 }
 0x5da   : > { %14844 = vpow2.f32 %v1865_v58  ;;  %1874 = vadd.xlane.f32.xlu0 %v1873_v27  ;;  %13704 = vmatprep.subr.bf16.mxu1 %v1922_v61 }
 0x5db   : > { %13705 = vmatpush3.bf16.msra.mxu1 %v1922_v61 }
 0x5dc   : > { %v14839_v16 = vpop.eup %14838  ;;  %13706 = vmatprep.subr.bf16.mxu1 %v1924_v37 }
 0x5dd   : > { %v1882_v59 = vsel %vm480_vm0, %v14839_v16, 0.0  ;;  %v14841_v48 = vpop.eup %14840 }
 0x5de   : > { %1883 = vadd.xlane.f32.xlu1 %v1882_v59  ;;  %v1876_v60 = vsel %vm480_vm0, %v14841_v48, 0.0 }
 0x5df   : > { %13707 = vmatpush3.bf16.msra.mxu1 %v1924_v37 }
 0x5e0   : > { %v16410_v10 = vpop.eup %14842  ;;  %13708 = vmatprep.subr.bf16.mxu1 %v1926_v57 }
 0x5e1   : > { %v1891_v7 = vsel %vm480_vm0, %v16410_v10, 0.0 }
 0x5e2   : > { %1892 = vadd.xlane.f32.xlu0 %v1891_v7  ;;  %1877 = vadd.xlane.f32.xlu1 %v1876_v60 }
 0x5e3   : > { %13709 = vmatpush3.bf16.msra.mxu1 %v1926_v57 }
 0x5e4   : > { %v16415_v45 = vpop.eup %14844 }
 0x5e5   : > { %v1885_v49 = vsel %vm480_vm0, %v16415_v45, 0.0 }
 0x5e6   : > { %1886 = vadd.xlane.f32.xlu0 %v1885_v49 }
 0x5f3   : > { %2238 = vrot.lane.b32.xlu1 %v16206_v39, %s20961_s30 }
 0x5f7   : > { %2240 = vrot.lane.b32.xlu1 %v16226_v3, %s20961_s30 }
 0x601   : > { %v1848_v44 = vpop.xlane.xlu1 %1847 }
 0x602   : > { %v1856_v62 = vsub.f32 %v16391_v14, %v1848_v44  ;;  %v2010_v14 = vld [vmem:[%s20947_s3 + $0x98] sm:$0xff] }
 0x604   : > { %v1871_v56 = vmul.f32 1.442695, %v1856_v62 }
 0x605   : > { %v1842_v9 = vpop.xlane.xlu1 %1841 }
 0x606   : > { %14846 = vpow2.f32 %v1871_v56  ;;  %v1854_v17 = vsub.f32 %v16393_v36, %v1842_v9  ;;  %v2011_v36 = vld [vmem:[%s20947_s3 + $0xb8] sm:$0xff] }
 0x607   : > { %v12739_v59 = vcombine.low %v2010_v14, %v2011_v36  ;;  %v12740_v57 = vcombine.high %v2010_v14, %v2011_v36 }
 0x608   : > { %v1867_v46 = vmul.f32 1.442695, %v1854_v17 }
 0x609   : > { %v1928_v47 = vpop.permute.xlu1 %1927  ;;  %2050 = vmatprep.subr.bf16.mxu0 %v12740_v57 }
 0x60a   : > { %13710 = vmatprep.subr.bf16.mxu1 %v1928_v47  ;;  %14848 = vpow2.f32 %v1867_v46  ;;  %2051 = vmatpush1.bf16.msra.mxu0 %v12739_v59 }
 0x60b   : > { %13711 = vmatpush3.bf16.msra.mxu1 %v1928_v47 }
 0x610   : > { %v14847_v58 = vpop.eup %14846 }
 0x611   : > { %v1894_v37 = vsel %vm480_vm0, %v14847_v58, 0.0 }
 0x612   : > { %1895 = vadd.xlane.f32.xlu0 %v1894_v37 }
 0x614   : > { %v14849_v61 = vpop.eup %14848 }
 0x615   : > { %v1888_v27 = vsel %vm480_vm0, %v14849_v61, 0.0 }
 0x61b   : > { %1889 = vadd.xlane.f32.xlu1 %v1888_v27 }
 0x628   : > { %2236 = vrot.lane.b32.xlu0 %v16184_v11, %s20961_s30 }
 0x62c   : > { %2228 = vrot.lane.b32.xlu0 %v16182_v33, %s20961_s30  ;;  %2242 = vrot.lane.b32.xlu1 %v16246_v30, %s20961_s30 }
 0x630   : > { %2232 = vrot.lane.b32.xlu0 %v16224_v1, %s20961_s30  ;;  %2230 = vrot.lane.b32.xlu1 %v16204_v38, %s20961_s30 }
 0x634   : > { %2234 = vrot.lane.b32.xlu1 %v16244_v26, %s20961_s30 }
 0x663   : > { %v1881_v7 = vpop.xlane.xlu0 %1880 }
 0x667   : > { %v1875_v49 = vpop.xlane.xlu0 %1874 }
 0x66b   : > { %v1884_v60 = vpop.xlane.xlu1 %1883 }
 0x66c   : > { %14850 = vrcp.f32 %v1884_v60 }
 0x66d   : > { %14852 = vrcp.f32 %v1875_v49 }
 0x66e   : > { %14854 = vrcp.f32 %v1881_v7 }
 0x66f   : > { %v1878_v44 = vpop.xlane.xlu1 %1877  ;;  %v1893_v59 = vpop.xlane.xlu0 %1892 }
 0x670   : > { %14856 = vrcp.f32 %v1878_v44 }
 0x673   : > { %v1887_v57 = vpop.xlane.xlu0 %1886  ;;  %v2239_v7 = vpop.permute.xlu1 %2238 }
 0x676   : > { %v14851_v62 = vpop.eup %14850 }
 0x677   : > { %v14853_v56 = vpop.eup %14852  ;;  %v1904_v46 = vmul.f32 %v14851_v62, %v14839_v16  ;;  %v2241_v44 = vpop.permute.xlu1 %2240 }
 0x678   : > { %v14855_v9 = vpop.eup %14854  ;;  %v1898_v47 = vmul.f32 %v14853_v56, %v16405_v15  ;;  %v2260_v15 = vsel %vm1429_vm1, %v2239_v7, 0 }
 0x679   : > { %v1902_v27 = vmul.f32 %v14855_v9, %v16401_v52 }
 0x67a   : > { %v14857_v17 = vpop.eup %14856 }
 0x67b   : > { %v1900_v37 = vmul.f32 %v14857_v17, %v14841_v48  ;;  %v1914_v36 = vpack.c.bf16 %v1904_v46, %v1902_v27  ;;  %v2263_v46 = vsel %vm1429_vm1, %v2241_v44, 0 }
 0x67d   : > { %v1913_v14 = vpack.c.bf16 %v1900_v37, %v1898_v47 }
 0x67f   : > { %13712 = vmatprep.mubr.msk.bf16.mxu1 %vm480_vm0, %v1913_v14 }
 0x680   : > { %13713 = vmatmul.mubr.msk.bf16.vlgmr.msra.gmra.mrb[32].mxu1 %vm480_vm0, %v1914_v36 }
 0x69f   : > { %v1896_v60 = vpop.xlane.xlu0 %1895 }
 0x6a0   : > { %14858 = vrcp.f32 %v1896_v60  ;;  %v2013_v60 = vld [vmem:[%s20947_s3 + $0xf8] sm:$0xff] }
 0x6a1   : > { %14860 = vrcp.f32 %v1887_v57 }
 0x6a2   : > { %14862 = vrcp.f32 %v1893_v59 }
 0x6a3   : > { %v2237_v49 = vpop.permute.xlu0 %2236 }
 0x6a4   : > { %14480 = vmatprep.subr.msk.bf16.mxu1 %vm1429_vm1, %v2237_v49  ;;  %v2257_v16 = vsel %vm1429_vm1, %v2237_v49, 0 }
 0x6a5   : > { %13721 = vmatpush3.bf16.xpose.msra.mxu1 %v2257_v16  ;;  %v1696_v16 = vld [vmem:[%s20947_s3 + $0x18] sm:$0xff] }
 0x6a6   : > { %14481 = vmatprep.subr.msk.bf16.mxu1 %vm1429_vm1, %v2239_v7  ;;  %v2012_v7 = vld [vmem:[%s20947_s3 + $0xd8] sm:$0xff] }
 0x6a7   : > { %v2229_v57 = vpop.permute.xlu0 %2228  ;;  %v12742_v49 = vcombine.high %v2012_v7, %v2013_v60 }
 0x6a8   : > { %v1890_v52 = vpop.xlane.xlu1 %1889 }
 0x6a9   : > { %14864 = vrcp.f32 %v1890_v52  ;;  %2052 = vmatprep.subr.bf16.mxu0 %v12742_v49  ;;  %v1697_v52 = vld [vmem:[%s20947_s3 + $0x38] sm:$0xff] }
 0x6aa   : > { %v14859_v48 = vpop.eup %14858 }
 0x6ab   : > { %v14861_v62 = vpop.eup %14860  ;;  %v1912_v17 = vmul.f32 %v14859_v48, %v14847_v58  ;;  %v12747_v48 = vcombine.low %v1696_v16, %v1697_v52 }
 0x6ac   : > { %v14863_v56 = vpop.eup %14862  ;;  %v1906_v47 = vmul.f32 %v14861_v62, %v16415_v45  ;;  %v2243_v27 = vpop.permute.xlu1 %2242 }
 0x6ad   : > { %13723 = vmatpush3.bf16.xpose.msra.mxu1 %v2260_v15  ;;  %v1910_v14 = vmul.f32 %v14863_v56, %v16410_v10  ;;  %v2266_v58 = vsel %vm1429_vm1, %v2243_v27, 0  ;;  %v12748_v15 = vcombine.high %v1696_v16, %v1697_v52 }
 0x6ae   : > { %14482 = vmatprep.subr.msk.bf16.mxu1 %vm1429_vm1, %v2241_v44  ;;  %v12741_v44 = vcombine.low %v2012_v7, %v2013_v60 }
 0x6af   : > { %v1916_v59 = vpack.c.bf16 %v1912_v17, %v1910_v14  ;;  %v1699_v17 = vld [vmem:[%s20947_s3 + $0x78] sm:$0xff] }
 0x6b0   : > { %v2231_v45 = vpop.permute.xlu1 %2230  ;;  %2053 = vmatpush1.bf16.msra.mxu0 %v12741_v44 }
 0x6b1   : > { %2155 = vmatprep.subr.bf16.mxu0 %v12748_v15 }
 0x6b3   : > { %v14865_v9 = vpop.eup %14864 }
 0x6b4   : > { %v1908_v37 = vmul.f32 %v14865_v9, %v14849_v61  ;;  %v2233_v61 = vpop.permute.xlu0 %2232  ;;  %v2235_v10 = vpop.permute.xlu1 %2234  ;;  %v1698_v9 = vld [vmem:[%s20947_s3 + $0x58] sm:$0xff] }
 0x6b5   : > { %13725 = vmatpush3.bf16.xpose.msra.mxu1 %v2263_v46  ;;  %v12750_v14 = vcombine.high %v1698_v9, %v1699_v17 }
 0x6b6   : > { %14483 = vmatprep.subr.msk.bf16.mxu1 %vm1429_vm1, %v2243_v27  ;;  %v1915_v36 = vpack.c.bf16 %v1908_v37, %v1906_v47 }
 0x6b8   : > { %13716 = vmatprep.mubr.msk.bf16.mxu1 %vm480_vm0, %v1915_v36  ;;  %v12749_v36 = vcombine.low %v1698_v9, %v1699_v17 }
 0x6b9   : > { %13717 = vmatmul.mubr.msk.bf16.gmra.mrb[36].mxu1 %vm480_vm0, %v1916_v59 }
 0x6ba   : > { %13728 = vmatprep.mubr.msk.bf16.mxu1 %vm1429_vm1, %v2229_v57 }
 0x6bd   : > { %13727 = vmatpush3.bf16.xpose.msra.mxu1 %v2266_v58 }
 0x6c4   : > { %13729 = vmatmul.mubr.msk.bf16.vlgmr.msra.gmra.mrb[40].mxu1 %vm1429_vm1, %v2231_v45 }
 0x6c5   : > { %13732 = vmatprep.mubr.msk.bf16.mxu1 %vm1429_vm1, %v2233_v61 }
 0x6cc   : > { %13733 = vmatmul.mubr.msk.bf16.gmra.mrb[44].mxu1 %vm1429_vm1, %v2235_v10 }
 0x753   : > { %v13714_v62 = vpop.f32.mrb[32].mxu1 }
 0x754   : > { %v1979_v56 = vpop.f32.mrb[33].mxu1 }
 0x755   : > { %v13715_v46 = vpop.f32.mrb[34].mxu1 }
 0x756   : > { %v2015_v47 = vpack.c.bf16 %v13715_v46, %v13714_v62  ;;  %v1982_v37 = vpop.f32.mrb[35].mxu1 }
 0x757   : > { %v2014_v27 = vpack.c.bf16 %v1982_v37, %v1979_v56 }
 0x759   : > { %12743 = vmatmul.mubr.msk.bf16.vlgmr.msra.gmra.mrb[56].mxu0 %vm1429_vm1, %v2014_v27 }
 0x75a   : > { %2092 = vmatprep.mubr.bf16.mxu0 %v20967_v2  ;;  %2156 = vmatpush1.bf16.msra.mxu0 %v12747_v48 }
 0x75b   : > { %2157 = vmatprep.subr.bf16.mxu0 %v12750_v14 }
 0x75e   : > { %2158 = vmatpush1.bf16.msra.mxu0 %v12749_v36 }
 0x761   : > { %12744 = vmatmul.mubr.msk.bf16.gmra.mrb[60].mxu0 %vm1429_vm1, %v2015_v47 }
 0x762   : > { %2102 = vmatprep.mubr.bf16.mxu0 %v20967_v2 }
 0x78c   : > { %v13718_v59 = vpop.f32.mrb[36].mxu1 }
 0x78d   : > { %v1995_v57 = vpop.f32.mrb[37].mxu1 }
 0x78e   : > { %v13719_v58 = vpop.f32.mrb[38].mxu1 }
 0x78f   : > { %v2017_v45 = vpack.c.bf16 %v13719_v58, %v13718_v59  ;;  %v1998_v61 = vpop.f32.mrb[39].mxu1 }
 0x790   : > { %v2016_v10 = vpack.c.bf16 %v1998_v61, %v1995_v57 }
 0x792   : > { %12745 = vmatmul.mubr.msk.bf16.gmra.mrb[64].mxu0 %vm1429_vm1, %v2016_v10 }
 0x793   : > { %2112 = vmatprep.mubr.bf16.mxu0 %v20967_v2 }
 0x797   : > { %v13730_v7 = vpop.f32.mrb[40].mxu1 }
 0x798   : > { %v2335_v60 = vmul.f32 0.17677669, %v13730_v7  ;;  %v2302_v49 = vpop.f32.mrb[41].mxu1 }
 0x799   : > { %v13731_v44 = vpop.f32.mrb[42].mxu1  ;;  %v2333_v16 = vmul.f32 0.17677669, %v2302_v49 }
 0x79a   : > { %12746 = vmatmul.mubr.msk.bf16.gmra.mrb[68].mxu0 %vm1429_vm1, %v2017_v45  ;;  %v2305_v52 = vpop.f32.mrb[43].mxu1  ;;  %v2347_v15 = vsel %vm480_vm0, %v2335_v60, -inf  ;;  %v2336_v56 = vmul.f32 0.17677669, %v13731_v44 }
 0x79b   : > { %v2334_v48 = vmul.f32 0.17677669, %v2305_v52  ;;  %2348 = vmax.xlane.f32.xlu0 %v2347_v15  ;;  %2187 = vmatprep.mubr.bf16.mxu0 %v20967_v2  ;;  %v2341_v9 = vsel %vm480_vm0, %v2333_v16, -inf }
 0x79c   : > { %v2350_v14 = vsel %vm480_vm0, %v2336_v56, -inf }
 0x79d   : > { %v2344_v62 = vsel %vm480_vm0, %v2334_v48, -inf }
 0x79e   : > { %2345 = vmax.xlane.f32.xlu1 %v2344_v62 }
 0x79f   : > { %2342 = vmax.xlane.f32.xlu0 %v2341_v9  ;;  %v13734_v17 = vpop.f32.mrb[44].mxu1 }
 0x7a0   : > { %v2318_v46 = vpop.f32.mrb[45].mxu1  ;;  %v2339_v37 = vmul.f32 0.17677669, %v13734_v17 }
 0x7a1   : > { %v13735_v47 = vpop.f32.mrb[46].mxu1  ;;  %v2337_v36 = vmul.f32 0.17677669, %v2318_v46 }
 0x7a2   : > { %12751 = vmatmul.mubr.msk.bf16.vlgmr.msra.gmra.mrb[56].mxu0 %vm1429_vm1, %v1700_v22  ;;  %v2321_v27 = vpop.f32.mrb[47].mxu1  ;;  %v2359_v59 = vsel %vm480_vm0, %v2339_v37, -inf  ;;  %v16523_v32 = vmul.f32 0.17677669, %v13735_v47 }
 0x7a3   : > { %2351 = vmax.xlane.f32.xlu0 %v2350_v14  ;;  %2197 = vmatprep.mubr.bf16.mxu0 %v20967_v2  ;;  %v2353_v57 = vsel %vm480_vm0, %v2337_v36, -inf  ;;  %v16525_v21 = vmul.f32 0.17677669, %v2321_v27 }
 0x7a4   : > { %v2362_v50 = vsel %vm480_vm0, %v16523_v32, -inf }
 0x7a7   : > { %2360 = vmax.xlane.f32.xlu0 %v2359_v59 }
 0x7aa   : > { %12752 = vmatmul.mubr.msk.bf16.gmra.mrb[60].mxu0 %vm1429_vm1, %v1701_v63  ;;  %v2356_v63 = vsel %vm480_vm0, %v16525_v21, -inf }
 0x7ab   : > { %2354 = vmax.xlane.f32.xlu0 %v2353_v57  ;;  %2207 = vmatprep.mubr.bf16.mxu0 %v20967_v2 }
 0x7af   : > { %2435 = vrot.lane.b32.xlu1 %v16276_v0, %s20961_s30 }
 0x7b2   : > { %12753 = vmatmul.mubr.msk.bf16.gmra.mrb[64].mxu0 %vm1429_vm1, %v1702_v8 }
 0x7b3   : > { %2437 = vrot.lane.b32.xlu1 %v16282_v19, %s20961_s30  ;;  %2217 = vmatprep.mubr.bf16.mxu0 %v20967_v2 }
 0x7ba   : > { %12754 = vmatmul.mubr.msk.bf16.gmra.mrb[68].mxu0 %vm1429_vm1, %v1703_v25 }
 0x7bb   : > { %2594 = vmatprep.mubr.bf16.mxu0 %v20967_v2 }
 0x7c1   : > { %2433 = vrot.lane.b32.xlu0 %v16270_v51, %s20961_s30 }
 0x7d7   : > { %2363 = vmax.xlane.f32.xlu1 %v2362_v50 }
 0x7db   : > { %2357 = vmax.xlane.f32.xlu1 %v2356_v63 }
 0x7ec   : > { %2439 = vrot.lane.b32.xlu1 %v16288_v42, %s20961_s30  ;;  %s20992_s30 = smov 64  }
 0x828   : > { %v2349_v18 = vpop.xlane.xlu0 %2348 }
 0x829   : > { %v2367_v22 = vsub.f32 %v2335_v60, %v2349_v18 }
 0x82b   : > { %v2377_v23 = vmul.f32 1.442695, %v2367_v22  ;;  %v2346_v54 = vpop.xlane.xlu1 %2345 }
 0x82c   : > { %v2343_v24 = vpop.xlane.xlu0 %2342  ;;  %v2366_v55 = vsub.f32 %v2334_v48, %v2346_v54 }
 0x82d   : > { %14866 = vpow2.f32 %v2377_v23  ;;  %v2365_v25 = vsub.f32 %v2333_v16, %v2343_v24 }
 0x82e   : > { %v2375_v61 = vmul.f32 1.442695, %v2366_v55 }
 0x82f   : > { %v2373_v8 = vmul.f32 1.442695, %v2365_v25 }
 0x830   : > { %v2352_v58 = vpop.xlane.xlu0 %2351 }
 0x831   : > { %14868 = vpow2.f32 %v2373_v8  ;;  %v2368_v45 = vsub.f32 %v2336_v56, %v2352_v58  ;;  %v2436_v56 = vpop.permute.xlu1 %2435 }
 0x833   : > { %v2379_v10 = vmul.f32 1.442695, %v2368_v45 }
 0x834   : > { %v2361_v7 = vpop.xlane.xlu0 %2360 }
 0x835   : > { %14870 = vpow2.f32 %v2379_v10  ;;  %v2371_v49 = vsub.f32 %v2339_v37, %v2361_v7  ;;  %v2438_v27 = vpop.permute.xlu1 %2437 }
 0x836   : > { %14872 = vpow2.f32 %v2375_v61 }
 0x837   : > { %v16533_v44 = vpop.eup %14866  ;;  %v2385_v52 = vmul.f32 1.442695, %v2371_v49 }
 0x838   : > { %v2355_v60 = vpop.xlane.xlu0 %2354  ;;  %v2395_v15 = vsel %vm480_vm0, %v16533_v44, 0.0 }
 0x839   : > { %14874 = vpow2.f32 %v2385_v52  ;;  %v2369_v16 = vsub.f32 %v2337_v36, %v2355_v60  ;;  %2396 = vadd.xlane.f32.xlu0 %v2395_v15 }
 0x83b   : > { %v16537_v48 = vpop.eup %14868  ;;  %v2381_v62 = vmul.f32 1.442695, %v2369_v16 }
 0x83c   : > { %v2434_v9 = vpop.permute.xlu0 %2433  ;;  %v2389_v17 = vsel %vm480_vm0, %v16537_v48, 0.0 }
 0x83d   : > { %14876 = vpow2.f32 %v2381_v62  ;;  %2390 = vadd.xlane.f32.xlu0 %v2389_v17  ;;  %13736 = vmatprep.subr.bf16.mxu1 %v2434_v9 }
 0x83e   : > { %13737 = vmatpush3.bf16.msra.mxu1 %v2434_v9 }
 0x83f   : > { %v14871_v46 = vpop.eup %14870  ;;  %13738 = vmatprep.subr.bf16.mxu1 %v2436_v56 }
 0x840   : > { %v2398_v47 = vsel %vm480_vm0, %v14871_v46, 0.0  ;;  %v14873_v37 = vpop.eup %14872 }
 0x841   : > { %2399 = vadd.xlane.f32.xlu1 %v2398_v47  ;;  %v2392_v59 = vsel %vm480_vm0, %v14873_v37, 0.0 }
 0x842   : > { %13739 = vmatpush3.bf16.msra.mxu1 %v2436_v56 }
 0x843   : > { %v16542_v14 = vpop.eup %14874  ;;  %13740 = vmatprep.subr.bf16.mxu1 %v2438_v27 }
 0x844   : > { %v2407_v36 = vsel %vm480_vm0, %v16542_v14, 0.0 }
 0x845   : > { %2408 = vadd.xlane.f32.xlu0 %v2407_v36  ;;  %2393 = vadd.xlane.f32.xlu1 %v2392_v59 }
 0x846   : > { %13741 = vmatpush3.bf16.msra.mxu1 %v2438_v27 }
 0x847   : > { %v16547_v57 = vpop.eup %14876 }
 0x848   : > { %v2401_v50 = vsel %vm480_vm0, %v16547_v57, 0.0 }
 0x849   : > { %2402 = vadd.xlane.f32.xlu0 %v2401_v50 }
 0x856   : > { %2661 = vrot.lane.b32.xlu1 %v16206_v39, %s20963_s12 }
 0x85a   : > { %2663 = vrot.lane.b32.xlu1 %v16226_v3, %s20963_s12 }
 0x864   : > { %v2364_v63 = vpop.xlane.xlu1 %2363 }
 0x865   : > { %v2372_v18 = vsub.f32 %v16523_v32, %v2364_v63  ;;  %v2522_v32 = vld [vmem:[%s20947_s3 + $0x118] sm:$0xff] }
 0x867   : > { %v2387_v22 = vmul.f32 1.442695, %v2372_v18 }
 0x868   : > { %v2358_v23 = vpop.xlane.xlu1 %2357 }
 0x869   : > { %14878 = vpow2.f32 %v2387_v22  ;;  %v2370_v54 = vsub.f32 %v16525_v21, %v2358_v23 }
 0x86b   : > { %v2383_v24 = vmul.f32 1.442695, %v2370_v54 }
 0x86c   : > { %v2440_v25 = vpop.permute.xlu1 %2439 }
 0x86d   : > { %13742 = vmatprep.subr.bf16.mxu1 %v2440_v25  ;;  %14880 = vpow2.f32 %v2383_v24 }
 0x86e   : > { %13743 = vmatpush3.bf16.msra.mxu1 %v2440_v25 }
 0x873   : > { %v14879_v55 = vpop.eup %14878 }
 0x874   : > { %v2410_v8 = vsel %vm480_vm0, %v14879_v55, 0.0 }
 0x875   : > { %2411 = vadd.xlane.f32.xlu0 %v2410_v8 }
 0x877   : > { %v14881_v39 = vpop.eup %14880 }
 0x878   : > { %v2404_v3 = vsel %vm480_vm0, %v14881_v39, 0.0 }
 0x87e   : > { %2405 = vadd.xlane.f32.xlu1 %v2404_v3 }
 0x88b   : > { %2659 = vrot.lane.b32.xlu0 %v16184_v11, %s20963_s12 }
 0x88f   : > { %2651 = vrot.lane.b32.xlu0 %v16182_v33, %s20963_s12  ;;  %2665 = vrot.lane.b32.xlu1 %v16246_v30, %s20963_s12  ;;  %v2523_v33 = vld [vmem:[%s20947_s3 + $0x138] sm:$0xff] }
 0x890   : > { %v12763_v11 = vcombine.low %v2522_v32, %v2523_v33  ;;  %v12764_v21 = vcombine.high %v2522_v32, %v2523_v33  ;;  %v2524_v32 = vld [vmem:[%s20947_s3 + $0x158] sm:$0xff] }
 0x891   : > { %v2525_v33 = vld [vmem:[%s20947_s3 + $0x178] sm:$0xff] }
 0x892   : > { %2562 = vmatprep.subr.bf16.mxu0 %v12764_v21  ;;  %v12765_v21 = vcombine.low %v2524_v32, %v2525_v33 }
 0x893   : > { %2655 = vrot.lane.b32.xlu0 %v16224_v1, %s20963_s12  ;;  %2653 = vrot.lane.b32.xlu1 %v16204_v38, %s20963_s12 }
 0x894   : > { %2563 = vmatpush1.bf16.msra.mxu0 %v12763_v11  ;;  %v12766_v11 = vcombine.high %v2524_v32, %v2525_v33 }
 0x896   : > { %2564 = vmatprep.subr.bf16.mxu0 %v12766_v11 }
 0x897   : > { %2657 = vrot.lane.b32.xlu1 %v16244_v26, %s20963_s12 }
 0x898   : > { %2565 = vmatpush1.bf16.msra.mxu0 %v12765_v21 }
 0x8c6   : > { %v2397_v30 = vpop.xlane.xlu0 %2396 }
 0x8ca   : > { %v2391_v58 = vpop.xlane.xlu0 %2390 }
 0x8ce   : > { %v2400_v1 = vpop.xlane.xlu1 %2399 }
 0x8cf   : > { %14882 = vrcp.f32 %v2400_v1  ;;  %v2946_v1 = vld [vmem:[%s20947_s3 + $0x1b8] sm:$0xff] }
 0x8d0   : > { %14884 = vrcp.f32 %v2391_v58 }
 0x8d1   : > { %14886 = vrcp.f32 %v2397_v30  ;;  %v2945_v30 = vld [vmem:[%s20947_s3 + $0x198] sm:$0xff] }
 0x8d2   : > { %v2394_v38 = vpop.xlane.xlu1 %2393  ;;  %v2409_v62 = vpop.xlane.xlu0 %2408  ;;  %v12780_v58 = vcombine.high %v2945_v30, %v2946_v1 }
 0x8d3   : > { %14888 = vrcp.f32 %v2394_v38  ;;  %v12779_v38 = vcombine.low %v2945_v30, %v2946_v1 }
 0x8d4   : > { %2985 = vmatprep.subr.bf16.mxu0 %v12780_v58 }
 0x8d6   : > { %v2403_v56 = vpop.xlane.xlu0 %2402  ;;  %v2662_v9 = vpop.permute.xlu1 %2661 }
 0x8d9   : > { %v14883_v26 = vpop.eup %14882 }
 0x8da   : > { %v14885_v45 = vpop.eup %14884  ;;  %v2420_v7 = vmul.f32 %v14883_v26, %v14871_v46  ;;  %v2664_v27 = vpop.permute.xlu1 %2663 }
 0x8db   : > { %v14887_v61 = vpop.eup %14886  ;;  %v2414_v49 = vmul.f32 %v14885_v45, %v16537_v48  ;;  %v2683_v48 = vsel %vm1429_vm1, %v2662_v9, 0  ;;  %v2686_v18 = vsel %vm1429_vm1, %v2664_v27, 0 }
 0x8dc   : > { %v2418_v60 = vmul.f32 %v14887_v61, %v16533_v44  ;;  %v2947_v61 = vld [vmem:[%s20947_s3 + $0x1d8] sm:$0xff] }
 0x8dd   : > { %v14889_v10 = vpop.eup %14888 }
 0x8de   : > { %v2416_v52 = vmul.f32 %v14889_v10, %v14873_v37  ;;  %v2430_v16 = vpack.c.bf16 %v2420_v7, %v2418_v60  ;;  %v2948_v10 = vld [vmem:[%s20947_s3 + $0x1f8] sm:$0xff] }
 0x8e0   : > { %v2429_v15 = vpack.c.bf16 %v2416_v52, %v2414_v49 }
 0x8e2   : > { %13744 = vmatprep.mubr.msk.bf16.mxu1 %vm480_vm0, %v2429_v15  ;;  %v12782_v15 = vcombine.high %v2947_v61, %v2948_v10 }
 0x8e3   : > { %13745 = vmatmul.mubr.msk.bf16.vlgmr.msra.gmra.mrb[48].mxu1 %vm480_vm0, %v2430_v16  ;;  %v12781_v16 = vcombine.low %v2947_v61, %v2948_v10 }
 0x902   : > { %v2412_v17 = vpop.xlane.xlu0 %2411 }
 0x903   : > { %14890 = vrcp.f32 %v2412_v17 }
 0x904   : > { %14892 = vrcp.f32 %v2403_v56 }
 0x905   : > { %14894 = vrcp.f32 %v2409_v62 }
 0x906   : > { %v2660_v47 = vpop.permute.xlu0 %2659 }
 0x907   : > { %14484 = vmatprep.subr.msk.bf16.mxu1 %vm1429_vm1, %v2660_v47  ;;  %v2680_v46 = vsel %vm1429_vm1, %v2660_v47, 0 }
 0x908   : > { %13753 = vmatpush3.bf16.xpose.msra.mxu1 %v2680_v46 }
 0x909   : > { %14485 = vmatprep.subr.msk.bf16.mxu1 %vm1429_vm1, %v2662_v9 }
 0x90a   : > { %v2652_v3 = vpop.permute.xlu0 %2651 }
 0x90b   : > { %v2406_v44 = vpop.xlane.xlu1 %2405 }
 0x90c   : > { %14896 = vrcp.f32 %v2406_v44 }
 0x90d   : > { %v14891_v37 = vpop.eup %14890 }
 0x90e   : > { %v14893_v36 = vpop.eup %14892  ;;  %v2428_v63 = vmul.f32 %v14891_v37, %v14879_v55 }
 0x90f   : > { %v14895_v59 = vpop.eup %14894  ;;  %v2422_v22 = vmul.f32 %v14893_v36, %v16547_v57  ;;  %v2666_v54 = vpop.permute.xlu1 %2665 }
 0x910   : > { %13755 = vmatpush3.bf16.xpose.msra.mxu1 %v2683_v48  ;;  %v2426_v24 = vmul.f32 %v14895_v59, %v16542_v14  ;;  %v2689_v55 = vsel %vm1429_vm1, %v2666_v54, 0 }
 0x911   : > { %14486 = vmatprep.subr.msk.bf16.mxu1 %vm1429_vm1, %v2664_v27 }
 0x912   : > { %v2432_v8 = vpack.c.bf16 %v2428_v63, %v2426_v24 }
 0x913   : > { %v2654_v57 = vpop.permute.xlu1 %2653 }
 0x916   : > { %v14897_v50 = vpop.eup %14896 }
 0x917   : > { %v2424_v23 = vmul.f32 %v14897_v50, %v14881_v39  ;;  %v2656_v39 = vpop.permute.xlu0 %2655  ;;  %v2658_v14 = vpop.permute.xlu1 %2657 }
 0x918   : > { %13757 = vmatpush3.bf16.xpose.msra.mxu1 %v2686_v18 }
 0x919   : > { %14487 = vmatprep.subr.msk.bf16.mxu1 %vm1429_vm1, %v2666_v54  ;;  %v2431_v25 = vpack.c.bf16 %v2424_v23, %v2422_v22 }
 0x91b   : > { %13748 = vmatprep.mubr.msk.bf16.mxu1 %vm480_vm0, %v2431_v25 }
 0x91c   : > { %13749 = vmatmul.mubr.msk.bf16.gmra.mrb[52].mxu1 %vm480_vm0, %v2432_v8 }
 0x91d   : > { %13760 = vmatprep.mubr.msk.bf16.mxu1 %vm1429_vm1, %v2652_v3 }
 0x920   : > { %13759 = vmatpush3.bf16.xpose.msra.mxu1 %v2689_v55 }
 0x927   : > { %13761 = vmatmul.mubr.msk.bf16.vlgmr.msra.gmra.mrb[56].mxu1 %vm1429_vm1, %v2654_v57 }
 0x928   : > { %13764 = vmatprep.mubr.msk.bf16.mxu1 %vm1429_vm1, %v2656_v39 }
 0x92f   : > { %13765 = vmatmul.mubr.msk.bf16.gmra.mrb[60].mxu1 %vm1429_vm1, %v2658_v14 }
 0x9b6   : > { %v13746_v26 = vpop.f32.mrb[48].mxu1 }
 0x9b7   : > { %v2491_v45 = vpop.f32.mrb[49].mxu1 }
 0x9b8   : > { %v13747_v7 = vpop.f32.mrb[50].mxu1 }
 0x9b9   : > { %v2527_v49 = vpack.c.bf16 %v13747_v7, %v13746_v26  ;;  %v2494_v52 = vpop.f32.mrb[51].mxu1 }
 0x9ba   : > { %v2526_v60 = vpack.c.bf16 %v2494_v52, %v2491_v45 }
 0x9bc   : > { %12767 = vmatmul.mubr.msk.bf16.vlgmr.msra.gmra.mrb[56].mxu0 %vm1429_vm1, %v2526_v60 }
 0x9bd   : > { %2986 = vmatpush1.bf16.msra.mxu0 %v12779_v38  ;;  %2604 = vmatprep.mubr.bf16.mxu0 %v20967_v2 }
 0x9be   : > { %2987 = vmatprep.subr.bf16.mxu0 %v12782_v15 }
 0x9c1   : > { %2988 = vmatpush1.bf16.msra.mxu0 %v12781_v16 }
 0x9c2   : > { %13800 = vmatprep.subr.bf16.mxu0 %v16272_v53 }
 0x9c4   : > { %12768 = vmatmul.mubr.msk.bf16.gmra.mrb[60].mxu0 %vm1429_vm1, %v2527_v49 }
 0x9c5   : > { %2614 = vmatprep.mubr.bf16.mxu0 %v20967_v2 }
 0x9ef   : > { %v13750_v62 = vpop.f32.mrb[52].mxu1 }
 0x9f0   : > { %v2507_v56 = vpop.f32.mrb[53].mxu1 }
 0x9f1   : > { %v13751_v9 = vpop.f32.mrb[54].mxu1 }
 0x9f2   : > { %v2529_v17 = vpack.c.bf16 %v13751_v9, %v13750_v62  ;;  %v2510_v47 = vpop.f32.mrb[55].mxu1 }
 0x9f3   : > { %v2528_v27 = vpack.c.bf16 %v2510_v47, %v2507_v56 }
 0x9f5   : > { %12769 = vmatmul.mubr.msk.bf16.gmra.mrb[64].mxu0 %vm1429_vm1, %v2528_v27 }
 0x9f6   : > { %2624 = vmatprep.mubr.bf16.mxu0 %v20967_v2 }
 0x9fa   : > { %v13762_v46 = vpop.f32.mrb[56].mxu1 }
 0x9fb   : > { %v2758_v44 = vmul.f32 0.17677669, %v13762_v46  ;;  %v2725_v48 = vpop.f32.mrb[57].mxu1 }
 0x9fc   : > { %v13763_v37 = vpop.f32.mrb[58].mxu1  ;;  %v2756_v36 = vmul.f32 0.17677669, %v2725_v48 }
 0x9fd   : > { %12770 = vmatmul.mubr.msk.bf16.gmra.mrb[68].mxu0 %vm1429_vm1, %v2529_v17  ;;  %v2728_v59 = vpop.f32.mrb[59].mxu1  ;;  %v2770_v50 = vsel %vm480_vm0, %v2758_v44, -inf  ;;  %v2759_v22 = vmul.f32 0.17677669, %v13763_v37 }
 0x9fe   : > { %v2757_v63 = vmul.f32 0.17677669, %v2728_v59  ;;  %2771 = vmax.xlane.f32.xlu0 %v2770_v50  ;;  %3017 = vmatprep.mubr.bf16.mxu0 %v20967_v2  ;;  %v2764_v23 = vsel %vm480_vm0, %v2756_v36, -inf }
 0x9ff   : > { %v2773_v57 = vsel %vm480_vm0, %v2759_v22, -inf }
 0xa00   : > { %v2767_v18 = vsel %vm480_vm0, %v2757_v63, -inf }
 0xa01   : > { %2768 = vmax.xlane.f32.xlu1 %v2767_v18 }
 0xa02   : > { %2765 = vmax.xlane.f32.xlu0 %v2764_v23  ;;  %v13766_v54 = vpop.f32.mrb[60].mxu1 }
 0xa03   : > { %v2741_v24 = vpop.f32.mrb[61].mxu1  ;;  %v2762_v32 = vmul.f32 0.17677669, %v13766_v54 }
 0xa04   : > { %v13767_v25 = vpop.f32.mrb[62].mxu1  ;;  %v2760_v8 = vmul.f32 0.17677669, %v2741_v24 }
 0xa05   : > { %v2763_v3 = vmul.f32 0.17677669, %v13767_v25  ;;  %v2744_v55 = vpop.f32.mrb[63].mxu1  ;;  %v2782_v21 = vsel %vm480_vm0, %v2762_v32, -inf }
 0xa06   : > { %2774 = vmax.xlane.f32.xlu0 %v2773_v57  ;;  %v2761_v39 = vmul.f32 0.17677669, %v2744_v55  ;;  %v2776_v33 = vsel %vm480_vm0, %v2760_v8, -inf }
 0xa07   : > { %v2785_v14 = vsel %vm480_vm0, %v2763_v3, -inf }
 0xa08   : > { %2786 = vmax.xlane.f32.xlu1 %v2785_v14  ;;  %v2779_v11 = vsel %vm480_vm0, %v2761_v39, -inf }
 0xa0a   : > { %2777 = vmax.xlane.f32.xlu0 %v2776_v33 }
 0xa0c   : > { %2780 = vmax.xlane.f32.xlu1 %v2779_v11 }
 0xa0e   : > { %2783 = vmax.xlane.f32.xlu0 %v2782_v21 }
 0xa1d   : > { %2858 = vrot.lane.b32.xlu1 %v16276_v0, %s20963_s12 }
 0xa21   : > { %2860 = vrot.lane.b32.xlu1 %v16282_v19, %s20963_s12 }
 0xa8b   : > { %v2772_v30 = vpop.xlane.xlu0 %2771 }
 0xa8c   : > { %v2790_v1 = vsub.f32 %v2758_v44, %v2772_v30 }
 0xa8e   : > { %v2800_v58 = vmul.f32 1.442695, %v2790_v1  ;;  %v2769_v38 = vpop.xlane.xlu1 %2768 }
 0xa8f   : > { %v2766_v26 = vpop.xlane.xlu0 %2765  ;;  %v2789_v61 = vsub.f32 %v2757_v63, %v2769_v38 }
 0xa90   : > { %14898 = vpow2.f32 %v2800_v58  ;;  %v2788_v45 = vsub.f32 %v2756_v36, %v2766_v26 }
 0xa91   : > { %v2798_v52 = vmul.f32 1.442695, %v2789_v61 }
 0xa92   : > { %v2796_v10 = vmul.f32 1.442695, %v2788_v45 }
 0xa93   : > { %v2775_v7 = vpop.xlane.xlu0 %2774 }
 0xa94   : > { %14900 = vpow2.f32 %v2796_v10  ;;  %v2791_v49 = vsub.f32 %v2759_v22, %v2775_v7 }
 0xa95   : > { %v2787_v27 = vpop.xlane.xlu1 %2786 }
 0xa96   : > { %v2802_v60 = vmul.f32 1.442695, %v2791_v49  ;;  %v2795_v59 = vsub.f32 %v2763_v3, %v2787_v27 }
 0xa97   : > { %v2778_v47 = vpop.xlane.xlu0 %2777 }
 0xa98   : > { %14902 = vpow2.f32 %v2802_v60  ;;  %v2792_v46 = vsub.f32 %v2760_v8, %v2778_v47  ;;  %v2810_v18 = vmul.f32 1.442695, %v2795_v59  ;;  %v3102_v60 = vsel %vm1429_vm1, %v16210_v41, 0 }
 0xa99   : > { %14904 = vpow2.f32 %v2798_v52  ;;  %v2781_v36 = vpop.xlane.xlu1 %2780  ;;  %v3099_v52 = vsel %vm1429_vm1, %v16188_v13, 0 }
 0xa9a   : > { %v16636_v15 = vpop.eup %14898  ;;  %v2804_v48 = vmul.f32 1.442695, %v2792_v46  ;;  %v2793_v50 = vsub.f32 %v2761_v39, %v2781_v36 }
 0xa9b   : > { %v2818_v0 = vsel %vm480_vm0, %v16636_v15, 0.0  ;;  %v2784_v44 = vpop.xlane.xlu0 %2783 }
 0xa9c   : > { %2819 = vadd.xlane.f32.xlu0 %v2818_v0  ;;  %v2794_v37 = vsub.f32 %v2762_v32, %v2784_v44  ;;  %14906 = vpow2.f32 %v2804_v48  ;;  %v2806_v22 = vmul.f32 1.442695, %v2793_v50  ;;  %v3108_v0 = vsel %vm1429_vm1, %v16250_v35, 0 }
 0xa9d   : > { %v2859_v55 = vpop.permute.xlu1 %2858 }
 0xa9e   : > { %v16640_v19 = vpop.eup %14900  ;;  %v2808_v63 = vmul.f32 1.442695, %v2794_v37 }
 0xa9f   : > { %v2812_v16 = vsel %vm480_vm0, %v16640_v19, 0.0 }
 0xaa0   : > { %2813 = vadd.xlane.f32.xlu0 %v2812_v16  ;;  %14908 = vpow2.f32 %v2808_v63 }
 0xaa1   : > { %14910 = vpow2.f32 %v2810_v18  ;;  %v2861_v39 = vpop.permute.xlu1 %2860 }
 0xaa2   : > { %v16644_v62 = vpop.eup %14902  ;;  %14912 = vpow2.f32 %v2806_v22 }
 0xaa3   : > { %v2821_v56 = vsel %vm480_vm0, %v16644_v62, 0.0  ;;  %v16648_v9 = vpop.eup %14904 }
 0xaa4   : > { %2822 = vadd.xlane.f32.xlu1 %v2821_v56  ;;  %v2815_v17 = vsel %vm480_vm0, %v16648_v9, 0.0 }
 0xaa8   : > { %2816 = vadd.xlane.f32.xlu1 %v2815_v17 }
 0xab6   : > { %2856 = vrot.lane.b32.xlu0 %v16270_v51, %s20963_s12  ;;  %v16656_v51 = vpop.eup %14906 }
 0xab7   : > { %v16660_v23 = vpop.eup %14908 }
 0xab8   : > { %v16662_v54 = vpop.eup %14910  ;;  %v2830_v24 = vsel %vm480_vm0, %v16660_v23, 0.0 }
 0xab9   : > { %2862 = vrot.lane.b32.xlu1 %v16288_v42, %s20963_s12  ;;  %v2824_v42 = vsel %vm480_vm0, %v16656_v51, 0.0  ;;  %v16666_v25 = vpop.eup %14912  ;;  %v2833_v8 = vsel %vm480_vm0, %v16662_v54, 0.0 }
 0xaba   : > { %v2827_v3 = vsel %vm480_vm0, %v16666_v25, 0.0 }
 0xad5   : > { %2825 = vadd.xlane.f32.xlu0 %v2824_v42 }
 0xad9   : > { %2831 = vadd.xlane.f32.xlu0 %v2830_v24 }
 0xadd   : > { %2834 = vadd.xlane.f32.xlu0 %v2833_v8  ;;  %2828 = vadd.xlane.f32.xlu1 %v2827_v3 }
 0xaee   : > { %3499 = vrot.lane.b32.xlu1 %v16210_v41, %s20965_s29 }
 0xaf2   : > { %3501 = vrot.lane.b32.xlu1 %v16230_v5, %s20965_s29 }
 0xaf3   : > { %3497 = vrot.lane.b32.xlu0 %v16188_v13, %s20965_s29 }
 0xaf6   : > { %3503 = vrot.lane.b32.xlu1 %v16250_v35, %s20965_s29 }
 0xaf7   : > { %3485 = vrot.lane.b32.xlu0 %v16186_v12, %s20965_s29 }
 0xafa   : > { %3487 = vrot.lane.b32.xlu1 %v16208_v40, %s20965_s29 }
 0xafb   : > { %3489 = vrot.lane.b32.xlu0 %v16228_v4, %s20965_s29 }
 0xafe   : > { %3491 = vrot.lane.b32.xlu1 %v16248_v34, %s20965_s29 }
 0xaff   : > { %3698 = vrot.lane.b32.xlu0 %v16272_v53, %s20965_s29 }
 0xb02   : > { %3700 = vrot.lane.b32.xlu1 %v16278_v6, %s20965_s29 }
 0xb06   : > { %3702 = vrot.lane.b32.xlu1 %v16284_v20, %s20965_s29 }
 0xb0a   : > { %3704 = vrot.lane.b32.xlu1 %v16290_v43, %s20965_s29 }
 0xb29   : > { %v2820_v57 = vpop.xlane.xlu0 %2819 }
 0xb2d   : > { %v2814_v14 = vpop.xlane.xlu0 %2813 }
 0xb31   : > { %v2857_v32 = vpop.permute.xlu0 %2856  ;;  %v2823_v33 = vpop.xlane.xlu1 %2822 }
 0xb32   : > { %13768 = vmatprep.subr.bf16.mxu1 %v2857_v32  ;;  %14914 = vrcp.f32 %v2823_v33 }
 0xb33   : > { %13769 = vmatpush3.bf16.msra.mxu1 %v2857_v32  ;;  %14916 = vrcp.f32 %v2814_v14 }
 0xb34   : > { %13770 = vmatprep.subr.bf16.mxu1 %v2859_v55  ;;  %14918 = vrcp.f32 %v2820_v57 }
 0xb35   : > { %v2817_v11 = vpop.xlane.xlu1 %2816 }
 0xb36   : > { %14920 = vrcp.f32 %v2817_v11 }
 0xb37   : > { %13771 = vmatpush3.bf16.msra.mxu1 %v2859_v55 }
 0xb38   : > { %13772 = vmatprep.subr.bf16.mxu1 %v2861_v39 }
 0xb39   : > { %v2863_v21 = vpop.permute.xlu1 %2862 }
 0xb3b   : > { %13773 = vmatpush3.bf16.msra.mxu1 %v2861_v39 }
 0xb3c   : > { %13774 = vmatprep.subr.bf16.mxu1 %v2863_v21  ;;  %v14915_v30 = vpop.eup %14914 }
 0xb3d   : > { %v14917_v1 = vpop.eup %14916  ;;  %v2843_v26 = vmul.f32 %v14915_v30, %v16644_v62 }
 0xb3e   : > { %v14919_v58 = vpop.eup %14918  ;;  %v2837_v45 = vmul.f32 %v14917_v1, %v16640_v19 }
 0xb3f   : > { %13775 = vmatpush3.bf16.msra.mxu1 %v2863_v21  ;;  %v2841_v10 = vmul.f32 %v14919_v58, %v16636_v15  ;;  %v3105_v15 = vsel %vm1429_vm1, %v16230_v5, 0 }
 0xb40   : > { %v14921_v38 = vpop.eup %14920  ;;  %14488 = vmatprep.subr.msk.bf16.mxu1 %vm1429_vm1, %v16188_v13 }
 0xb41   : > { %v2839_v61 = vmul.f32 %v14921_v38, %v16648_v9  ;;  %v2853_v49 = vpack.c.bf16 %v2843_v26, %v2841_v10 }
 0xb43   : > { %v2852_v7 = vpack.c.bf16 %v2839_v61, %v2837_v45 }
 0xb45   : > { %13776 = vmatprep.mubr.msk.bf16.mxu1 %vm480_vm0, %v2852_v7 }
 0xb46   : > { %13777 = vmatmul.mubr.msk.bf16.vlgmr.msra.gmra.mrb[64].mxu1 %vm480_vm0, %v2853_v49 }
 0xb48   : > { %13785 = vmatpush3.bf16.xpose.msra.mxu1 %v3099_v52 }
 0xb49   : > { %14489 = vmatprep.subr.msk.bf16.mxu1 %vm1429_vm1, %v16210_v41 }
 0xb50   : > { %13787 = vmatpush3.bf16.xpose.msra.mxu1 %v3102_v60 }
 0xb51   : > { %14490 = vmatprep.subr.msk.bf16.mxu1 %vm1429_vm1, %v16230_v5 }
 0xb58   : > { %13789 = vmatpush3.bf16.xpose.msra.mxu1 %v3105_v15 }
 0xb59   : > { %14491 = vmatprep.subr.msk.bf16.mxu1 %vm1429_vm1, %v16250_v35 }
 0xb60   : > { %13791 = vmatpush3.bf16.xpose.msra.mxu1 %v3108_v0 }
 0xb62   : > { %v2826_v19 = vpop.xlane.xlu0 %2825 }
 0xb66   : > { %v2832_v16 = vpop.xlane.xlu0 %2831 }
 0xb67   : > { %14922 = vrcp.f32 %v2832_v16 }
 0xb68   : > { %14924 = vrcp.f32 %v2826_v19 }
 0xb6a   : > { %v2835_v62 = vpop.xlane.xlu0 %2834  ;;  %v2829_v56 = vpop.xlane.xlu1 %2828 }
 0xb6b   : > { %14926 = vrcp.f32 %v2835_v62 }
 0xb6c   : > { %14928 = vrcp.f32 %v2829_v56 }
 0xb6e   : > { %v3498_v9 = vpop.permute.xlu0 %3497  ;;  %v3500_v63 = vpop.permute.xlu1 %3499 }
 0xb6f   : > { %14492 = vmatprep.subr.msk.bf16.mxu1 %vm1429_vm1, %v3498_v9  ;;  %v3518_v18 = vsel %vm1429_vm1, %v3498_v9, 0  ;;  %v3521_v42 = vsel %vm1429_vm1, %v3500_v63, 0 }
 0xb71   : > { %v14923_v17 = vpop.eup %14922 }
 0xb72   : > { %v14925_v47 = vpop.eup %14924  ;;  %v2849_v44 = vmul.f32 %v14923_v17, %v16660_v23  ;;  %v3502_v22 = vpop.permute.xlu1 %3501 }
 0xb73   : > { %v2845_v37 = vmul.f32 %v14925_v47, %v16656_v51  ;;  %v3486_v51 = vpop.permute.xlu0 %3485 }
 0xb75   : > { %v14927_v27 = vpop.eup %14926 }
 0xb76   : > { %v14929_v46 = vpop.eup %14928  ;;  %v2851_v48 = vmul.f32 %v14927_v27, %v16662_v54  ;;  %v3504_v23 = vpop.permute.xlu1 %3503  ;;  %v3524_v54 = vsel %vm1429_vm1, %v3502_v22, 0 }
 0xb77   : > { %v2847_v36 = vmul.f32 %v14929_v46, %v16666_v25  ;;  %v3490_v25 = vpop.permute.xlu0 %3489  ;;  %v3527_v3 = vsel %vm1429_vm1, %v3504_v23, 0 }
 0xb78   : > { %v2855_v59 = vpack.c.bf16 %v2851_v48, %v2849_v44 }
 0xb79   : > { %v2854_v50 = vpack.c.bf16 %v2847_v36, %v2845_v37 }
 0xb7a   : > { %v3488_v24 = vpop.permute.xlu1 %3487 }
 0xb7b   : > { %13780 = vmatprep.mubr.msk.bf16.mxu1 %vm480_vm0, %v2854_v50  ;;  %v3699_v55 = vpop.permute.xlu0 %3698 }
 0xb7c   : > { %13781 = vmatmul.mubr.msk.bf16.gmra.mrb[68].mxu1 %vm480_vm0, %v2855_v59 }
 0xb7d   : > { %13792 = vmatprep.mubr.msk.bf16.mxu1 %vm1429_vm1, %v16186_v12 }
 0xb7e   : > { %v3492_v8 = vpop.permute.xlu1 %3491 }
 0xb82   : > { %v3701_v57 = vpop.permute.xlu1 %3700 }
 0xb84   : > { %13793 = vmatmul.mubr.msk.bf16.vlgmr.msra.gmra.mrb[72].mxu1 %vm1429_vm1, %v16208_v40 }
 0xb85   : > { %13817 = vmatpush3.bf16.xpose.msra.mxu1 %v3518_v18  ;;  %13796 = vmatprep.mubr.msk.bf16.mxu1 %vm1429_vm1, %v16228_v4 }
 0xb86   : > { %14493 = vmatprep.subr.msk.bf16.mxu1 %vm1429_vm1, %v3500_v63  ;;  %v3703_v39 = vpop.permute.xlu1 %3702 }
 0xb8a   : > { %v3705_v14 = vpop.permute.xlu1 %3704 }
 0xb8c   : > { %13797 = vmatmul.mubr.msk.bf16.gmra.mrb[76].mxu1 %vm1429_vm1, %v16248_v34 }
 0xb8d   : > { %13819 = vmatpush3.bf16.xpose.msra.mxu1 %v3521_v42  ;;  %13824 = vmatprep.mubr.msk.bf16.mxu1 %vm1429_vm1, %v3486_v51 }
 0xb8e   : > { %14494 = vmatprep.subr.msk.bf16.mxu1 %vm1429_vm1, %v3502_v22 }
 0xb95   : > { %13821 = vmatpush3.bf16.xpose.msra.mxu1 %v3524_v54 }
 0xb96   : > { %14495 = vmatprep.subr.msk.bf16.mxu1 %vm1429_vm1, %v3504_v23 }
 0xb9d   : > { %13823 = vmatpush3.bf16.xpose.msra.mxu1 %v3527_v3 }
 0xb9e   : > { %13832 = vmatprep.subr.bf16.mxu1 %v3699_v55 }
 0xba4   : > { %13825 = vmatmul.mubr.msk.bf16.vlgmr.msra.gmra.mrb[80].mxu1 %vm1429_vm1, %v3488_v24 }
 0xba5   : > { %13828 = vmatprep.mubr.msk.bf16.mxu1 %vm1429_vm1, %v3490_v25  ;;  %13833 = vmatpush3.bf16.msra.mxu1 %v3699_v55 }
 0xba6   : > { %13834 = vmatprep.subr.bf16.mxu1 %v3701_v57 }
 0xba9   : > { %13835 = vmatpush3.bf16.msra.mxu1 %v3701_v57 }
 0xbaa   : > { %13836 = vmatprep.subr.bf16.mxu1 %v3703_v39 }
 0xbac   : > { %13829 = vmatmul.mubr.msk.bf16.gmra.mrb[84].mxu1 %vm1429_vm1, %v3492_v8 }
 0xbad   : > { %13837 = vmatpush3.bf16.msra.mxu1 %v3703_v39 }
 0xbae   : > { %13838 = vmatprep.subr.bf16.mxu1 %v3705_v14 }
 0xbb1   : > { %13839 = vmatpush3.bf16.msra.mxu1 %v3705_v14 }
 0xc19   : > { %v13778_v32 = vpop.f32.mrb[64].mxu1 }
 0xc1a   : > { %v2914_v33 = vpop.f32.mrb[65].mxu1 }
 0xc1b   : > { %v13779_v11 = vpop.f32.mrb[66].mxu1 }
 0xc1c   : > { %v2950_v21 = vpack.c.bf16 %v13779_v11, %v13778_v32  ;;  %v2917_v30 = vpop.f32.mrb[67].mxu1 }
 0xc1d   : > { %v2949_v1 = vpack.c.bf16 %v2917_v30, %v2914_v33 }
 0xc1f   : > { %12783 = vmatmul.mubr.msk.bf16.vlgmr.msra.gmra.mrb[56].mxu0 %vm1429_vm1, %v2949_v1 }
 0xc20   : > { %13801 = vmatpush3.bf16.msra.mxu0 %v16272_v53  ;;  %3027 = vmatprep.mubr.bf16.mxu0 %v20967_v2 }
 0xc21   : > { %13802 = vmatprep.subr.bf16.mxu0 %v16278_v6 }
 0xc24   : > { %13803 = vmatpush3.bf16.msra.mxu0 %v16278_v6 }
 0xc25   : > { %13804 = vmatprep.subr.bf16.mxu0 %v16284_v20 }
 0xc27   : > { %12784 = vmatmul.mubr.msk.bf16.gmra.mrb[60].mxu0 %vm1429_vm1, %v2950_v21 }
 0xc28   : > { %13805 = vmatpush3.bf16.msra.mxu0 %v16284_v20  ;;  %3037 = vmatprep.mubr.bf16.mxu0 %v20967_v2 }
 0xc29   : > { %13806 = vmatprep.subr.bf16.mxu0 %v16290_v43 }
 0xc2c   : > { %13807 = vmatpush3.bf16.msra.mxu0 %v16290_v43 }
 0xc4f   : > { %v13782_v58 = vpop.f32.mrb[68].mxu1 }
 0xc50   : > { %v2930_v38 = vpop.f32.mrb[69].mxu1 }
 0xc51   : > { %v13783_v26 = vpop.f32.mrb[70].mxu1 }
 0xc52   : > { %v2952_v45 = vpack.c.bf16 %v13783_v26, %v13782_v58  ;;  %v2933_v61 = vpop.f32.mrb[71].mxu1 }
 0xc53   : > { %v2951_v10 = vpack.c.bf16 %v2933_v61, %v2930_v38 }
 0xc55   : > { %12785 = vmatmul.mubr.msk.bf16.gmra.mrb[64].mxu0 %vm1429_vm1, %v2951_v10 }
 0xc56   : > { %3047 = vmatprep.mubr.bf16.mxu0 %v20967_v2 }
 0xc57   : > { %v13794_v7 = vpop.f32.mrb[72].mxu1 }
 0xc58   : > { %v3144_v49 = vpop.f32.mrb[73].mxu1  ;;  %v16792_v39 = vmul.f32 0.17677669, %v13794_v7 }
 0xc59   : > { %v13795_v52 = vpop.f32.mrb[74].mxu1  ;;  %v16786_v3 = vmul.f32 0.17677669, %v3144_v49 }
 0xc5a   : > { %v3147_v60 = vpop.f32.mrb[75].mxu1  ;;  %v16798_v33 = vmul.f32 0.17677669, %v13795_v52  ;;  %v3189_v11 = vsel %vm480_vm0, %v16792_v39, -inf }
 0xc5b   : > { %v16780_v24 = vmul.f32 0.17677669, %v3147_v60  ;;  %v3183_v14 = vsel %vm480_vm0, %v16786_v3, -inf }
 0xc5c   : > { %v3192_v21 = vsel %vm480_vm0, %v16798_v33, -inf }
 0xc5d   : > { %12786 = vmatmul.mubr.msk.bf16.gmra.mrb[68].mxu0 %vm1429_vm1, %v2952_v45  ;;  %v3186_v8 = vsel %vm480_vm0, %v16780_v24, -inf }
 0xc5f   : > { %v16758_v15 = vpop.f32.mrb[76].mxu1 }
 0xc60   : > { %v16760_v0 = vpop.f32.mrb[77].mxu1 }
 0xc61   : > { %v16762_v19 = vpop.f32.mrb[78].mxu1 }
 0xc62   : > { %v16764_v16 = vpop.f32.mrb[79].mxu1 }
 0xc77   : > { %v13826_v62 = vpop.f32.mrb[80].mxu1 }
 0xc78   : > { %v3596_v56 = vmul.f32 0.17677669, %v13826_v62  ;;  %v3563_v9 = vpop.f32.mrb[81].mxu1 }
 0xc79   : > { %v13827_v17 = vpop.f32.mrb[82].mxu1  ;;  %v3594_v47 = vmul.f32 0.17677669, %v3563_v9 }
 0xc7a   : > { %v3566_v27 = vpop.f32.mrb[83].mxu1  ;;  %v3608_v46 = vsel %vm480_vm0, %v3596_v56, -inf  ;;  %v3597_v37 = vmul.f32 0.17677669, %v13827_v17 }
 0xc7b   : > { %v3595_v44 = vmul.f32 0.17677669, %v3566_v27  ;;  %3609 = vmax.xlane.f32.xlu0 %v3608_v46  ;;  %v3602_v36 = vsel %vm480_vm0, %v3594_v47, -inf }
 0xc7c   : > { %v3611_v51 = vsel %vm480_vm0, %v3597_v37, -inf }
 0xc7d   : > { %v3605_v48 = vsel %vm480_vm0, %v3595_v44, -inf }
 0xc7e   : > { %3606 = vmax.xlane.f32.xlu1 %v3605_v48 }
 0xc7f   : > { %3603 = vmax.xlane.f32.xlu0 %v3602_v36  ;;  %v13830_v59 = vpop.f32.mrb[84].mxu1 }
 0xc80   : > { %v3579_v50 = vpop.f32.mrb[85].mxu1  ;;  %v3600_v18 = vmul.f32 0.17677669, %v13830_v59 }
 0xc81   : > { %v13831_v63 = vpop.f32.mrb[86].mxu1  ;;  %v3598_v42 = vmul.f32 0.17677669, %v3579_v50 }
 0xc82   : > { %v3582_v22 = vpop.f32.mrb[87].mxu1  ;;  %v3620_v23 = vsel %vm480_vm0, %v3600_v18, -inf  ;;  %v16782_v25 = vmul.f32 0.17677669, %v13831_v63 }
 0xc83   : > { %3612 = vmax.xlane.f32.xlu0 %v3611_v51  ;;  %v3614_v54 = vsel %vm480_vm0, %v3598_v42, -inf  ;;  %v16788_v55 = vmul.f32 0.17677669, %v3582_v22 }
 0xc84   : > { %v3623_v57 = vsel %vm480_vm0, %v16782_v25, -inf }
 0xc85   : > { %v3617_v32 = vsel %vm480_vm0, %v16788_v55, -inf }
 0xc87   : > { %3621 = vmax.xlane.f32.xlu0 %v3620_v23 }
 0xc8b   : > { %3615 = vmax.xlane.f32.xlu0 %v3614_v54 }
 0xc8f   : > { %3926 = vrot.lane.b32.xlu1 %v16210_v41, %s20992_s30 }
 0xc93   : > { %3928 = vrot.lane.b32.xlu1 %v16230_v5, %s20992_s30 }
 0xc97   : > { %3930 = vrot.lane.b32.xlu1 %v16250_v35, %s20992_s30 }
 0xca1   : > { %3924 = vrot.lane.b32.xlu0 %v16188_v13, %s20992_s30 }
 0xcbb   : > { %3187 = vmax.xlane.f32.xlu1 %v3186_v8 }
 0xcbf   : > { %3624 = vmax.xlane.f32.xlu1 %v3623_v57 }
 0xcc0   : > { %3184 = vmax.xlane.f32.xlu0 %v3183_v14 }
 0xcc3   : > { %3618 = vmax.xlane.f32.xlu1 %v3617_v32 }
 0xcc4   : > { %3190 = vmax.xlane.f32.xlu0 %v3189_v11 }
 0xcc8   : > { %3193 = vmax.xlane.f32.xlu0 %v3192_v21 }
 0xd08   : > { %v3610_v30 = vpop.xlane.xlu0 %3609 }
 0xd09   : > { %v3628_v1 = vsub.f32 %v3596_v56, %v3610_v30 }
 0xd0b   : > { %v3638_v58 = vmul.f32 1.442695, %v3628_v1  ;;  %v3607_v38 = vpop.xlane.xlu1 %3606 }
 0xd0c   : > { %v3604_v26 = vpop.xlane.xlu0 %3603  ;;  %v3627_v61 = vsub.f32 %v3595_v44, %v3607_v38 }
 0xd0d   : > { %14930 = vpow2.f32 %v3638_v58  ;;  %v3626_v45 = vsub.f32 %v3594_v47, %v3604_v26 }
 0xd0e   : > { %v3636_v52 = vmul.f32 1.442695, %v3627_v61  ;;  %v16865_v61 = vmul.f32 0.17677669, %v16764_v16 }
 0xd0f   : > { %v3634_v10 = vmul.f32 1.442695, %v3626_v45  ;;  %v16834_v54 = vpop.permute.xlu1 %3926 }
 0xd10   : > { %v3613_v7 = vpop.xlane.xlu0 %3612 }
 0xd11   : > { %14932 = vpow2.f32 %v3634_v10  ;;  %v3629_v49 = vsub.f32 %v3597_v37, %v3613_v7  ;;  %v16870_v7 = vmul.f32 0.17677669, %v16762_v19 }
 0xd13   : > { %v3640_v60 = vmul.f32 1.442695, %v3629_v49  ;;  %v16838_v8 = vpop.permute.xlu1 %3928  ;;  %v3204_v16 = vsel %vm480_vm0, %v16870_v7, -inf }
 0xd14   : > { %v3622_v62 = vpop.xlane.xlu0 %3621 }
 0xd15   : > { %14934 = vpow2.f32 %v3640_v60  ;;  %v3632_v9 = vsub.f32 %v3600_v18, %v3622_v62 }
 0xd16   : > { %14936 = vpow2.f32 %v3636_v52 }
 0xd17   : > { %v16804_v17 = vpop.eup %14930  ;;  %v3646_v27 = vmul.f32 1.442695, %v3632_v9  ;;  %v16840_v57 = vpop.permute.xlu1 %3930 }
 0xd18   : > { %v3616_v56 = vpop.xlane.xlu0 %3615  ;;  %v3656_v46 = vsel %vm480_vm0, %v16804_v17, 0.0 }
 0xd19   : > { %14938 = vpow2.f32 %v3646_v27  ;;  %v3630_v47 = vsub.f32 %v3598_v42, %v3616_v56  ;;  %3657 = vadd.xlane.f32.xlu0 %v3656_v46 }
 0xd1b   : > { %v16808_v44 = vpop.eup %14932  ;;  %v3642_v48 = vmul.f32 1.442695, %v3630_v47 }
 0xd1c   : > { %v16810_v37 = vpop.permute.xlu0 %3924  ;;  %v3650_v36 = vsel %vm480_vm0, %v16808_v44, 0.0 }
 0xd1d   : > { %14940 = vpow2.f32 %v3642_v48  ;;  %3651 = vadd.xlane.f32.xlu0 %v3650_v36  ;;  %14496 = vmatprep.subr.msk.bf16.mxu1 %vm1429_vm1, %v16810_v37 }
 0xd1f   : > { %v16816_v59 = vpop.eup %14934 }
 0xd20   : > { %v3659_v50 = vsel %vm480_vm0, %v16816_v59, 0.0  ;;  %v16820_v63 = vpop.eup %14936 }
 0xd21   : > { %3660 = vadd.xlane.f32.xlu1 %v3659_v50  ;;  %v3653_v51 = vsel %vm480_vm0, %v16820_v63, 0.0 }
 0xd23   : > { %v16822_v18 = vpop.eup %14938 }
 0xd24   : > { %v3668_v22 = vsel %vm480_vm0, %v16822_v18, 0.0 }
 0xd25   : > { %3669 = vadd.xlane.f32.xlu0 %v3668_v22  ;;  %3654 = vadd.xlane.f32.xlu1 %v3653_v51 }
 0xd27   : > { %v16828_v42 = vpop.eup %14940 }
 0xd28   : > { %v3662_v23 = vsel %vm480_vm0, %v16828_v42, 0.0 }
 0xd29   : > { %3663 = vadd.xlane.f32.xlu0 %v3662_v23 }
 0xd36   : > { %3918 = vrot.lane.b32.xlu1 %v16208_v40, %s20992_s30 }
 0xd3a   : > { %4347 = vrot.lane.b32.xlu1 %v16188_v13, %s20963_s12 }
 0xd48   : > { %v16842_v14 = vpop.xlane.xlu1 %3187 }
 0xd4c   : > { %v3625_v32 = vpop.xlane.xlu1 %3624 }
 0xd4d   : > { %v3633_v11 = vsub.f32 %v16782_v25, %v3625_v32  ;;  %v16859_v25 = vmul.f32 0.17677669, %v16760_v0  ;;  %v3198_v0 = vsel %vm480_vm0, %v16865_v61, -inf }
 0xd4f   : > { %v3648_v21 = vmul.f32 1.442695, %v3633_v11  ;;  %v3195_v10 = vsel %vm480_vm0, %v16859_v25, -inf  ;;  %v3954_v11 = vsel %vm1429_vm1, %v16840_v57, 0 }
 0xd50   : > { %v3619_v30 = vpop.xlane.xlu1 %3618 }
 0xd51   : > { %14942 = vpow2.f32 %v3648_v21  ;;  %v3631_v1 = vsub.f32 %v16788_v55, %v3619_v30  ;;  %v16862_v55 = vmul.f32 0.17677669, %v16758_v15  ;;  %v3185_v15 = vpop.xlane.xlu0 %3184 }
 0xd53   : > { %v3644_v58 = vmul.f32 1.442695, %v3631_v1 }
 0xd55   : > { %14944 = vpow2.f32 %v3644_v58  ;;  %v3191_v49 = vpop.xlane.xlu0 %3190 }
 0xd59   : > { %v3194_v52 = vpop.xlane.xlu0 %3193 }
 0xd5b   : > { %v16846_v38 = vpop.eup %14942 }
 0xd5c   : > { %v3671_v13 = vsel %vm480_vm0, %v16846_v38, 0.0 }
 0xd5d   : > { %3672 = vadd.xlane.f32.xlu0 %v3671_v13 }
 0xd5f   : > { %v16850_v26 = vpop.eup %14944 }
 0xd60   : > { %v3665_v45 = vsel %vm480_vm0, %v16850_v26, 0.0 }
 0xd61   : > { %3666 = vadd.xlane.f32.xlu1 %v3665_v45 }
 0xd72   : > { %4349 = vrot.lane.b32.xlu1 %v16210_v41, %s20963_s12  ;;  %v3201_v41 = vsel %vm480_vm0, %v16862_v55, -inf }
 0xd73   : > { %3916 = vrot.lane.b32.xlu0 %v16186_v12, %s20992_s30 }
 0xd92   : > { %3196 = vmax.xlane.f32.xlu0 %v3195_v10 }
 0xd96   : > { %3202 = vmax.xlane.f32.xlu0 %v3201_v41  ;;  %3199 = vmax.xlane.f32.xlu1 %v3198_v0 }
 0xd9a   : > { %3205 = vmax.xlane.f32.xlu0 %v3204_v16 }
 0xda6   : > { %v3658_v19 = vpop.xlane.xlu0 %3657 }
 0xda7   : > { %3922 = vrot.lane.b32.xlu1 %v16248_v34, %s20992_s30 }
 0xdaa   : > { %v3652_v62 = vpop.xlane.xlu0 %3651 }
 0xdab   : > { %4351 = vrot.lane.b32.xlu1 %v16230_v5, %s20963_s12 }
 0xdae   : > { %v3661_v60 = vpop.xlane.xlu1 %3660 }
 0xdaf   : > { %4353 = vrot.lane.b32.xlu1 %v16250_v35, %s20963_s12  ;;  %14946 = vrcp.f32 %v3661_v60 }
 0xdb0   : > { %3920 = vrot.lane.b32.xlu0 %v16228_v4, %s20992_s30  ;;  %14948 = vrcp.f32 %v3652_v62 }
 0xdb1   : > { %14950 = vrcp.f32 %v3658_v19 }
 0xdb2   : > { %v3655_v9 = vpop.xlane.xlu1 %3654  ;;  %v3670_v1 = vpop.xlane.xlu0 %3669 }
 0xdb3   : > { %4341 = vrot.lane.b32.xlu1 %v16208_v40, %s20963_s12  ;;  %14952 = vrcp.f32 %v3655_v9 }
 0xdb4   : > { %4339 = vrot.lane.b32.xlu0 %v16186_v12, %s20963_s12  ;;  %v3207_v12 = vsub.f32 %v16786_v3, %v3185_v15 }
 0xdb6   : > { %v3664_v58 = vpop.xlane.xlu0 %3663 }
 0xdb7   : > { %4345 = vrot.lane.b32.xlu1 %v16248_v34, %s20963_s12  ;;  %v3945_v34 = vsel %vm1429_vm1, %v16810_v37, 0  ;;  %v3951_v37 = vsel %vm1429_vm1, %v16838_v8, 0 }
 0xdb8   : > { %4343 = vrot.lane.b32.xlu0 %v16228_v4, %s20963_s12  ;;  %v3208_v4 = vsub.f32 %v16780_v24, %v16842_v14  ;;  %v3948_v24 = vsel %vm1429_vm1, %v16834_v54, 0 }
 0xdb9   : > { %v14947_v5 = vpop.eup %14946 }
 0xdba   : > { %v14949_v35 = vpop.eup %14948  ;;  %v3681_v46 = vmul.f32 %v14947_v5, %v16816_v59  ;;  %v3215_v59 = vmul.f32 1.442695, %v3207_v12  ;;  %v3217_v3 = vmul.f32 1.442695, %v3208_v4 }
 0xdbb   : > { %v14951_v27 = vpop.eup %14950  ;;  %v3675_v47 = vmul.f32 %v14949_v35, %v16808_v44  ;;  %v3209_v44 = vsub.f32 %v16792_v39, %v3191_v49 }
 0xdbc   : > { %v3679_v48 = vmul.f32 %v14951_v27, %v16804_v17  ;;  %14954 = vpow2.f32 %v3215_v59 }
 0xdbd   : > { %v14953_v56 = vpop.eup %14952  ;;  %v3219_v17 = vmul.f32 1.442695, %v3209_v44  ;;  %14956 = vpow2.f32 %v3217_v3 }
 0xdbe   : > { %v3677_v40 = vmul.f32 %v14953_v56, %v16820_v63  ;;  %v3691_v50 = vpack.c.bf16 %v3681_v46, %v3679_v48  ;;  %v3210_v63 = vsub.f32 %v16798_v33, %v3194_v52 }
 0xdbf   : > { %14958 = vpow2.f32 %v3219_v17 }
 0xdc0   : > { %v3690_v36 = vpack.c.bf16 %v3677_v40, %v3675_v47  ;;  %v3221_v22 = vmul.f32 1.442695, %v3210_v63 }
 0xdc2   : > { %13840 = vmatprep.mubr.msk.bf16.mxu1 %vm480_vm0, %v3690_v36  ;;  %14960 = vpow2.f32 %v3221_v22 }
 0xdc3   : > { %13841 = vmatmul.mubr.msk.bf16.vlgmr.msra.gmra.mrb[88].mxu1 %vm480_vm0, %v3691_v50 }
 0xdc4   : > { %13849 = vmatpush3.bf16.xpose.msra.mxu1 %v3945_v34 }
 0xdc5   : > { %14497 = vmatprep.subr.msk.bf16.mxu1 %vm1429_vm1, %v16834_v54  ;;  %v3919_v54 = vpop.permute.xlu1 %3918 }
 0xdc6   : > { %v16913_v39 = vpop.eup %14954 }
 0xdc7   : > { %v16917_v51 = vpop.eup %14956  ;;  %v3231_v33 = vsel %vm480_vm0, %v16913_v39, 0.0 }
 0xdc8   : > { %v3234_v32 = vsel %vm480_vm0, %v16917_v51, 0.0 }
 0xdc9   : > { %v16923_v23 = vpop.eup %14958  ;;  %v4348_v21 = vpop.permute.xlu1 %4347 }
 0xdca   : > { %v3237_v14 = vsel %vm480_vm0, %v16923_v23, 0.0  ;;  %v4368_v9 = vsel %vm1429_vm1, %v4348_v21, 0 }
 0xdcc   : > { %13851 = vmatpush3.bf16.xpose.msra.mxu1 %v3948_v24 }
 0xdcd   : > { %14498 = vmatprep.subr.msk.bf16.mxu1 %vm1429_vm1, %v16838_v8  ;;  %v16929_v8 = vpop.eup %14960 }
 0xdce   : > { %v3240_v30 = vsel %vm480_vm0, %v16929_v8, 0.0 }
 0xdd4   : > { %13853 = vmatpush3.bf16.xpose.msra.mxu1 %v3951_v37 }
 0xdd5   : > { %14499 = vmatprep.subr.msk.bf16.mxu1 %vm1429_vm1, %v16840_v57 }
 0xdd7   : > { %3232 = vadd.xlane.f32.xlu0 %v3231_v33 }
 0xddb   : > { %3238 = vadd.xlane.f32.xlu0 %v3237_v14  ;;  %3235 = vadd.xlane.f32.xlu1 %v3234_v32 }
 0xddc   : > { %13855 = vmatpush3.bf16.xpose.msra.mxu1 %v3954_v11 }
 0xddd   : > { %14500 = vmatprep.subr.msk.bf16.mxu1 %vm1429_vm1, %v4348_v21 }
 0xddf   : > { %3241 = vadd.xlane.f32.xlu0 %v3240_v30 }
 0xdea   : > { %v3673_v13 = vpop.xlane.xlu0 %3672 }
 0xdeb   : > { %14962 = vrcp.f32 %v3673_v13 }
 0xdec   : > { %14964 = vrcp.f32 %v3664_v58 }
 0xded   : > { %14966 = vrcp.f32 %v3670_v1 }
 0xdee   : > { %v3667_v45 = vpop.xlane.xlu1 %3666  ;;  %v3917_v62 = vpop.permute.xlu0 %3916 }
 0xdef   : > { %14968 = vrcp.f32 %v3667_v45 }
 0xdf5   : > { %v14963_v10 = vpop.eup %14962 }
 0xdf6   : > { %v14965_v41 = vpop.eup %14964  ;;  %v3689_v15 = vmul.f32 %v14963_v10, %v16846_v38  ;;  %v4350_v38 = vpop.permute.xlu1 %4349 }
 0xdf7   : > { %v14967_v0 = vpop.eup %14966  ;;  %v3683_v16 = vmul.f32 %v14965_v41, %v16828_v42  ;;  %v4371_v42 = vsel %vm1429_vm1, %v4350_v38, 0 }
 0xdf8   : > { %v3687_v52 = vmul.f32 %v14967_v0, %v16822_v18 }
 0xdf9   : > { %v14969_v57 = vpop.eup %14968 }
 0xdfa   : > { %v3685_v49 = vmul.f32 %v14969_v57, %v16850_v26  ;;  %v3693_v60 = vpack.c.bf16 %v3689_v15, %v3687_v52 }
 0xdfc   : > { %v3692_v19 = vpack.c.bf16 %v3685_v49, %v3683_v16 }
 0xdfe   : > { %13844 = vmatprep.mubr.msk.bf16.mxu1 %vm480_vm0, %v3692_v19 }
 0xdff   : > { %13845 = vmatmul.mubr.msk.bf16.gmra.mrb[92].mxu1 %vm480_vm0, %v3693_v60 }
 0xe00   : > { %13856 = vmatprep.mubr.msk.bf16.mxu1 %vm1429_vm1, %v3917_v62 }
 0xe07   : > { %13857 = vmatmul.mubr.msk.bf16.vlgmr.msra.gmra.mrb[96].mxu1 %vm1429_vm1, %v3919_v54 }
 0xe08   : > { %13881 = vmatpush3.bf16.xpose.msra.mxu1 %v4368_v9 }
 0xe09   : > { %14501 = vmatprep.subr.msk.bf16.mxu1 %vm1429_vm1, %v4350_v38  ;;  %v3352_v38 = vld [vmem:[%s20947_s3 + $0x218] sm:$0xff] }
 0xe10   : > { %13883 = vmatpush3.bf16.xpose.msra.mxu1 %v4371_v42  ;;  %v3353_v42 = vld [vmem:[%s20947_s3 + $0x238] sm:$0xff] }
 0xe1f   : > { %v3197_v18 = vpop.xlane.xlu0 %3196 }
 0xe20   : > { %v3211_v26 = vsub.f32 %v16859_v25, %v3197_v18  ;;  %v12795_v18 = vcombine.low %v3352_v38, %v3353_v42 }
 0xe22   : > { %v3223_v5 = vmul.f32 1.442695, %v3211_v26  ;;  %v12796_v26 = vcombine.high %v3352_v38, %v3353_v42 }
 0xe23   : > { %v3203_v35 = vpop.xlane.xlu0 %3202  ;;  %v3200_v27 = vpop.xlane.xlu1 %3199 }
 0xe24   : > { %14970 = vpow2.f32 %v3223_v5  ;;  %v3213_v56 = vsub.f32 %v16862_v55, %v3203_v35  ;;  %v3212_v46 = vsub.f32 %v16865_v61, %v3200_v27  ;;  %3392 = vmatprep.subr.bf16.mxu0 %v12796_v26 }
 0xe26   : > { %v3227_v47 = vmul.f32 1.442695, %v3213_v56  ;;  %v3225_v40 = vmul.f32 1.442695, %v3212_v46 }
 0xe27   : > { %v3206_v48 = vpop.xlane.xlu0 %3205  ;;  %v3923_v12 = vpop.permute.xlu1 %3922 }
 0xe28   : > { %14972 = vpow2.f32 %v3227_v47  ;;  %v3214_v36 = vsub.f32 %v16870_v7, %v3206_v48  ;;  %v3354_v47 = vld [vmem:[%s20947_s3 + $0x258] sm:$0xff] }
 0xe29   : > { %14974 = vpow2.f32 %v3225_v40  ;;  %v3355_v40 = vld [vmem:[%s20947_s3 + $0x278] sm:$0xff] }
 0xe2a   : > { %v3229_v50 = vmul.f32 1.442695, %v3214_v36  ;;  %v12798_v36 = vcombine.high %v3354_v47, %v3355_v40 }
 0xe2b   : > { %v3921_v4 = vpop.permute.xlu0 %3920  ;;  %v4352_v34 = vpop.permute.xlu1 %4351 }
 0xe2c   : > { %14976 = vpow2.f32 %v3229_v50  ;;  %13860 = vmatprep.mubr.msk.bf16.mxu1 %vm1429_vm1, %v3921_v4  ;;  %14502 = vmatprep.subr.msk.bf16.mxu1 %vm1429_vm1, %v4352_v34  ;;  %v4374_v25 = vsel %vm1429_vm1, %v4352_v34, 0 }
 0xe2d   : > { %13861 = vmatmul.mubr.msk.bf16.gmra.mrb[100].mxu1 %vm1429_vm1, %v3923_v12  ;;  %v12797_v12 = vcombine.low %v3354_v47, %v3355_v40 }
 0xe2e   : > { %v16955_v55 = vpop.eup %14970  ;;  %13885 = vmatpush3.bf16.xpose.msra.mxu1 %v4374_v25 }
 0xe2f   : > { %v4340_v61 = vpop.permute.xlu0 %4339  ;;  %v4354_v59 = vpop.permute.xlu1 %4353  ;;  %v3243_v7 = vsel %vm480_vm0, %v16955_v55, 0.0 }
 0xe30   : > { %3244 = vadd.xlane.f32.xlu0 %v3243_v7  ;;  %14503 = vmatprep.subr.msk.bf16.mxu1 %vm1429_vm1, %v4354_v59  ;;  %v4377_v24 = vsel %vm1429_vm1, %v4354_v59, 0  ;;  %v17022_v59 = vld [vmem:[%s20947_s3 + $0x2b8] sm:$0xff] }
 0xe31   : > { %13888 = vmatprep.mubr.msk.bf16.mxu1 %vm1429_vm1, %v4340_v61  ;;  %v17017_v61 = vld [vmem:[%s20947_s3 + $0x298] sm:$0xff] }
 0xe32   : > { %v16961_v44 = vpop.eup %14972 }
 0xe33   : > { %v14975_v3 = vpop.eup %14974  ;;  %v3249_v17 = vsel %vm480_vm0, %v16961_v44, 0.0  ;;  %v4342_v33 = vpop.permute.xlu1 %4341 }
 0xe34   : > { %3250 = vadd.xlane.f32.xlu0 %v3249_v17  ;;  %v3246_v63 = vsel %vm480_vm0, %v14975_v3, 0.0  ;;  %v4344_v54 = vpop.permute.xlu0 %4343  ;;  %v12812_v17 = vcombine.high %v17017_v61, %v17022_v59 }
 0xe35   : > { %3247 = vadd.xlane.f32.xlu1 %v3246_v63 }
 0xe36   : > { %v16967_v22 = vpop.eup %14976  ;;  %13887 = vmatpush3.bf16.xpose.msra.mxu1 %v4377_v24 }
 0xe37   : > { %v3252_v37 = vsel %vm480_vm0, %v16967_v22, 0.0  ;;  %v4346_v14 = vpop.permute.xlu1 %4345 }
 0xe39   : > { %3253 = vadd.xlane.f32.xlu1 %v3252_v37 }
 0xe3d   : > { %13889 = vmatmul.mubr.msk.bf16.vlgmr.msra.gmra.mrb[104].mxu1 %vm1429_vm1, %v4342_v33 }
 0xe3e   : > { %13892 = vmatprep.mubr.msk.bf16.mxu1 %vm1429_vm1, %v4344_v54 }
 0xe45   : > { %13893 = vmatmul.mubr.msk.bf16.gmra.mrb[108].mxu1 %vm1429_vm1, %v4346_v14 }
 0xe4a   : > { %4121 = vrot.lane.b32.xlu0 %v16272_v53, %s20992_s30 }
 0xe64   : > { %v3233_v32 = vpop.xlane.xlu0 %3232 }
 0xe65   : > { %14978 = vrcp.f32 %v3233_v32 }
 0xe68   : > { %v3239_v11 = vpop.xlane.xlu0 %3238  ;;  %v3236_v21 = vpop.xlane.xlu1 %3235 }
 0xe69   : > { %14980 = vrcp.f32 %v3236_v21 }
 0xe6a   : > { %14982 = vrcp.f32 %v3239_v11 }
 0xe6c   : > { %v3242_v30 = vpop.xlane.xlu0 %3241 }
 0xe6d   : > { %14984 = vrcp.f32 %v3242_v30 }
 0xe6f   : > { %v14979_v1 = vpop.eup %14978 }
 0xe70   : > { %v3256_v45 = vmul.f32 %v14979_v1, %v16913_v39 }
 0xe73   : > { %v14981_v58 = vpop.eup %14980 }
 0xe74   : > { %v14983_v13 = vpop.eup %14982  ;;  %v3258_v10 = vmul.f32 %v14981_v58, %v16917_v51 }
 0xe75   : > { %v3260_v57 = vmul.f32 %v14983_v13, %v16923_v23 }
 0xe76   : > { %v3271_v0 = vpack.c.bf16 %v3258_v10, %v3256_v45 }
 0xe77   : > { %v14985_v41 = vpop.eup %14984 }
 0xe78   : > { %v3262_v15 = vmul.f32 %v14985_v41, %v16929_v8  ;;  %13808 = vmatprep.mubr.msk.bf16.mxu0 %vm480_vm0, %v3271_v0 }
 0xe7a   : > { %v3272_v16 = vpack.c.bf16 %v3262_v15, %v3260_v57 }
 0xe7c   : > { %13809 = vmatmul.mubr.msk.bf16.vlgmr.msra.gmra.mrb[72].mxu0 %vm480_vm0, %v3272_v16 }
 0xe7d   : > { %3393 = vmatpush1.bf16.msra.mxu0 %v12795_v18 }
 0xe7e   : > { %3394 = vmatprep.subr.bf16.mxu0 %v12798_v36 }
 0xe81   : > { %3395 = vmatpush1.bf16.msra.mxu0 %v12797_v12 }
 0xe82   : > { %3827 = vmatprep.subr.bf16.mxu0 %v12812_v17 }
 0xe96   : > { %v16982_v49 = vpop.f32.mrb[88].mxu1 }
 0xe97   : > { %v16984_v52 = vpop.f32.mrb[89].mxu1 }
 0xe98   : > { %v16986_v19 = vpop.f32.mrb[90].mxu1 }
 0xe99   : > { %v3792_v39 = vpack.c.bf16 %v16986_v19, %v16982_v49  ;;  %v16990_v51 = vpop.f32.mrb[91].mxu1 }
 0xe9a   : > { %v3791_v23 = vpack.c.bf16 %v16990_v51, %v16984_v52 }
 0xebd   : > { %v3245_v8 = vpop.xlane.xlu0 %3244 }
 0xebe   : > { %14986 = vrcp.f32 %v3245_v8 }
 0xec1   : > { %v3251_v60 = vpop.xlane.xlu0 %3250 }
 0xec2   : > { %v3248_v62 = vpop.xlane.xlu1 %3247 }
 0xec3   : > { %14988 = vrcp.f32 %v3248_v62 }
 0xec4   : > { %14990 = vrcp.f32 %v3251_v60 }
 0xec6   : > { %v3254_v9 = vpop.xlane.xlu1 %3253 }
 0xec7   : > { %14992 = vrcp.f32 %v3254_v9 }
 0xec8   : > { %v14987_v5 = vpop.eup %14986 }
 0xec9   : > { %v3264_v27 = vmul.f32 %v14987_v5, %v16955_v55 }
 0xecd   : > { %v14989_v35 = vpop.eup %14988 }
 0xece   : > { %v3266_v56 = vmul.f32 %v14989_v35, %v14975_v3  ;;  %v14991_v46 = vpop.eup %14990 }
 0xecf   : > { %v3268_v34 = vmul.f32 %v14991_v46, %v16961_v44  ;;  %v12811_v44 = vcombine.low %v17017_v61, %v17022_v59 }
 0xed0   : > { %v3273_v48 = vpack.c.bf16 %v3266_v56, %v3264_v27 }
 0xed1   : > { %v14993_v50 = vpop.eup %14992 }
 0xed2   : > { %13812 = vmatprep.mubr.msk.bf16.mxu0 %vm480_vm0, %v3273_v48  ;;  %v17008_v4 = vpop.f32.mrb[92].mxu1  ;;  %v3270_v25 = vmul.f32 %v14993_v50, %v16967_v22 }
 0xed3   : > { %v17012_v55 = vpop.f32.mrb[93].mxu1 }
 0xed4   : > { %v17024_v7 = vpop.f32.mrb[94].mxu1  ;;  %v3274_v3 = vpack.c.bf16 %v3270_v25, %v3268_v34 }
 0xed5   : > { %v3794_v63 = vpack.c.bf16 %v17024_v7, %v17008_v4  ;;  %v17032_v24 = vpop.f32.mrb[95].mxu1 }
 0xed6   : > { %13813 = vmatmul.mubr.msk.bf16.gmra.mrb[76].mxu0 %vm480_vm0, %v3274_v3  ;;  %v3793_v22 = vpack.c.bf16 %v17032_v24, %v17012_v55 }
 0xed7   : > { %3424 = vmatprep.mubr.bf16.mxu0 %v20967_v2 }
 0xeda   : > { %v13858_v37 = vpop.f32.mrb[96].mxu1 }
 0xedb   : > { %v17038_v33 = vmul.f32 0.17677669, %v13858_v37  ;;  %v3990_v54 = vpop.f32.mrb[97].mxu1 }
 0xedc   : > { %v13859_v14 = vpop.f32.mrb[98].mxu1  ;;  %v17040_v32 = vmul.f32 0.17677669, %v3990_v54 }
 0xedd   : > { %v17042_v11 = vmul.f32 0.17677669, %v13859_v14  ;;  %v3993_v21 = vpop.f32.mrb[99].mxu1  ;;  %v4035_v30 = vsel %vm480_vm0, %v17038_v33, -inf }
 0xede   : > { %4036 = vmax.xlane.f32.xlu0 %v4035_v30  ;;  %v17046_v1 = vmul.f32 0.17677669, %v3993_v21  ;;  %v4029_v13 = vsel %vm480_vm0, %v17040_v32, -inf }
 0xedf   : > { %v4038_v58 = vsel %vm480_vm0, %v17042_v11, -inf }
 0xee0   : > { %4039 = vmax.xlane.f32.xlu1 %v4038_v58  ;;  %v4032_v45 = vsel %vm480_vm0, %v17046_v1, -inf }
 0xee2   : > { %4030 = vmax.xlane.f32.xlu0 %v4029_v13 }
 0xee4   : > { %4033 = vmax.xlane.f32.xlu1 %v4032_v45 }
 0xef5   : > { %4123 = vrot.lane.b32.xlu1 %v16278_v6, %s20992_s30 }
 0xf00   : > { %v13862_v10 = vpop.f32.mrb[100].mxu1 }
 0xf01   : > { %v17056_v41 = vmul.f32 0.17677669, %v13862_v10  ;;  %v4006_v0 = vpop.f32.mrb[101].mxu1 }
 0xf02   : > { %v13863_v57 = vpop.f32.mrb[102].mxu1  ;;  %v17058_v15 = vmul.f32 0.17677669, %v4006_v0  ;;  %v3789_v0 = vld [vmem:[%s20947_s3 + $0x2d8] sm:$0xff] }
 0xf03   : > { %v4009_v16 = vpop.f32.mrb[103].mxu1  ;;  %v4047_v8 = vsel %vm480_vm0, %v17056_v41, -inf  ;;  %v17064_v18 = vmul.f32 0.17677669, %v13863_v57  ;;  %v3790_v57 = vld [vmem:[%s20947_s3 + $0x2f8] sm:$0xff] }
 0xf04   : > { %4048 = vmax.xlane.f32.xlu0 %v4047_v8  ;;  %v4041_v60 = vsel %vm480_vm0, %v17058_v15, -inf  ;;  %v17066_v26 = vmul.f32 0.17677669, %v4009_v16 }
 0xf05   : > { %v4050_v35 = vsel %vm480_vm0, %v17064_v18, -inf }
 0xf06   : > { %v4044_v40 = vsel %vm480_vm0, %v17066_v26, -inf }
 0xf08   : > { %4042 = vmax.xlane.f32.xlu0 %v4041_v60 }
 0xf10   : > { %v13890_v62 = vpop.f32.mrb[104].mxu1 }
 0xf11   : > { %v4413_v9 = vpop.f32.mrb[105].mxu1  ;;  %v17090_v17 = vmul.f32 0.17677669, %v13890_v62 }
 0xf12   : > { %v13891_v38 = vpop.f32.mrb[106].mxu1  ;;  %v17092_v37 = vmul.f32 0.17677669, %v4413_v9  ;;  %v12814_v9 = vcombine.high %v3789_v0, %v3790_v57 }
 0xf13   : > { %v4416_v42 = vpop.f32.mrb[107].mxu1  ;;  %v17070_v47 = vmul.f32 0.17677669, %v13891_v38  ;;  %v4458_v54 = vsel %vm480_vm0, %v17090_v17, -inf  ;;  %v12813_v38 = vcombine.low %v3789_v0, %v3790_v57 }
 0xf14   : > { %v17076_v48 = vmul.f32 0.17677669, %v4416_v42  ;;  %v4452_v21 = vsel %vm480_vm0, %v17092_v37, -inf  ;;  %v17117_v42 = vpop.permute.xlu0 %4121 }
 0xf15   : > { %v4461_v12 = vsel %vm480_vm0, %v17070_v47, -inf }
 0xf16   : > { %v4455_v50 = vsel %vm480_vm0, %v17076_v48, -inf }
 0xf18   : > { %v13894_v5 = vpop.f32.mrb[108].mxu1 }
 0xf19   : > { %v4429_v27 = vpop.f32.mrb[109].mxu1  ;;  %4051 = vmax.xlane.f32.xlu1 %v4050_v35  ;;  %v17096_v14 = vmul.f32 0.17677669, %v13894_v5 }
 0xf1a   : > { %v13895_v56 = vpop.f32.mrb[110].mxu1  ;;  %v17100_v30 = vmul.f32 0.17677669, %v4429_v27 }
 0xf1b   : > { %v4432_v46 = vpop.f32.mrb[111].mxu1  ;;  %v17080_v36 = vmul.f32 0.17677669, %v13895_v56  ;;  %v4470_v58 = vsel %vm480_vm0, %v17096_v14, -inf }
 0xf1c   : > { %v17084_v34 = vmul.f32 0.17677669, %v4432_v46  ;;  %v4464_v13 = vsel %vm480_vm0, %v17100_v30, -inf }
 0xf1d   : > { %4045 = vmax.xlane.f32.xlu1 %v4044_v40  ;;  %v4473_v25 = vsel %vm480_vm0, %v17080_v36, -inf }
 0xf1e   : > { %4125 = vrot.lane.b32.xlu0 %v16284_v20, %s20992_s30  ;;  %v4467_v3 = vsel %vm480_vm0, %v17084_v34, -inf }
 0xf21   : > { %4462 = vmax.xlane.f32.xlu1 %v4461_v12 }
 0xf25   : > { %4456 = vmax.xlane.f32.xlu1 %v4455_v50 }
 0xf29   : > { %4474 = vmax.xlane.f32.xlu1 %v4473_v25 }
 0xf2d   : > { %4468 = vmax.xlane.f32.xlu1 %v4467_v3 }
 0xf3d   : > { %4459 = vmax.xlane.f32.xlu0 %v4458_v54 }
 0xf41   : > { %4453 = vmax.xlane.f32.xlu0 %v4452_v21 }
 0xf45   : > { %4471 = vmax.xlane.f32.xlu0 %v4470_v58 }
 0xf49   : > { %4465 = vmax.xlane.f32.xlu0 %v4464_v13 }
 0xf4f   : > { %v13810_v45 = vpop.f32.mrb[72].mxu0 }
 0xf50   : > { %v3321_v10 = vpop.f32.mrb[73].mxu0 }
 0xf51   : > { %v13811_v16 = vpop.f32.mrb[74].mxu0 }
 0xf52   : > { %v3357_v8 = vpack.c.bf16 %v13811_v16, %v13810_v45  ;;  %v3324_v60 = vpop.f32.mrb[75].mxu0 }
 0xf53   : > { %v3356_v62 = vpack.c.bf16 %v3324_v60, %v3321_v10 }
 0xf55   : > { %12799 = vmatmul.mubr.msk.bf16.vlgmr.msra.gmra.mrb[56].mxu0 %vm1429_vm1, %v3356_v62 }
 0xf56   : > { %3828 = vmatpush1.bf16.msra.mxu0 %v12811_v44  ;;  %3434 = vmatprep.mubr.bf16.mxu0 %v20967_v2 }
 0xf57   : > { %3829 = vmatprep.subr.bf16.mxu0 %v12814_v9 }
 0xf5a   : > { %3830 = vmatpush1.bf16.msra.mxu0 %v12813_v38 }
 0xf5b   : > { %13864 = vmatprep.subr.bf16.mxu0 %v17117_v42 }
 0xf5d   : > { %12800 = vmatmul.mubr.msk.bf16.gmra.mrb[60].mxu0 %vm1429_vm1, %v3357_v8 }
 0xf5e   : > { %3444 = vmatprep.mubr.bf16.mxu0 %v20967_v2 }
 0xf6b   : > { %v4037_v5 = vpop.xlane.xlu0 %4036 }
 0xf6c   : > { %v4055_v35 = vsub.f32 %v17038_v33, %v4037_v5 }
 0xf6d   : > { %v4040_v27 = vpop.xlane.xlu1 %4039 }
 0xf6e   : > { %v4065_v56 = vmul.f32 1.442695, %v4055_v35  ;;  %v4056_v61 = vsub.f32 %v17042_v11, %v4040_v27 }
 0xf6f   : > { %v4031_v59 = vpop.xlane.xlu0 %4030 }
 0xf70   : > { %14994 = vpow2.f32 %v4065_v56  ;;  %v4067_v44 = vmul.f32 1.442695, %v4056_v61  ;;  %v4053_v46 = vsub.f32 %v17040_v32, %v4031_v59 }
 0xf71   : > { %v4034_v40 = vpop.xlane.xlu1 %4033 }
 0xf72   : > { %14996 = vpow2.f32 %v4067_v44  ;;  %v4061_v12 = vmul.f32 1.442695, %v4053_v46  ;;  %v4054_v50 = vsub.f32 %v17046_v1, %v4034_v40 }
 0xf74   : > { %14998 = vpow2.f32 %v4061_v12  ;;  %v4063_v25 = vmul.f32 1.442695, %v4054_v50 }
 0xf75   : > { %v4124_v62 = vpop.permute.xlu1 %4123 }
 0xf76   : > { %15000 = vpow2.f32 %v4063_v25 }
 0xf7a   : > { %v17126_v3 = vpop.eup %14994 }
 0xf7b   : > { %v4083_v33 = vsel %vm480_vm0, %v17126_v3, 0.0 }
 0xf7c   : > { %v17130_v54 = vpop.eup %14996  ;;  %4084 = vadd.xlane.f32.xlu0 %v4083_v33 }
 0xf7d   : > { %v4086_v11 = vsel %vm480_vm0, %v17130_v54, 0.0 }
 0xf7e   : > { %v17134_v32 = vpop.eup %14998  ;;  %4087 = vadd.xlane.f32.xlu1 %v4086_v11 }
 0xf7f   : > { %v4077_v1 = vsel %vm480_vm0, %v17134_v32, 0.0 }
 0xf80   : > { %v17138_v21 = vpop.eup %15000  ;;  %4078 = vadd.xlane.f32.xlu0 %v4077_v1 }
 0xf81   : > { %v4080_v58 = vsel %vm480_vm0, %v17138_v21, 0.0 }
 0xf82   : > { %4081 = vadd.xlane.f32.xlu1 %v4080_v58 }
 0xf91   : > { %v4049_v13 = vpop.xlane.xlu0 %4048 }
 0xf92   : > { %v4059_v45 = vsub.f32 %v17056_v41, %v4049_v13 }
 0xf94   : > { %v4073_v10 = vmul.f32 1.442695, %v4059_v45 }
 0xf95   : > { %v4043_v0 = vpop.xlane.xlu0 %4042 }
 0xf96   : > { %15002 = vpow2.f32 %v4073_v10  ;;  %v4057_v57 = vsub.f32 %v17058_v15, %v4043_v0  ;;  %4127 = vrot.lane.b32.xlu0 %v16290_v43, %s20992_s30 }
 0xf98   : > { %v4069_v16 = vmul.f32 1.442695, %v4057_v57 }
 0xf99   : > { %v4126_v33 = vpop.permute.xlu0 %4125 }
 0xf9a   : > { %15004 = vpow2.f32 %v4069_v16 }
 0xfa0   : > { %v17146_v8 = vpop.eup %15002 }
 0xfa1   : > { %v4095_v60 = vsel %vm480_vm0, %v17146_v8, 0.0 }
 0xfa2   : > { %4096 = vadd.xlane.f32.xlu1 %v4095_v60 }
 0xfa4   : > { %v17150_v9 = vpop.eup %15004 }
 0xfa5   : > { %v4089_v41 = vsel %vm480_vm0, %v17150_v9, 0.0 }
 0xfa6   : > { %4090 = vadd.xlane.f32.xlu1 %v4089_v41  ;;  %v4052_v38 = vpop.xlane.xlu1 %4051 }
 0xfa7   : > { %v4060_v15 = vsub.f32 %v17064_v18, %v4052_v38 }
 0xfa9   : > { %v4075_v5 = vmul.f32 1.442695, %v4060_v15  ;;  %v13814_v35 = vpop.f32.mrb[76].mxu0 }
 0xfaa   : > { %v3337_v27 = vpop.f32.mrb[77].mxu0  ;;  %v4046_v56 = vpop.xlane.xlu1 %4045 }
 0xfab   : > { %15006 = vpow2.f32 %v4075_v5  ;;  %v13815_v61 = vpop.f32.mrb[78].mxu0  ;;  %v4058_v59 = vsub.f32 %v17066_v26, %v4046_v56 }
 0xfac   : > { %v3359_v44 = vpack.c.bf16 %v13815_v61, %v13814_v35  ;;  %v3340_v46 = vpop.f32.mrb[79].mxu0 }
 0xfad   : > { %v4071_v40 = vmul.f32 1.442695, %v4058_v59  ;;  %v3358_v12 = vpack.c.bf16 %v3340_v46, %v3337_v27 }
 0xfae   : > { %v4463_v11 = vpop.xlane.xlu1 %4462 }
 0xfaf   : > { %15008 = vpow2.f32 %v4071_v40  ;;  %12801 = vmatmul.mubr.msk.bf16.gmra.mrb[64].mxu0 %vm1429_vm1, %v3358_v12 }
 0xfb0   : > { %3454 = vmatprep.mubr.bf16.mxu0 %v20967_v2 }
 0xfb2   : > { %v4457_v55 = vpop.xlane.xlu1 %4456 }
 0xfb5   : > { %v17158_v50 = vpop.eup %15006 }
 0xfb6   : > { %v4098_v18 = vsel %vm480_vm0, %v17158_v50, 0.0  ;;  %v4475_v13 = vpop.xlane.xlu1 %4474 }
 0xfb7   : > { %12802 = vmatmul.mubr.msk.bf16.gmra.mrb[68].mxu0 %vm1429_vm1, %v3359_v44  ;;  %4099 = vadd.xlane.f32.xlu1 %v4098_v18 }
 0xfb8   : > { %3859 = vmatprep.mubr.bf16.mxu0 %v20967_v2 }
 0xfb9   : > { %v17164_v26 = vpop.eup %15008 }
 0xfba   : > { %v4092_v25 = vsel %vm480_vm0, %v17164_v26, 0.0  ;;  %v4469_v57 = vpop.xlane.xlu1 %4468 }
 0xfbb   : > { %4093 = vadd.xlane.f32.xlu1 %v4092_v25 }
 0xfbf   : > { %12815 = vmatmul.mubr.msk.bf16.vlgmr.msra.gmra.mrb[56].mxu0 %vm1429_vm1, %v3791_v23  ;;  %v4479_v23 = vsub.f32 %v17070_v47, %v4463_v11 }
 0xfc0   : > { %13865 = vmatpush3.bf16.msra.mxu0 %v17117_v42  ;;  %3869 = vmatprep.mubr.bf16.mxu0 %v20967_v2 }
 0xfc1   : > { %13866 = vmatprep.subr.bf16.mxu0 %v4124_v62  ;;  %v4490_v49 = vmul.f32 1.442695, %v4479_v23  ;;  %v4211_v23 = vld [vmem:[%s20947_s3 + $0x338] sm:$0xff] }
 0xfc4   : > { %13867 = vmatpush3.bf16.msra.mxu0 %v4124_v62  ;;  %v4483_v62 = vsub.f32 %v17080_v36, %v4475_v13 }
 0xfc5   : > { %13868 = vmatprep.subr.bf16.mxu0 %v4126_v33 }
 0xfc6   : > { %v4498_v38 = vmul.f32 1.442695, %v4483_v62 }
 0xfc7   : > { %12816 = vmatmul.mubr.msk.bf16.gmra.mrb[60].mxu0 %vm1429_vm1, %v3792_v39 }
 0xfc8   : > { %13869 = vmatpush3.bf16.msra.mxu0 %v4126_v33  ;;  %3879 = vmatprep.mubr.bf16.mxu0 %v20967_v2 }
 0xfca   : > { %v4460_v52 = vpop.xlane.xlu0 %4459 }
 0xfcb   : > { %v4478_v51 = vsub.f32 %v17090_v17, %v4460_v52 }
 0xfcc   : > { %4546 = vrot.lane.b32.xlu1 %v16278_v6, %s20963_s12 }
 0xfcd   : > { %v4488_v42 = vmul.f32 1.442695, %v4478_v51  ;;  %v4210_v51 = vld [vmem:[%s20947_s3 + $0x318] sm:$0xff] }
 0xfce   : > { %v4454_v1 = vpop.xlane.xlu0 %4453 }
 0xfcf   : > { %15010 = vpow2.f32 %v4488_v42  ;;  %v4476_v58 = vsub.f32 %v17092_v37, %v4454_v1  ;;  %12817 = vmatmul.mubr.msk.bf16.gmra.mrb[64].mxu0 %vm1429_vm1, %v3793_v22  ;;  %v12827_v1 = vcombine.low %v4210_v51, %v4211_v23 }
 0xfd0   : > { %4548 = vrot.lane.b32.xlu1 %v16284_v20, %s20963_s12  ;;  %3889 = vmatprep.mubr.bf16.mxu0 %v20967_v2  ;;  %v4477_v20 = vsub.f32 %v17076_v48, %v4457_v55 }
 0xfd1   : > { %v4484_v19 = vmul.f32 1.442695, %v4476_v58  ;;  %v12828_v58 = vcombine.high %v4210_v51, %v4211_v23  ;;  %v4635_v51 = vld [vmem:[%s20947_s3 + $0x3d8] sm:$0xff] }
 0xfd2   : > { %v4486_v4 = vmul.f32 1.442695, %v4477_v20  ;;  %v4472_v37 = vpop.xlane.xlu0 %4471 }
 0xfd3   : > { %15012 = vpow2.f32 %v4484_v19  ;;  %v4482_v10 = vsub.f32 %v17096_v14, %v4472_v37 }
 0xfd4   : > { %15014 = vpow2.f32 %v4490_v49 }
 0xfd5   : > { %15016 = vpow2.f32 %v4486_v4  ;;  %v4496_v16 = vmul.f32 1.442695, %v4482_v10 }
 0xfd6   : > { %v4466_v48 = vpop.xlane.xlu0 %4465 }
 0xfd7   : > { %12818 = vmatmul.mubr.msk.bf16.gmra.mrb[68].mxu0 %vm1429_vm1, %v3794_v63  ;;  %v4480_v45 = vsub.f32 %v17100_v30, %v4466_v48 }
 0xfd9   : > { %v17195_v6 = vpop.eup %15010  ;;  %v4492_v0 = vmul.f32 1.442695, %v4480_v45 }
 0xfda   : > { %v4506_v39 = vsel %vm480_vm0, %v17195_v6, 0.0 }
 0xfdb   : > { %4507 = vadd.xlane.f32.xlu0 %v4506_v39  ;;  %15018 = vpow2.f32 %v4492_v0 }
 0xfdc   : > { %15020 = vpow2.f32 %v4496_v16 }
 0xfdd   : > { %v17199_v24 = vpop.eup %15012 }
 0xfde   : > { %v4500_v22 = vsel %vm480_vm0, %v17199_v24, 0.0  ;;  %v17204_v47 = vpop.eup %15014 }
 0xfdf   : > { %4501 = vadd.xlane.f32.xlu0 %v4500_v22  ;;  %v4509_v7 = vsel %vm480_vm0, %v17204_v47, 0.0  ;;  %v17208_v63 = vpop.eup %15016 }
 0xfe0   : > { %v4503_v17 = vsel %vm480_vm0, %v17208_v63, 0.0 }
 0xfe3   : > { %4510 = vadd.xlane.f32.xlu0 %v4509_v7 }
 0xfe5   : > { %v17220_v15 = vpop.eup %15018 }
 0xfe6   : > { %v17222_v5 = vpop.eup %15020  ;;  %v4512_v27 = vsel %vm480_vm0, %v17220_v15, 0.0 }
 0xff4   : > { %4504 = vadd.xlane.f32.xlu1 %v4503_v17 }
 0xff9   : > { %4544 = vrot.lane.b32.xlu0 %v16272_v53, %s20963_s12 }
0x1005   : > { %4550 = vrot.lane.b32.xlu1 %v16290_v43, %s20963_s12  ;;  %v4481_v43 = vsub.f32 %v17084_v34, %v4469_v57  ;;  %v4518_v34 = vsel %vm480_vm0, %v17222_v5, 0.0 }
0x1007   : > { %v4494_v35 = vmul.f32 1.442695, %v4481_v43 }
0x1009   : > { %v4085_v60 = vpop.xlane.xlu0 %4084 }
0x100b   : > { %v4088_v41 = vpop.xlane.xlu1 %4087 }
0x100c   : > { %15022 = vrcp.f32 %v4088_v41 }
0x100d   : > { %v4079_v53 = vpop.xlane.xlu0 %4078 }
0x100e   : > { %15024 = vrcp.f32 %v4079_v53 }
0x100f   : > { %15026 = vrcp.f32 %v4085_v60  ;;  %v4082_v30 = vpop.xlane.xlu1 %4081 }
0x1010   : > { %15028 = vrcp.f32 %v4082_v30 }
0x1011   : > { %v4128_v14 = vpop.permute.xlu0 %4127  ;;  %15030 = vpow2.f32 %v4498_v38 }
0x1012   : > { %13870 = vmatprep.subr.bf16.mxu0 %v4128_v14  ;;  %15032 = vpow2.f32 %v4494_v35 }
0x1013   : > { %13871 = vmatpush3.bf16.msra.mxu0 %v4128_v14 }
0x1014   : > { %4250 = vmatprep.subr.bf16.mxu0 %v12828_v58 }
0x1016   : > { %v15023_v36 = vpop.eup %15022 }
0x1017   : > { %v4108_v44 = vmul.f32 %v15023_v36, %v17130_v54 }
0x1018   : > { %v15025_v56 = vpop.eup %15024  ;;  %4513 = vadd.xlane.f32.xlu0 %v4512_v27 }
0x1019   : > { %v15027_v61 = vpop.eup %15026  ;;  %v4102_v46 = vmul.f32 %v15025_v56, %v17134_v32 }
0x101a   : > { %v15029_v59 = vpop.eup %15028  ;;  %v4106_v18 = vmul.f32 %v15027_v61, %v17126_v3 }
0x101b   : > { %v4104_v40 = vmul.f32 %v15029_v59, %v17138_v21  ;;  %v17231_v12 = vpop.eup %15030 }
0x101c   : > { %4519 = vadd.xlane.f32.xlu0 %v4518_v34  ;;  %v4118_v33 = vpack.c.bf16 %v4108_v44, %v4106_v18  ;;  %v4521_v54 = vsel %vm480_vm0, %v17231_v12, 0.0  ;;  %v17238_v11 = vpop.eup %15032 }
0x101d   : > { %v4117_v25 = vpack.c.bf16 %v4104_v40, %v4102_v46  ;;  %v4515_v32 = vsel %vm480_vm0, %v17238_v11, 0.0 }
0x101f   : > { %13872 = vmatprep.mubr.msk.bf16.mxu0 %vm480_vm0, %v4117_v25 }
0x1020   : > { %4522 = vadd.xlane.f32.xlu0 %v4521_v54  ;;  %13873 = vmatmul.mubr.msk.bf16.vlgmr.msra.gmra.mrb[80].mxu0 %vm480_vm0, %v4118_v33 }
0x1021   : > { %4251 = vmatpush1.bf16.msra.mxu0 %v12827_v1 }
0x1029   : > { %4516 = vadd.xlane.f32.xlu1 %v4515_v32 }
0x102f   : > { %v4097_v21 = vpop.xlane.xlu1 %4096 }
0x1033   : > { %v4091_v52 = vpop.xlane.xlu1 %4090 }
0x1044   : > { %v4100_v3 = vpop.xlane.xlu1 %4099 }
0x1045   : > { %15034 = vrcp.f32 %v4100_v3 }
0x1046   : > { %15036 = vrcp.f32 %v4091_v52 }
0x1047   : > { %15038 = vrcp.f32 %v4097_v21 }
0x1048   : > { %v4094_v42 = vpop.xlane.xlu1 %4093 }
0x1049   : > { %15040 = vrcp.f32 %v4094_v42 }
0x104c   : > { %v4547_v10 = vpop.permute.xlu1 %4546 }
0x104f   : > { %v15035_v49 = vpop.eup %15034 }
0x1050   : > { %v15037_v19 = vpop.eup %15036  ;;  %v4116_v20 = vmul.f32 %v15035_v49, %v17158_v50  ;;  %v4549_v57 = vpop.permute.xlu1 %4548 }
0x1051   : > { %v15039_v39 = vpop.eup %15038  ;;  %v4110_v22 = vmul.f32 %v15037_v19, %v17150_v9  ;;  %v4212_v9 = vld [vmem:[%s20947_s3 + $0x358] sm:$0xff] }
0x1052   : > { %v4114_v7 = vmul.f32 %v15039_v39, %v17146_v8  ;;  %v4213_v8 = vld [vmem:[%s20947_s3 + $0x378] sm:$0xff] }
0x1053   : > { %v15041_v55 = vpop.eup %15040  ;;  %v12830_v50 = vcombine.high %v4212_v9, %v4213_v8 }
0x1054   : > { %v4112_v4 = vmul.f32 %v15041_v55, %v17164_v26  ;;  %v4120_v37 = vpack.c.bf16 %v4116_v20, %v4114_v7  ;;  %v12829_v26 = vcombine.low %v4212_v9, %v4213_v8 }
0x1055   : > { %4252 = vmatprep.subr.bf16.mxu0 %v12830_v50 }
0x1056   : > { %v4119_v17 = vpack.c.bf16 %v4112_v4, %v4110_v22  ;;  %4253 = vmatpush1.bf16.msra.mxu0 %v12829_v26  ;;  %v4762_v26 = vld [vmem:[%s20952_s8 + $0x8] sm:$0x3] }
0x1058   : > { %13876 = vmatprep.mubr.msk.bf16.mxu0 %vm480_vm0, %v4119_v17 }
0x1059   : > { %13877 = vmatmul.mubr.msk.bf16.gmra.mrb[84].mxu0 %vm480_vm0, %v4120_v37 }
0x105a   : > { %4282 = vmatprep.mubr.bf16.mxu0 %v20967_v2 }
0x1068   : > { %v4508_v48 = vpop.xlane.xlu0 %4507 }
0x106c   : > { %v4502_v13 = vpop.xlane.xlu0 %4501 }
0x1070   : > { %v4511_v45 = vpop.xlane.xlu0 %4510 }
0x1071   : > { %15042 = vrcp.f32 %v4511_v45 }
0x1072   : > { %15044 = vrcp.f32 %v4502_v13 }
0x1073   : > { %15046 = vrcp.f32 %v4508_v48 }
0x1074   : > { %v4545_v0 = vpop.permute.xlu0 %4544 }
0x1075   : > { %13896 = vmatprep.subr.bf16.mxu1 %v4545_v0 }
0x1076   : > { %13897 = vmatpush3.bf16.msra.mxu1 %v4545_v0 }
0x1077   : > { %13898 = vmatprep.subr.bf16.mxu1 %v4547_v10 }
0x107a   : > { %13899 = vmatpush3.bf16.msra.mxu1 %v4547_v10 }
0x107b   : > { %13900 = vmatprep.subr.bf16.mxu1 %v4549_v57  ;;  %v15043_v62 = vpop.eup %15042 }
0x107c   : > { %v15045_v41 = vpop.eup %15044  ;;  %v4531_v30 = vmul.f32 %v15043_v62, %v17204_v47 }
0x107d   : > { %v15047_v53 = vpop.eup %15046  ;;  %v4525_v14 = vmul.f32 %v15045_v41, %v17199_v24  ;;  %v4633_v24 = vld [vmem:[%s20947_s3 + $0x398] sm:$0xff] }
0x107e   : > { %13901 = vmatpush3.bf16.msra.mxu1 %v4549_v57  ;;  %v4529_v36 = vmul.f32 %v15047_v53, %v17195_v6  ;;  %v4634_v6 = vld [vmem:[%s20947_s3 + $0x3b8] sm:$0xff]  ;;  %v4767_v57 = vrot.slane %v4762_v26, %v15967_v29 }
0x107f   : > { %v12844_v47 = vcombine.high %v4633_v24, %v4634_v6 }
0x1080   : > { %v4541_v27 = vpack.c.bf16 %v4531_v30, %v4529_v36 }
0x1081   : > { %v4505_v16 = vpop.xlane.xlu1 %4504  ;;  %4673 = vmatprep.subr.bf16.mxu0 %v12844_v47 }
0x1082   : > { %15048 = vrcp.f32 %v4505_v16  ;;  %v4771_v16 = vrot.slane %v4762_v26, %v15973_v31  ;;  %v5020_v26 = vld [vmem:[%s20948_s4 + $0xa8] sm:$0xff] }
0x1085   : > { %v4551_v60 = vpop.permute.xlu1 %4550 }
0x1086   : > { %13902 = vmatprep.subr.bf16.mxu1 %v4551_v60 }
0x1087   : > { %13903 = vmatpush3.bf16.msra.mxu1 %v4551_v60 }
0x108c   : > { %v15049_v38 = vpop.eup %15048 }
0x108d   : > { %v4527_v43 = vmul.f32 %v15049_v38, %v17208_v63 }
0x108f   : > { %v4540_v35 = vpack.c.bf16 %v4527_v43, %v4525_v14 }
0x1091   : > { %13904 = vmatprep.mubr.msk.bf16.mxu1 %vm480_vm0, %v4540_v35 }
0x1092   : > { %13905 = vmatmul.mubr.msk.bf16.vlgmr.msra.gmra.mrb[112].mxu1 %vm480_vm0, %v4541_v27 }
0x10a5   : > { %v4514_v56 = vpop.xlane.xlu0 %4513 }
0x10a9   : > { %v4520_v61 = vpop.xlane.xlu0 %4519 }
0x10ad   : > { %v4523_v59 = vpop.xlane.xlu0 %4522 }
0x10ae   : > { %15050 = vrcp.f32 %v4523_v59 }
0x10af   : > { %15052 = vrcp.f32 %v4514_v56 }
0x10b0   : > { %15054 = vrcp.f32 %v4520_v61 }
0x10b6   : > { %v4517_v44 = vpop.xlane.xlu1 %4516 }
0x10b7   : > { %15056 = vrcp.f32 %v4517_v44 }
0x10b8   : > { %v15051_v63 = vpop.eup %15050 }
0x10b9   : > { %v15053_v34 = vpop.eup %15052  ;;  %v4539_v18 = vmul.f32 %v15051_v63, %v17231_v12 }
0x10ba   : > { %v15055_v46 = vpop.eup %15054  ;;  %v4533_v25 = vmul.f32 %v15053_v34, %v17220_v15  ;;  %v4636_v15 = vld [vmem:[%s20947_s3 + $0x3f8] sm:$0xff] }
0x10bb   : > { %v4537_v54 = vmul.f32 %v15055_v46, %v17222_v5  ;;  %v12843_v5 = vcombine.low %v4633_v24, %v4634_v6  ;;  %v12846_v1 = vcombine.high %v4635_v51, %v4636_v15  ;;  %v12845_v58 = vcombine.low %v4635_v51, %v4636_v15 }
0x10bd   : > { %v4543_v21 = vpack.c.bf16 %v4539_v18, %v4537_v54 }
0x10c1   : > { %v15057_v40 = vpop.eup %15056 }
0x10c2   : > { %v4535_v33 = vmul.f32 %v15057_v40, %v17238_v11 }
0x10c4   : > { %v4542_v32 = vpack.c.bf16 %v4535_v33, %v4533_v25 }
0x10c6   : > { %13908 = vmatprep.mubr.msk.bf16.mxu1 %vm480_vm0, %v4542_v32 }
0x10c7   : > { %13909 = vmatmul.mubr.msk.bf16.gmra.mrb[116].mxu1 %vm480_vm0, %v4543_v21 }
0x10f3   : > { %v13874_v52 = vpop.f32.mrb[80].mxu0 }
0x10f4   : > { %v4179_v3 = vpop.f32.mrb[81].mxu0 }
0x10f5   : > { %v13875_v12 = vpop.f32.mrb[82].mxu0 }
0x10f6   : > { %v4215_v11 = vpack.c.bf16 %v13875_v12, %v13874_v52  ;;  %v4182_v23 = vpop.f32.mrb[83].mxu0 }
0x10f7   : > { %v4214_v42 = vpack.c.bf16 %v4182_v23, %v4179_v3 }
0x10f9   : > { %12831 = vmatmul.mubr.msk.bf16.vlgmr.msra.gmra.mrb[56].mxu0 %vm1429_vm1, %v4214_v42 }
0x10fa   : > { %4292 = vmatprep.mubr.bf16.mxu0 %v20967_v2  ;;  %4674 = vmatpush1.bf16.msra.mxu0 %v12843_v5 }
0x10fb   : > { %4675 = vmatprep.subr.bf16.mxu0 %v12846_v1 }
0x10fe   : > { %4676 = vmatpush1.bf16.msra.mxu0 %v12845_v58 }
0x1101   : > { %12832 = vmatmul.mubr.msk.bf16.gmra.mrb[60].mxu0 %vm1429_vm1, %v4215_v11 }
0x1102   : > { %4302 = vmatprep.mubr.bf16.mxu0 %v20967_v2 }
0x112c   : > { %v13878_v49 = vpop.f32.mrb[84].mxu0 }
0x112d   : > { %v4195_v19 = vpop.f32.mrb[85].mxu0 }
0x112e   : > { %v13879_v39 = vpop.f32.mrb[86].mxu0 }
0x112f   : > { %v4217_v55 = vpack.c.bf16 %v13879_v39, %v13878_v49  ;;  %v4198_v20 = vpop.f32.mrb[87].mxu0  ;;  %v5003_v39 = vld [vmem:[%s20948_s4 + $0x20] sm:$0xff] }
0x1130   : > { %v4216_v22 = vpack.c.bf16 %v4198_v20, %v4195_v19  ;;  %v4999_v19 = vld [vmem:[%s20948_s4] sm:$0xff] }
0x1131   : > { %v12851_v20 = vcombine.low %v4999_v19, %v5003_v39 }
0x1132   : > { %12833 = vmatmul.mubr.msk.bf16.gmra.mrb[64].mxu0 %vm1429_vm1, %v4216_v22  ;;  %v12852_v22 = vcombine.high %v4999_v19, %v5003_v39 }
0x1133   : > { %4312 = vmatprep.mubr.bf16.mxu0 %v20967_v2 }
0x1134   : > { %5809 = vmatprep.subr.bf16.mxu1 %v12852_v22  ;;  %v5048_v22 = vld [vmem:[%s20948_s4 + $0x188] sm:$0xff] }
0x1135   : > { %5810 = vmatpush1.bf16.msra.mxu1 %v12851_v20  ;;  %v5051_v20 = vld [vmem:[%s20948_s4 + $0x1a0] sm:$0xff] }
0x113a   : > { %12834 = vmatmul.mubr.msk.bf16.gmra.mrb[68].mxu0 %vm1429_vm1, %v4217_v55  ;;  %v5000_v55 = vld [vmem:[%s20948_s4 + $0x8] sm:$0xff] }
0x113b   : > { %4705 = vmatprep.mubr.bf16.mxu0 %v20967_v2 }
0x1165   : > { %v13906_v4 = vpop.f32.mrb[112].mxu1 }
0x1166   : > { %v4602_v7 = vpop.f32.mrb[113].mxu1 }
0x1167   : > { %v13907_v17 = vpop.f32.mrb[114].mxu1 }
0x1168   : > { %v4638_v37 = vpack.c.bf16 %v13907_v17, %v13906_v4  ;;  %v4605_v48 = vpop.f32.mrb[115].mxu1  ;;  %v5004_v4 = vld [vmem:[%s20948_s4 + $0x28] sm:$0xff]  ;;  %v5011_v17 = vld [vmem:[%s20948_s4 + $0x60] sm:$0xff] }
0x1169   : > { %v4637_v13 = vpack.c.bf16 %v4605_v48, %v4602_v7  ;;  %v5007_v7 = vld [vmem:[%s20948_s4 + $0x40] sm:$0xff]  ;;  %v12854_v48 = vcombine.high %v5000_v55, %v5004_v4 }
0x116b   : > { %12847 = vmatmul.mubr.msk.bf16.vlgmr.msra.gmra.mrb[56].mxu0 %vm1429_vm1, %v4637_v13  ;;  %v12860_v13 = vcombine.high %v5007_v7, %v5011_v17  ;;  %5882 = vmatprep.subr.bf16.mxu0 %v12854_v48 }
0x116c   : > { %4715 = vmatprep.mubr.bf16.mxu0 %v20967_v2 }
0x116d   : > { %5811 = vmatprep.subr.bf16.mxu1 %v12860_v13  ;;  %v5055_v13 = vld [vmem:[%s20948_s4 + $0x1c0] sm:$0xff] }
0x1173   : > { %12848 = vmatmul.mubr.msk.bf16.gmra.mrb[60].mxu0 %vm1429_vm1, %v4638_v37  ;;  %v12853_v37 = vcombine.low %v5000_v55, %v5004_v4  ;;  %v5047_v55 = vld [vmem:[%s20948_s4 + $0x180] sm:$0xff]  ;;  %v5052_v4 = vld [vmem:[%s20948_s4 + $0x1a8] sm:$0xff] }
0x1174   : > { %4725 = vmatprep.mubr.bf16.mxu0 %v20967_v2  ;;  %v12902_v48 = vcombine.high %v5048_v22, %v5052_v4 }
0x1175   : > { %5883 = vmatpush1.bf16.msra.mxu0 %v12853_v37  ;;  %v12900_v37 = vcombine.high %v5047_v55, %v5051_v20 }
0x119a   : > { %v13910_v45 = vpop.f32.mrb[116].mxu1 }
0x119b   : > { %v4618_v10 = vpop.f32.mrb[117].mxu1 }
0x119c   : > { %v13911_v0 = vpop.f32.mrb[118].mxu1 }
0x119d   : > { %v4640_v9 = vpack.c.bf16 %v13911_v0, %v13910_v45  ;;  %v4621_v8 = vpop.f32.mrb[119].mxu1  ;;  %v5008_v45 = vld [vmem:[%s20948_s4 + $0x48] sm:$0xff]  ;;  %v5015_v0 = vld [vmem:[%s20948_s4 + $0x80] sm:$0xff] }
0x119e   : > { %v4639_v50 = vpack.c.bf16 %v4621_v8, %v4618_v10  ;;  %v5012_v10 = vld [vmem:[%s20948_s4 + $0x68] sm:$0xff]  ;;  %v5019_v8 = vld [vmem:[%s20948_s4 + $0xa0] sm:$0xff] }
0x11a0   : > { %12849 = vmatmul.mubr.msk.bf16.gmra.mrb[64].mxu0 %vm1429_vm1, %v4639_v50  ;;  %v5016_v50 = vld [vmem:[%s20948_s4 + $0x88] sm:$0xff] }
0x11a1   : > { %4735 = vmatprep.mubr.bf16.mxu0 %v20967_v2 }
0x11a8   : > { %12850 = vmatmul.mubr.msk.bf16.gmra.mrb[68].mxu0 %vm1429_vm1, %v4640_v9  ;;  %v12862_v9 = vcombine.high %v5008_v45, %v5012_v10 }
0x11aa   : > { %5884 = vmatprep.subr.bf16.mxu0 %v12862_v9  ;;  %v12899_v9 = vcombine.low %v5047_v55, %v5051_v20 }
0x123e   : > { %v4707_v60 = vpop.f32.mrb[56].mxu0 }
0x123f   : > { %v17305_v62 = vadd.f32 %v4767_v57, %v4707_v60  ;;  %v4709_v41 = vpop.f32.mrb[57].mxu0  ;;  %v12868_v60 = vcombine.high %v5015_v0, %v5019_v8 }
0x1240   : > { %v17307_v53 = vadd.f32 %v4771_v16, %v4709_v41  ;;  %v4711_v38 = vpop.f32.mrb[58].mxu0  ;;  %v12870_v41 = vcombine.high %v5016_v50, %v5020_v26 }
0x1241   : > { %v17309_v30 = vadd.f32 %v4767_v57, %v4711_v38  ;;  %v4713_v14 = vpop.f32.mrb[59].mxu0  ;;  %v5023_v38 = vld [vmem:[%s20948_s4 + $0xc0] sm:$0xff] }
0x1242   : > { %v4790_v43 = vadd.f32 %v17307_v53, %v17305_v62  ;;  %v17313_v36 = vadd.f32 %v4771_v16, %v4713_v14  ;;  %v5027_v14 = vld [vmem:[%s20948_s4 + $0xe0] sm:$0xff] }
0x1244   : > { %v4793_v35 = vadd.f32 %v17313_v36, %v17309_v30  ;;  %4791 = vadd.xlane.f32.xlu0 %v4790_v43  ;;  %v5024_v43 = vld [vmem:[%s20948_s4 + $0xc8] sm:$0xff] }
0x1246   : > { %4794 = vadd.xlane.f32.xlu1 %v4793_v35  ;;  %v4717_v27 = vpop.f32.mrb[60].mxu0  ;;  %v5028_v35 = vld [vmem:[%s20948_s4 + $0xe8] sm:$0xff] }
0x1247   : > { %v17317_v56 = vadd.f32 %v4767_v57, %v4717_v27  ;;  %v4719_v61 = vpop.f32.mrb[61].mxu0  ;;  %v12867_v27 = vcombine.low %v5015_v0, %v5019_v8  ;;  %v5060_v0 = vld [vmem:[%s20948_s4 + $0x1e8] sm:$0xff]  ;;  %v12901_v8 = vcombine.low %v5048_v22, %v5052_v4 }
0x1248   : > { %v17319_v59 = vadd.f32 %v4771_v16, %v4719_v61  ;;  %v4721_v44 = vpop.f32.mrb[62].mxu0  ;;  %v12869_v61 = vcombine.low %v5016_v50, %v5020_v26 }
0x1249   : > { %v17321_v24 = vadd.f32 %v4767_v57, %v4721_v44  ;;  %v4723_v6 = vpop.f32.mrb[63].mxu0  ;;  %v12876_v44 = vcombine.high %v5023_v38, %v5027_v14 }
0x124a   : > { %v4796_v47 = vadd.f32 %v17319_v59, %v17317_v56  ;;  %v17325_v63 = vadd.f32 %v4771_v16, %v4723_v6  ;;  %v12878_v6 = vcombine.high %v5024_v43, %v5028_v35 }
0x124c   : > { %v4799_v34 = vadd.f32 %v17325_v63, %v17321_v24  ;;  %4797 = vadd.xlane.f32.xlu0 %v4796_v47  ;;  %v5031_v47 = vld [vmem:[%s20948_s4 + $0x100] sm:$0xff] }
0x124e   : > { %4800 = vadd.xlane.f32.xlu1 %v4799_v34  ;;  %v5035_v34 = vld [vmem:[%s20948_s4 + $0x120] sm:$0xff] }
0x1273   : > { %v4727_v46 = vpop.f32.mrb[64].mxu0 }
0x1274   : > { %v17329_v40 = vadd.f32 %v4767_v57, %v4727_v46  ;;  %v4729_v18 = vpop.f32.mrb[65].mxu0  ;;  %v5032_v46 = vld [vmem:[%s20948_s4 + $0x108] sm:$0xff] }
0x1275   : > { %v17331_v25 = vadd.f32 %v4771_v16, %v4729_v18  ;;  %v4731_v33 = vpop.f32.mrb[66].mxu0  ;;  %v5036_v18 = vld [vmem:[%s20948_s4 + $0x128] sm:$0xff] }
0x1276   : > { %v17333_v54 = vadd.f32 %v4767_v57, %v4731_v33  ;;  %v4733_v32 = vpop.f32.mrb[67].mxu0  ;;  %v12875_v33 = vcombine.low %v5023_v38, %v5027_v14 }
0x1277   : > { %v4802_v21 = vadd.f32 %v17331_v25, %v17329_v40  ;;  %v17337_v52 = vadd.f32 %v4771_v16, %v4733_v32  ;;  %v12877_v32 = vcombine.low %v5024_v43, %v5028_v35 }
0x1279   : > { %v4805_v3 = vadd.f32 %v17337_v52, %v17333_v54  ;;  %4803 = vadd.xlane.f32.xlu0 %v4802_v21  ;;  %v12884_v21 = vcombine.high %v5031_v47, %v5035_v34 }
0x127b   : > { %4806 = vadd.xlane.f32.xlu1 %v4805_v3  ;;  %v4737_v51 = vpop.f32.mrb[68].mxu0  ;;  %v12886_v3 = vcombine.high %v5032_v46, %v5036_v18 }
0x127c   : > { %v17341_v15 = vadd.f32 %v4767_v57, %v4737_v51  ;;  %v4739_v12 = vpop.f32.mrb[69].mxu0  ;;  %v5039_v51 = vld [vmem:[%s20948_s4 + $0x140] sm:$0xff] }
0x127d   : > { %v17343_v11 = vadd.f32 %v4771_v16, %v4739_v12  ;;  %v4741_v23 = vpop.f32.mrb[70].mxu0  ;;  %v5043_v12 = vld [vmem:[%s20948_s4 + $0x160] sm:$0xff] }
0x127e   : > { %v17345_v5 = vadd.f32 %v4767_v57, %v4741_v23  ;;  %v4743_v42 = vpop.f32.mrb[71].mxu0  ;;  %v12859_v57 = vcombine.low %v5007_v7, %v5011_v17  ;;  %v5040_v23 = vld [vmem:[%s20948_s4 + $0x148] sm:$0xff]  ;;  %v12892_v19 = vcombine.high %v5039_v51, %v5043_v12  ;;  %v12891_v7 = vcombine.low %v5039_v51, %v5043_v12 }
0x127f   : > { %v4808_v1 = vadd.f32 %v17343_v11, %v17341_v15  ;;  %v17349_v58 = vadd.f32 %v4771_v16, %v4743_v42  ;;  %v12861_v16 = vcombine.low %v5008_v45, %v5012_v10  ;;  %v5044_v42 = vld [vmem:[%s20948_s4 + $0x168] sm:$0xff]  ;;  %v5059_v45 = vld [vmem:[%s20948_s4 + $0x1e0] sm:$0xff] }
0x1280   : > { %5812 = vmatpush1.bf16.msra.mxu1 %v12859_v57  ;;  %v12894_v39 = vcombine.high %v5040_v23, %v5044_v42  ;;  %v12893_v17 = vcombine.low %v5040_v23, %v5044_v42  ;;  %v5056_v10 = vld [vmem:[%s20948_s4 + $0x1c8] sm:$0xff]  ;;  %v12908_v50 = vcombine.high %v5055_v13, %v5059_v45  ;;  %v5063_v57 = vld [vmem:[%s20948_s4 + $0x200] sm:$0xff]  ;;  %v12907_v38 = vcombine.low %v5055_v13, %v5059_v45 }
0x1281   : > { %v4811_v49 = vadd.f32 %v17349_v58, %v17345_v5  ;;  %4809 = vadd.xlane.f32.xlu0 %v4808_v1  ;;  %5885 = vmatpush1.bf16.msra.mxu0 %v12861_v16  ;;  %v12883_v1 = vcombine.low %v5031_v47, %v5035_v34  ;;  %v12910_v26 = vcombine.high %v5056_v10, %v5060_v0  ;;  %v5067_v16 = vld [vmem:[%s20948_s4 + $0x220] sm:$0xff] }
0x1282   : > { %5813 = vmatprep.subr.bf16.mxu1 %v12868_v60  ;;  %5886 = vmatprep.subr.bf16.mxu0 %v12870_v41  ;;  %v5064_v60 = vld [vmem:[%s20948_s4 + $0x208] sm:$0xff]  ;;  %v12909_v14 = vcombine.low %v5056_v10, %v5060_v0  ;;  %v12916_v43 = vcombine.high %v5063_v57, %v5067_v16  ;;  %v5079_v10 = vld [vmem:[%s20948_s4 + $0x280] sm:$0xff] }
0x1283   : > { %4812 = vadd.xlane.f32.xlu1 %v4811_v49  ;;  %v12885_v49 = vcombine.low %v5032_v46, %v5036_v18  ;;  %v5068_v41 = vld [vmem:[%s20948_s4 + $0x228] sm:$0xff]  ;;  %v5083_v0 = vld [vmem:[%s20948_s4 + $0x2a0] sm:$0xff] }
0x1284   : > { %5814 = vmatpush1.bf16.msra.mxu1 %v12867_v27  ;;  %v12918_v35 = vcombine.high %v5064_v60, %v5068_v41  ;;  %v12915_v27 = vcombine.low %v5063_v57, %v5067_v16 }
0x1285   : > { %5887 = vmatpush1.bf16.msra.mxu0 %v12869_v61  ;;  %5815 = vmatprep.subr.bf16.mxu1 %v12876_v44  ;;  %v12917_v61 = vcombine.low %v5064_v60, %v5068_v41  ;;  %v5087_v60 = vld [vmem:[%s20948_s4 + $0x2c0] sm:$0xff] }
0x1286   : > { %5888 = vmatprep.subr.bf16.mxu0 %v12878_v6  ;;  %v5091_v41 = vld [vmem:[%s20948_s4 + $0x2e0] sm:$0xff] }
0x1288   : > { %5816 = vmatpush1.bf16.msra.mxu1 %v12875_v33 }
0x1289   : > { %5889 = vmatpush1.bf16.msra.mxu0 %v12877_v32  ;;  %5817 = vmatprep.subr.bf16.mxu1 %v12884_v21 }
0x128a   : > { %5890 = vmatprep.subr.bf16.mxu0 %v12886_v3 }
0x128c   : > { %5818 = vmatpush1.bf16.msra.mxu1 %v12883_v1 }
0x128d   : > { %5891 = vmatpush1.bf16.msra.mxu0 %v12885_v49  ;;  %5819 = vmatprep.subr.bf16.mxu1 %v12892_v19 }
0x128e   : > { %5892 = vmatprep.subr.bf16.mxu0 %v12894_v39 }
0x1290   : > { %5820 = vmatpush1.bf16.msra.mxu1 %v12891_v7  ;;  %v5071_v7 = vld [vmem:[%s20948_s4 + $0x240] sm:$0xff] }
0x1291   : > { %5893 = vmatpush1.bf16.msra.mxu0 %v12893_v17  ;;  %5821 = vmatprep.subr.bf16.mxu1 %v12900_v37  ;;  %v5076_v37 = vld [vmem:[%s20948_s4 + $0x268] sm:$0xff] }
0x1292   : > { %5894 = vmatprep.subr.bf16.mxu0 %v12902_v48 }
0x1294   : > { %5822 = vmatpush1.bf16.msra.mxu1 %v12899_v9  ;;  %v5080_v9 = vld [vmem:[%s20948_s4 + $0x288] sm:$0xff] }
0x1295   : > { %5895 = vmatpush1.bf16.msra.mxu0 %v12901_v8  ;;  %5823 = vmatprep.subr.bf16.mxu1 %v12908_v50  ;;  %v12932_v8 = vcombine.high %v5079_v10, %v5083_v0  ;;  %v5084_v50 = vld [vmem:[%s20948_s4 + $0x2a8] sm:$0xff] }
0x1296   : > { %5896 = vmatprep.subr.bf16.mxu0 %v12910_v26  ;;  %v12931_v26 = vcombine.low %v5079_v10, %v5083_v0  ;;  %v12933_v57 = vcombine.low %v5080_v9, %v5084_v50  ;;  %v12934_v16 = vcombine.high %v5080_v9, %v5084_v50  ;;  %v5124_v10 = vld [vmem:[%s20948_s4 + $0x3e8] sm:$0xff]  ;;  %v17588_v50 = vld [vmem:[%s20948_s4 + $0x10] sm:$0xff] }
0x1298   : > { %5824 = vmatpush1.bf16.msra.mxu1 %v12907_v38  ;;  %v5088_v38 = vld [vmem:[%s20948_s4 + $0x2c8] sm:$0xff] }
0x1299   : > { %5897 = vmatpush1.bf16.msra.mxu0 %v12909_v14  ;;  %5825 = vmatprep.subr.bf16.mxu1 %v12916_v43  ;;  %v12940_v14 = vcombine.high %v5087_v60, %v5091_v41  ;;  %v5092_v43 = vld [vmem:[%s20948_s4 + $0x2e8] sm:$0xff] }
0x129a   : > { %5898 = vmatprep.subr.bf16.mxu0 %v12918_v35  ;;  %v12939_v35 = vcombine.low %v5087_v60, %v5091_v41 }
0x129c   : > { %5826 = vmatpush1.bf16.msra.mxu1 %v12915_v27  ;;  %v12941_v27 = vcombine.low %v5088_v38, %v5092_v43 }
0x129d   : > { %5899 = vmatpush1.bf16.msra.mxu0 %v12917_v61  ;;  %v12942_v61 = vcombine.high %v5088_v38, %v5092_v43  ;;  %v17607_v38 = vld [vmem:[%s20948_s4 + $0x38] sm:$0xff] }
0x12d1   : > { %v4792_v44 = vpop.xlane.xlu0 %4791 }
0x12d2   : > { %v4815_v6 = vmul.f32 0.00390625, %v4792_v44  ;;  %v5095_v44 = vld [vmem:[%s20948_s4 + $0x300] sm:$0xff] }
0x12d3   : > { %v4795_v47 = vpop.xlane.xlu1 %4794 }
0x12d4   : > { %v17462_v34 = vsub.f32 %v17305_v62, %v4815_v6  ;;  %v17465_v46 = vsub.f32 %v17307_v53, %v4815_v6  ;;  %v4816_v18 = vmul.f32 0.00390625, %v4795_v47  ;;  %v5099_v6 = vld [vmem:[%s20948_s4 + $0x320] sm:$0xff]  ;;  %v5096_v47 = vld [vmem:[%s20948_s4 + $0x308] sm:$0xff] }
0x12d6   : > { %v4839_v33 = vmul.f32 %v17462_v34, %v17462_v34  ;;  %v4840_v32 = vmul.f32 %v17465_v46, %v17465_v46  ;;  %v17472_v21 = vsub.f32 %v17309_v30, %v4816_v18  ;;  %v17475_v3 = vsub.f32 %v17313_v36, %v4816_v18 }
0x12d7   : > { %v12948_v18 = vcombine.high %v5095_v44, %v5099_v6 }
0x12d8   : > { %v4841_v62 = vmul.f32 %v17472_v21, %v17472_v21  ;;  %v4842_v53 = vmul.f32 %v17475_v3, %v17475_v3  ;;  %v4855_v51 = vadd.f32 %v4840_v32, %v4839_v33  ;;  %v5100_v33 = vld [vmem:[%s20948_s4 + $0x328] sm:$0xff]  ;;  %v12947_v32 = vcombine.low %v5095_v44, %v5099_v6 }
0x12d9   : > { %v4798_v12 = vpop.xlane.xlu0 %4797 }
0x12da   : > { %v4817_v23 = vmul.f32 0.00390625, %v4798_v12  ;;  %4856 = vadd.xlane.f32.xlu0 %v4855_v51  ;;  %v4858_v42 = vadd.f32 %v4842_v53, %v4841_v62  ;;  %v12949_v62 = vcombine.low %v5096_v47, %v5100_v33  ;;  %v12950_v53 = vcombine.high %v5096_v47, %v5100_v33  ;;  %v5103_v51 = vld [vmem:[%s20948_s4 + $0x340] sm:$0xff] }
0x12db   : > { %v4801_v1 = vpop.xlane.xlu1 %4800  ;;  %v5107_v12 = vld [vmem:[%s20948_s4 + $0x360] sm:$0xff] }
0x12dc   : > { %v17482_v49 = vsub.f32 %v17317_v56, %v4817_v23  ;;  %v17485_v30 = vsub.f32 %v17319_v59, %v4817_v23  ;;  %v4818_v36 = vmul.f32 0.00390625, %v4801_v1  ;;  %4859 = vadd.xlane.f32.xlu1 %v4858_v42  ;;  %v5104_v23 = vld [vmem:[%s20948_s4 + $0x348] sm:$0xff]  ;;  %v12956_v42 = vcombine.high %v5103_v51, %v5107_v12 }
0x12dd   : > { %v5108_v1 = vld [vmem:[%s20948_s4 + $0x368] sm:$0xff] }
0x12de   : > { %v4843_v19 = vmul.f32 %v17482_v49, %v17482_v49  ;;  %v4844_v39 = vmul.f32 %v17485_v30, %v17485_v30  ;;  %v17492_v55 = vsub.f32 %v17321_v24, %v4818_v36  ;;  %v17495_v20 = vsub.f32 %v17325_v63, %v4818_v36  ;;  %v5075_v24 = vld [vmem:[%s20948_s4 + $0x260] sm:$0xff]  ;;  %v5072_v63 = vld [vmem:[%s20948_s4 + $0x248] sm:$0xff] }
0x12df   : > { %v12924_v17 = vcombine.high %v5071_v7, %v5075_v24  ;;  %v12923_v48 = vcombine.low %v5071_v7, %v5075_v24  ;;  %v12925_v13 = vcombine.low %v5072_v63, %v5076_v37  ;;  %v12926_v45 = vcombine.high %v5072_v63, %v5076_v37  ;;  %v5116_v7 = vld [vmem:[%s20948_s4 + $0x3a8] sm:$0xff]  ;;  %v5119_v37 = vld [vmem:[%s20948_s4 + $0x3c0] sm:$0xff] }
0x12e0   : > { %v4845_v56 = vmul.f32 %v17492_v55, %v17492_v55  ;;  %v4846_v59 = vmul.f32 %v17495_v20, %v17495_v20  ;;  %v4861_v22 = vadd.f32 %v4844_v39, %v4843_v19  ;;  %v12955_v36 = vcombine.low %v5103_v51, %v5107_v12 }
0x12e1   : > { %5827 = vmatprep.subr.bf16.mxu1 %v12924_v17  ;;  %5900 = vmatprep.subr.bf16.mxu0 %v12926_v45  ;;  %v12957_v19 = vcombine.low %v5104_v23, %v5108_v1  ;;  %v12958_v39 = vcombine.high %v5104_v23, %v5108_v1 }
0x12e2   : > { %4862 = vadd.xlane.f32.xlu0 %v4861_v22  ;;  %v4864_v4 = vadd.f32 %v4846_v59, %v4845_v56  ;;  %5828 = vmatpush1.bf16.msra.mxu1 %v12923_v48  ;;  %v5111_v56 = vld [vmem:[%s20948_s4 + $0x380] sm:$0xff]  ;;  %v5112_v22 = vld [vmem:[%s20948_s4 + $0x388] sm:$0xff] }
0x12e3   : > { %5901 = vmatpush1.bf16.msra.mxu0 %v12925_v13  ;;  %5829 = vmatprep.subr.bf16.mxu1 %v12932_v8  ;;  %v5115_v59 = vld [vmem:[%s20948_s4 + $0x3a0] sm:$0xff]  ;;  %v12965_v63 = vcombine.low %v5112_v22, %v5116_v7  ;;  %v12966_v17 = vcombine.high %v5112_v22, %v5116_v7  ;;  %v5120_v13 = vld [vmem:[%s20948_s4 + $0x3c8] sm:$0xff] }
0x12e4   : > { %4865 = vadd.xlane.f32.xlu1 %v4864_v4  ;;  %5902 = vmatprep.subr.bf16.mxu0 %v12934_v16  ;;  %v12964_v4 = vcombine.high %v5111_v56, %v5115_v59  ;;  %v12963_v24 = vcombine.low %v5111_v56, %v5115_v59  ;;  %v5123_v48 = vld [vmem:[%s20948_s4 + $0x3e0] sm:$0xff]  ;;  %v12973_v9 = vcombine.low %v5120_v13, %v5124_v10 }
0x12e5   : > { %v12972_v45 = vcombine.high %v5119_v37, %v5123_v48  ;;  %v12971_v0 = vcombine.low %v5119_v37, %v5123_v48  ;;  %v12974_v8 = vcombine.high %v5120_v13, %v5124_v10  ;;  %v4919_v48 = vld [vmem:[%s20952_s8 + $0xa] sm:$0x3] }
0x12e6   : > { %5830 = vmatpush1.bf16.msra.mxu1 %v12931_v26  ;;  %v17593_v26 = vld [vmem:[%s20948_s4 + $0x30] sm:$0xff] }
0x12e7   : > { %5903 = vmatpush1.bf16.msra.mxu0 %v12933_v57  ;;  %5831 = vmatprep.subr.bf16.mxu1 %v12940_v14  ;;  %v17598_v57 = vld [vmem:[%s20948_s4 + $0x18] sm:$0xff]  ;;  %v12855_v60 = vcombine.low %v17588_v50, %v17593_v26  ;;  %v12856_v41 = vcombine.high %v17588_v50, %v17593_v26  ;;  %v5025_v50 = vld [vmem:[%s20948_s4 + $0xd0] sm:$0xff] }
0x12e8   : > { %5904 = vmatprep.subr.bf16.mxu0 %v12942_v61  ;;  %v12857_v43 = vcombine.low %v17598_v57, %v17607_v38 }
0x12ea   : > { %5832 = vmatpush1.bf16.msra.mxu1 %v12939_v35  ;;  %v12858_v35 = vcombine.high %v17598_v57, %v17607_v38  ;;  %v5029_v57 = vld [vmem:[%s20948_s4 + $0xf0] sm:$0xff]  ;;  %v5026_v38 = vld [vmem:[%s20948_s4 + $0xd8] sm:$0xff] }
0x12eb   : > { %5905 = vmatpush1.bf16.msra.mxu0 %v12941_v27  ;;  %5833 = vmatprep.subr.bf16.mxu1 %v12948_v18 }
0x12ec   : > { %5906 = vmatprep.subr.bf16.mxu0 %v12950_v53 }
0x12ee   : > { %5834 = vmatpush1.bf16.msra.mxu1 %v12947_v32 }
0x12ef   : > { %5907 = vmatpush1.bf16.msra.mxu0 %v12949_v62  ;;  %5835 = vmatprep.subr.bf16.mxu1 %v12956_v42 }
0x12f0   : > { %5908 = vmatprep.subr.bf16.mxu0 %v12958_v39 }
0x12f2   : > { %5836 = vmatpush1.bf16.msra.mxu1 %v12955_v36 }
0x12f3   : > { %5909 = vmatpush1.bf16.msra.mxu0 %v12957_v19  ;;  %5837 = vmatprep.subr.bf16.mxu1 %v12964_v4 }
0x12f4   : > { %5910 = vmatprep.subr.bf16.mxu0 %v12966_v17 }
0x12f6   : > { %5838 = vmatpush1.bf16.msra.mxu1 %v12963_v24 }
0x12f7   : > { %5911 = vmatpush1.bf16.msra.mxu0 %v12965_v63  ;;  %5839 = vmatprep.subr.bf16.mxu1 %v12972_v45 }
0x12f8   : > { %5912 = vmatprep.subr.bf16.mxu0 %v12974_v8  ;;  %v4947_v8 = vld [vmem:[%s20952_s8 + $0xc] sm:$0x3] }
0x12fa   : > { %5840 = vmatpush1.bf16.msra.mxu1 %v12971_v0  ;;  %v17657_v0 = vrot.slane %v4919_v48, %v15967_v29 }
0x12fb   : > { %5913 = vmatpush1.bf16.msra.mxu0 %v12973_v9  ;;  %5955 = vmatprep.subr.bf16.mxu1 %v12856_v41  ;;  %v17660_v9 = vrot.slane %v4919_v48, %v15973_v31 }
0x12fc   : > { %6028 = vmatprep.subr.bf16.mxu0 %v12858_v35 }
0x1306   : > { %v4804_v16 = vpop.xlane.xlu0 %4803 }
0x1307   : > { %v4819_v14 = vmul.f32 0.00390625, %v4804_v16 }
0x1308   : > { %v4807_v27 = vpop.xlane.xlu1 %4806 }
0x1309   : > { %v17614_v61 = vsub.f32 %v17329_v40, %v4819_v14  ;;  %v17617_v44 = vsub.f32 %v17331_v25, %v4819_v14  ;;  %v4820_v6 = vmul.f32 0.00390625, %v4807_v27  ;;  %v17668_v27 = vrot.slane %v4947_v8, %v15973_v31 }
0x130b   : > { %v4847_v47 = vmul.f32 %v17614_v61, %v17614_v61  ;;  %v4848_v18 = vmul.f32 %v17617_v44, %v17617_v44  ;;  %v17624_v33 = vsub.f32 %v17333_v54, %v4820_v6  ;;  %v17627_v32 = vsub.f32 %v17337_v52, %v4820_v6 }
0x130c   : > { %v17671_v6 = vrot.slane %v4947_v8, %v15967_v29 }
0x130d   : > { %v4849_v40 = vmul.f32 %v17624_v33, %v17624_v33  ;;  %v4850_v25 = vmul.f32 %v17627_v32, %v17627_v32  ;;  %v4867_v62 = vadd.f32 %v4848_v18, %v4847_v47 }
0x130e   : > { %v4810_v53 = vpop.xlane.xlu0 %4809 }
0x130f   : > { %v4821_v51 = vmul.f32 0.00390625, %v4810_v53  ;;  %4868 = vadd.xlane.f32.xlu0 %v4867_v62  ;;  %v4870_v12 = vadd.f32 %v4850_v25, %v4849_v40 }
0x1310   : > { %v4813_v23 = vpop.xlane.xlu1 %4812 }
0x1311   : > { %v17634_v42 = vsub.f32 %v17341_v15, %v4821_v51  ;;  %v17637_v54 = vsub.f32 %v17343_v11, %v4821_v51  ;;  %v4822_v52 = vmul.f32 0.00390625, %v4813_v23  ;;  %4871 = vadd.xlane.f32.xlu1 %v4870_v12 }
0x1313   : > { %v4851_v1 = vmul.f32 %v17634_v42, %v17634_v42  ;;  %v4852_v36 = vmul.f32 %v17637_v54, %v17637_v54  ;;  %v17644_v19 = vsub.f32 %v17345_v5, %v4822_v52  ;;  %v17647_v39 = vsub.f32 %v17349_v58, %v4822_v52 }
0x1315   : > { %v4853_v15 = vmul.f32 %v17644_v19, %v17644_v19  ;;  %v4854_v11 = vmul.f32 %v17647_v39, %v17647_v39  ;;  %v4873_v56 = vadd.f32 %v4852_v36, %v4851_v1  ;;  %v15506_v1 = vld [vmem:[%s15985_s21 + $0x18] sm:$0xff] }
0x1317   : > { %4874 = vadd.xlane.f32.xlu0 %v4873_v56  ;;  %v4876_v59 = vadd.f32 %v4854_v11, %v4853_v15  ;;  %v15507_v15 = vld [vmem:[%s15985_s21 + $0x10] sm:$0xff] }
0x1318   : > { %v5013_v56 = vld [vmem:[%s20948_s4 + $0x70] sm:$0xff] }
0x1319   : > { %4877 = vadd.xlane.f32.xlu1 %v4876_v59  ;;  %v5010_v59 = vld [vmem:[%s20948_s4 + $0x58] sm:$0xff] }
0x1367   : > { %v4857_v22 = vpop.xlane.xlu0 %4856 }
0x1368   : > { %v4879_v4 = vmul.f32 0.00390625, %v4857_v22  ;;  %v5014_v22 = vld [vmem:[%s20948_s4 + $0x78] sm:$0xff] }
0x1369   : > { %v4860_v7 = vpop.xlane.xlu1 %4859 }
0x136a   : > { %v4887_v24 = vadd.f32 1e-05, %v4879_v4  ;;  %v4880_v63 = vmul.f32 0.00390625, %v4860_v7 }
0x136c   : > { %15058 = vrsqrt.f32 %v4887_v24  ;;  %v4888_v5 = vadd.f32 1e-05, %v4880_v63 }
0x136e   : > { %15060 = vrsqrt.f32 %v4888_v5 }
0x136f   : > { %v4863_v58 = vpop.xlane.xlu0 %4862 }
0x1370   : > { %v4881_v17 = vmul.f32 0.00390625, %v4863_v58 }
0x1371   : > { %v4866_v37 = vpop.xlane.xlu1 %4865 }
0x1372   : > { %v4889_v13 = vadd.f32 1e-05, %v4881_v17  ;;  %v4882_v45 = vmul.f32 0.00390625, %v4866_v37 }
0x1374   : > { %15062 = vrsqrt.f32 %v4889_v13  ;;  %v4890_v10 = vadd.f32 1e-05, %v4882_v45  ;;  %v12866_v45 = vcombine.high %v5010_v59, %v5014_v22 }
0x1376   : > { %v15059_v16 = vpop.eup %15058  ;;  %15064 = vrsqrt.f32 %v4890_v10 }
0x1377   : > { %v4903_v41 = vmul.f32 %v15059_v16, %v17462_v34  ;;  %v4904_v14 = vmul.f32 %v15059_v16, %v17465_v46 }
0x1378   : > { %v15061_v35 = vpop.eup %15060 }
0x1379   : > { %v4931_v47 = vmul.f32 %v17657_v0, %v4903_v41  ;;  %v4932_v18 = vmul.f32 %v17660_v9, %v4904_v14  ;;  %v4905_v40 = vmul.f32 %v15061_v35, %v17472_v21  ;;  %v4906_v25 = vmul.f32 %v15061_v35, %v17475_v3  ;;  %v5009_v21 = vld [vmem:[%s20948_s4 + $0x50] sm:$0xff] }
0x137a   : > { %v12864_v13 = vcombine.high %v5009_v21, %v5013_v56  ;;  %v5021_v35 = vld [vmem:[%s20948_s4 + $0xb0] sm:$0xff] }
0x137b   : > { %v4933_v34 = vmul.f32 %v17657_v0, %v4905_v40  ;;  %v4934_v46 = vmul.f32 %v17660_v9, %v4906_v25  ;;  %v4960_v62 = vadd.f32 %v17668_v27, %v4932_v18  ;;  %v4959_v53 = vadd.f32 %v17671_v6, %v4931_v47  ;;  %v5018_v47 = vld [vmem:[%s20948_s4 + $0x98] sm:$0xff]  ;;  %v15510_v40 = vld [vmem:[%s15985_s21 + $0x28] sm:$0xff] }
0x137c   : > { %v5022_v18 = vld [vmem:[%s20948_s4 + $0xb8] sm:$0xff] }
0x137d   : > { %v4962_v51 = vadd.f32 %v17668_v27, %v4934_v46  ;;  %v4961_v12 = vadd.f32 %v17671_v6, %v4933_v34  ;;  %v12863_v34 = vcombine.low %v5009_v21, %v5013_v56  ;;  %v12865_v46 = vcombine.low %v5010_v59, %v5014_v22  ;;  %v5033_v56 = vld [vmem:[%s20948_s4 + $0x110] sm:$0xff]  ;;  %v5034_v22 = vld [vmem:[%s20948_s4 + $0x118] sm:$0xff] }
0x137e   : > { %v15063_v23 = vpop.eup %15062  ;;  %v5037_v59 = vld [vmem:[%s20948_s4 + $0x130] sm:$0xff] }
0x137f   : > { %v4907_v3 = vmul.f32 %v15063_v23, %v17482_v49  ;;  %v4908_v52 = vmul.f32 %v15063_v23, %v17485_v30  ;;  %v4978_v36 = vadd.f32 %v15506_v1, %v4962_v51  ;;  %v4977_v11 = vadd.f32 %v15507_v15, %v4961_v12  ;;  %v15508_v49 = vld [vmem:[%s15985_s21 + $0x8] sm:$0xff]  ;;  %v15509_v30 = vld [vmem:[%s15985_s21] sm:$0xff]  ;;  %v15513_v23 = vld [vmem:[%s15985_s21 + $0x30] sm:$0xff] }
0x1380   : > { %v15065_v4 = vpop.eup %15064  ;;  %v4976_v7 = vadd.f32 %v15508_v49, %v4960_v62  ;;  %v4975_v24 = vadd.f32 %v15509_v30, %v4959_v53  ;;  %v15511_v62 = vld [vmem:[%s15985_s21 + $0x38] sm:$0xff]  ;;  %v15512_v51 = vld [vmem:[%s15985_s21 + $0x20] sm:$0xff]  ;;  %v12880_v15 = vcombine.high %v5025_v50, %v5029_v57  ;;  %v12879_v49 = vcombine.low %v5025_v50, %v5029_v57  ;;  %v5069_v50 = vld [vmem:[%s20948_s4 + $0x230] sm:$0xff] }
0x1381   : > { %v4935_v63 = vmul.f32 %v17657_v0, %v4907_v3  ;;  %v4936_v5 = vmul.f32 %v17660_v9, %v4908_v52  ;;  %v4909_v58 = vmul.f32 %v15065_v4, %v17492_v55  ;;  %v4910_v17 = vmul.f32 %v15065_v4, %v17495_v20  ;;  %v5017_v55 = vld [vmem:[%s20948_s4 + $0x90] sm:$0xff]  ;;  %v5038_v4 = vld [vmem:[%s20948_s4 + $0x138] sm:$0xff] }
0x1382   : > { %v17705_v37 = vpack.c.bf16 %v4978_v36, %v4976_v7  ;;  %v17707_v48 = vpack.c.bf16 %v4977_v11, %v4975_v24  ;;  %v12872_v26 = vcombine.high %v5017_v55, %v5021_v35  ;;  %v12871_v1 = vcombine.low %v5017_v55, %v5021_v35  ;;  %v5050_v55 = vld [vmem:[%s20948_s4 + $0x198] sm:$0xff] }
0x1383   : > { %v4937_v10 = vmul.f32 %v17657_v0, %v4909_v58  ;;  %v4938_v8 = vmul.f32 %v17660_v9, %v4910_v17  ;;  %v4964_v16 = vadd.f32 %v17668_v27, %v4936_v5  ;;  %v4963_v41 = vadd.f32 %v17671_v6, %v4935_v63  ;;  %v5041_v63 = vld [vmem:[%s20948_s4 + $0x150] sm:$0xff]  ;;  %v5042_v58 = vld [vmem:[%s20948_s4 + $0x158] sm:$0xff] }
0x1384   : > { %20993 = vst [vmem:[#allocation8_spill] sm:$0xff] %v17705_v37  ;;  %20994 = vst [vmem:[#allocation9_spill] sm:$0xff] %v17707_v48  ;;  %5841 = vmatprep.mubr.bf16.mxu1 %v17705_v37  ;;  %5914 = vmatprep.mubr.bf16.mxu0 %v17705_v37  ;;  %v12873_v36 = vcombine.low %v5018_v47, %v5022_v18  ;;  %v12888_v30 = vcombine.high %v5033_v56, %v5037_v59  ;;  %v5045_v5 = vld [vmem:[%s20948_s4 + $0x170] sm:$0xff]  ;;  %v5046_v17 = vld [vmem:[%s20948_s4 + $0x178] sm:$0xff] }
0x1385   : > { %5842 = vmatmul.mubr.bf16.vlgmr.msra.gmra.mrb[120].mxu1 %v17707_v48  ;;  %5915 = vmatmul.mubr.bf16.vlgmr.msra.gmra.mrb[88].mxu0 %v17707_v48  ;;  %v4966_v20 = vadd.f32 %v17668_v27, %v4938_v8  ;;  %v4965_v14 = vadd.f32 %v17671_v6, %v4937_v10  ;;  %v4980_v25 = vadd.f32 %v15510_v40, %v4964_v16  ;;  %v5049_v16 = vld [vmem:[%s20948_s4 + $0x190] sm:$0xff] }
0x1386   : > { %5956 = vmatpush1.bf16.msra.mxu1 %v12855_v60  ;;  %6029 = vmatpush1.bf16.msra.mxu0 %v12857_v43  ;;  %v4979_v12 = vadd.f32 %v15512_v51, %v4963_v41  ;;  %v12874_v60 = vcombine.high %v5018_v47, %v5022_v18  ;;  %v5030_v43 = vld [vmem:[%s20948_s4 + $0xf8] sm:$0xff]  ;;  %v12890_v24 = vcombine.high %v5034_v22, %v5038_v4  ;;  %v5053_v41 = vld [vmem:[%s20948_s4 + $0x1b0] sm:$0xff] }
0x1387   : > { %v4982_v53 = vadd.f32 %v15511_v62, %v4966_v20  ;;  %v4981_v3 = vadd.f32 %v15513_v23, %v4965_v14  ;;  %5957 = vmatprep.subr.bf16.mxu1 %v12864_v13  ;;  %6030 = vmatprep.subr.bf16.mxu0 %v12866_v45  ;;  %v12882_v11 = vcombine.high %v5026_v38, %v5030_v43  ;;  %v5054_v20 = vld [vmem:[%s20948_s4 + $0x1b8] sm:$0xff]  ;;  %v5057_v40 = vld [vmem:[%s20948_s4 + $0x1d0] sm:$0xff] }
0x1388   : > { %v12881_v7 = vcombine.low %v5026_v38, %v5030_v43  ;;  %v12887_v13 = vcombine.low %v5033_v56, %v5037_v59  ;;  %v12889_v45 = vcombine.low %v5034_v22, %v5038_v4  ;;  %v12896_v10 = vcombine.high %v5041_v63, %v5045_v5  ;;  %v5065_v23 = vld [vmem:[%s20948_s4 + $0x210] sm:$0xff]  ;;  %v5074_v4 = vld [vmem:[%s20948_s4 + $0x258] sm:$0xff] }
0x1389   : > { %v17753_v21 = vpack.c.bf16 %v4982_v53, %v4980_v25  ;;  %v17755_v52 = vpack.c.bf16 %v4981_v3, %v4979_v12  ;;  %v12898_v8 = vcombine.high %v5042_v58, %v5046_v17  ;;  %v12895_v14 = vcombine.low %v5041_v63, %v5045_v5  ;;  %v5061_v25 = vld [vmem:[%s20948_s4 + $0x1f0] sm:$0xff] }
0x138a   : > { %5958 = vmatpush1.bf16.msra.mxu1 %v12863_v34  ;;  %6031 = vmatpush1.bf16.msra.mxu0 %v12865_v46  ;;  %v12897_v35 = vcombine.low %v5042_v58, %v5046_v17  ;;  %v12904_v47 = vcombine.high %v5049_v16, %v5053_v41  ;;  %v12906_v18 = vcombine.high %v5050_v55, %v5054_v20  ;;  %v5058_v34 = vld [vmem:[%s20948_s4 + $0x1d8] sm:$0xff]  ;;  %v5073_v59 = vld [vmem:[%s20948_s4 + $0x250] sm:$0xff] }
0x138b   : > { %20995 = vst [vmem:[#allocation10_spill] sm:$0xff] %v17753_v21  ;;  %20996 = vst [vmem:[#allocation11_spill] sm:$0xff] %v17755_v52  ;;  %5851 = vmatprep.mubr.bf16.mxu1 %v17753_v21  ;;  %5924 = vmatprep.mubr.bf16.mxu0 %v17753_v21  ;;  %v5062_v46 = vld [vmem:[%s20948_s4 + $0x1f8] sm:$0xff]  ;;  %v12903_v62 = vcombine.low %v5049_v16, %v5053_v41  ;;  %v12905_v53 = vcombine.low %v5050_v55, %v5054_v20  ;;  %v5077_v22 = vld [vmem:[%s20948_s4 + $0x270] sm:$0xff] }
0x138c   : > { %5959 = vmatprep.subr.bf16.mxu1 %v12872_v26  ;;  %6032 = vmatprep.subr.bf16.mxu0 %v12874_v60  ;;  %v12912_v51 = vcombine.high %v5057_v40, %v5061_v25  ;;  %v12914_v12 = vcombine.high %v5058_v34, %v5062_v46  ;;  %v5066_v26 = vld [vmem:[%s20948_s4 + $0x218] sm:$0xff]  ;;  %v12911_v43 = vcombine.low %v5057_v40, %v5061_v25  ;;  %v5081_v58 = vld [vmem:[%s20948_s4 + $0x290] sm:$0xff] }
0x138d   : > { %5852 = vmatmul.mubr.bf16.gmra.mrb[124].mxu1 %v17755_v52  ;;  %5925 = vmatmul.mubr.bf16.gmra.mrb[92].mxu0 %v17755_v52  ;;  %v5070_v60 = vld [vmem:[%s20948_s4 + $0x238] sm:$0xff]  ;;  %v12928_v63 = vcombine.high %v5073_v59, %v5077_v22  ;;  %v12927_v41 = vcombine.low %v5073_v59, %v5077_v22  ;;  %v5093_v40 = vld [vmem:[%s20948_s4 + $0x2f0] sm:$0xff] }
0x138e   : > { %5960 = vmatpush1.bf16.msra.mxu1 %v12871_v1  ;;  %6033 = vmatpush1.bf16.msra.mxu0 %v12873_v36  ;;  %v12913_v1 = vcombine.low %v5058_v34, %v5062_v46  ;;  %v12922_v56 = vcombine.high %v5066_v26, %v5070_v60  ;;  %v5090_v34 = vld [vmem:[%s20948_s4 + $0x2d8] sm:$0xff]  ;;  %v17878_v59 = vld [vmem:[%s20948_s4 + $0x350] sm:$0xff] }
0x138f   : > { %5961 = vmatprep.subr.bf16.mxu1 %v12880_v15  ;;  %6034 = vmatprep.subr.bf16.mxu0 %v12882_v11  ;;  %v12920_v11 = vcombine.high %v5065_v23, %v5069_v50  ;;  %v5094_v46 = vld [vmem:[%s20948_s4 + $0x2f8] sm:$0xff] }
0x1392   : > { %5962 = vmatpush1.bf16.msra.mxu1 %v12879_v49  ;;  %6035 = vmatpush1.bf16.msra.mxu0 %v12881_v7  ;;  %v5078_v49 = vld [vmem:[%s20948_s4 + $0x278] sm:$0xff] }
0x1393   : > { %5963 = vmatprep.subr.bf16.mxu1 %v12888_v30  ;;  %6036 = vmatprep.subr.bf16.mxu0 %v12890_v24  ;;  %v12919_v30 = vcombine.low %v5065_v23, %v5069_v50  ;;  %v12921_v24 = vcombine.low %v5066_v26, %v5070_v60  ;;  %v12930_v5 = vcombine.high %v5074_v4, %v5078_v49  ;;  %v5097_v26 = vld [vmem:[%s20948_s4 + $0x310] sm:$0xff] }
0x1394   : > { %v12929_v55 = vcombine.low %v5074_v4, %v5078_v49  ;;  %v12946_v50 = vcombine.high %v5090_v34, %v5094_v46  ;;  %v5101_v60 = vld [vmem:[%s20948_s4 + $0x330] sm:$0xff] }
0x1396   : > { %5964 = vmatpush1.bf16.msra.mxu1 %v12887_v13  ;;  %6037 = vmatpush1.bf16.msra.mxu0 %v12889_v45  ;;  %v5085_v13 = vld [vmem:[%s20948_s4 + $0x2b0] sm:$0xff]  ;;  %v5082_v45 = vld [vmem:[%s20948_s4 + $0x298] sm:$0xff] }
0x1397   : > { %5965 = vmatprep.subr.bf16.mxu1 %v12896_v10  ;;  %6038 = vmatprep.subr.bf16.mxu0 %v12898_v8  ;;  %v5086_v10 = vld [vmem:[%s20948_s4 + $0x2b8] sm:$0xff] }
0x139a   : > { %5966 = vmatpush1.bf16.msra.mxu1 %v12895_v14  ;;  %6039 = vmatpush1.bf16.msra.mxu0 %v12897_v35  ;;  %v12936_v35 = vcombine.high %v5081_v58, %v5085_v13 }
0x139b   : > { %5967 = vmatprep.subr.bf16.mxu1 %v12904_v47  ;;  %6040 = vmatprep.subr.bf16.mxu0 %v12906_v18  ;;  %v12938_v47 = vcombine.high %v5082_v45, %v5086_v10  ;;  %v5089_v18 = vld [vmem:[%s20948_s4 + $0x2d0] sm:$0xff] }
0x139c   : > { %v4869_v3 = vpop.xlane.xlu0 %4868 }
0x139d   : > { %v4883_v57 = vmul.f32 0.00390625, %v4869_v3 }
0x139e   : > { %v4872_v38 = vpop.xlane.xlu1 %4871  ;;  %5968 = vmatpush1.bf16.msra.mxu1 %v12903_v62  ;;  %6041 = vmatpush1.bf16.msra.mxu0 %v12905_v53  ;;  %v12935_v62 = vcombine.low %v5081_v58, %v5085_v13  ;;  %v12951_v58 = vcombine.low %v5097_v26, %v5101_v60  ;;  %v17898_v13 = vld [vmem:[%s20948_s4 + $0x390] sm:$0xff] }
0x139f   : > { %v4891_v36 = vadd.f32 1e-05, %v4883_v57  ;;  %v4884_v15 = vmul.f32 0.00390625, %v4872_v38  ;;  %5969 = vmatprep.subr.bf16.mxu1 %v12912_v51  ;;  %6042 = vmatprep.subr.bf16.mxu0 %v12914_v12  ;;  %v12937_v51 = vcombine.low %v5082_v45, %v5086_v10  ;;  %v12944_v12 = vcombine.high %v5089_v18, %v5093_v40  ;;  %v17903_v45 = vld [vmem:[%s20948_s4 + $0x3b0] sm:$0xff] }
0x13a0   : > { %v12943_v38 = vcombine.low %v5089_v18, %v5093_v40  ;;  %v5114_v40 = vld [vmem:[%s20948_s4 + $0x398] sm:$0xff] }
0x13a1   : > { %15066 = vrsqrt.f32 %v4891_v36  ;;  %v4892_v7 = vadd.f32 1e-05, %v4884_v15 }
0x13a2   : > { %5970 = vmatpush1.bf16.msra.mxu1 %v12911_v43  ;;  %6043 = vmatpush1.bf16.msra.mxu0 %v12913_v1  ;;  %v5098_v43 = vld [vmem:[%s20948_s4 + $0x318] sm:$0xff] }
0x13a3   : > { %15068 = vrsqrt.f32 %v4892_v7  ;;  %5971 = vmatprep.subr.bf16.mxu1 %v12920_v11  ;;  %6044 = vmatprep.subr.bf16.mxu0 %v12922_v56  ;;  %v12945_v11 = vcombine.low %v5090_v34, %v5094_v46  ;;  %v12952_v56 = vcombine.high %v5097_v26, %v5101_v60  ;;  %v5110_v7 = vld [vmem:[%s20948_s4 + $0x378] sm:$0xff]  ;;  %v15516_v46 = vld [vmem:[%s15985_s21 + $0x48] sm:$0xff] }
0x13a4   : > { %v4875_v17 = vpop.xlane.xlu0 %4874 }
0x13a5   : > { %v4885_v8 = vmul.f32 0.00390625, %v4875_v17 }
0x13a6   : > { %v4878_v16 = vpop.xlane.xlu1 %4877  ;;  %5972 = vmatpush1.bf16.msra.mxu1 %v12919_v30  ;;  %6045 = vmatpush1.bf16.msra.mxu0 %v12921_v24 }
0x13a7   : > { %v4893_v20 = vadd.f32 1e-05, %v4885_v8  ;;  %v4886_v14 = vmul.f32 0.00390625, %v4878_v16  ;;  %5973 = vmatprep.subr.bf16.mxu1 %v12928_v63  ;;  %6046 = vmatprep.subr.bf16.mxu0 %v12930_v5 }
0x13a9   : > { %15070 = vrsqrt.f32 %v4893_v20  ;;  %v4894_v25 = vadd.f32 1e-05, %v4886_v14  ;;  %v15514_v14 = vld [vmem:[%s15985_s21 + $0x58] sm:$0xff] }
0x13aa   : > { %5974 = vmatpush1.bf16.msra.mxu1 %v12927_v41  ;;  %6047 = vmatpush1.bf16.msra.mxu0 %v12929_v55 }
0x13ab   : > { %v15067_v53 = vpop.eup %15066  ;;  %15072 = vrsqrt.f32 %v4894_v25  ;;  %5975 = vmatprep.subr.bf16.mxu1 %v12936_v35  ;;  %6048 = vmatprep.subr.bf16.mxu0 %v12938_v47  ;;  %v15515_v47 = vld [vmem:[%s15985_s21 + $0x50] sm:$0xff]  ;;  %v5118_v25 = vld [vmem:[%s20948_s4 + $0x3b8] sm:$0xff] }
0x13ac   : > { %v4911_v23 = vmul.f32 %v15067_v53, %v17614_v61  ;;  %v4912_v3 = vmul.f32 %v15067_v53, %v17617_v44  ;;  %v5102_v61 = vld [vmem:[%s20948_s4 + $0x338] sm:$0xff]  ;;  %v15517_v53 = vld [vmem:[%s15985_s21 + $0x40] sm:$0xff] }
0x13ad   : > { %v15069_v57 = vpop.eup %15068  ;;  %v12954_v49 = vcombine.high %v5098_v43, %v5102_v61  ;;  %v12953_v17 = vcombine.low %v5098_v43, %v5102_v61 }
0x13ae   : > { %v4939_v44 = vmul.f32 %v17657_v0, %v4911_v23  ;;  %v4940_v1 = vmul.f32 %v17660_v9, %v4912_v3  ;;  %v4913_v36 = vmul.f32 %v15069_v57, %v17624_v33  ;;  %v4914_v15 = vmul.f32 %v15069_v57, %v17627_v32  ;;  %5976 = vmatpush1.bf16.msra.mxu1 %v12935_v62  ;;  %v5109_v33 = vld [vmem:[%s20948_s4 + $0x370] sm:$0xff]  ;;  %v5106_v32 = vld [vmem:[%s20948_s4 + $0x358] sm:$0xff] }
0x13af   : > { %6049 = vmatpush1.bf16.msra.mxu0 %v12937_v51  ;;  %5977 = vmatprep.subr.bf16.mxu1 %v12944_v12  ;;  %v12959_v8 = vcombine.low %v17878_v59, %v5109_v33  ;;  %v12960_v16 = vcombine.high %v17878_v59, %v5109_v33  ;;  %v12962_v41 = vcombine.high %v5106_v32, %v5110_v7 }
0x13b0   : > { %v4941_v22 = vmul.f32 %v17657_v0, %v4913_v36  ;;  %v4942_v4 = vmul.f32 %v17660_v9, %v4914_v15  ;;  %6050 = vmatprep.subr.bf16.mxu0 %v12946_v50  ;;  %v4968_v30 = vadd.f32 %v17668_v27, %v4940_v1  ;;  %v4967_v24 = vadd.f32 %v17671_v6, %v4939_v44  ;;  %v5125_v44 = vld [vmem:[%s20948_s4 + $0x3f0] sm:$0xff]  ;;  %v5122_v1 = vld [vmem:[%s20948_s4 + $0x3d8] sm:$0xff]  ;;  %v15518_v15 = vld [vmem:[%s15985_s21 + $0x68] sm:$0xff] }
0x13b1   : > { %v12961_v51 = vcombine.low %v5106_v32, %v5110_v7  ;;  %v12970_v57 = vcombine.high %v5114_v40, %v5118_v25  ;;  %v5126_v36 = vld [vmem:[%s20948_s4 + $0x3f8] sm:$0xff] }
0x13b2   : > { %5978 = vmatpush1.bf16.msra.mxu1 %v12943_v38  ;;  %v4970_v63 = vadd.f32 %v17668_v27, %v4942_v4  ;;  %v4969_v5 = vadd.f32 %v17671_v6, %v4941_v22  ;;  %v4984_v62 = vadd.f32 %v15516_v46, %v4968_v30  ;;  %v15520_v22 = vld [vmem:[%s15985_s21 + $0x60] sm:$0xff]  ;;  %v12978_v7 = vcombine.high %v5122_v1, %v5126_v36 }
0x13b3   : > { %v15071_v10 = vpop.eup %15070  ;;  %6051 = vmatpush1.bf16.msra.mxu0 %v12945_v11  ;;  %5979 = vmatprep.subr.bf16.mxu1 %v12952_v56  ;;  %v15519_v56 = vld [vmem:[%s15985_s21 + $0x78] sm:$0xff]  ;;  %v14618_v46 = vld [vmem:[%s20949_s5 + $0x80] ss:$8 sps:$4 sm:$0xff]  }
0x13b4   : > { %v4915_v55 = vmul.f32 %v15071_v10, %v17634_v42  ;;  %v4916_v20 = vmul.f32 %v15071_v10, %v17637_v54  ;;  %v4986_v35 = vadd.f32 %v15514_v14, %v4970_v63  ;;  %v4985_v18 = vadd.f32 %v15515_v47, %v4969_v5  ;;  %6052 = vmatprep.subr.bf16.mxu0 %v12954_v49  ;;  %v15521_v49 = vld [vmem:[%s15985_s21 + $0x70] sm:$0xff]  ;;  %v14602_v10 = vld [vmem:[%s20949_s5 + $0x24] ss:$8 sps:$4 sm:$0xff]  }
0x13b5   : > { %v15073_v34 = vpop.eup %15072  ;;  %v4983_v42 = vadd.f32 %v15517_v53, %v4967_v24  ;;  %v12968_v54 = vcombine.high %v17898_v13, %v17903_v45  ;;  %v12977_v5 = vcombine.low %v5122_v1, %v5126_v36  ;;  %v14611_v14 = vld [vmem:[%s20949_s5 + $0x54] ss:$8 sps:$4 sm:$0xff]   ;;  %v14614_v47 = vld [vmem:[%s20949_s5 + $0x64] ss:$8 sps:$4 sm:$0xff]   ;;  %v14621_v53 = vld [vmem:[%s20949_s5 + $0x90] ss:$8 sps:$4 sm:$0xff]  }
0x13b6   : > { %v4943_v12 = vmul.f32 %v17657_v0, %v4915_v55  ;;  %v4944_v23 = vmul.f32 %v17660_v9, %v4916_v20  ;;  %v4917_v3 = vmul.f32 %v15073_v34, %v17644_v19  ;;  %v4918_v50 = vmul.f32 %v15073_v34, %v17647_v39  ;;  %5980 = vmatpush1.bf16.msra.mxu1 %v12951_v58  ;;  %v5121_v39 = vld [vmem:[%s20948_s4 + $0x3d0] sm:$0xff]  ;;  %v14596_v58 = vld [vmem:[%s20949_s5 + $0x4] ss:$8 sps:$4 sm:$0xff]   ;;  %v14606_v20 = vld [vmem:[%s20949_s5 + $0x40] ss:$8 sps:$4 sm:$0xff]  }
0x13b7   : > { %v17925_v26 = vpack.c.bf16 %v4986_v35, %v4984_v62  ;;  %v17927_v60 = vpack.c.bf16 %v4985_v18, %v4983_v42  ;;  %6053 = vmatpush1.bf16.msra.mxu0 %v12953_v17  ;;  %5981 = vmatprep.subr.bf16.mxu1 %v12960_v16  ;;  %v12976_v32 = vcombine.high %v5121_v39, %v5125_v44  ;;  %v14594_v17 = vld [vmem:[%s20949_s5] ss:$8 sps:$4 sm:$0xff]   ;;  %v14605_v16 = vld [vmem:[%s20949_s5 + $0x34] ss:$8 sps:$4 sm:$0xff]   ;;  %v14608_v55 = vld [vmem:[%s20949_s5 + $0x44] ss:$8 sps:$4 sm:$0xff]  }
0x13b8   : > { %v4945_v38 = vmul.f32 %v17657_v0, %v4917_v3  ;;  %v4946_v43 = vmul.f32 %v17660_v9, %v4918_v50  ;;  %6054 = vmatprep.subr.bf16.mxu0 %v12962_v41  ;;  %v4972_v61 = vadd.f32 %v17668_v27, %v4944_v23  ;;  %v4971_v19 = vadd.f32 %v17671_v6, %v4943_v12  ;;  %v14603_v41 = vld [vmem:[%s20949_s5 + $0x30] ss:$8 sps:$4 sm:$0xff]   ;;  %v14612_v18 = vld [vmem:[%s20949_s5 + $0x60] ss:$8 sps:$4 sm:$0xff]   ;;  %v14620_v34 = vld [vmem:[%s20949_s5 + $0x84] ss:$8 sps:$4 sm:$0xff]  }
0x13b9   : > { %20997 = vst [vmem:[#allocation12_spill] sm:$0xff] %v17925_v26  ;;  %20998 = vst [vmem:[#allocation13_spill] sm:$0xff] %v17927_v60  ;;  %5861 = vmatprep.mubr.bf16.mxu1 %v17925_v26  ;;  %5934 = vmatprep.mubr.bf16.mxu0 %v17925_v26  ;;  %v12975_v63 = vcombine.low %v5121_v39, %v5125_v44  ;;  %v14609_v35 = vld [vmem:[%s20949_s5 + $0x50] ss:$8 sps:$4 sm:$0xff]   ;;  %v14623_v62 = vld [vmem:[%s20949_s5 + $0x94] ss:$8 sps:$4 sm:$0xff]  }
0x13ba   : > { %5862 = vmatmul.mubr.bf16.gmra.mrb[128].mxu1 %v17927_v60  ;;  %5935 = vmatmul.mubr.bf16.gmra.mrb[96].mxu0 %v17927_v60  ;;  %v4974_v0 = vadd.f32 %v17668_v27, %v4946_v43  ;;  %v4973_v9 = vadd.f32 %v17671_v6, %v4945_v38  ;;  %v4988_v11 = vadd.f32 %v15518_v15, %v4972_v61  ;;  %v14626_v42 = vld [vmem:[%s20949_s5 + $0xa4] ss:$8 sps:$4 sm:$0xff]   ;;  %v14627_v12 = vld [vmem:[%s20949_s5 + $0xb0] ss:$8 sps:$4 sm:$0xff]   ;;  %v14630_v3 = vld [vmem:[%s20949_s5 + $0xc0] ss:$8 sps:$4 sm:$0xff]  }
0x13bb   : > { %5982 = vmatpush1.bf16.msra.mxu1 %v12959_v8  ;;  %6055 = vmatpush1.bf16.msra.mxu0 %v12961_v51  ;;  %v12967_v27 = vcombine.low %v17898_v13, %v17903_v45  ;;  %v12969_v6 = vcombine.low %v5114_v40, %v5118_v25  ;;  %v4987_v4 = vadd.f32 %v15520_v22, %v4971_v19  ;;  %v14599_v13 = vld [vmem:[%s20949_s5 + $0x14] ss:$8 sps:$4 sm:$0xff]   ;;  %v14597_v45 = vld [vmem:[%s20949_s5 + $0x10] ss:$8 sps:$4 sm:$0xff]   ;;  %v14600_v8 = vld [vmem:[%s20949_s5 + $0x20] ss:$8 sps:$4 sm:$0xff]  }
0x13bc   : > { %v4990_v59 = vadd.f32 %v15519_v56, %v4974_v0  ;;  %v4989_v33 = vadd.f32 %v15521_v49, %v4973_v9  ;;  %5983 = vmatprep.subr.bf16.mxu1 %v12968_v54  ;;  %6056 = vmatprep.subr.bf16.mxu0 %v12970_v57  ;;  %v14617_v40 = vld [vmem:[%s20949_s5 + $0x74] ss:$8 sps:$4 sm:$0xff]   ;;  %v14615_v25 = vld [vmem:[%s20949_s5 + $0x70] ss:$8 sps:$4 sm:$0xff]   ;;  %v14624_v51 = vld [vmem:[%s20949_s5 + $0xa0] ss:$8 sps:$4 sm:$0xff]  }
0x13bd   : > { %v14629_v54 = vld [vmem:[%s20949_s5 + $0xb4] ss:$8 sps:$4 sm:$0xff]   ;;  %v14632_v23 = vld [vmem:[%s20949_s5 + $0xc4] ss:$8 sps:$4 sm:$0xff]   ;;  %v14633_v57 = vld [vmem:[%s20949_s5 + $0xd0] ss:$8 sps:$4 sm:$0xff]  }
0x13be   : > { %v17957_v30 = vpack.c.bf16 %v4990_v59, %v4988_v11  ;;  %v17959_v24 = vpack.c.bf16 %v4989_v33, %v4987_v4  ;;  %v14635_v50 = vld [vmem:[%s20949_s5 + $0xd4] ss:$8 sps:$4 sm:$0xff]   ;;  %v14638_v38 = vld [vmem:[%s20949_s5 + $0xe4] ss:$8 sps:$4 sm:$0xff]   ;;  %v14636_v43 = vld [vmem:[%s20949_s5 + $0xe0] ss:$8 sps:$4 sm:$0xff]  }
0x13bf   : > { %5984 = vmatpush1.bf16.msra.mxu1 %v12967_v27  ;;  %6057 = vmatpush1.bf16.msra.mxu0 %v12969_v6  ;;  %v14641_v61 = vld [vmem:[%s20949_s5 + $0xf4] ss:$8 sps:$4 sm:$0xff]   ;;  %v14639_v19 = vld [vmem:[%s20949_s5 + $0xf0] ss:$8 sps:$4 sm:$0xff]   ;;  %v14644_v39 = vld [vmem:[%s20949_s5 + $0x104] ss:$8 sps:$4 sm:$0xff]  }
0x13c0   : > { %20999 = vst [vmem:[#allocation14_spill] sm:$0xff] %v17957_v30  ;;  %21000 = vst [vmem:[#allocation15_spill] sm:$0xff] %v17959_v24  ;;  %5871 = vmatprep.mubr.bf16.mxu1 %v17957_v30  ;;  %5944 = vmatprep.mubr.bf16.mxu0 %v17957_v30  ;;  %v18083_v0 = vld [vmem:[%s20952_s8 + $0xe] sm:$0xff]  ;;  %v21001_v44 = vsub.s32 2, %v15964_v28  ;;  %v21002_v15 = vsub.s32 3, %v15964_v28 }
0x13c1   : > { %5985 = vmatprep.subr.bf16.mxu1 %v12976_v32  ;;  %6058 = vmatprep.subr.bf16.mxu0 %v12978_v7  ;;  %v18087_v9 = vrot.slane %v18083_v0, %v15967_v29  ;;  %v18096_v36 = vrot.slane %v18083_v0, %v15973_v31 }
0x13c2   : > { %5872 = vmatmul.mubr.bf16.gmra.mrb[132].mxu1 %v17959_v24  ;;  %5945 = vmatmul.mubr.bf16.gmra.mrb[100].mxu0 %v17959_v24  ;;  %v18092_v1 = vrot.slane %v18083_v0, %v21001_v44  ;;  %v18101_v11 = vrot.slane %v18083_v0, %v21002_v15 }
0x13c3   : > { %5987 = vmatprep.mubr.bf16.mxu1 %v17705_v37  ;;  %6060 = vmatprep.mubr.bf16.mxu0 %v17705_v37 }
0x13c4   : > { %5986 = vmatpush1.bf16.msra.mxu1 %v12975_v63  ;;  %6059 = vmatpush1.bf16.msra.mxu0 %v12977_v5 }
0x13c5   : > { %7233 = vmatprep.subr.bf16.mxu1 %v14596_v58 }
0x13ca   : > { %5988 = vmatmul.mubr.bf16.vlgmr.msra.gmra.mrb[136].mxu1 %v17707_v48  ;;  %6061 = vmatmul.mubr.bf16.vlgmr.msra.gmra.mrb[104].mxu0 %v17707_v48 }
0x13cb   : > { %5997 = vmatprep.mubr.bf16.mxu1 %v17753_v21  ;;  %6070 = vmatprep.mubr.bf16.mxu0 %v17753_v21 }
0x13cc   : > { %7234 = vmatpush1.bf16.msra.mxu1 %v14594_v17 }
0x13cd   : > { %7235 = vmatprep.subr.bf16.mxu1 %v14599_v13 }
0x13d0   : > { %7236 = vmatpush1.bf16.msra.mxu1 %v14597_v45 }
0x13d1   : > { %7237 = vmatprep.subr.bf16.mxu1 %v14602_v10 }
0x13d2   : > { %5998 = vmatmul.mubr.bf16.gmra.mrb[140].mxu1 %v17755_v52  ;;  %6071 = vmatmul.mubr.bf16.gmra.mrb[108].mxu0 %v17755_v52 }
0x13d3   : > { %6007 = vmatprep.mubr.bf16.mxu1 %v17925_v26  ;;  %6080 = vmatprep.mubr.bf16.mxu0 %v17925_v26 }
0x13d4   : > { %7238 = vmatpush1.bf16.msra.mxu1 %v14600_v8 }
0x13d5   : > { %7239 = vmatprep.subr.bf16.mxu1 %v14605_v16 }
0x13d8   : > { %7240 = vmatpush1.bf16.msra.mxu1 %v14603_v41 }
0x13d9   : > { %7241 = vmatprep.subr.bf16.mxu1 %v14608_v55 }
0x13da   : > { %6008 = vmatmul.mubr.bf16.gmra.mrb[144].mxu1 %v17927_v60  ;;  %6081 = vmatmul.mubr.bf16.gmra.mrb[112].mxu0 %v17927_v60 }
0x13db   : > { %6017 = vmatprep.mubr.bf16.mxu1 %v17957_v30  ;;  %6090 = vmatprep.mubr.bf16.mxu0 %v17957_v30 }
0x13dc   : > { %7242 = vmatpush1.bf16.msra.mxu1 %v14606_v20 }
0x13dd   : > { %7243 = vmatprep.subr.bf16.mxu1 %v14611_v14 }
0x13e0   : > { %7244 = vmatpush1.bf16.msra.mxu1 %v14609_v35 }
0x13e1   : > { %7245 = vmatprep.subr.bf16.mxu1 %v14614_v47 }
0x13e2   : > { %6018 = vmatmul.mubr.bf16.gmra.mrb[148].mxu1 %v17959_v24  ;;  %6091 = vmatmul.mubr.bf16.gmra.mrb[116].mxu0 %v17959_v24 }
0x13e4   : > { %7246 = vmatpush1.bf16.msra.mxu1 %v14612_v18 }
0x13e5   : > { %7247 = vmatprep.subr.bf16.mxu1 %v14617_v40 }
0x13e8   : > { %7248 = vmatpush1.bf16.msra.mxu1 %v14615_v25 }
0x13e9   : > { %7249 = vmatprep.subr.bf16.mxu1 %v14620_v34 }
0x13ec   : > { %7250 = vmatpush1.bf16.msra.mxu1 %v14618_v46 }
0x13ed   : > { %7251 = vmatprep.subr.bf16.mxu1 %v14623_v62 }
0x13f0   : > { %7252 = vmatpush1.bf16.msra.mxu1 %v14621_v53 }
0x13f1   : > { %7253 = vmatprep.subr.bf16.mxu1 %v14626_v42 }
0x13f4   : > { %7254 = vmatpush1.bf16.msra.mxu1 %v14624_v51 }
0x13f5   : > { %7255 = vmatprep.subr.bf16.mxu1 %v14629_v54 }
0x13f8   : > { %7256 = vmatpush1.bf16.msra.mxu1 %v14627_v12 }
0x13f9   : > { %7257 = vmatprep.subr.bf16.mxu1 %v14632_v23 }
0x13fc   : > { %7258 = vmatpush1.bf16.msra.mxu1 %v14630_v3 }
0x13fd   : > { %7259 = vmatprep.subr.bf16.mxu1 %v14635_v50 }
0x1400   : > { %7260 = vmatpush1.bf16.msra.mxu1 %v14633_v57 }
0x1401   : > { %7261 = vmatprep.subr.bf16.mxu1 %v14638_v38 }
0x1404   : > { %7262 = vmatpush1.bf16.msra.mxu1 %v14636_v43 }
0x1405   : > { %7263 = vmatprep.subr.bf16.mxu1 %v14641_v61 }
0x1408   : > { %7264 = vmatpush1.bf16.msra.mxu1 %v14639_v19 }
0x1409   : > { %7306 = vmatprep.subr.bf16.mxu1 %v14644_v39 }
0x1458   : > { %v5843_v27 = vpop.f32.mrb[120].mxu1  ;;  %v5916_v6 = vpop.f32.mrb[88].mxu0 }
0x1459   : > { %v5844_v56 = vadd.f32 %v5843_v27, %v18087_v9  ;;  %v5917_v59 = vadd.f32 %v5916_v6, %v18092_v1  ;;  %v5845_v22 = vpop.f32.mrb[121].mxu1  ;;  %v5918_v4 = vpop.f32.mrb[89].mxu0 }
0x145a   : > { %v5846_v49 = vadd.f32 %v5845_v22, %v18096_v36  ;;  %v5919_v33 = vadd.f32 %v5918_v4, %v18101_v11  ;;  %v5847_v32 = vpop.f32.mrb[122].mxu1  ;;  %v5920_v7 = vpop.f32.mrb[90].mxu0 }
0x145b   : > { %v6165_v63 = vmul.f32 0.70710677, %v5844_v56  ;;  %v6167_v5 = vmul.f32 0.70710677, %v5917_v59  ;;  %v5848_v13 = vadd.f32 %v5847_v32, %v18087_v9  ;;  %v18109_v45 = vadd.f32 %v5920_v7, %v18092_v1  ;;  %v5849_v10 = vpop.f32.mrb[123].mxu1  ;;  %v5922_v8 = vpop.f32.mrb[91].mxu0 }
0x145c   : > { %v6166_v58 = vmul.f32 0.70710677, %v5846_v49  ;;  %v6168_v17 = vmul.f32 0.70710677, %v5919_v33  ;;  %v5850_v16 = vadd.f32 %v5849_v10, %v18096_v36  ;;  %v18113_v41 = vadd.f32 %v5922_v8, %v18101_v11 }
0x145d   : > { %15074 = verf.f32 %v6165_v63  ;;  %v6173_v55 = vmul.f32 0.70710677, %v5848_v13  ;;  %v6175_v20 = vmul.f32 0.70710677, %v18109_v45  ;;  %v6101_v6 = vmul.f32 0.5, %v5844_v56 }
0x145e   : > { %15076 = verf.f32 %v6167_v5  ;;  %v6174_v14 = vmul.f32 0.70710677, %v5850_v16  ;;  %v6176_v47 = vmul.f32 0.70710677, %v18113_v41  ;;  %v6103_v22 = vmul.f32 0.5, %v5917_v59 }
0x145f   : > { %15078 = verf.f32 %v6166_v58  ;;  %v6102_v63 = vmul.f32 0.5, %v5846_v49  ;;  %v6104_v10 = vmul.f32 0.5, %v5919_v33  ;;  %v6109_v8 = vmul.f32 0.5, %v5848_v13 }
0x1460   : > { %15080 = verf.f32 %v6168_v17  ;;  %v5853_v35 = vpop.f32.mrb[124].mxu1  ;;  %v5926_v40 = vpop.f32.mrb[92].mxu0  ;;  %v6110_v49 = vmul.f32 0.5, %v5850_v16 }
0x1461   : > { %15082 = verf.f32 %v6173_v55  ;;  %v18118_v18 = vadd.f32 %v5853_v35, %v18087_v9  ;;  %v5855_v25 = vpop.f32.mrb[125].mxu1  ;;  %v18121_v34 = vadd.f32 %v5926_v40, %v18092_v1  ;;  %v5928_v62 = vpop.f32.mrb[93].mxu0 }
0x1462   : > { %15084 = verf.f32 %v6175_v20  ;;  %v18124_v46 = vadd.f32 %v5855_v25, %v18096_v36  ;;  %v5857_v53 = vpop.f32.mrb[126].mxu1  ;;  %v18128_v51 = vadd.f32 %v5928_v62, %v18101_v11  ;;  %v5930_v54 = vpop.f32.mrb[94].mxu0 }
0x1463   : > { %15086 = verf.f32 %v6174_v14  ;;  %v6181_v42 = vmul.f32 0.70710677, %v18118_v18  ;;  %v5859_v12 = vpop.f32.mrb[127].mxu1  ;;  %v6183_v23 = vmul.f32 0.70710677, %v18121_v34  ;;  %v5932_v3 = vpop.f32.mrb[95].mxu0  ;;  %v18134_v38 = vadd.f32 %v5857_v53, %v18087_v9 }
0x1464   : > { %15088 = verf.f32 %v6176_v47  ;;  %v6182_v50 = vmul.f32 0.70710677, %v18124_v46  ;;  %v6184_v57 = vmul.f32 0.70710677, %v18128_v51  ;;  %v18137_v43 = vadd.f32 %v5930_v54, %v18092_v1 }
0x1465   : > { %15090 = verf.f32 %v6181_v42  ;;  %v18140_v61 = vadd.f32 %v5859_v12, %v18096_v36  ;;  %v6189_v44 = vmul.f32 0.70710677, %v18134_v38  ;;  %v18144_v15 = vadd.f32 %v5932_v3, %v18101_v11 }
0x1466   : > { %15092 = verf.f32 %v6183_v23  ;;  %v6191_v4 = vmul.f32 0.70710677, %v18137_v43  ;;  %v6111_v47 = vmul.f32 0.5, %v18109_v45  ;;  %v6112_v54 = vmul.f32 0.5, %v18113_v41 }
0x1467   : > { %v15075_v19 = vpop.eup %15074  ;;  %15094 = verf.f32 %v6182_v50  ;;  %v6190_v5 = vmul.f32 0.70710677, %v18140_v61  ;;  %v6192_v56 = vmul.f32 0.70710677, %v18144_v15 }
0x1468   : > { %v15077_v39 = vpop.eup %15076  ;;  %15096 = verf.f32 %v6184_v57  ;;  %v6293_v7 = vadd.f32 1.0, %v15075_v19 }
0x1469   : > { %v15079_v27 = vpop.eup %15078  ;;  %15098 = verf.f32 %v6189_v44  ;;  %v6295_v17 = vadd.f32 1.0, %v15077_v39 }
0x146a   : > { %v15081_v32 = vpop.eup %15080  ;;  %15100 = verf.f32 %v6191_v4  ;;  %v6294_v20 = vadd.f32 1.0, %v15079_v27  ;;  %v6357_v62 = vmul.f32 %v6293_v7, %v6101_v6  ;;  %v14642_v6 = vld [vmem:[%s20949_s5 + $0x100] ss:$8 sps:$4 sm:$0xff]   ;;  %v14647_v4 = vld [vmem:[%s20949_s5 + $0x114] ss:$8 sps:$4 sm:$0xff]  }
0x146b   : > { %v15083_v58 = vpop.eup %15082  ;;  %15102 = verf.f32 %v6190_v5  ;;  %v6296_v35 = vadd.f32 1.0, %v15081_v32  ;;  %v18150_v33 = vmul.f32 %v6295_v17, %v6103_v22  ;;  %v6119_v17 = vmul.f32 0.5, %v18121_v34 }
0x146c   : > { %v15085_v55 = vpop.eup %15084  ;;  %v6301_v14 = vadd.f32 1.0, %v15083_v58  ;;  %15104 = verf.f32 %v6192_v56  ;;  %v6358_v3 = vmul.f32 %v6294_v20, %v6102_v63  ;;  %v6117_v63 = vmul.f32 0.5, %v18118_v18  ;;  %v14645_v18 = vld [vmem:[%s20949_s5 + $0x110] ss:$8 sps:$4 sm:$0xff]  }
0x146d   : > { %v15087_v59 = vpop.eup %15086  ;;  %v6303_v40 = vadd.f32 1.0, %v15085_v55  ;;  %v18155_v45 = vmul.f32 %v6296_v35, %v6104_v10  ;;  %v6127_v56 = vmul.f32 0.5, %v18137_v43  ;;  %v6126_v35 = vmul.f32 0.5, %v18140_v61 }
0x146e   : > { %v15089_v25 = vpop.eup %15088  ;;  %v6365_v53 = vmul.f32 %v6301_v14, %v6109_v8  ;;  %v6302_v42 = vadd.f32 1.0, %v15087_v59  ;;  %v6125_v8 = vmul.f32 0.5, %v18134_v38  ;;  %v6118_v14 = vmul.f32 0.5, %v18124_v46  ;;  %v14650_v38 = vld [vmem:[%s20949_s5 + $0x124] ss:$8 sps:$4 sm:$0xff]  }
0x146f   : > { %v18152_v13 = vmul.f32 %v6303_v40, %v6111_v47  ;;  %v6304_v12 = vadd.f32 1.0, %v15089_v25  ;;  %v15091_v23 = vpop.eup %15090  ;;  %v6120_v43 = vmul.f32 0.5, %v18128_v51  ;;  %v14648_v51 = vld [vmem:[%s20949_s5 + $0x120] ss:$8 sps:$4 sm:$0xff]  }
0x1470   : > { %v6421_v50 = vpack.c.bf16 %v6365_v53, %v6357_v62  ;;  %v6366_v57 = vmul.f32 %v6302_v42, %v6110_v49  ;;  %v15093_v19 = vpop.eup %15092  ;;  %v6309_v22 = vadd.f32 1.0, %v15091_v23  ;;  %v6128_v62 = vmul.f32 0.5, %v18144_v15  ;;  %v14653_v15 = vld [vmem:[%s20949_s5 + $0x134] ss:$8 sps:$4 sm:$0xff]  }
0x1471   : > { %v18159_v39 = vmul.f32 %v6304_v12, %v6112_v54  ;;  %v15095_v44 = vpop.eup %15094  ;;  %v6311_v5 = vadd.f32 1.0, %v15093_v19 }
0x1472   : > { %v6422_v27 = vpack.c.bf16 %v6366_v57, %v6358_v3  ;;  %v15097_v41 = vpop.eup %15096  ;;  %v6310_v10 = vadd.f32 1.0, %v15095_v44  ;;  %v6373_v47 = vmul.f32 %v6309_v22, %v6117_v63  ;;  %v14651_v44 = vld [vmem:[%s20949_s5 + $0x130] ss:$8 sps:$4 sm:$0xff]   ;;  %v14665_v63 = vld [vmem:[%s20949_s5 + $0x174] ss:$8 sps:$4 sm:$0xff]  }
0x1473   : > { %v15099_v7 = vpop.eup %15098  ;;  %v6312_v34 = vadd.f32 1.0, %v15097_v41  ;;  %v18181_v25 = vmul.f32 %v6311_v5, %v6119_v17  ;;  %v14659_v41 = vld [vmem:[%s20949_s5 + $0x154] ss:$8 sps:$4 sm:$0xff]   ;;  %v14657_v22 = vld [vmem:[%s20949_s5 + $0x150] ss:$8 sps:$4 sm:$0xff]  }
0x1474   : > { %7265 = vmatprep.mubr.bf16.mxu1 %v6422_v27  ;;  %v15101_v58 = vpop.eup %15100  ;;  %v6317_v55 = vadd.f32 1.0, %v15099_v7  ;;  %v6374_v53 = vmul.f32 %v6310_v10, %v6118_v14  ;;  %v14656_v27 = vld [vmem:[%s20949_s5 + $0x144] ss:$8 sps:$4 sm:$0xff]   ;;  %v14660_v7 = vld [vmem:[%s20949_s5 + $0x160] ss:$8 sps:$4 sm:$0xff]  }
0x1475   : > { %7266 = vmatmul.mubr.bf16.vlgmr.msra.gmra.mrb[152].mxu1 %v6421_v50  ;;  %v15103_v20 = vpop.eup %15102  ;;  %v6319_v59 = vadd.f32 1.0, %v15101_v58  ;;  %21003 = vst [vmem:[#allocation16_spill] sm:$0xff] %v18181_v25  ;;  %v18189_v3 = vmul.f32 %v6312_v34, %v6120_v43  ;;  %v14668_v34 = vld [vmem:[%s20949_s5 + $0x184] ss:$8 sps:$4 sm:$0xff]  }
0x1476   : > { %7307 = vmatpush1.bf16.msra.mxu1 %v14642_v6  ;;  %v6381_v40 = vmul.f32 %v6317_v55, %v6125_v8  ;;  %v6318_v49 = vadd.f32 1.0, %v15103_v20  ;;  %v15105_v46 = vpop.eup %15104  ;;  %v14654_v6 = vld [vmem:[%s20949_s5 + $0x140] ss:$8 sps:$4 sm:$0xff]  }
0x1477   : > { %7308 = vmatprep.subr.bf16.mxu1 %v14647_v4  ;;  %v18184_v61 = vmul.f32 %v6319_v59, %v6127_v56  ;;  %v6320_v54 = vadd.f32 1.0, %v15105_v46  ;;  %v14662_v4 = vld [vmem:[%s20949_s5 + $0x164] ss:$8 sps:$4 sm:$0xff]  }
0x1478   : > { %v6382_v42 = vmul.f32 %v6318_v49, %v6126_v35  ;;  %v6429_v12 = vpack.c.bf16 %v6381_v40, %v6373_v47  ;;  %v14663_v35 = vld [vmem:[%s20949_s5 + $0x170] ss:$8 sps:$4 sm:$0xff]  }
0x1479   : > { %21004 = vst [vmem:[#allocation17_spill] sm:$0xff] %v18184_v61  ;;  %v18191_v50 = vmul.f32 %v6320_v54, %v6128_v62  ;;  %v14666_v54 = vld [vmem:[%s20949_s5 + $0x180] ss:$8 sps:$4 sm:$0xff]  }
0x147a   : > { %7309 = vmatpush1.bf16.msra.mxu1 %v14645_v18  ;;  %v6430_v57 = vpack.c.bf16 %v6382_v42, %v6374_v53 }
0x147b   : > { %7310 = vmatprep.subr.bf16.mxu1 %v14650_v38 }
0x147c   : > { %7275 = vmatprep.mubr.bf16.mxu1 %v6430_v57 }
0x147d   : > { %7276 = vmatmul.mubr.bf16.gmra.mrb[156].mxu1 %v6429_v12  ;;  %v5155_v12 = vsub.s32 6, %v15964_v28 }
0x147e   : > { %7311 = vmatpush1.bf16.msra.mxu1 %v14648_v51  ;;  %v14671_v51 = vld [vmem:[%s20949_s5 + $0x194] ss:$8 sps:$4 sm:$0xff]  }
0x147f   : > { %7312 = vmatprep.subr.bf16.mxu1 %v14653_v15 }
0x1482   : > { %7313 = vmatpush1.bf16.msra.mxu1 %v14651_v44 }
0x1483   : > { %7314 = vmatprep.subr.bf16.mxu1 %v14656_v27 }
0x1486   : > { %7315 = vmatpush1.bf16.msra.mxu1 %v14654_v6  ;;  %v5159_v6 = vsub.s32 7, %v15964_v28 }
0x1487   : > { %7316 = vmatprep.subr.bf16.mxu1 %v14659_v41 }
0x148a   : > { %7317 = vmatpush1.bf16.msra.mxu1 %v14657_v22 }
0x148b   : > { %7318 = vmatprep.subr.bf16.mxu1 %v14662_v4 }
0x148d   : > { %v5863_v5 = vpop.f32.mrb[128].mxu1  ;;  %v5936_v58 = vpop.f32.mrb[96].mxu0 }
0x148e   : > { %v5864_v17 = vadd.f32 %v5863_v5, %v18087_v9  ;;  %v5937_v10 = vadd.f32 %v5936_v58, %v18092_v1  ;;  %v5865_v8 = vpop.f32.mrb[129].mxu1  ;;  %v5938_v55 = vpop.f32.mrb[97].mxu0  ;;  %7319 = vmatpush1.bf16.msra.mxu1 %v14660_v7 }
0x148f   : > { %v18228_v20 = vadd.f32 %v5865_v8, %v18096_v36  ;;  %v18231_v14 = vadd.f32 %v5938_v55, %v18101_v11  ;;  %v5867_v56 = vpop.f32.mrb[130].mxu1  ;;  %v5940_v59 = vpop.f32.mrb[98].mxu0  ;;  %7320 = vmatprep.subr.bf16.mxu1 %v14665_v63  ;;  %v21005_v63 = vsub.s32 4, %v15964_v28 }
0x1490   : > { %v6197_v18 = vmul.f32 0.70710677, %v5864_v17  ;;  %v6199_v47 = vmul.f32 0.70710677, %v5937_v10  ;;  %v5868_v38 = vadd.f32 %v5867_v56, %v18087_v9  ;;  %v5941_v46 = vadd.f32 %v5940_v59, %v18092_v1  ;;  %v5869_v43 = vpop.f32.mrb[131].mxu1  ;;  %v5942_v62 = vpop.f32.mrb[99].mxu0 }
0x1491   : > { %v6198_v40 = vmul.f32 0.70710677, %v18228_v20  ;;  %v6200_v49 = vmul.f32 0.70710677, %v18231_v14  ;;  %v5870_v53 = vadd.f32 %v5869_v43, %v18096_v36  ;;  %v18245_v42 = vadd.f32 %v5942_v62, %v18101_v11  ;;  %v14669_v59 = vld [vmem:[%s20949_s5 + $0x190] ss:$8 sps:$4 sm:$0xff]  }
0x1492   : > { %15106 = verf.f32 %v6197_v18  ;;  %7321 = vmatpush1.bf16.msra.mxu1 %v14663_v35  ;;  %v6205_v57 = vmul.f32 0.70710677, %v5868_v38  ;;  %v6207_v15 = vmul.f32 0.70710677, %v5941_v46  ;;  %v18260_v5 = vrot.slane %v18083_v0, %v21005_v63  ;;  %v14674_v62 = vld [vmem:[%s20949_s5 + $0x1a4] ss:$8 sps:$4 sm:$0xff]  }
0x1493   : > { %15108 = verf.f32 %v6199_v47  ;;  %7322 = vmatprep.subr.bf16.mxu1 %v14668_v34  ;;  %v6206_v44 = vmul.f32 0.70710677, %v5870_v53  ;;  %v6208_v41 = vmul.f32 0.70710677, %v18245_v42  ;;  %v18268_v35 = vrot.slane %v18083_v0, %v5155_v12 }
0x1494   : > { %15110 = verf.f32 %v6198_v40  ;;  %v18305_v63 = vmul.f32 0.5, %v5870_v53  ;;  %v14680_v53 = vld [vmem:[%s20949_s5 + $0x1c4] ss:$8 sps:$4 sm:$0xff]  }
0x1495   : > { %15112 = verf.f32 %v6200_v49  ;;  %v5873_v27 = vpop.f32.mrb[132].mxu1  ;;  %v5946_v4 = vpop.f32.mrb[100].mxu0  ;;  %v21006_v49 = vsub.s32 5, %v15964_v28 }
0x1496   : > { %15114 = verf.f32 %v6205_v57  ;;  %v5874_v22 = vadd.f32 %v5873_v27, %v18087_v9  ;;  %v5875_v7 = vpop.f32.mrb[133].mxu1  ;;  %v5947_v58 = vadd.f32 %v5946_v4, %v18092_v1  ;;  %v5948_v55 = vpop.f32.mrb[101].mxu0  ;;  %7323 = vmatpush1.bf16.msra.mxu1 %v14666_v54  ;;  %v18279_v54 = vmul.f32 0.5, %v5864_v17  ;;  %v14672_v17 = vld [vmem:[%s20949_s5 + $0x1a0] ss:$8 sps:$4 sm:$0xff]  }
0x1497   : > { %15116 = verf.f32 %v6207_v15  ;;  %v5876_v8 = vadd.f32 %v5875_v7, %v18096_v36  ;;  %v5877_v56 = vpop.f32.mrb[134].mxu1  ;;  %v5949_v47 = vadd.f32 %v5948_v55, %v18101_v11  ;;  %v5950_v34 = vpop.f32.mrb[102].mxu0  ;;  %7324 = vmatprep.subr.bf16.mxu1 %v14671_v51  ;;  %v18274_v43 = vrot.slane %v18083_v0, %v21006_v49 }
0x1498   : > { %15118 = verf.f32 %v6206_v44  ;;  %v6213_v18 = vmul.f32 0.70710677, %v5874_v22  ;;  %v5879_v40 = vpop.f32.mrb[135].mxu1  ;;  %v6215_v12 = vmul.f32 0.70710677, %v5947_v58  ;;  %v5952_v57 = vpop.f32.mrb[103].mxu0  ;;  %v18282_v15 = vrot.slane %v18083_v0, %v5159_v6 }
0x1499   : > { %15120 = verf.f32 %v6208_v41  ;;  %v18284_v44 = vmul.f32 0.5, %v5937_v10  ;;  %v6214_v51 = vmul.f32 0.70710677, %v5876_v8  ;;  %v6216_v28 = vmul.f32 0.70710677, %v5949_v47 }
0x149a   : > { %15122 = verf.f32 %v6213_v18  ;;  %v5878_v27 = vadd.f32 %v5877_v56, %v18087_v9  ;;  %v5951_v4 = vadd.f32 %v5950_v34, %v18092_v1  ;;  %v5880_v7 = vadd.f32 %v5879_v40, %v18096_v36  ;;  %7325 = vmatpush1.bf16.msra.mxu1 %v14669_v59  ;;  %v14677_v9 = vld [vmem:[%s20949_s5 + $0x1b4] ss:$8 sps:$4 sm:$0xff]  }
0x149b   : > { %15124 = verf.f32 %v6215_v12  ;;  %v18293_v0 = vmul.f32 0.5, %v18228_v20  ;;  %v18296_v10 = vmul.f32 0.5, %v18231_v14  ;;  %v18298_v6 = vmul.f32 0.5, %v5868_v38  ;;  %7326 = vmatprep.subr.bf16.mxu1 %v14674_v62  ;;  %v14675_v14 = vld [vmem:[%s20949_s5 + $0x1b0] ss:$8 sps:$4 sm:$0xff]  }
0x149c   : > { %v15107_v41 = vpop.eup %15106  ;;  %15126 = verf.f32 %v6214_v51  ;;  %v18303_v36 = vmul.f32 0.5, %v5941_v46  ;;  %v6221_v55 = vmul.f32 0.70710677, %v5878_v27  ;;  %v5953_v20 = vadd.f32 %v5952_v57, %v18101_v11 }
0x149d   : > { %v15109_v1 = vpop.eup %15108  ;;  %v5989_v56 = vpop.f32.mrb[136].mxu1  ;;  %v18312_v18 = vmul.f32 0.5, %v18245_v42  ;;  %v18314_v34 = vmul.f32 0.5, %v5874_v22  ;;  %15128 = verf.f32 %v6216_v28  ;;  %v6223_v46 = vmul.f32 0.70710677, %v5951_v4 }
0x149e   : > { %v6062_v59 = vpop.f32.mrb[104].mxu0  ;;  %v15111_v38 = vpop.eup %15110  ;;  %v18319_v49 = vmul.f32 0.5, %v5947_v58  ;;  %v18321_v62 = vmul.f32 0.5, %v5876_v8  ;;  %15130 = verf.f32 %v6221_v55  ;;  %v6222_v12 = vmul.f32 0.70710677, %v5880_v7  ;;  %7327 = vmatpush1.bf16.msra.mxu1 %v14672_v17 }
0x149f   : > { %v5991_v40 = vpop.f32.mrb[137].mxu1  ;;  %v15113_v11 = vpop.eup %15112  ;;  %v6325_v22 = vadd.f32 1.0, %v15107_v41  ;;  %v6327_v2 = vadd.f32 1.0, %v15109_v1  ;;  %v18323_v28 = vmul.f32 0.5, %v5949_v47  ;;  %15132 = verf.f32 %v6223_v46  ;;  %7328 = vmatprep.subr.bf16.mxu1 %v14677_v9 }
0x14a0   : > { %v6064_v57 = vpop.f32.mrb[105].mxu0  ;;  %v5993_v51 = vpop.f32.mrb[138].mxu1  ;;  %v6326_v32 = vadd.f32 1.0, %v15111_v38  ;;  %v6328_v58 = vadd.f32 1.0, %v15113_v11  ;;  %15134 = verf.f32 %v6222_v12  ;;  %v6224_v8 = vmul.f32 0.70710677, %v5953_v20 }
0x14a1   : > { %v15115_v42 = vpop.eup %15114  ;;  %v6066_v23 = vpop.f32.mrb[106].mxu0  ;;  %v5990_v17 = vadd.f32 %v5989_v56, %v18260_v5  ;;  %v6063_v41 = vadd.f32 %v6062_v59, %v18268_v35  ;;  %v18329_v1 = vmul.f32 0.5, %v5878_v27  ;;  %v18331_v46 = vmul.f32 0.5, %v5951_v4  ;;  %v14678_v38 = vld [vmem:[%s20949_s5 + $0x1c0] ss:$8 sps:$4 sm:$0xff]  }
0x14a2   : > { %v5995_v19 = vpop.f32.mrb[139].mxu1  ;;  %v15117_v16 = vpop.eup %15116  ;;  %v6333_v30 = vadd.f32 1.0, %v15115_v42  ;;  %15136 = verf.f32 %v6224_v8  ;;  %v5992_v9 = vadd.f32 %v5991_v40, %v18274_v43  ;;  %7329 = vmatpush1.bf16.msra.mxu1 %v14675_v14  ;;  %v18341_v56 = vmul.f32 %v6327_v2, %v18284_v44  ;;  %v14683_v4 = vld [vmem:[%s20949_s5 + $0x1d4] ss:$8 sps:$4 sm:$0xff]  }
0x14a3   : > { %v18325_v24 = vpop.f32.mrb[107].mxu0  ;;  %v15119_v55 = vpop.eup %15118  ;;  %v6335_v60 = vadd.f32 1.0, %v15117_v16  ;;  %v18338_v16 = vmul.f32 %v6325_v22, %v18279_v54  ;;  %v18343_v59 = vmul.f32 0.5, %v5880_v7  ;;  %v6169_v27 = vmul.f32 0.70710677, %v5990_v17  ;;  %7330 = vmatprep.subr.bf16.mxu1 %v14680_v53 }
0x14a4   : > { %v15121_v47 = vpop.eup %15120  ;;  %21007 = vst [vmem:[#allocation18_spill] sm:$0xff] %v18341_v56  ;;  %v18349_v40 = vmul.f32 %v6326_v32, %v18293_v0  ;;  %v6334_v12 = vadd.f32 1.0, %v15119_v55  ;;  %v18351_v42 = vmul.f32 0.5, %v5953_v20  ;;  %v6171_v54 = vmul.f32 0.70710677, %v6063_v41 }
0x14a5   : > { %v15123_v11 = vpop.eup %15122  ;;  %v18353_v22 = vpop.f32.mrb[140].mxu1  ;;  %v18358_v7 = vmul.f32 %v6328_v58, %v18296_v10  ;;  %v18361_v53 = vmul.f32 %v6333_v30, %v18298_v6  ;;  %v18364_v8 = vmul.f32 %v6335_v60, %v18303_v36  ;;  %v6336_v32 = vadd.f32 1.0, %v15121_v47  ;;  %v14681_v20 = vld [vmem:[%s20949_s5 + $0x1d0] ss:$8 sps:$4 sm:$0xff]  }
0x14a6   : > { %v15125_v14 = vpop.eup %15124  ;;  %v18355_v2 = vpop.f32.mrb[108].mxu0  ;;  %v6341_v26 = vadd.f32 1.0, %v15123_v11  ;;  %15138 = verf.f32 %v6169_v27  ;;  %v6170_v21 = vmul.f32 0.70710677, %v5992_v9  ;;  %7331 = vmatpush1.bf16.msra.mxu1 %v14678_v38  ;;  %v18375_v6 = vmul.f32 0.5, %v5990_v17 }
0x14a7   : > { %v15127_v44 = vpop.eup %15126  ;;  %21008 = vst [vmem:[#allocation19_spill] sm:$0xff] %v18358_v7  ;;  %21009 = vst [vmem:[#allocation20_spill] sm:$0xff] %v18364_v8  ;;  %v6001_v0 = vpop.f32.mrb[141].mxu1  ;;  %v6343_v52 = vadd.f32 1.0, %v15125_v14  ;;  %v6065_v36 = vadd.f32 %v6064_v57, %v18282_v15  ;;  %v5994_v47 = vadd.f32 %v5993_v51, %v18260_v5  ;;  %7332 = vmatprep.subr.bf16.mxu1 %v14683_v4  ;;  %v14686_v11 = vld [vmem:[%s20949_s5 + $0x1e4] ss:$8 sps:$4 sm:$0xff]   ;;  %15140 = verf.f32 %v6171_v54 }
0x14a8   : > { %v18366_v55 = vpop.f32.mrb[109].mxu0  ;;  %v18371_v10 = vpop.f32.mrb[142].mxu1  ;;  %v6342_v60 = vadd.f32 1.0, %v15127_v44  ;;  %v18387_v38 = vmul.f32 %v6334_v12, %v18305_v63  ;;  %v6067_v17 = vadd.f32 %v6066_v23, %v18268_v35  ;;  %v5996_v57 = vadd.f32 %v5995_v19, %v18274_v43  ;;  %v14684_v19 = vld [vmem:[%s20949_s5 + $0x1e0] ss:$8 sps:$4 sm:$0xff]  }
0x14a9   : > { %v18373_v58 = vpop.f32.mrb[110].mxu0  ;;  %v15129_v30 = vpop.eup %15128  ;;  %v18392_v51 = vmul.f32 %v6336_v32, %v18312_v18  ;;  %v18394_v44 = vmul.f32 0.5, %v6063_v41  ;;  %v18396_v4 = vmul.f32 0.5, %v5992_v9  ;;  %v6172_v31 = vmul.f32 0.70710677, %v6065_v36 }
0x14aa   : > { %v18379_v48 = vpop.f32.mrb[143].mxu1  ;;  %v18381_v37 = vpop.f32.mrb[111].mxu0  ;;  %v18399_v25 = vmul.f32 %v6341_v26, %v18314_v34  ;;  %v18402_v63 = vmul.f32 %v6343_v52, %v18319_v49  ;;  %15142 = verf.f32 %v6170_v21  ;;  %v6177_v23 = vmul.f32 0.70710677, %v5994_v47  ;;  %7333 = vmatpush1.bf16.msra.mxu1 %v14681_v20  ;;  %v14689_v26 = vld [vmem:[%s20949_s5 + $0x1f4] ss:$8 sps:$4 sm:$0xff]  }
0x14ab   : > { %v15131_v27 = vpop.eup %15130  ;;  %21010 = vst [vmem:[#allocation21_spill] sm:$0xff] %v18392_v51  ;;  %v18408_v18 = vmul.f32 %v6342_v60, %v18321_v62  ;;  %v6344_v41 = vadd.f32 1.0, %v15129_v30  ;;  %15144 = verf.f32 %v6172_v31  ;;  %v6179_v9 = vmul.f32 0.70710677, %v6067_v17  ;;  %7334 = vmatprep.subr.bf16.mxu1 %v14686_v11 }
0x14ac   : > { %v15133_v14 = vpop.eup %15132  ;;  %21011 = vst [vmem:[#allocation22_spill] sm:$0xff] %v18402_v63  ;;  %v6349_v34 = vadd.f32 1.0, %v15131_v27  ;;  %15146 = verf.f32 %v6177_v23  ;;  %v6178_v49 = vmul.f32 0.70710677, %v5996_v57  ;;  %v6069_v31 = vadd.f32 %v18325_v24, %v18282_v15  ;;  %v14687_v24 = vld [vmem:[%s20949_s5 + $0x1f0] ss:$8 sps:$4 sm:$0xff]  }
0x14ad   : > { %v15135_v29 = vpop.eup %15134  ;;  %v6351_v21 = vadd.f32 1.0, %v15133_v14  ;;  %v18413_v12 = vpop.f32.mrb[144].mxu1  ;;  %15148 = verf.f32 %v6179_v9  ;;  %v6000_v60 = vadd.f32 %v18353_v22, %v18260_v5  ;;  %v6073_v11 = vadd.f32 %v18355_v2, %v18268_v35  ;;  %v14692_v23 = vld [vmem:[%s20949_s5 + $0x204] ss:$8 sps:$4 sm:$0xff]  }
0x14ae   : > { %v15137_v52 = vpop.eup %15136  ;;  %v18415_v54 = vpop.f32.mrb[112].mxu0  ;;  %v6350_v32 = vadd.f32 1.0, %v15135_v29  ;;  %15150 = verf.f32 %v6178_v49  ;;  %v6002_v27 = vadd.f32 %v6001_v0, %v18274_v43  ;;  %7335 = vmatpush1.bf16.msra.mxu1 %v14684_v19  ;;  %v18439_v22 = vmul.f32 %v6344_v41, %v18323_v28 }
0x14af   : > { %v6352_v62 = vadd.f32 1.0, %v15137_v52  ;;  %v18419_v20 = vpop.f32.mrb[145].mxu1  ;;  %v18421_v30 = vpop.f32.mrb[113].mxu0  ;;  %v18441_v9 = vmul.f32 0.5, %v6065_v36  ;;  %v6180_v2 = vmul.f32 0.70710677, %v6069_v31  ;;  %v6075_v0 = vadd.f32 %v18366_v55, %v18282_v15  ;;  %7336 = vmatprep.subr.bf16.mxu1 %v14689_v26 }
0x14b0   : > { %v18428_v14 = vpop.f32.mrb[146].mxu1  ;;  %v18430_v29 = vpop.f32.mrb[114].mxu0  ;;  %21012 = vst [vmem:[#allocation23_spill] sm:$0xff] %v18439_v22  ;;  %v18450_v63 = vmul.f32 %v6349_v34, %v18329_v1  ;;  %v6113_v61 = vmul.f32 0.5, %v5994_v47  ;;  %v6115_v8 = vmul.f32 0.5, %v6067_v17  ;;  %v18453_v28 = vmul.f32 %v6351_v21, %v18331_v46 }
0x14b1   : > { %v18445_v52 = vpop.f32.mrb[147].mxu1  ;;  %v18447_v19 = vpop.f32.mrb[115].mxu0  ;;  %v6185_v56 = vmul.f32 0.70710677, %v6000_v60  ;;  %v18455_v36 = vmul.f32 0.5, %v5996_v57  ;;  %15152 = verf.f32 %v6180_v2  ;;  %v18458_v22 = vmul.f32 %v6350_v32, %v18343_v59 }
0x14b2   : > { %v15139_v49 = vpop.eup %15138  ;;  %21013 = vst [vmem:[#allocation24_spill] sm:$0xff] %v18453_v28  ;;  %v6187_v41 = vmul.f32 0.70710677, %v6073_v11  ;;  %v18461_v26 = vmul.f32 %v6352_v62, %v18351_v42  ;;  %v6186_v1 = vmul.f32 0.70710677, %v6002_v27  ;;  %7337 = vmatpush1.bf16.msra.mxu1 %v14687_v24  ;;  %v18463_v17 = vmul.f32 0.5, %v6069_v31 }
0x14b3   : > { %v15141_v55 = vpop.eup %15140  ;;  %15154 = verf.f32 %v6185_v56  ;;  %v6297_v47 = vadd.f32 1.0, %v15139_v49  ;;  %v6188_v46 = vmul.f32 0.70710677, %v6075_v0  ;;  %7379 = vmatprep.subr.bf16.mxu1 %v14692_v23  ;;  %v6438_v34 = vpack.c.bf16 %v18387_v38, %v18349_v40 }
0x14b4   : > { %21014 = vst [vmem:[#allocation25_spill] sm:$0xff] %v18461_v26  ;;  %15156 = verf.f32 %v6187_v41  ;;  %v15143_v57 = vpop.eup %15142  ;;  %v6004_v59 = vadd.f32 %v18371_v10, %v18260_v5  ;;  %v6077_v42 = vadd.f32 %v18373_v58, %v18268_v35  ;;  %v6299_v62 = vadd.f32 1.0, %v15141_v55 }
0x14b5   : > { %15158 = verf.f32 %v6186_v1  ;;  %v18471_v56 = vpop.f32.mrb[148].mxu1  ;;  %v18473_v21 = vpop.f32.mrb[116].mxu0  ;;  %v6437_v31 = vpack.c.bf16 %v18361_v53, %v18338_v16  ;;  %v6006_v24 = vadd.f32 %v18379_v48, %v18274_v43  ;;  %v18483_v23 = vmul.f32 0.5, %v6000_v60  ;;  %7285 = vmatprep.mubr.bf16.mxu1 %v6438_v34 }
0x14b6   : > { %v15145_v32 = vpop.eup %15144  ;;  %15160 = verf.f32 %v6188_v46  ;;  %v18479_v40 = vpop.f32.mrb[149].mxu1  ;;  %v18485_v58 = vmul.f32 0.5, %v6073_v11  ;;  %v18487_v2 = vmul.f32 0.5, %v6002_v27  ;;  %v6193_v49 = vmul.f32 0.70710677, %v6004_v59 }
0x14b7   : > { %v18481_v38 = vpop.f32.mrb[117].mxu0  ;;  %v15147_v10 = vpop.eup %15146  ;;  %v18492_v16 = vmul.f32 %v6297_v47, %v18375_v6  ;;  %v6195_v53 = vmul.f32 0.70710677, %v6077_v42  ;;  %7286 = vmatmul.mubr.bf16.gmra.mrb[160].mxu1 %v6437_v31  ;;  %v6194_v1 = vmul.f32 0.70710677, %v6006_v24  ;;  %v6298_v28 = vadd.f32 1.0, %v15143_v57 }
0x14b8   : > { %v18489_v41 = vpop.f32.mrb[150].mxu1  ;;  %v15149_v55 = vpop.eup %15148  ;;  %v6305_v48 = vadd.f32 1.0, %v15147_v10  ;;  %v18494_v26 = vmul.f32 0.5, %v6075_v0  ;;  %v6079_v11 = vadd.f32 %v18381_v37, %v18282_v15  ;;  %v18503_v51 = vmul.f32 %v6299_v62, %v18394_v44 }
0x14b9   : > { %v15151_v46 = vpop.eup %15150  ;;  %v6307_v60 = vadd.f32 1.0, %v15149_v55  ;;  %v18498_v27 = vpop.f32.mrb[118].mxu0  ;;  %15162 = verf.f32 %v6193_v49  ;;  %v6010_v47 = vadd.f32 %v18413_v12, %v18260_v5  ;;  %v6300_v0 = vadd.f32 1.0, %v15145_v32 }
0x14ba   : > { %v18500_v34 = vpop.f32.mrb[151].mxu1  ;;  %v18505_v6 = vmul.f32 %v6305_v48, %v6113_v61  ;;  %v18509_v57 = vpop.f32.mrb[119].mxu0  ;;  %15164 = verf.f32 %v6195_v53  ;;  %v6196_v37 = vmul.f32 0.70710677, %v6079_v11  ;;  %v6306_v7 = vadd.f32 1.0, %v15151_v46 }
0x14bb   : > { %v18511_v31 = vmul.f32 %v6307_v60, %v6115_v8  ;;  %v15153_v10 = vpop.eup %15152  ;;  %15166 = verf.f32 %v6194_v1  ;;  %v6201_v44 = vmul.f32 0.70710677, %v6010_v47  ;;  %v18516_v62 = vmul.f32 %v6298_v28, %v18396_v4 }
0x14bc   : > { %15168 = verf.f32 %v6196_v37  ;;  %v6083_v8 = vadd.f32 %v18415_v54, %v18268_v35  ;;  %v18522_v49 = vmul.f32 0.5, %v6004_v59  ;;  %v6012_v48 = vadd.f32 %v18419_v20, %v18274_v43 }
0x14bd   : > { %v15155_v61 = vpop.eup %15154  ;;  %15170 = verf.f32 %v6201_v44  ;;  %v6085_v53 = vadd.f32 %v18421_v30, %v18282_v15  ;;  %v18529_v4 = vmul.f32 %v6300_v0, %v18441_v9  ;;  %v18531_v28 = vmul.f32 0.5, %v6077_v42 }
0x14be   : > { %v15157_v32 = vpop.eup %15156  ;;  %v18533_v46 = vmul.f32 0.5, %v6006_v24  ;;  %v6203_v60 = vmul.f32 0.70710677, %v6083_v8  ;;  %v18536_v59 = vmul.f32 %v6306_v7, %v18455_v36  ;;  %v6308_v37 = vadd.f32 1.0, %v15153_v10 }
0x14bf   : > { %v15159_v1 = vpop.eup %15158  ;;  %v18538_v44 = vmul.f32 0.5, %v6079_v11  ;;  %v6202_v20 = vmul.f32 0.70710677, %v6012_v48  ;;  %v6313_v12 = vadd.f32 1.0, %v15155_v61  ;;  %v6315_v55 = vadd.f32 1.0, %v15157_v32 }
0x14c0   : > { %v15161_v54 = vpop.eup %15160  ;;  %v18540_v30 = vmul.f32 0.5, %v6010_v47  ;;  %15172 = verf.f32 %v6203_v60  ;;  %v6314_v9 = vadd.f32 1.0, %v15159_v1  ;;  %v6204_v42 = vmul.f32 0.70710677, %v6085_v53 }
0x14c1   : > { %15174 = verf.f32 %v6202_v20  ;;  %v6446_v24 = vpack.c.bf16 %v18458_v22, %v18408_v18  ;;  %v6316_v0 = vadd.f32 1.0, %v15161_v54  ;;  %v6014_v7 = vadd.f32 %v18428_v14, %v18260_v5 }
0x14c2   : > { %v6087_v36 = vadd.f32 %v18430_v29, %v18268_v35  ;;  %v6445_v11 = vpack.c.bf16 %v18450_v63, %v18399_v25  ;;  %v18551_v47 = vmul.f32 %v6308_v37, %v18463_v17  ;;  %15176 = verf.f32 %v6204_v42 }
0x14c3   : > { %v15163_v10 = vpop.eup %15162  ;;  %7295 = vmatprep.mubr.bf16.mxu1 %v6446_v24  ;;  %v6016_v61 = vadd.f32 %v18445_v52, %v18274_v43  ;;  %v6089_v18 = vadd.f32 %v18447_v19, %v18282_v15  ;;  %v18558_v14 = vmul.f32 %v6313_v12, %v18483_v23  ;;  %v6139_v29 = vmul.f32 0.5, %v6083_v8 }
0x14c4   : > { %v15165_v22 = vpop.eup %15164  ;;  %v18560_v32 = vmul.f32 0.5, %v6012_v48  ;;  %v6209_v25 = vmul.f32 0.70710677, %v6014_v7  ;;  %7296 = vmatmul.mubr.bf16.gmra.mrb[164].mxu1 %v6445_v11  ;;  %v18563_v17 = vmul.f32 %v6315_v55, %v18485_v58  ;;  %v18566_v1 = vmul.f32 %v6314_v9, %v18487_v2  ;;  %v14690_v9 = vld [vmem:[%s20949_s5 + $0x200] ss:$8 sps:$4 sm:$0xff]  }
0x14c5   : > { %v15167_v63 = vpop.eup %15166  ;;  %v18568_v52 = vmul.f32 0.5, %v6085_v53  ;;  %v6211_v60 = vmul.f32 0.70710677, %v6087_v36  ;;  %v21015_v19 = vpack.c.bf16 %v18159_v39, %v18155_v45  ;;  %v18574_v12 = vmul.f32 %v6316_v0, %v18494_v26 }
0x14c6   : > { %v15169_v23 = vpop.eup %15168  ;;  %v6321_v8 = vadd.f32 1.0, %v15163_v10  ;;  %15178 = verf.f32 %v6209_v25  ;;  %v6210_v48 = vmul.f32 0.70710677, %v6016_v61  ;;  %v6323_v58 = vadd.f32 1.0, %v15165_v22 }
0x14c7   : > { %7338 = vmatprep.mubr.bf16.mxu1 %v21015_v19  ;;  %v15171_v54 = vpop.eup %15170  ;;  %v18576_v55 = vmul.f32 0.5, %v6014_v7  ;;  %15180 = verf.f32 %v6211_v60  ;;  %v6212_v2 = vmul.f32 0.70710677, %v6089_v18  ;;  %v18578_v53 = vmul.f32 0.5, %v6087_v36 }
0x14c8   : > { %15182 = verf.f32 %v6210_v48  ;;  %v18582_v45 = vadd.f32 %v18471_v56, %v18260_v5  ;;  %v18586_v39 = vadd.f32 %v18473_v21, %v18268_v35  ;;  %v6322_v26 = vadd.f32 1.0, %v15167_v63  ;;  %v14696_v48 = vld [vmem:[%s20949_s5 + $0x220] ss:$8 sps:$4 sm:$0xff]  }
0x14c9   : > { %15184 = verf.f32 %v6212_v2  ;;  %v18590_v37 = vadd.f32 %v18479_v40, %v18274_v43  ;;  %v18594_v20 = vadd.f32 %v18481_v38, %v18282_v15  ;;  %v18600_v42 = vmul.f32 %v6321_v8, %v18522_v49  ;;  %v14695_v40 = vld [vmem:[%s20949_s5 + $0x214] ss:$8 sps:$4 sm:$0xff]  }
0x14ca   : > { %v15173_v56 = vpop.eup %15172  ;;  %v6324_v21 = vadd.f32 1.0, %v15169_v23  ;;  %v6329_v24 = vadd.f32 1.0, %v15171_v54  ;;  %v6217_v0 = vmul.f32 0.70710677, %v18582_v45  ;;  %v6146_v38 = vmul.f32 0.5, %v6016_v61  ;;  %v21018_v54 = vld [vmem:[#allocation19_spill] sm:$0xff] }
0x14cb   : > { %v15175_v7 = vpop.eup %15174  ;;  %v6331_v36 = vadd.f32 1.0, %v15173_v56  ;;  %v6219_v11 = vmul.f32 0.70710677, %v18586_v39  ;;  %v6218_v10 = vmul.f32 0.70710677, %v18590_v37  ;;  %v18609_v22 = vmul.f32 %v6323_v58, %v18531_v28  ;;  %v21020_v56 = vld [vmem:[#allocation18_spill] sm:$0xff] }
0x14cc   : > { %v6330_v49 = vadd.f32 1.0, %v15175_v7  ;;  %v6148_v25 = vmul.f32 0.5, %v6089_v18  ;;  %v6220_v63 = vmul.f32 0.70710677, %v18594_v20  ;;  %v21016_v60 = vpack.c.bf16 %v18152_v13, %v18150_v33  ;;  %v15177_v19 = vpop.eup %15176  ;;  %v14693_v33 = vld [vmem:[%s20949_s5 + $0x210] ss:$8 sps:$4 sm:$0xff]  }
0x14cd   : > { %v18616_v23 = vmul.f32 %v6322_v26, %v18533_v46  ;;  %15186 = verf.f32 %v6217_v0  ;;  %v18620_v61 = vadd.f32 %v18489_v41, %v18260_v5  ;;  %v18624_v28 = vadd.f32 %v18498_v27, %v18268_v35 }
0x14ce   : > { %7339 = vmatmul.mubr.bf16.vlgmr.msra.gmra.mrb[152].mxu1 %v21016_v60  ;;  %v21017_v18 = vpack.c.bf16 %v18191_v50, %v18189_v3  ;;  %v18633_v13 = vmul.f32 %v6324_v21, %v18538_v44  ;;  %v18636_v46 = vmul.f32 %v6329_v24, %v18540_v30  ;;  %15188 = verf.f32 %v6219_v11  ;;  %v14698_v3 = vld [vmem:[%s20949_s5 + $0x224] ss:$8 sps:$4 sm:$0xff]   ;;  %v21021_v21 = vld [vmem:[#allocation20_spill] sm:$0xff]  ;;  %v21023_v24 = vld [vmem:[#allocation25_spill] sm:$0xff] }
0x14cf   : > { %7380 = vmatpush1.bf16.msra.mxu1 %v14690_v9  ;;  %v18640_v5 = vadd.f32 %v18500_v34, %v18274_v43  ;;  %v18645_v50 = vmul.f32 %v6331_v36, %v6139_v29  ;;  %v6332_v35 = vadd.f32 1.0, %v15177_v19  ;;  %15190 = verf.f32 %v6218_v10  ;;  %v14701_v9 = vld [vmem:[%s20949_s5 + $0x234] ss:$8 sps:$4 sm:$0xff]  }
0x14d0   : > { %7348 = vmatprep.mubr.bf16.mxu1 %v21017_v18  ;;  %7381 = vmatprep.subr.bf16.mxu1 %v14695_v40  ;;  %v6225_v41 = vmul.f32 0.70710677, %v18620_v61  ;;  %v15179_v27 = vpop.eup %15178  ;;  %v18649_v44 = vmul.f32 %v6330_v49, %v18560_v32  ;;  %15192 = verf.f32 %v6220_v63  ;;  %v6227_v30 = vmul.f32 0.70710677, %v18624_v28  ;;  %v21019_v32 = vld [vmem:[#allocation21_spill] sm:$0xff]  ;;  %v21025_v19 = vld [vmem:[#allocation16_spill] sm:$0xff] }
0x14d1   : > { %v6226_v43 = vmul.f32 0.70710677, %v18640_v5  ;;  %v15181_v34 = vpop.eup %15180  ;;  %v6337_v8 = vadd.f32 1.0, %v15179_v27  ;;  %v18655_v29 = vadd.f32 %v18509_v57, %v18282_v15  ;;  %v6440_v58 = vpack.c.bf16 %v21019_v32, %v21018_v54  ;;  %v21022_v57 = vld [vmem:[#allocation23_spill] sm:$0xff]  ;;  %v21024_v60 = vld [vmem:[#allocation17_spill] sm:$0xff] }
0x14d2   : > { %15194 = verf.f32 %v6225_v41  ;;  %v15183_v2 = vpop.eup %15182  ;;  %v6339_v26 = vadd.f32 1.0, %v15181_v34  ;;  %v6439_v15 = vpack.c.bf16 %v21021_v21, %v21020_v56  ;;  %v6448_v0 = vpack.c.bf16 %v21023_v24, %v21022_v57  ;;  %v14707_v57 = vld [vmem:[%s20949_s5 + $0x254] ss:$8 sps:$4 sm:$0xff]  }
0x14d3   : > { %7382 = vmatpush1.bf16.msra.mxu1 %v14693_v33  ;;  %15196 = verf.f32 %v6227_v30  ;;  %v15185_v40 = vpop.eup %15184  ;;  %v18670_v7 = vmul.f32 %v6332_v35, %v18568_v52  ;;  %v18673_v36 = vmul.f32 %v6337_v8, %v18576_v55  ;;  %v6338_v11 = vadd.f32 1.0, %v15183_v2  ;;  %v21027_v33 = vld [vmem:[#allocation22_spill] sm:$0xff]  ;;  %v14699_v55 = vld [vmem:[%s20949_s5 + $0x230] ss:$8 sps:$4 sm:$0xff]  }
0x14d4   : > { %7383 = vmatprep.subr.bf16.mxu1 %v14698_v3  ;;  %15198 = verf.f32 %v6226_v43  ;;  %v18676_v10 = vmul.f32 %v6339_v26, %v18578_v53  ;;  %v6340_v49 = vadd.f32 1.0, %v15185_v40  ;;  %v6228_v63 = vmul.f32 0.70710677, %v18655_v29  ;;  %v21028_v3 = vld [vmem:[#allocation24_spill] sm:$0xff] }
0x14d5   : > { %v21026_v18 = vpack.c.bf16 %v21024_v60, %v21025_v19  ;;  %v6447_v41 = vpack.c.bf16 %v21028_v3, %v21027_v33  ;;  %v18684_v52 = vmul.f32 %v6338_v11, %v6146_v38  ;;  %v6426_v53 = vpack.c.bf16 %v18536_v59, %v18516_v62  ;;  %v14704_v38 = vld [vmem:[%s20949_s5 + $0x244] ss:$8 sps:$4 sm:$0xff]   ;;  %v14714_v33 = vld [vmem:[%s20949_s5 + $0x280] ss:$8 sps:$4 sm:$0xff]   ;;  %v14719_v62 = vld [vmem:[%s20949_s5 + $0x294] ss:$8 sps:$4 sm:$0xff]  }
0x14d6   : > { %v6434_v35 = vpack.c.bf16 %v18616_v23, %v18566_v1  ;;  %v18693_v27 = vmul.f32 %v6340_v49, %v6148_v25  ;;  %15200 = verf.f32 %v6228_v63  ;;  %v6433_v30 = vpack.c.bf16 %v18600_v42, %v18558_v14  ;;  %v14717_v59 = vld [vmem:[%s20949_s5 + $0x290] ss:$8 sps:$4 sm:$0xff]   ;;  %v14722_v3 = vld [vmem:[%s20949_s5 + $0x2a4] ss:$8 sps:$4 sm:$0xff]   ;;  %v14750_v14 = vld [vmem:[%s20949_s5 + $0x340] ss:$8 sps:$4 sm:$0xff]  }
0x14d7   : > { %7349 = vmatmul.mubr.bf16.gmra.mrb[156].mxu1 %v21026_v18  ;;  %v6441_v43 = vpack.c.bf16 %v18673_v36, %v18636_v46  ;;  %v15187_v34 = vpop.eup %15186  ;;  %v6442_v8 = vpack.c.bf16 %v18684_v52, %v18649_v44  ;;  %v6428_v25 = vpack.c.bf16 %v18551_v47, %v18529_v4  ;;  %v6435_v32 = vpack.c.bf16 %v18609_v22, %v18563_v17  ;;  %v14747_v1 = vld [vmem:[%s20949_s5 + $0x330] ss:$8 sps:$4 sm:$0xff]   ;;  %v14752_v23 = vld [vmem:[%s20949_s5 + $0x344] ss:$8 sps:$4 sm:$0xff]   ;;  %v14755_v42 = vld [vmem:[%s20949_s5 + $0x354] ss:$8 sps:$4 sm:$0xff]  }
0x14d8   : > { %7384 = vmatpush1.bf16.msra.mxu1 %v14696_v48  ;;  %7358 = vmatprep.mubr.bf16.mxu1 %v6440_v58  ;;  %v6436_v48 = vpack.c.bf16 %v18633_v13, %v18574_v12  ;;  %v15189_v54 = vpop.eup %15188  ;;  %v6444_v58 = vpack.c.bf16 %v18693_v27, %v18670_v7  ;;  %v6345_v21 = vadd.f32 1.0, %v15187_v34  ;;  %v6153_v49 = vmul.f32 0.5, %v18582_v45  ;;  %v14753_v44 = vld [vmem:[%s20949_s5 + $0x350] ss:$8 sps:$4 sm:$0xff]   ;;  %v14758_v52 = vld [vmem:[%s20949_s5 + $0x364] ss:$8 sps:$4 sm:$0xff]  }
0x14d9   : > { %7385 = vmatprep.subr.bf16.mxu1 %v14701_v9  ;;  %v15191_v26 = vpop.eup %15190  ;;  %v14702_v9 = vld [vmem:[%s20949_s5 + $0x240] ss:$8 sps:$4 sm:$0xff]   ;;  %v6347_v40 = vadd.f32 1.0, %v15189_v54  ;;  %v6161_v60 = vmul.f32 0.5, %v18620_v61  ;;  %v6154_v34 = vmul.f32 0.5, %v18590_v37  ;;  %v6162_v61 = vmul.f32 0.5, %v18640_v5 }
0x14da   : > { %v15193_v56 = vpop.eup %15192  ;;  %v6346_v63 = vadd.f32 1.0, %v15191_v26  ;;  %v14705_v54 = vld [vmem:[%s20949_s5 + $0x250] ss:$8 sps:$4 sm:$0xff]   ;;  %v18728_v45 = vmul.f32 %v6345_v21, %v6153_v49  ;;  %v6156_v5 = vmul.f32 0.5, %v18594_v20  ;;  %v14756_v46 = vld [vmem:[%s20949_s5 + $0x360] ss:$8 sps:$4 sm:$0xff]  }
0x14db   : > { %v14761_v36 = vld [vmem:[%s20949_s5 + $0x374] ss:$8 sps:$4 sm:$0xff]   ;;  %v14765_v47 = vld [vmem:[%s20949_s5 + $0x390] ss:$8 sps:$4 sm:$0xff]   ;;  %v21033_v12 = vld [vmem:[#allocation7_spill] sm:$0xff] }
0x14dc   : > { %7386 = vmatpush1.bf16.msra.mxu1 %v14699_v55  ;;  %v15195_v24 = vpop.eup %15194  ;;  %v6155_v55 = vmul.f32 0.5, %v18586_v39  ;;  %v14710_v39 = vld [vmem:[%s20949_s5 + $0x264] ss:$8 sps:$4 sm:$0xff]   ;;  %v14767_v4 = vld [vmem:[%s20949_s5 + $0x394] ss:$8 sps:$4 sm:$0xff]  }
0x14dd   : > { %7387 = vmatprep.subr.bf16.mxu1 %v14704_v38  ;;  %v15197_v11 = vpop.eup %15196  ;;  %v6353_v19 = vadd.f32 1.0, %v15195_v24  ;;  %v6163_v38 = vmul.f32 0.5, %v18624_v28  ;;  %v6348_v28 = vadd.f32 1.0, %v15193_v56  ;;  %v18740_v24 = vmul.f32 %v6346_v63, %v6154_v34  ;;  %v14708_v56 = vld [vmem:[%s20949_s5 + $0x260] ss:$8 sps:$4 sm:$0xff]  }
0x14de   : > { %v15199_v18 = vpop.eup %15198  ;;  %v6355_v2 = vadd.f32 1.0, %v15197_v11  ;;  %v18736_v37 = vmul.f32 %v6347_v40, %v6155_v55  ;;  %v14713_v40 = vld [vmem:[%s20949_s5 + $0x274] ss:$8 sps:$4 sm:$0xff]   ;;  %v14723_v55 = vld [vmem:[%s20949_s5 + $0x2b0] ss:$8 sps:$4 sm:$0xff]  }
0x14df   : > { %7359 = vmatmul.mubr.bf16.gmra.mrb[160].mxu1 %v6439_v15  ;;  %v18730_v26 = vmul.f32 %v6353_v19, %v6161_v60  ;;  %v6354_v15 = vadd.f32 1.0, %v15199_v18  ;;  %v18758_v20 = vmul.f32 %v6348_v28, %v6156_v5  ;;  %v14711_v60 = vld [vmem:[%s20949_s5 + $0x270] ss:$8 sps:$4 sm:$0xff]   ;;  %v14716_v18 = vld [vmem:[%s20949_s5 + $0x284] ss:$8 sps:$4 sm:$0xff]  }
0x14e0   : > { %7388 = vmatpush1.bf16.msra.mxu1 %v14702_v9  ;;  %7368 = vmatprep.mubr.bf16.mxu1 %v6448_v0  ;;  %v18738_v0 = vmul.f32 %v6355_v2, %v6163_v38  ;;  %v15201_v9 = vpop.eup %15200  ;;  %v14728_v34 = vld [vmem:[%s20949_s5 + $0x2c4] ss:$8 sps:$4 sm:$0xff]   ;;  %v14726_v38 = vld [vmem:[%s20949_s5 + $0x2c0] ss:$8 sps:$4 sm:$0xff]   ;;  %v14737_v28 = vld [vmem:[%s20949_s5 + $0x2f4] ss:$8 sps:$4 sm:$0xff]  }
0x14e1   : > { %7389 = vmatprep.subr.bf16.mxu1 %v14707_v57  ;;  %v18742_v21 = vmul.f32 %v6354_v15, %v6162_v61  ;;  %v6449_v11 = vpack.c.bf16 %v18730_v26, %v18728_v45  ;;  %v6164_v57 = vmul.f32 0.5, %v18655_v29  ;;  %v6356_v49 = vadd.f32 1.0, %v15201_v9  ;;  %v14729_v61 = vld [vmem:[%s20949_s5 + $0x2d0] ss:$8 sps:$4 sm:$0xff]   ;;  %v14734_v15 = vld [vmem:[%s20949_s5 + $0x2e4] ss:$8 sps:$4 sm:$0xff]  }
0x14e2   : > { %v6451_v2 = vpack.c.bf16 %v18738_v0, %v18736_v37  ;;  %v14735_v9 = vld [vmem:[%s20949_s5 + $0x2f0] ss:$8 sps:$4 sm:$0xff]   ;;  %v14740_v5 = vld [vmem:[%s20949_s5 + $0x304] ss:$8 sps:$4 sm:$0xff]   ;;  %v14773_v45 = vld [vmem:[%s20949_s5 + $0x3b4] ss:$8 sps:$4 sm:$0xff]  }
0x14e3   : > { %v6450_v63 = vpack.c.bf16 %v18742_v21, %v18740_v24  ;;  %v18760_v29 = vmul.f32 %v6356_v49, %v6164_v57  ;;  %v14738_v57 = vld [vmem:[%s20949_s5 + $0x300] ss:$8 sps:$4 sm:$0xff]   ;;  %v14743_v49 = vld [vmem:[%s20949_s5 + $0x314] ss:$8 sps:$4 sm:$0xff]   ;;  %v14771_v26 = vld [vmem:[%s20949_s5 + $0x3b0] ss:$8 sps:$4 sm:$0xff]  }
0x14e4   : > { %7390 = vmatpush1.bf16.msra.mxu1 %v14705_v54  ;;  %v14731_v54 = vld [vmem:[%s20949_s5 + $0x2d4] ss:$8 sps:$4 sm:$0xff]   ;;  %v14776_v24 = vld [vmem:[%s20949_s5 + $0x3c4] ss:$8 sps:$4 sm:$0xff]   ;;  %v14774_v21 = vld [vmem:[%s20949_s5 + $0x3c0] ss:$8 sps:$4 sm:$0xff]  }
0x14e5   : > { %7391 = vmatprep.subr.bf16.mxu1 %v14710_v39  ;;  %v6452_v19 = vpack.c.bf16 %v18760_v29, %v18758_v20  ;;  %v14732_v39 = vld [vmem:[%s20949_s5 + $0x2e0] ss:$8 sps:$4 sm:$0xff]  }
0x14e7   : > { %7369 = vmatmul.mubr.bf16.gmra.mrb[164].mxu1 %v6447_v41  ;;  %v14720_v41 = vld [vmem:[%s20949_s5 + $0x2a0] ss:$8 sps:$4 sm:$0xff]  }
0x14e8   : > { %7392 = vmatpush1.bf16.msra.mxu1 %v14708_v56  ;;  %7411 = vmatprep.mubr.bf16.mxu1 %v6426_v53  ;;  %v14725_v53 = vld [vmem:[%s20949_s5 + $0x2b4] ss:$8 sps:$4 sm:$0xff]   ;;  %v21029_v56 = vpack.c.bf16 %v18505_v6, %v18492_v16  ;;  %v14744_v16 = vld [vmem:[%s20949_s5 + $0x320] ss:$8 sps:$4 sm:$0xff]  }
0x14e9   : > { %7393 = vmatprep.subr.bf16.mxu1 %v14713_v40  ;;  %v14741_v40 = vld [vmem:[%s20949_s5 + $0x310] ss:$8 sps:$4 sm:$0xff]   ;;  %v14749_v6 = vld [vmem:[%s20949_s5 + $0x334] ss:$8 sps:$4 sm:$0xff]  }
0x14ec   : > { %7394 = vmatpush1.bf16.msra.mxu1 %v14711_v60  ;;  %v14746_v60 = vld [vmem:[%s20949_s5 + $0x324] ss:$8 sps:$4 sm:$0xff]  }
0x14ed   : > { %7395 = vmatprep.subr.bf16.mxu1 %v14716_v18  ;;  %v14782_v18 = vld [vmem:[%s20949_s5 + $0x3e4] ss:$8 sps:$4 sm:$0xff]  }
0x14f0   : > { %7396 = vmatpush1.bf16.msra.mxu1 %v14714_v33  ;;  %v14780_v33 = vld [vmem:[%s20949_s5 + $0x3e0] ss:$8 sps:$4 sm:$0xff]  }
0x14f1   : > { %7397 = vmatprep.subr.bf16.mxu1 %v14719_v62  ;;  %v14785_v62 = vld [vmem:[%s20949_s5 + $0x3f4] ss:$8 sps:$4 sm:$0xff]  }
0x14f4   : > { %7398 = vmatpush1.bf16.msra.mxu1 %v14717_v59  ;;  %v14783_v59 = vld [vmem:[%s20949_s5 + $0x3f0] ss:$8 sps:$4 sm:$0xff]  }
0x14f5   : > { %7399 = vmatprep.subr.bf16.mxu1 %v14722_v3  ;;  %v21030_v3 = vpack.c.bf16 %v18511_v31, %v18503_v51  ;;  %v6581_v51 = vld [vmem:[%s20952_s8 + $0x16] sm:$0x3]  ;;  %v21032_v31 = vld [vmem:[#allocation6_spill] sm:$0xff] }
0x14f6   : > { %v6586_v17 = vrot.slane %v6581_v51, %v21032_v31  ;;  %v6590_v22 = vrot.slane %v6581_v51, %v21033_v12  ;;  %v7727_v51 = vld [vmem:[%s20950_s6 + $0x140] sm:$0xff] }
0x14f8   : > { %7400 = vmatpush1.bf16.msra.mxu1 %v14720_v41  ;;  %v21031_v41 = vpack.c.bf16 %v18676_v10, %v18645_v50 }
0x14f9   : > { %7401 = vmatprep.subr.bf16.mxu1 %v14725_v53 }
0x14fc   : > { %7402 = vmatpush1.bf16.msra.mxu1 %v14723_v55 }
0x14fd   : > { %7403 = vmatprep.subr.bf16.mxu1 %v14728_v34 }
0x1500   : > { %7404 = vmatpush1.bf16.msra.mxu1 %v14726_v38 }
0x1501   : > { %7405 = vmatprep.subr.bf16.mxu1 %v14731_v54 }
0x1504   : > { %7406 = vmatpush1.bf16.msra.mxu1 %v14729_v61 }
0x1505   : > { %7407 = vmatprep.subr.bf16.mxu1 %v14734_v15 }
0x1508   : > { %7408 = vmatpush1.bf16.msra.mxu1 %v14732_v39 }
0x1509   : > { %7409 = vmatprep.subr.bf16.mxu1 %v14737_v28 }
0x150c   : > { %7410 = vmatpush1.bf16.msra.mxu1 %v14735_v9 }
0x150d   : > { %7452 = vmatprep.subr.bf16.mxu1 %v14740_v5 }
0x150f   : > { %7412 = vmatmul.mubr.bf16.vlgmr.msra.gmra.mrb[152].mxu1 %v21029_v56 }
0x1510   : > { %7421 = vmatprep.mubr.bf16.mxu1 %v6434_v35  ;;  %7453 = vmatpush1.bf16.msra.mxu1 %v14738_v57  ;;  %v14759_v35 = vld [vmem:[%s20949_s5 + $0x370] ss:$8 sps:$4 sm:$0xff]  }
0x1511   : > { %7454 = vmatprep.subr.bf16.mxu1 %v14743_v49 }
0x1514   : > { %7455 = vmatpush1.bf16.msra.mxu1 %v14741_v40 }
0x1515   : > { %7456 = vmatprep.subr.bf16.mxu1 %v14746_v60 }
0x1517   : > { %7422 = vmatmul.mubr.bf16.gmra.mrb[156].mxu1 %v6433_v30  ;;  %v14764_v30 = vld [vmem:[%s20949_s5 + $0x384] ss:$8 sps:$4 sm:$0xff]  }
0x1518   : > { %7431 = vmatprep.mubr.bf16.mxu1 %v6442_v8  ;;  %7457 = vmatpush1.bf16.msra.mxu1 %v14744_v16  ;;  %v14770_v8 = vld [vmem:[%s20949_s5 + $0x3a4] ss:$8 sps:$4 sm:$0xff]  }
0x1519   : > { %7458 = vmatprep.subr.bf16.mxu1 %v14749_v6 }
0x151c   : > { %7459 = vmatpush1.bf16.msra.mxu1 %v14747_v1 }
0x151d   : > { %7460 = vmatprep.subr.bf16.mxu1 %v14752_v23 }
0x151f   : > { %7432 = vmatmul.mubr.bf16.gmra.mrb[160].mxu1 %v6441_v43  ;;  %v14762_v43 = vld [vmem:[%s20949_s5 + $0x380] ss:$8 sps:$4 sm:$0xff]  }
0x1520   : > { %7441 = vmatprep.mubr.bf16.mxu1 %v6450_v63  ;;  %7461 = vmatpush1.bf16.msra.mxu1 %v14750_v14  ;;  %v14777_v63 = vld [vmem:[%s20949_s5 + $0x3d0] ss:$8 sps:$4 sm:$0xff]  }
0x1521   : > { %7462 = vmatprep.subr.bf16.mxu1 %v14755_v42 }
0x1524   : > { %7463 = vmatpush1.bf16.msra.mxu1 %v14753_v44 }
0x1525   : > { %7464 = vmatprep.subr.bf16.mxu1 %v14758_v52 }
0x1527   : > { %7442 = vmatmul.mubr.bf16.gmra.mrb[164].mxu1 %v6449_v11  ;;  %v14779_v11 = vld [vmem:[%s20949_s5 + $0x3d4] ss:$8 sps:$4 sm:$0xff]  }
0x1528   : > { %7465 = vmatpush1.bf16.msra.mxu1 %v14756_v46  ;;  %7484 = vmatprep.mubr.bf16.mxu1 %v6428_v25  ;;  %v14768_v25 = vld [vmem:[%s20949_s5 + $0x3a0] ss:$8 sps:$4 sm:$0xff]  }
0x1529   : > { %7466 = vmatprep.subr.bf16.mxu1 %v14761_v36 }
0x152c   : > { %7467 = vmatpush1.bf16.msra.mxu1 %v14759_v35  ;;  %v7717_v35 = vld [vmem:[%s20950_s6] sm:$0xff] }
0x152d   : > { %7468 = vmatprep.subr.bf16.mxu1 %v14764_v30  ;;  %v7718_v30 = vld [vmem:[%s20950_s6 + $0x20] sm:$0xff] }
0x1530   : > { %7469 = vmatpush1.bf16.msra.mxu1 %v14762_v43  ;;  %v7719_v43 = vld [vmem:[%s20950_s6 + $0x40] sm:$0xff] }
0x1531   : > { %7470 = vmatprep.subr.bf16.mxu1 %v14767_v4  ;;  %v13107_v4 = vcombine.low %v7717_v35, %v7718_v30 }
0x1534   : > { %7471 = vmatpush1.bf16.msra.mxu1 %v14765_v47  ;;  %v13108_v47 = vcombine.high %v7717_v35, %v7718_v30 }
0x1535   : > { %7472 = vmatprep.subr.bf16.mxu1 %v14770_v8  ;;  %v7720_v8 = vld [vmem:[%s20950_s6 + $0x60] sm:$0xff] }
0x1536   : > { %7921 = vmatprep.subr.bf16.mxu0 %v13108_v47 }
0x1537   : > { %7922 = vmatpush1.bf16.msra.mxu0 %v13107_v4 }
0x1538   : > { %7473 = vmatpush1.bf16.msra.mxu1 %v14768_v25  ;;  %v13110_v25 = vcombine.high %v7719_v43, %v7720_v8 }
0x1539   : > { %7474 = vmatprep.subr.bf16.mxu1 %v14773_v45  ;;  %v7721_v45 = vld [vmem:[%s20950_s6 + $0x80] sm:$0xff] }
0x153a   : > { %7923 = vmatprep.subr.bf16.mxu0 %v13110_v25 }
0x153c   : > { %7475 = vmatpush1.bf16.msra.mxu1 %v14771_v26  ;;  %v7722_v26 = vld [vmem:[%s20950_s6 + $0xa0] sm:$0xff] }
0x153d   : > { %7476 = vmatprep.subr.bf16.mxu1 %v14776_v24  ;;  %v13109_v24 = vcombine.low %v7719_v43, %v7720_v8 }
0x153f   : > { %7924 = vmatpush1.bf16.msra.mxu0 %v13109_v24 }
0x1540   : > { %7477 = vmatpush1.bf16.msra.mxu1 %v14774_v21  ;;  %v13112_v21 = vcombine.high %v7721_v45, %v7722_v26 }
0x1541   : > { %7478 = vmatprep.subr.bf16.mxu1 %v14779_v11  ;;  %v7723_v11 = vld [vmem:[%s20950_s6 + $0xc0] sm:$0xff] }
0x1542   : > { %7925 = vmatprep.subr.bf16.mxu0 %v13112_v21 }
0x1544   : > { %7479 = vmatpush1.bf16.msra.mxu1 %v14777_v63  ;;  %v7724_v63 = vld [vmem:[%s20950_s6 + $0xe0] sm:$0xff] }
0x1545   : > { %7480 = vmatprep.subr.bf16.mxu1 %v14782_v18  ;;  %v13111_v18 = vcombine.low %v7721_v45, %v7722_v26 }
0x1547   : > { %7926 = vmatpush1.bf16.msra.mxu0 %v13111_v18 }
0x1548   : > { %7481 = vmatpush1.bf16.msra.mxu1 %v14780_v33  ;;  %v13114_v33 = vcombine.high %v7723_v11, %v7724_v63 }
0x1549   : > { %7482 = vmatprep.subr.bf16.mxu1 %v14785_v62  ;;  %v7725_v62 = vld [vmem:[%s20950_s6 + $0x100] sm:$0xff] }
0x154a   : > { %7927 = vmatprep.subr.bf16.mxu0 %v13114_v33 }
0x154c   : > { %7483 = vmatpush1.bf16.msra.mxu1 %v14783_v59  ;;  %v7726_v59 = vld [vmem:[%s20950_s6 + $0x120] sm:$0xff] }
0x154f   : > { %7485 = vmatmul.mubr.bf16.vlgmr.msra.gmra.mrb[152].mxu1 %v21030_v3  ;;  %v13113_v3 = vcombine.low %v7723_v11, %v7724_v63 }
0x1550   : > { %7494 = vmatprep.mubr.bf16.mxu1 %v6436_v48 }
0x1551   : > { %7928 = vmatpush1.bf16.msra.mxu0 %v13113_v3 }
0x1557   : > { %7495 = vmatmul.mubr.bf16.gmra.mrb[156].mxu1 %v6435_v32 }
0x1558   : > { %7504 = vmatprep.mubr.bf16.mxu1 %v6444_v58 }
0x155f   : > { %7505 = vmatmul.mubr.bf16.gmra.mrb[160].mxu1 %v21031_v41  ;;  %v13116_v41 = vcombine.high %v7725_v62, %v7726_v59 }
0x1560   : > { %7514 = vmatprep.mubr.bf16.mxu1 %v6452_v19 }
0x1561   : > { %7929 = vmatprep.subr.bf16.mxu0 %v13116_v41 }
0x1567   : > { %7515 = vmatmul.mubr.bf16.gmra.mrb[164].mxu1 %v6451_v2 }
0x1622   : > { %v7486_v13 = vpop.f32.mrb[152].mxu1 }
0x1623   : > { %v18967_v7 = vadd.f32 %v7486_v13, %v6586_v17  ;;  %v7488_v50 = vpop.f32.mrb[153].mxu1 }
0x1624   : > { %v18969_v10 = vadd.f32 %v7488_v50, %v6590_v22  ;;  %v7490_v27 = vpop.f32.mrb[154].mxu1  ;;  %v7729_v50 = vld [vmem:[%s20950_s6 + $0x180] sm:$0xff] }
0x1625   : > { %v18971_v48 = vadd.f32 %v7490_v27, %v6586_v17  ;;  %v7492_v32 = vpop.f32.mrb[155].mxu1  ;;  %v7730_v27 = vld [vmem:[%s20950_s6 + $0x1a0] sm:$0xff] }
0x1626   : > { %v7525_v58 = vadd.f32 %v18969_v10, %v18967_v7  ;;  %v18975_v37 = vadd.f32 %v7492_v32, %v6590_v22 }
0x1628   : > { %v7528_v0 = vadd.f32 %v18975_v37, %v18971_v48  ;;  %7526 = vadd.xlane.f32.xlu0 %v7525_v58  ;;  %v13120_v58 = vcombine.high %v7729_v50, %v7730_v27 }
0x162a   : > { %v7496_v2 = vpop.f32.mrb[156].mxu1  ;;  %7529 = vadd.xlane.f32.xlu1 %v7528_v0  ;;  %v7731_v0 = vld [vmem:[%s20950_s6 + $0x1c0] sm:$0xff] }
0x162b   : > { %v18979_v20 = vadd.f32 %v7496_v2, %v6586_v17  ;;  %v7498_v29 = vpop.f32.mrb[157].mxu1  ;;  %v7732_v2 = vld [vmem:[%s20950_s6 + $0x1e0] sm:$0xff] }
0x162c   : > { %v18981_v19 = vadd.f32 %v7498_v29, %v6590_v22  ;;  %v7500_v53 = vpop.f32.mrb[158].mxu1  ;;  %v13119_v29 = vcombine.low %v7729_v50, %v7730_v27 }
0x162d   : > { %v18983_v55 = vadd.f32 %v7500_v53, %v6586_v17  ;;  %v7502_v34 = vpop.f32.mrb[159].mxu1  ;;  %v13122_v53 = vcombine.high %v7731_v0, %v7732_v2 }
0x162e   : > { %v7531_v38 = vadd.f32 %v18981_v19, %v18979_v20  ;;  %v18987_v54 = vadd.f32 %v7502_v34, %v6590_v22  ;;  %v7733_v34 = vld [vmem:[%s20950_s6 + $0x200] sm:$0xff] }
0x1630   : > { %v7534_v61 = vadd.f32 %v18987_v54, %v18983_v55  ;;  %7532 = vadd.xlane.f32.xlu0 %v7531_v38  ;;  %v7734_v38 = vld [vmem:[%s20950_s6 + $0x220] sm:$0xff] }
0x1632   : > { %v7506_v15 = vpop.f32.mrb[160].mxu1  ;;  %7535 = vadd.xlane.f32.xlu1 %v7534_v61  ;;  %v13121_v61 = vcombine.low %v7731_v0, %v7732_v2 }
0x1633   : > { %v18991_v39 = vadd.f32 %v7506_v15, %v6586_v17  ;;  %v7508_v28 = vpop.f32.mrb[161].mxu1  ;;  %v13124_v15 = vcombine.high %v7733_v34, %v7734_v38 }
0x1634   : > { %v18993_v9 = vadd.f32 %v7508_v28, %v6590_v22  ;;  %v7510_v5 = vpop.f32.mrb[162].mxu1  ;;  %v7735_v28 = vld [vmem:[%s20950_s6 + $0x240] sm:$0xff] }
0x1635   : > { %v18995_v57 = vadd.f32 %v7510_v5, %v6586_v17  ;;  %v7512_v49 = vpop.f32.mrb[163].mxu1  ;;  %v7736_v5 = vld [vmem:[%s20950_s6 + $0x260] sm:$0xff] }
0x1636   : > { %v7537_v56 = vadd.f32 %v18993_v9, %v18991_v39  ;;  %v18999_v40 = vadd.f32 %v7512_v49, %v6590_v22  ;;  %v13123_v49 = vcombine.low %v7733_v34, %v7734_v38 }
0x1638   : > { %v7540_v60 = vadd.f32 %v18999_v40, %v18995_v57  ;;  %7538 = vadd.xlane.f32.xlu0 %v7537_v56  ;;  %v13126_v56 = vcombine.high %v7735_v28, %v7736_v5 }
0x163a   : > { %v7516_v16 = vpop.f32.mrb[164].mxu1  ;;  %7541 = vadd.xlane.f32.xlu1 %v7540_v60  ;;  %v13125_v60 = vcombine.low %v7735_v28, %v7736_v5  ;;  %v7737_v5 = vld [vmem:[%s20950_s6 + $0x280] sm:$0xff] }
0x163b   : > { %v19003_v6 = vadd.f32 %v7516_v16, %v6586_v17  ;;  %v7518_v1 = vpop.f32.mrb[165].mxu1 }
0x163c   : > { %v19005_v23 = vadd.f32 %v7518_v1, %v6590_v22  ;;  %v7520_v14 = vpop.f32.mrb[166].mxu1 }
0x163d   : > { %v19007_v42 = vadd.f32 %v7520_v14, %v6586_v17  ;;  %v7522_v44 = vpop.f32.mrb[167].mxu1  ;;  %v7728_v17 = vld [vmem:[%s20950_s6 + $0x160] sm:$0xff] }
0x163e   : > { %v7543_v52 = vadd.f32 %v19005_v23, %v19003_v6  ;;  %v19011_v46 = vadd.f32 %v7522_v44, %v6590_v22  ;;  %v13115_v22 = vcombine.low %v7725_v62, %v7726_v59  ;;  %v13118_v13 = vcombine.high %v7727_v51, %v7728_v17 }
0x163f   : > { %v13117_v32 = vcombine.low %v7727_v51, %v7728_v17 }
0x1640   : > { %v7546_v36 = vadd.f32 %v19011_v46, %v19007_v42  ;;  %7544 = vadd.xlane.f32.xlu0 %v7543_v52  ;;  %7930 = vmatpush1.bf16.msra.mxu0 %v13115_v22 }
0x1641   : > { %7931 = vmatprep.subr.bf16.mxu0 %v13118_v13 }
0x1642   : > { %7547 = vadd.xlane.f32.xlu1 %v7546_v36 }
0x1644   : > { %7932 = vmatpush1.bf16.msra.mxu0 %v13117_v32 }
0x1645   : > { %7933 = vmatprep.subr.bf16.mxu0 %v13120_v58 }
0x1648   : > { %7934 = vmatpush1.bf16.msra.mxu0 %v13119_v29 }
0x1649   : > { %7935 = vmatprep.subr.bf16.mxu0 %v13122_v53 }
0x164c   : > { %7936 = vmatpush1.bf16.msra.mxu0 %v13121_v61 }
0x164d   : > { %7937 = vmatprep.subr.bf16.mxu0 %v13124_v15 }
0x1650   : > { %7938 = vmatpush1.bf16.msra.mxu0 %v13123_v49 }
0x1651   : > { %7939 = vmatprep.subr.bf16.mxu0 %v13126_v56  ;;  %v7739_v56 = vld [vmem:[%s20950_s6 + $0x2c0] sm:$0xff] }
0x1654   : > { %7940 = vmatpush1.bf16.msra.mxu0 %v13125_v60  ;;  %v7740_v60 = vld [vmem:[%s20950_s6 + $0x2e0] sm:$0xff] }
0x16b5   : > { %v7527_v16 = vpop.xlane.xlu0 %7526 }
0x16b6   : > { %v7549_v1 = vmul.f32 0.00390625, %v7527_v16  ;;  %v7741_v16 = vld [vmem:[%s20950_s6 + $0x300] sm:$0xff] }
0x16b7   : > { %v7530_v14 = vpop.xlane.xlu1 %7529 }
0x16b8   : > { %v19076_v44 = vsub.f32 %v18967_v7, %v7549_v1  ;;  %v19079_v52 = vsub.f32 %v18969_v10, %v7549_v1  ;;  %v7550_v36 = vmul.f32 0.00390625, %v7530_v14  ;;  %v13130_v1 = vcombine.high %v7739_v56, %v7740_v60  ;;  %v7742_v14 = vld [vmem:[%s20950_s6 + $0x320] sm:$0xff] }
0x16ba   : > { %v7573_v35 = vmul.f32 %v19076_v44, %v19076_v44  ;;  %v7574_v30 = vmul.f32 %v19079_v52, %v19079_v52  ;;  %v19086_v43 = vsub.f32 %v18971_v48, %v7550_v36  ;;  %v19089_v4 = vsub.f32 %v18975_v37, %v7550_v36 }
0x16bb   : > { %v13129_v36 = vcombine.low %v7739_v56, %v7740_v60 }
0x16bc   : > { %v7575_v7 = vmul.f32 %v19086_v43, %v19086_v43  ;;  %v7576_v10 = vmul.f32 %v19089_v4, %v19089_v4  ;;  %v7589_v47 = vadd.f32 %v7574_v30, %v7573_v35  ;;  %v13132_v35 = vcombine.high %v7741_v16, %v7742_v14  ;;  %v7743_v30 = vld [vmem:[%s20950_s6 + $0x340] sm:$0xff] }
0x16bd   : > { %v7533_v8 = vpop.xlane.xlu0 %7532 }
0x16be   : > { %v7551_v25 = vmul.f32 0.00390625, %v7533_v8  ;;  %7590 = vadd.xlane.f32.xlu0 %v7589_v47  ;;  %v7592_v45 = vadd.f32 %v7576_v10, %v7575_v7  ;;  %v7744_v7 = vld [vmem:[%s20950_s6 + $0x360] sm:$0xff]  ;;  %v13131_v10 = vcombine.low %v7741_v16, %v7742_v14 }
0x16bf   : > { %v7536_v26 = vpop.xlane.xlu1 %7535  ;;  %v13134_v47 = vcombine.high %v7743_v30, %v7744_v7  ;;  %v7745_v8 = vld [vmem:[%s20950_s6 + $0x380] sm:$0xff] }
0x16c0   : > { %v19096_v24 = vsub.f32 %v18979_v20, %v7551_v25  ;;  %v19099_v48 = vsub.f32 %v18981_v19, %v7551_v25  ;;  %v7552_v37 = vmul.f32 0.00390625, %v7536_v26  ;;  %7593 = vadd.xlane.f32.xlu1 %v7592_v45  ;;  %v7746_v25 = vld [vmem:[%s20950_s6 + $0x3a0] sm:$0xff]  ;;  %v19188_v45 = vld [vmem:[%s20950_s6 + $0x8] sm:$0xff] }
0x16c1   : > { %v19193_v26 = vld [vmem:[%s20950_s6 + $0x28] sm:$0xff] }
0x16c2   : > { %v7577_v21 = vmul.f32 %v19096_v24, %v19096_v24  ;;  %v7578_v11 = vmul.f32 %v19099_v48, %v19099_v48  ;;  %v19106_v63 = vsub.f32 %v18983_v55, %v7552_v37  ;;  %v19109_v18 = vsub.f32 %v18987_v54, %v7552_v37 }
0x16c3   : > { %v13133_v37 = vcombine.low %v7743_v30, %v7744_v7 }
0x16c4   : > { %v7579_v20 = vmul.f32 %v19106_v63, %v19106_v63  ;;  %v7580_v19 = vmul.f32 %v19109_v18, %v19109_v18  ;;  %v7595_v33 = vadd.f32 %v7578_v11, %v7577_v21  ;;  %v13139_v21 = vcombine.low %v19188_v45, %v19193_v26 }
0x16c5   : > { %v7539_v62 = vpop.xlane.xlu0 %7538  ;;  %v13136_v11 = vcombine.high %v7745_v8, %v7746_v25 }
0x16c6   : > { %v7553_v59 = vmul.f32 0.00390625, %v7539_v62  ;;  %7596 = vadd.xlane.f32.xlu0 %v7595_v33  ;;  %v7598_v3 = vadd.f32 %v7580_v19, %v7579_v20  ;;  %v7747_v20 = vld [vmem:[%s20950_s6 + $0x3c0] sm:$0xff]  ;;  %v13135_v33 = vcombine.low %v7745_v8, %v7746_v25 }
0x16c7   : > { %v7542_v41 = vpop.xlane.xlu1 %7541  ;;  %v7748_v19 = vld [vmem:[%s20950_s6 + $0x3e0] sm:$0xff] }
0x16c8   : > { %v19116_v51 = vsub.f32 %v18991_v39, %v7553_v59  ;;  %v19119_v55 = vsub.f32 %v18993_v9, %v7553_v59  ;;  %v7554_v54 = vmul.f32 0.00390625, %v7542_v41  ;;  %7599 = vadd.xlane.f32.xlu1 %v7598_v3  ;;  %v13138_v62 = vcombine.high %v7747_v20, %v7748_v19 }
0x16c9   : > { %v13137_v59 = vcombine.low %v7747_v20, %v7748_v19  ;;  %v13140_v3 = vcombine.high %v19188_v45, %v19193_v26  ;;  %v8000_v45 = vld [vmem:[%s20950_s6 + $0xc8] sm:$0xff] }
0x16ca   : > { %v7581_v17 = vmul.f32 %v19116_v51, %v19116_v51  ;;  %v7582_v22 = vmul.f32 %v19119_v55, %v19119_v55  ;;  %v19126_v13 = vsub.f32 %v18995_v57, %v7554_v54  ;;  %v19129_v50 = vsub.f32 %v18999_v40, %v7554_v54  ;;  %v8001_v26 = vld [vmem:[%s20950_s6 + $0xe8] sm:$0xff] }
0x16cc   : > { %v7583_v39 = vmul.f32 %v19126_v13, %v19126_v13  ;;  %v7584_v9 = vmul.f32 %v19129_v50, %v19129_v50  ;;  %v7601_v27 = vadd.f32 %v7582_v22, %v7581_v17 }
0x16cd   : > { %v7545_v32 = vpop.xlane.xlu0 %7544 }
0x16ce   : > { %v7555_v58 = vmul.f32 0.00390625, %v7545_v32  ;;  %7602 = vadd.xlane.f32.xlu0 %v7601_v27  ;;  %v7604_v0 = vadd.f32 %v7584_v9, %v7583_v39 }
0x16cf   : > { %v7548_v2 = vpop.xlane.xlu1 %7547 }
0x16d0   : > { %v19136_v29 = vsub.f32 %v19003_v6, %v7555_v58  ;;  %v19139_v57 = vsub.f32 %v19005_v23, %v7555_v58  ;;  %v7556_v40 = vmul.f32 0.00390625, %v7548_v2  ;;  %7605 = vadd.xlane.f32.xlu1 %v7604_v0  ;;  %v7653_v0 = vld [vmem:[%s20952_s8 + $0x18] sm:$0x3] }
0x16d2   : > { %v7585_v53 = vmul.f32 %v19136_v29, %v19136_v29  ;;  %v7586_v34 = vmul.f32 %v19139_v57, %v19139_v57  ;;  %v19146_v38 = vsub.f32 %v19007_v42, %v7556_v40  ;;  %v19149_v61 = vsub.f32 %v19011_v46, %v7556_v40  ;;  %v7738_v42 = vld [vmem:[%s20950_s6 + $0x2a0] sm:$0xff] }
0x16d3   : > { %v13127_v46 = vcombine.low %v7737_v5, %v7738_v42  ;;  %v13128_v49 = vcombine.high %v7737_v5, %v7738_v42 }
0x16d4   : > { %v7587_v6 = vmul.f32 %v19146_v38, %v19146_v38  ;;  %v7588_v23 = vmul.f32 %v19149_v61, %v19149_v61  ;;  %v7607_v15 = vadd.f32 %v7586_v34, %v7585_v53  ;;  %v19209_v34 = vrot.slane %v7653_v0, %v21032_v31 }
0x16d5   : > { %7941 = vmatprep.subr.bf16.mxu0 %v13128_v49 }
0x16d6   : > { %7608 = vadd.xlane.f32.xlu0 %v7607_v15  ;;  %v7610_v28 = vadd.f32 %v7588_v23, %v7587_v6  ;;  %7942 = vmatpush1.bf16.msra.mxu0 %v13127_v46  ;;  %v19212_v6 = vrot.slane %v7653_v0, %v21033_v12  ;;  %v7681_v23 = vld [vmem:[%s20952_s8 + $0x1a] sm:$0x3] }
0x16d7   : > { %7943 = vmatprep.subr.bf16.mxu0 %v13130_v1  ;;  %v19220_v56 = vrot.slane %v7681_v23, %v21032_v31  ;;  %v19223_v60 = vrot.slane %v7681_v23, %v21033_v12 }
0x16d8   : > { %7611 = vadd.xlane.f32.xlu1 %v7610_v28 }
0x16da   : > { %7944 = vmatpush1.bf16.msra.mxu0 %v13129_v36 }
0x16db   : > { %7945 = vmatprep.subr.bf16.mxu0 %v13132_v35 }
0x16de   : > { %7946 = vmatpush1.bf16.msra.mxu0 %v13131_v10 }
0x16df   : > { %7947 = vmatprep.subr.bf16.mxu0 %v13134_v47 }
0x16e2   : > { %7948 = vmatpush1.bf16.msra.mxu0 %v13133_v37  ;;  %v7997_v37 = vld [vmem:[%s20950_s6 + $0x68] sm:$0xff] }
0x16e3   : > { %7949 = vmatprep.subr.bf16.mxu0 %v13136_v11 }
0x16e6   : > { %7950 = vmatpush1.bf16.msra.mxu0 %v13135_v33 }
0x16e7   : > { %7951 = vmatprep.subr.bf16.mxu0 %v13138_v62 }
0x16ea   : > { %7952 = vmatpush1.bf16.msra.mxu0 %v13137_v59 }
0x16eb   : > { %8198 = vmatprep.subr.bf16.mxu0 %v13140_v3 }
0x174b   : > { %v7591_v41 = vpop.xlane.xlu0 %7590 }
0x174c   : > { %v7613_v54 = vmul.f32 0.00390625, %v7591_v41 }
0x174d   : > { %v7594_v17 = vpop.xlane.xlu1 %7593 }
0x174e   : > { %v7621_v22 = vadd.f32 1e-05, %v7613_v54  ;;  %v7614_v39 = vmul.f32 0.00390625, %v7594_v17 }
0x1750   : > { %15202 = vrsqrt.f32 %v7621_v22  ;;  %v7622_v9 = vadd.f32 1e-05, %v7614_v39 }
0x1752   : > { %15204 = vrsqrt.f32 %v7622_v9  ;;  %v7998_v9 = vld [vmem:[%s20950_s6 + $0x88] sm:$0xff] }
0x1753   : > { %v7597_v27 = vpop.xlane.xlu0 %7596 }
0x1754   : > { %v7615_v32 = vmul.f32 0.00390625, %v7597_v27  ;;  %v7999_v27 = vld [vmem:[%s20950_s6 + $0xa8] sm:$0xff] }
0x1755   : > { %v7600_v58 = vpop.xlane.xlu1 %7599 }
0x1756   : > { %v7623_v2 = vadd.f32 1e-05, %v7615_v32  ;;  %v7616_v40 = vmul.f32 0.00390625, %v7600_v58 }
0x1758   : > { %15206 = vrsqrt.f32 %v7623_v2  ;;  %v7624_v53 = vadd.f32 1e-05, %v7616_v40 }
0x175a   : > { %v15203_v15 = vpop.eup %15202  ;;  %15208 = vrsqrt.f32 %v7624_v53  ;;  %v13144_v53 = vcombine.high %v7998_v9, %v7999_v27 }
0x175b   : > { %v7637_v28 = vmul.f32 %v15203_v15, %v19076_v44  ;;  %v7603_v5 = vpop.xlane.xlu0 %7602  ;;  %v7638_v42 = vmul.f32 %v15203_v15, %v19079_v52 }
0x175c   : > { %v15205_v46 = vpop.eup %15204  ;;  %v7617_v49 = vmul.f32 0.00390625, %v7603_v5  ;;  %v13143_v5 = vcombine.low %v7998_v9, %v7999_v27 }
0x175d   : > { %v7665_v16 = vmul.f32 %v19209_v34, %v7637_v28  ;;  %v7639_v1 = vmul.f32 %v15205_v46, %v19086_v43  ;;  %v7606_v14 = vpop.xlane.xlu1 %7605  ;;  %v7640_v36 = vmul.f32 %v15205_v46, %v19089_v4  ;;  %v7666_v44 = vmul.f32 %v19212_v6, %v7638_v42  ;;  %v7996_v4 = vld [vmem:[%s20950_s6 + $0x48] sm:$0xff] }
0x175e   : > { %v7625_v35 = vadd.f32 1e-05, %v7617_v49  ;;  %v7618_v30 = vmul.f32 0.00390625, %v7606_v14  ;;  %v13142_v54 = vcombine.high %v7996_v4, %v7997_v37  ;;  %v13146_v14 = vcombine.high %v8000_v45, %v8001_v26 }
0x175f   : > { %v7667_v52 = vmul.f32 %v19209_v34, %v7639_v1  ;;  %v7668_v7 = vmul.f32 %v19212_v6, %v7640_v36  ;;  %v7694_v47 = vadd.f32 %v19223_v60, %v7666_v44  ;;  %v7693_v25 = vadd.f32 %v19220_v56, %v7665_v16 }
0x1760   : > { %15210 = vrsqrt.f32 %v7625_v35  ;;  %v7626_v10 = vadd.f32 1e-05, %v7618_v30  ;;  %v8002_v35 = vld [vmem:[%s20950_s6 + $0x108] sm:$0xff] }
0x1761   : > { %v7696_v8 = vadd.f32 %v19223_v60, %v7668_v7  ;;  %v7695_v43 = vadd.f32 %v19220_v56, %v7667_v52  ;;  %v8003_v30 = vld [vmem:[%s20950_s6 + $0x128] sm:$0xff]  ;;  %v13145_v52 = vcombine.low %v8000_v45, %v8001_v26 }
0x1762   : > { %v15207_v11 = vpop.eup %15206  ;;  %15212 = vrsqrt.f32 %v7626_v10  ;;  %v13148_v10 = vcombine.high %v8002_v35, %v8003_v30  ;;  %v8014_v26 = vld [vmem:[%s20950_s6 + $0x288] sm:$0xff] }
0x1763   : > { %v7609_v20 = vpop.xlane.xlu0 %7608  ;;  %v7710_v19 = vpack.c.bf16 %v7696_v8, %v7694_v47  ;;  %v7709_v33 = vpack.c.bf16 %v7695_v43, %v7693_v25  ;;  %v7642_v62 = vmul.f32 %v15207_v11, %v19099_v48  ;;  %v7641_v59 = vmul.f32 %v15207_v11, %v19096_v24 }
0x1764   : > { %v15209_v3 = vpop.eup %15208  ;;  %v7619_v41 = vmul.f32 0.00390625, %v7609_v20  ;;  %v13147_v11 = vcombine.low %v8002_v35, %v8003_v30  ;;  %v8020_v30 = vld [vmem:[%s20950_s6 + $0x348] sm:$0xff] }
0x1765   : > { %v7612_v17 = vpop.xlane.xlu1 %7611  ;;  %7953 = vmatprep.mubr.bf16.mxu0 %v7710_v19  ;;  %v7644_v22 = vmul.f32 %v15209_v3, %v19109_v18  ;;  %v7670_v39 = vmul.f32 %v19212_v6, %v7642_v62  ;;  %v7643_v48 = vmul.f32 %v15209_v3, %v19106_v63  ;;  %v7669_v24 = vmul.f32 %v19209_v34, %v7641_v59 }
0x1766   : > { %v7627_v32 = vadd.f32 1e-05, %v7619_v41  ;;  %v7620_v58 = vmul.f32 0.00390625, %v7612_v17  ;;  %7954 = vmatmul.mubr.bf16.vlgmr.msra.gmra.mrb[120].mxu0 %v7709_v33  ;;  %v13141_v18 = vcombine.low %v7996_v4, %v7997_v37  ;;  %v8005_v4 = vld [vmem:[%s20950_s6 + $0x168] sm:$0xff] }
0x1767   : > { %8199 = vmatpush1.bf16.msra.mxu0 %v13139_v21  ;;  %v7672_v0 = vmul.f32 %v19212_v6, %v7644_v22  ;;  %v7671_v2 = vmul.f32 %v19209_v34, %v7643_v48  ;;  %v7698_v63 = vadd.f32 %v19223_v60, %v7670_v39  ;;  %v7697_v15 = vadd.f32 %v19220_v56, %v7669_v24  ;;  %v8006_v17 = vld [vmem:[%s20950_s6 + $0x188] sm:$0xff] }
0x1768   : > { %15214 = vrsqrt.f32 %v7627_v32  ;;  %v7628_v40 = vadd.f32 1e-05, %v7620_v58  ;;  %8200 = vmatprep.subr.bf16.mxu0 %v13142_v54  ;;  %v8007_v22 = vld [vmem:[%s20950_s6 + $0x1a8] sm:$0xff] }
0x1769   : > { %v7700_v23 = vadd.f32 %v19223_v60, %v7672_v0  ;;  %v7699_v28 = vadd.f32 %v19220_v56, %v7671_v2  ;;  %v13152_v27 = vcombine.high %v8006_v17, %v8007_v22 }
0x176a   : > { %v15211_v21 = vpop.eup %15210  ;;  %15216 = vrsqrt.f32 %v7628_v40  ;;  %v21034_v40 = vld [vmem:[#allocation8_spill] sm:$0xff] }
0x176b   : > { %8201 = vmatpush1.bf16.msra.mxu0 %v13141_v18  ;;  %v7712_v42 = vpack.c.bf16 %v7700_v23, %v7698_v63  ;;  %v7711_v46 = vpack.c.bf16 %v7699_v28, %v7697_v15  ;;  %v7646_v49 = vmul.f32 %v15211_v21, %v19119_v55  ;;  %v7645_v16 = vmul.f32 %v15211_v21, %v19116_v51  ;;  %v8012_v23 = vld [vmem:[%s20950_s6 + $0x248] sm:$0xff] }
0x176c   : > { %v15213_v1 = vpop.eup %15212  ;;  %8202 = vmatprep.subr.bf16.mxu0 %v13144_v53  ;;  %v13151_v18 = vcombine.low %v8006_v17, %v8007_v22  ;;  %v8013_v15 = vld [vmem:[%s20950_s6 + $0x268] sm:$0xff]  ;;  %v21036_v17 = vld [vmem:[#allocation10_spill] sm:$0xff] }
0x176d   : > { %7963 = vmatprep.mubr.bf16.mxu0 %v7712_v42  ;;  %v7648_v36 = vmul.f32 %v15213_v1, %v19129_v50  ;;  %v7674_v44 = vmul.f32 %v19212_v6, %v7646_v49  ;;  %v7647_v55 = vmul.f32 %v15213_v1, %v19126_v13  ;;  %v7673_v51 = vmul.f32 %v19209_v34, %v7645_v16  ;;  %v8004_v13 = vld [vmem:[%s20950_s6 + $0x148] sm:$0xff] }
0x176e   : > { %7964 = vmatmul.mubr.bf16.gmra.mrb[124].mxu0 %v7711_v46  ;;  %v13150_v3 = vcombine.high %v8004_v13, %v8005_v4  ;;  %v13149_v39 = vcombine.low %v8004_v13, %v8005_v4  ;;  %v13158_v45 = vcombine.high %v8012_v23, %v8013_v15  ;;  %v8015_v21 = vld [vmem:[%s20950_s6 + $0x2a8] sm:$0xff]  ;;  %v8279_v4 = vld [vmem:[%s20950_s6 + $0x10] sm:$0xff] }
0x176f   : > { %8203 = vmatpush1.bf16.msra.mxu0 %v13143_v5  ;;  %v7676_v7 = vmul.f32 %v19212_v6, %v7648_v36  ;;  %v7675_v50 = vmul.f32 %v19209_v34, %v7647_v55  ;;  %v7702_v47 = vadd.f32 %v19223_v60, %v7674_v44  ;;  %v7701_v25 = vadd.f32 %v19220_v56, %v7673_v51  ;;  %v8016_v46 = vld [vmem:[%s20950_s6 + $0x2c8] sm:$0xff] }
0x1770   : > { %8204 = vmatprep.subr.bf16.mxu0 %v13146_v14  ;;  %v13157_v5 = vcombine.low %v8012_v23, %v8013_v15  ;;  %v13160_v42 = vcombine.high %v8014_v26, %v8015_v21  ;;  %v8017_v49 = vld [vmem:[%s20950_s6 + $0x2e8] sm:$0xff]  ;;  %v13159_v16 = vcombine.low %v8014_v26, %v8015_v21  ;;  %v8293_v23 = vld [vmem:[%s20950_s6 + $0x1d0] sm:$0xff]  ;;  %v15523_v26 = vld [vmem:[%s15985_s21 + $0x18] sm:$0xff] }
0x1771   : > { %v7704_v8 = vadd.f32 %v19223_v60, %v7676_v7  ;;  %v7703_v43 = vadd.f32 %v19220_v56, %v7675_v50  ;;  %v13162_v1 = vcombine.high %v8016_v46, %v8017_v49  ;;  %v8018_v14 = vld [vmem:[%s20950_s6 + $0x308] sm:$0xff]  ;;  %v13161_v44 = vcombine.low %v8016_v46, %v8017_v49  ;;  %v8294_v15 = vld [vmem:[%s20950_s6 + $0x1f0] sm:$0xff] }
0x1772   : > { %v15215_v37 = vpop.eup %15214  ;;  %v8019_v36 = vld [vmem:[%s20950_s6 + $0x328] sm:$0xff]  ;;  %v8296_v46 = vld [vmem:[%s20950_s6 + $0x230] sm:$0xff] }
0x1773   : > { %8205 = vmatpush1.bf16.msra.mxu0 %v13145_v52  ;;  %v7714_v20 = vpack.c.bf16 %v7704_v8, %v7702_v47  ;;  %v7713_v19 = vpack.c.bf16 %v7703_v43, %v7701_v25  ;;  %v7650_v33 = vmul.f32 %v15215_v37, %v19139_v57  ;;  %v7649_v62 = vmul.f32 %v15215_v37, %v19136_v29  ;;  %v8021_v55 = vld [vmem:[%s20950_s6 + $0x368] sm:$0xff]  ;;  %v8280_v37 = vld [vmem:[%s20950_s6 + $0x30] sm:$0xff] }
0x1774   : > { %v15217_v59 = vpop.eup %15216  ;;  %8206 = vmatprep.subr.bf16.mxu0 %v13148_v10  ;;  %v13164_v35 = vcombine.high %v8018_v14, %v8019_v36  ;;  %v13163_v51 = vcombine.low %v8018_v14, %v8019_v36  ;;  %v13166_v52 = vcombine.high %v8020_v30, %v8021_v55  ;;  %v8022_v7 = vld [vmem:[%s20950_s6 + $0x388] sm:$0xff]  ;;  %v13165_v10 = vcombine.low %v8020_v30, %v8021_v55  ;;  %v8297_v14 = vld [vmem:[%s20950_s6 + $0x250] sm:$0xff] }
0x1775   : > { %7973 = vmatprep.mubr.bf16.mxu0 %v7714_v20  ;;  %v7652_v41 = vmul.f32 %v15217_v59, %v19149_v61  ;;  %v7678_v54 = vmul.f32 %v19212_v6, %v7650_v33  ;;  %v7651_v57 = vmul.f32 %v15217_v59, %v19146_v38  ;;  %v7677_v29 = vmul.f32 %v19209_v34, %v7649_v62  ;;  %v8008_v38 = vld [vmem:[%s20950_s6 + $0x1c8] sm:$0xff]  ;;  %v8282_v33 = vld [vmem:[%s20950_s6 + $0x70] sm:$0xff] }
0x1776   : > { %7974 = vmatmul.mubr.bf16.gmra.mrb[128].mxu0 %v7713_v19  ;;  %v8023_v50 = vld [vmem:[%s20950_s6 + $0x3a8] sm:$0xff]  ;;  %v13172_v20 = vcombine.high %v8279_v4, %v8280_v37  ;;  %v8281_v19 = vld [vmem:[%s20950_s6 + $0x50] sm:$0xff]  ;;  %v13171_v62 = vcombine.low %v8279_v4, %v8280_v37 }
0x1777   : > { %8207 = vmatpush1.bf16.msra.mxu0 %v13147_v11  ;;  %v7680_v9 = vmul.f32 %v19212_v6, %v7652_v41  ;;  %v7679_v61 = vmul.f32 %v19209_v34, %v7651_v57  ;;  %v7706_v48 = vadd.f32 %v19223_v60, %v7678_v54  ;;  %v7705_v32 = vadd.f32 %v19220_v56, %v7677_v29  ;;  %v8009_v6 = vld [vmem:[%s20950_s6 + $0x1e8] sm:$0xff]  ;;  %v8284_v41 = vld [vmem:[%s20950_s6 + $0xb0] sm:$0xff]  ;;  %v21035_v54 = vld [vmem:[#allocation9_spill] sm:$0xff] }
0x1778   : > { %8208 = vmatprep.subr.bf16.mxu0 %v13150_v3  ;;  %v13154_v2 = vcombine.high %v8008_v38, %v8009_v6  ;;  %v13153_v53 = vcombine.low %v8008_v38, %v8009_v6  ;;  %v13168_v47 = vcombine.high %v8022_v7, %v8023_v50  ;;  %v8024_v8 = vld [vmem:[%s20950_s6 + $0x3c8] sm:$0xff]  ;;  %v13167_v43 = vcombine.low %v8022_v7, %v8023_v50  ;;  %v8283_v3 = vld [vmem:[%s20950_s6 + $0x90] sm:$0xff] }
0x1779   : > { %v7708_v24 = vadd.f32 %v19223_v60, %v7680_v9  ;;  %v7707_v58 = vadd.f32 %v19220_v56, %v7679_v61  ;;  %v8010_v60 = vld [vmem:[%s20950_s6 + $0x208] sm:$0xff]  ;;  %v13174_v59 = vcombine.high %v8281_v19, %v8282_v33  ;;  %v13173_v22 = vcombine.low %v8281_v19, %v8282_v33  ;;  %v8285_v29 = vld [vmem:[%s20950_s6 + $0xd0] sm:$0xff] }
0x177a   : > { %v8011_v56 = vld [vmem:[%s20950_s6 + $0x228] sm:$0xff]  ;;  %v13176_v57 = vcombine.high %v8283_v3, %v8284_v41  ;;  %v13175_v9 = vcombine.low %v8283_v3, %v8284_v41  ;;  %v8289_v6 = vld [vmem:[%s20950_s6 + $0x150] sm:$0xff] }
0x177b   : > { %8209 = vmatpush1.bf16.msra.mxu0 %v13149_v39  ;;  %v7716_v34 = vpack.c.bf16 %v7708_v24, %v7706_v48  ;;  %v7715_v0 = vpack.c.bf16 %v7707_v58, %v7705_v32  ;;  %v13156_v63 = vcombine.high %v8010_v60, %v8011_v56  ;;  %v13155_v28 = vcombine.low %v8010_v60, %v8011_v56  ;;  %v8025_v25 = vld [vmem:[%s20950_s6 + $0x3e8] sm:$0xff]  ;;  %v8286_v39 = vld [vmem:[%s20950_s6 + $0xf0] sm:$0xff]  ;;  %v21039_v56 = vld [vmem:[#allocation13_spill] sm:$0xff] }
0x177c   : > { %8210 = vmatprep.subr.bf16.mxu0 %v13152_v27  ;;  %v13170_v13 = vcombine.high %v8024_v8, %v8025_v25  ;;  %v13169_v11 = vcombine.low %v8024_v8, %v8025_v25  ;;  %v13178_v61 = vcombine.high %v8285_v29, %v8286_v39  ;;  %v8287_v27 = vld [vmem:[%s20950_s6 + $0x110] sm:$0xff]  ;;  %v21037_v24 = vld [vmem:[#allocation11_spill] sm:$0xff]  ;;  %v13177_v58 = vcombine.low %v8285_v29, %v8286_v39 }
0x177d   : > { %7983 = vmatprep.mubr.bf16.mxu0 %v7716_v34  ;;  %v8288_v48 = vld [vmem:[%s20950_s6 + $0x130] sm:$0xff]  ;;  %v21041_v49 = vld [vmem:[#allocation15_spill] sm:$0xff] }
0x177e   : > { %7984 = vmatmul.mubr.bf16.gmra.mrb[132].mxu0 %v7715_v0  ;;  %v21038_v32 = vld [vmem:[#allocation12_spill] sm:$0xff]  ;;  %v13180_v38 = vcombine.high %v8287_v27, %v8288_v48 }
0x177f   : > { %8211 = vmatpush1.bf16.msra.mxu0 %v13151_v18  ;;  %8230 = vmatprep.mubr.bf16.mxu0 %v21034_v40  ;;  %v8290_v34 = vld [vmem:[%s20950_s6 + $0x170] sm:$0xff]  ;;  %v13179_v18 = vcombine.low %v8287_v27, %v8288_v48  ;;  %v21040_v40 = vld [vmem:[#allocation14_spill] sm:$0xff] }
0x1780   : > { %8212 = vmatprep.subr.bf16.mxu0 %v13154_v2  ;;  %v13182_v0 = vcombine.high %v8289_v6, %v8290_v34  ;;  %v8291_v2 = vld [vmem:[%s20950_s6 + $0x190] sm:$0xff]  ;;  %v15528_v48 = vld [vmem:[%s15985_s21 + $0x20] sm:$0xff] }
0x1781   : > { %v8292_v60 = vld [vmem:[%s20950_s6 + $0x1b0] sm:$0xff] }
0x1782   : > { %v8298_v36 = vld [vmem:[%s20950_s6 + $0x270] sm:$0xff] }
0x1783   : > { %8213 = vmatpush1.bf16.msra.mxu0 %v13153_v53  ;;  %v13181_v53 = vcombine.low %v8289_v6, %v8290_v34  ;;  %v8299_v30 = vld [vmem:[%s20950_s6 + $0x290] sm:$0xff]  ;;  %v15532_v34 = vld [vmem:[%s15985_s21 + $0x40] sm:$0xff] }
0x1784   : > { %8214 = vmatprep.subr.bf16.mxu0 %v13156_v63  ;;  %v13184_v63 = vcombine.high %v8291_v2, %v8292_v60  ;;  %v8300_v55 = vld [vmem:[%s20950_s6 + $0x2b0] sm:$0xff] }
0x1785   : > { %v8301_v7 = vld [vmem:[%s20950_s6 + $0x2d0] sm:$0xff] }
0x1786   : > { %v8302_v50 = vld [vmem:[%s20950_s6 + $0x2f0] sm:$0xff] }
0x1787   : > { %8215 = vmatpush1.bf16.msra.mxu0 %v13155_v28  ;;  %v13183_v28 = vcombine.low %v8291_v2, %v8292_v60  ;;  %v8303_v8 = vld [vmem:[%s20950_s6 + $0x310] sm:$0xff]  ;;  %v15534_v2 = vld [vmem:[%s15985_s21 + $0x68] sm:$0xff]  ;;  %v15535_v60 = vld [vmem:[%s15985_s21 + $0x78] sm:$0xff] }
0x1788   : > { %8216 = vmatprep.subr.bf16.mxu0 %v13158_v45  ;;  %v15522_v45 = vld [vmem:[%s15985_s21 + $0x8] sm:$0xff]  ;;  %v8304_v25 = vld [vmem:[%s20950_s6 + $0x330] sm:$0xff] }
0x1789   : > { %v8272_v21 = vpack.c.bf16 %v15523_v26, %v15522_v45  ;;  %v8305_v4 = vld [vmem:[%s20950_s6 + $0x350] sm:$0xff] }
0x178a   : > { %v8306_v37 = vld [vmem:[%s20950_s6 + $0x370] sm:$0xff] }
0x178b   : > { %8217 = vmatpush1.bf16.msra.mxu0 %v13157_v5  ;;  %v13186_v5 = vcombine.high %v8293_v23, %v8294_v15  ;;  %v8307_v19 = vld [vmem:[%s20950_s6 + $0x390] sm:$0xff] }
0x178c   : > { %8218 = vmatprep.subr.bf16.mxu0 %v13160_v42  ;;  %v8295_v42 = vld [vmem:[%s20950_s6 + $0x210] sm:$0xff] }
0x178d   : > { %v8308_v33 = vld [vmem:[%s20950_s6 + $0x3b0] sm:$0xff] }
0x178e   : > { %v8309_v3 = vld [vmem:[%s20950_s6 + $0x3d0] sm:$0xff] }
0x178f   : > { %8219 = vmatpush1.bf16.msra.mxu0 %v13159_v16  ;;  %v13185_v16 = vcombine.low %v8293_v23, %v8294_v15  ;;  %v8310_v41 = vld [vmem:[%s20950_s6 + $0x3f0] sm:$0xff]  ;;  %v7749_v23 = vld [vmem:[%s20952_s8 + $0x1c] sm:$0x3] }
0x1790   : > { %8220 = vmatprep.subr.bf16.mxu0 %v13162_v1  ;;  %v13188_v1 = vcombine.high %v8295_v42, %v8296_v46  ;;  %v15525_v29 = vld [vmem:[%s15985_s21 + $0x10] sm:$0xff]  ;;  %v7754_v15 = vrot.slane %v7749_v23, %v21032_v31  ;;  %v7758_v45 = vrot.slane %v7749_v23, %v21033_v12 }
0x1793   : > { %8221 = vmatpush1.bf16.msra.mxu0 %v13161_v44  ;;  %v13187_v44 = vcombine.low %v8295_v42, %v8296_v46 }
0x1794   : > { %8222 = vmatprep.subr.bf16.mxu0 %v13164_v35  ;;  %v13190_v35 = vcombine.high %v8297_v14, %v8298_v36 }
0x1797   : > { %8223 = vmatpush1.bf16.msra.mxu0 %v13163_v51  ;;  %v13189_v51 = vcombine.low %v8297_v14, %v8298_v36 }
0x1798   : > { %8224 = vmatprep.subr.bf16.mxu0 %v13166_v52  ;;  %v13192_v52 = vcombine.high %v8299_v30, %v8300_v55 }
0x179b   : > { %8225 = vmatpush1.bf16.msra.mxu0 %v13165_v10  ;;  %v13191_v10 = vcombine.low %v8299_v30, %v8300_v55 }
0x179c   : > { %8226 = vmatprep.subr.bf16.mxu0 %v13168_v47  ;;  %v13194_v47 = vcombine.high %v8301_v7, %v8302_v50 }
0x179f   : > { %8227 = vmatpush1.bf16.msra.mxu0 %v13167_v43  ;;  %v13193_v43 = vcombine.low %v8301_v7, %v8302_v50 }
0x17a0   : > { %8228 = vmatprep.subr.bf16.mxu0 %v13170_v13  ;;  %v13196_v13 = vcombine.high %v8303_v8, %v8304_v25 }
0x17a3   : > { %8229 = vmatpush1.bf16.msra.mxu0 %v13169_v11  ;;  %v13195_v11 = vcombine.low %v8303_v8, %v8304_v25 }
0x17a4   : > { %8483 = vmatprep.subr.bf16.mxu0 %v13172_v20  ;;  %v13198_v20 = vcombine.high %v8305_v4, %v8306_v37 }
0x17a6   : > { %8231 = vmatmul.mubr.bf16.vlgmr.msra.gmra.mrb[136].mxu0 %v21035_v54  ;;  %v13199_v54 = vcombine.low %v8307_v19, %v8308_v33 }
0x17a7   : > { %8240 = vmatprep.mubr.bf16.mxu0 %v21036_v17  ;;  %8484 = vmatpush1.bf16.msra.mxu0 %v13171_v62  ;;  %v13197_v62 = vcombine.low %v8305_v4, %v8306_v37  ;;  %v13202_v17 = vcombine.high %v8309_v3, %v8310_v41 }
0x17a8   : > { %8485 = vmatprep.subr.bf16.mxu0 %v13174_v59  ;;  %v13200_v59 = vcombine.high %v8307_v19, %v8308_v33 }
0x17ab   : > { %8486 = vmatpush1.bf16.msra.mxu0 %v13173_v22  ;;  %v13201_v22 = vcombine.low %v8309_v3, %v8310_v41 }
0x17ac   : > { %8487 = vmatprep.subr.bf16.mxu0 %v13176_v57  ;;  %v15524_v57 = vld [vmem:[%s15985_s21] sm:$0xff] }
0x17ad   : > { %v8271_v39 = vpack.c.bf16 %v15525_v29, %v15524_v57 }
0x17ae   : > { %8241 = vmatmul.mubr.bf16.gmra.mrb[140].mxu0 %v21037_v24  ;;  %v15529_v24 = vld [vmem:[%s15985_s21 + $0x30] sm:$0xff] }
0x17af   : > { %8250 = vmatprep.mubr.bf16.mxu0 %v21038_v32  ;;  %8488 = vmatpush1.bf16.msra.mxu0 %v13175_v9  ;;  %v15526_v9 = vld [vmem:[%s15985_s21 + $0x28] sm:$0xff]  ;;  %v8273_v32 = vpack.c.bf16 %v15529_v24, %v15528_v48 }
0x17b0   : > { %8489 = vmatprep.subr.bf16.mxu0 %v13178_v61  ;;  %v15527_v61 = vld [vmem:[%s15985_s21 + $0x38] sm:$0xff] }
0x17b1   : > { %v8274_v27 = vpack.c.bf16 %v15527_v61, %v15526_v9 }
0x17b3   : > { %8490 = vmatpush1.bf16.msra.mxu0 %v13177_v58  ;;  %v15530_v58 = vld [vmem:[%s15985_s21 + $0x48] sm:$0xff] }
0x17b4   : > { %8491 = vmatprep.subr.bf16.mxu0 %v13180_v38  ;;  %v15531_v38 = vld [vmem:[%s15985_s21 + $0x58] sm:$0xff] }
0x17b5   : > { %v8276_v6 = vpack.c.bf16 %v15531_v38, %v15530_v58 }
0x17b6   : > { %8251 = vmatmul.mubr.bf16.gmra.mrb[144].mxu0 %v21039_v56  ;;  %v8278_v56 = vpack.c.bf16 %v15535_v60, %v15534_v2 }
0x17b7   : > { %8260 = vmatprep.mubr.bf16.mxu0 %v21040_v40  ;;  %8492 = vmatpush1.bf16.msra.mxu0 %v13179_v18  ;;  %v15533_v18 = vld [vmem:[%s15985_s21 + $0x50] sm:$0xff]  ;;  %v15536_v40 = vld [vmem:[%s15985_s21 + $0x60] sm:$0xff] }
0x17b8   : > { %8493 = vmatprep.subr.bf16.mxu0 %v13182_v0  ;;  %v8275_v0 = vpack.c.bf16 %v15533_v18, %v15532_v34 }
0x17bb   : > { %8494 = vmatpush1.bf16.msra.mxu0 %v13181_v53  ;;  %v15537_v53 = vld [vmem:[%s15985_s21 + $0x70] sm:$0xff]  ;;  %s21044_s21 = smov 32  }
0x17bc   : > { %8495 = vmatprep.subr.bf16.mxu0 %v13184_v63  ;;  %v8277_v63 = vpack.c.bf16 %v15537_v53, %v15536_v40 }
0x17be   : > { %8261 = vmatmul.mubr.bf16.gmra.mrb[148].mxu0 %v21041_v49 }
0x17bf   : > { %8496 = vmatpush1.bf16.msra.mxu0 %v13183_v28  ;;  %8515 = vmatprep.mubr.bf16.mxu0 %v8272_v21 }
0x17c0   : > { %8497 = vmatprep.subr.bf16.mxu0 %v13186_v5 }
0x17c3   : > { %8498 = vmatpush1.bf16.msra.mxu0 %v13185_v16 }
0x17c4   : > { %8499 = vmatprep.subr.bf16.mxu0 %v13188_v1 }
0x17c7   : > { %8500 = vmatpush1.bf16.msra.mxu0 %v13187_v44 }
0x17c8   : > { %8501 = vmatprep.subr.bf16.mxu0 %v13190_v35 }
0x17cb   : > { %8502 = vmatpush1.bf16.msra.mxu0 %v13189_v51 }
0x17cc   : > { %8503 = vmatprep.subr.bf16.mxu0 %v13192_v52 }
0x17cf   : > { %8504 = vmatpush1.bf16.msra.mxu0 %v13191_v10 }
0x17d0   : > { %8505 = vmatprep.subr.bf16.mxu0 %v13194_v47 }
0x17d3   : > { %8506 = vmatpush1.bf16.msra.mxu0 %v13193_v43 }
0x17d4   : > { %8507 = vmatprep.subr.bf16.mxu0 %v13196_v13 }
0x17d7   : > { %8508 = vmatpush1.bf16.msra.mxu0 %v13195_v11 }
0x17d8   : > { %8509 = vmatprep.subr.bf16.mxu0 %v13198_v20 }
0x17db   : > { %8510 = vmatpush1.bf16.msra.mxu0 %v13197_v62 }
0x17dc   : > { %8511 = vmatprep.subr.bf16.mxu0 %v13200_v59 }
0x17df   : > { %8512 = vmatpush1.bf16.msra.mxu0 %v13199_v54 }
0x17e0   : > { %8513 = vmatprep.subr.bf16.mxu0 %v13202_v17 }
0x17e3   : > { %8514 = vmatpush1.bf16.msra.mxu0 %v13201_v22 }
0x17e6   : > { %8516 = vmatmul.mubr.bf16.vlgmr.msra.gmra.mrb[152].mxu0 %v8271_v39  ;;  %v8026_v39 = vld [vmem:[%s20952_s8 + $0x1e] sm:$0x3] }
0x17e7   : > { %8525 = vmatprep.mubr.bf16.mxu0 %v8274_v27  ;;  %v8035_v9 = vrot.slane %v8026_v39, %v21033_v12  ;;  %v8031_v61 = vrot.slane %v8026_v39, %v21032_v31 }
0x17ee   : > { %8526 = vmatmul.mubr.bf16.gmra.mrb[156].mxu0 %v8273_v32 }
0x17ef   : > { %8535 = vmatprep.mubr.bf16.mxu0 %v8276_v6 }
0x17f6   : > { %8536 = vmatmul.mubr.bf16.gmra.mrb[160].mxu0 %v8275_v0 }
0x17f7   : > { %8545 = vmatprep.mubr.bf16.mxu0 %v8278_v56 }
0x17fe   : > { %8546 = vmatmul.mubr.bf16.gmra.mrb[164].mxu0 %v8277_v63 }
0x1839   : > { %v7955_v28 = vpop.f32.mrb[120].mxu0 }
0x183a   : > { %v7957_v26 = vpop.f32.mrb[121].mxu0  ;;  %v7956_v5 = vadd.f32 %v7955_v28, %v7754_v15 }
0x183b   : > { %v7959_v21 = vpop.f32.mrb[122].mxu0  ;;  %v7958_v49 = vadd.f32 %v7957_v26, %v7758_v45 }
0x183c   : > { %v7960_v42 = vadd.f32 %v7959_v21, %v7754_v15  ;;  %v7961_v46 = vpop.f32.mrb[123].mxu0 }
0x183d   : > { %v7962_v16 = vadd.f32 %v7961_v46, %v7758_v45 }
0x183e   : > { %v19489_v1 = vpack.c.bf16 %v7960_v42, %v7956_v5 }
0x183f   : > { %v19491_v14 = vpack.c.bf16 %v7962_v16, %v7958_v49 }
0x1840   : > { %13920 = vmatprep.mubr.msk.bf16.mxu0 %vm1429_vm1, %v19489_v1 }
0x1841   : > { %v7965_v36 = vpop.f32.mrb[124].mxu0 }
0x1842   : > { %v7966_v44 = vadd.f32 %v7965_v36, %v7754_v15  ;;  %v7967_v35 = vpop.f32.mrb[125].mxu0 }
0x1843   : > { %v7969_v30 = vpop.f32.mrb[126].mxu0  ;;  %v7968_v52 = vadd.f32 %v7967_v35, %v7758_v45 }
0x1844   : > { %v7970_v55 = vadd.f32 %v7969_v30, %v7754_v15  ;;  %v7971_v51 = vpop.f32.mrb[127].mxu0 }
0x1845   : > { %v7972_v7 = vadd.f32 %v7971_v51, %v7758_v45 }
0x1846   : > { %v19495_v50 = vpack.c.bf16 %v7970_v55, %v7966_v44 }
0x1847   : > { %v19497_v10 = vpack.c.bf16 %v7972_v7, %v7968_v52 }
0x1849   : > { %v7975_v47 = vpop.f32.mrb[128].mxu0 }
0x184a   : > { %v7976_v8 = vadd.f32 %v7975_v47, %v7754_v15  ;;  %v7977_v25 = vpop.f32.mrb[129].mxu0 }
0x184b   : > { %v7979_v43 = vpop.f32.mrb[130].mxu0  ;;  %v7978_v37 = vadd.f32 %v7977_v25, %v7758_v45 }
0x184c   : > { %v7980_v13 = vadd.f32 %v7979_v43, %v7754_v15  ;;  %v7981_v4 = vpop.f32.mrb[131].mxu0 }
0x184d   : > { %v7982_v11 = vadd.f32 %v7981_v4, %v7758_v45 }
0x184e   : > { %v19499_v20 = vpack.c.bf16 %v7980_v13, %v7976_v8 }
0x184f   : > { %v19501_v19 = vpack.c.bf16 %v7982_v11, %v7978_v37 }
0x1851   : > { %v7985_v33 = vpop.f32.mrb[132].mxu0 }
0x1852   : > { %v7986_v62 = vadd.f32 %v7985_v33, %v7754_v15  ;;  %v7987_v59 = vpop.f32.mrb[133].mxu0 }
0x1853   : > { %v7989_v3 = vpop.f32.mrb[134].mxu0  ;;  %v7988_v17 = vadd.f32 %v7987_v59, %v7758_v45 }
0x1854   : > { %v7990_v41 = vadd.f32 %v7989_v3, %v7754_v15  ;;  %v7991_v54 = vpop.f32.mrb[135].mxu0 }
0x1855   : > { %v7992_v22 = vadd.f32 %v7991_v54, %v7758_v45 }
0x1856   : > { %v19503_v57 = vpack.c.bf16 %v7990_v41, %v7986_v62  ;;  %v8311_v62 = vld [vmem:[%s20952_s8 + $0x20] sm:$0x3] }
0x1857   : > { %v19505_v29 = vpack.c.bf16 %v7992_v22, %v7988_v17  ;;  %v8316_v59 = vrot.slane %v8311_v62, %v21032_v31  ;;  %v8320_v3 = vrot.slane %v8311_v62, %v21033_v12 }
0x1879   : > { %v8232_v27 = vpop.f32.mrb[136].mxu0 }
0x187a   : > { %v8234_v48 = vpop.f32.mrb[137].mxu0  ;;  %v8233_v58 = vadd.f32 %v8232_v27, %v8031_v61 }
0x187b   : > { %v8235_v24 = vadd.f32 %v8234_v48, %v8035_v9  ;;  %v8236_v32 = vpop.f32.mrb[138].mxu0 }
0x187c   : > { %v8237_v38 = vadd.f32 %v8236_v32, %v8031_v61  ;;  %v8238_v6 = vpop.f32.mrb[139].mxu0 }
0x187d   : > { %v8239_v34 = vadd.f32 %v8238_v6, %v8035_v9 }
0x187e   : > { %v19512_v18 = vpack.c.bf16 %v8237_v38, %v8233_v58 }
0x187f   : > { %v19514_v0 = vpack.c.bf16 %v8239_v34, %v8235_v24 }
0x1880   : > { %14504 = vmatprep.subr.msk.bf16.mxu0 %vm1429_vm1, %v19512_v18  ;;  %v8581_v2 = vsel %vm1429_vm1, %v19512_v18, 0 }
0x1881   : > { %v8242_v60 = vpop.f32.mrb[140].mxu0  ;;  %13913 = vmatpush3.bf16.xpose.msra.mxu0 %v8581_v2 }
0x1882   : > { %v8244_v56 = vpop.f32.mrb[141].mxu0  ;;  %v8243_v63 = vadd.f32 %v8242_v60, %v8031_v61 }
0x1883   : > { %v8245_v40 = vadd.f32 %v8244_v56, %v8035_v9  ;;  %v8246_v53 = vpop.f32.mrb[142].mxu0 }
0x1884   : > { %v8247_v23 = vadd.f32 %v8246_v53, %v8031_v61  ;;  %v8248_v15 = vpop.f32.mrb[143].mxu0 }
0x1885   : > { %v8249_v28 = vadd.f32 %v8248_v15, %v8035_v9 }
0x1886   : > { %v19520_v45 = vpack.c.bf16 %v8247_v23, %v8243_v63 }
0x1887   : > { %v19522_v26 = vpack.c.bf16 %v8249_v28, %v8245_v40 }
0x1888   : > { %14505 = vmatprep.subr.msk.bf16.mxu0 %vm1429_vm1, %v19520_v45  ;;  %v8584_v21 = vsel %vm1429_vm1, %v19520_v45, 0 }
0x1889   : > { %v8252_v5 = vpop.f32.mrb[144].mxu0  ;;  %13915 = vmatpush3.bf16.xpose.msra.mxu0 %v8584_v21 }
0x188a   : > { %v8254_v42 = vpop.f32.mrb[145].mxu0  ;;  %v8253_v16 = vadd.f32 %v8252_v5, %v8031_v61 }
0x188b   : > { %v8255_v46 = vadd.f32 %v8254_v42, %v8035_v9  ;;  %v8256_v49 = vpop.f32.mrb[146].mxu0 }
0x188c   : > { %v8257_v36 = vadd.f32 %v8256_v49, %v8031_v61  ;;  %v8258_v44 = vpop.f32.mrb[147].mxu0 }
0x188d   : > { %v8259_v35 = vadd.f32 %v8258_v44, %v8035_v9 }
0x188e   : > { %v19528_v30 = vpack.c.bf16 %v8257_v36, %v8253_v16 }
0x188f   : > { %v19530_v55 = vpack.c.bf16 %v8259_v35, %v8255_v46 }
0x1890   : > { %14506 = vmatprep.subr.msk.bf16.mxu0 %vm1429_vm1, %v19528_v30  ;;  %v8587_v51 = vsel %vm1429_vm1, %v19528_v30, 0 }
0x1891   : > { %v8262_v52 = vpop.f32.mrb[148].mxu0  ;;  %13917 = vmatpush3.bf16.xpose.msra.mxu0 %v8587_v51 }
0x1892   : > { %v8264_v7 = vpop.f32.mrb[149].mxu0  ;;  %v8263_v25 = vadd.f32 %v8262_v52, %v8031_v61 }
0x1893   : > { %v8265_v47 = vadd.f32 %v8264_v7, %v8035_v9  ;;  %v8266_v8 = vpop.f32.mrb[150].mxu0 }
0x1894   : > { %v8267_v43 = vadd.f32 %v8266_v8, %v8031_v61  ;;  %v8268_v13 = vpop.f32.mrb[151].mxu0 }
0x1895   : > { %v8269_v4 = vadd.f32 %v8268_v13, %v8035_v9 }
0x1896   : > { %v19536_v37 = vpack.c.bf16 %v8267_v43, %v8263_v25 }
0x1897   : > { %v19538_v11 = vpack.c.bf16 %v8269_v4, %v8265_v47 }
0x1898   : > { %14507 = vmatprep.subr.msk.bf16.mxu0 %vm1429_vm1, %v19536_v37  ;;  %v8590_v33 = vsel %vm1429_vm1, %v19536_v37, 0 }
0x1899   : > { %13919 = vmatpush3.bf16.xpose.msra.mxu0 %v8590_v33 }
0x18a0   : > { %13921 = vmatmul.mubr.msk.bf16.vlgmr.msra.gmra.mrb[168].mxu0 %vm1429_vm1, %v19495_v50 }
0x18a1   : > { %13924 = vmatprep.mubr.msk.bf16.mxu0 %vm1429_vm1, %v19499_v20 }
0x18a8   : > { %13925 = vmatmul.mubr.msk.bf16.gmra.mrb[172].mxu0 %vm1429_vm1, %v19503_v57 }
0x18b9   : > { %v8517_v41 = vpop.f32.mrb[152].mxu0 }
0x18ba   : > { %v8518_v54 = vadd.f32 %v8517_v41, %v8316_v59  ;;  %v8519_v17 = vpop.f32.mrb[153].mxu0 }
0x18bb   : > { %v8520_v22 = vadd.f32 %v8519_v17, %v8320_v3  ;;  %v8521_v39 = vpop.f32.mrb[154].mxu0 }
0x18bc   : > { %v8522_v9 = vadd.f32 %v8521_v39, %v8316_v59  ;;  %v8523_v61 = vpop.f32.mrb[155].mxu0 }
0x18bd   : > { %v8524_v27 = vadd.f32 %v8523_v61, %v8320_v3 }
0x18be   : > { %v19555_v48 = vpack.c.bf16 %v8522_v9, %v8518_v54 }
0x18bf   : > { %v19557_v24 = vpack.c.bf16 %v8524_v27, %v8520_v22 }
0x18c0   : > { %13928 = vmatprep.subr.bf16.mxu0 %v19555_v48 }
0x18c1   : > { %v8527_v32 = vpop.f32.mrb[156].mxu0  ;;  %13929 = vmatpush3.bf16.msra.mxu0 %v19555_v48 }
0x18c2   : > { %v8528_v58 = vadd.f32 %v8527_v32, %v8316_v59  ;;  %v8529_v38 = vpop.f32.mrb[157].mxu0 }
0x18c3   : > { %v8530_v6 = vadd.f32 %v8529_v38, %v8320_v3  ;;  %v8531_v34 = vpop.f32.mrb[158].mxu0 }
0x18c4   : > { %v8532_v2 = vadd.f32 %v8531_v34, %v8316_v59  ;;  %v8533_v60 = vpop.f32.mrb[159].mxu0 }
0x18c5   : > { %v8534_v56 = vadd.f32 %v8533_v60, %v8320_v3 }
0x18c6   : > { %v19561_v40 = vpack.c.bf16 %v8532_v2, %v8528_v58 }
0x18c7   : > { %v19563_v53 = vpack.c.bf16 %v8534_v56, %v8530_v6 }
0x18c8   : > { %13930 = vmatprep.subr.bf16.mxu0 %v19561_v40 }
0x18c9   : > { %v8537_v63 = vpop.f32.mrb[160].mxu0  ;;  %13931 = vmatpush3.bf16.msra.mxu0 %v19561_v40 }
0x18ca   : > { %v8538_v23 = vadd.f32 %v8537_v63, %v8316_v59  ;;  %v8539_v15 = vpop.f32.mrb[161].mxu0 }
0x18cb   : > { %v8540_v28 = vadd.f32 %v8539_v15, %v8320_v3  ;;  %v8541_v21 = vpop.f32.mrb[162].mxu0 }
0x18cc   : > { %v8542_v5 = vadd.f32 %v8541_v21, %v8316_v59  ;;  %v8543_v42 = vpop.f32.mrb[163].mxu0 }
0x18cd   : > { %v8544_v46 = vadd.f32 %v8543_v42, %v8320_v3 }
0x18ce   : > { %v19567_v49 = vpack.c.bf16 %v8542_v5, %v8538_v23 }
0x18cf   : > { %v19569_v16 = vpack.c.bf16 %v8544_v46, %v8540_v28 }
0x18d0   : > { %13932 = vmatprep.subr.bf16.mxu0 %v19567_v49 }
0x18d1   : > { %v8547_v36 = vpop.f32.mrb[164].mxu0  ;;  %13933 = vmatpush3.bf16.msra.mxu0 %v19567_v49 }
0x18d2   : > { %v8548_v44 = vadd.f32 %v8547_v36, %v8316_v59  ;;  %v8549_v35 = vpop.f32.mrb[165].mxu0 }
0x18d3   : > { %v8550_v51 = vadd.f32 %v8549_v35, %v8320_v3  ;;  %v8551_v52 = vpop.f32.mrb[166].mxu0 }
0x18d4   : > { %v8552_v7 = vadd.f32 %v8551_v52, %v8316_v59  ;;  %v8553_v47 = vpop.f32.mrb[167].mxu0 }
0x18d5   : > { %v8554_v8 = vadd.f32 %v8553_v47, %v8320_v3 }
0x18d6   : > { %v19573_v25 = vpack.c.bf16 %v8552_v7, %v8548_v44 }
0x18d7   : > { %v19575_v43 = vpack.c.bf16 %v8554_v8, %v8550_v51 }
0x18d8   : > { %13934 = vmatprep.subr.bf16.mxu0 %v19573_v25 }
0x18d9   : > { %13935 = vmatpush3.bf16.msra.mxu0 %v19573_v25 }
0x1973   : > { %v13922_v13 = vpop.f32.mrb[168].mxu0 }
0x1974   : > { %v8626_v4 = vpop.f32.mrb[169].mxu0  ;;  %v8659_v54 = vmul.f32 0.17677669, %v13922_v13 }
0x1975   : > { %v8657_v33 = vmul.f32 0.17677669, %v8626_v4  ;;  %v13923_v62 = vpop.f32.mrb[170].mxu0 }
0x1976   : > { %v8629_v41 = vpop.f32.mrb[171].mxu0  ;;  %v8660_v59 = vmul.f32 0.17677669, %v13923_v62  ;;  %v8671_v9 = vsel %vm480_vm0, %v8659_v54, -inf }
0x1977   : > { %v8658_v17 = vmul.f32 0.17677669, %v8629_v41  ;;  %v8665_v22 = vsel %vm480_vm0, %v8657_v33, -inf }
0x1978   : > { %8666 = vmax.xlane.f32.xlu0 %v8665_v22  ;;  %v8674_v58 = vsel %vm480_vm0, %v8660_v59, -inf }
0x1979   : > { %v8668_v3 = vsel %vm480_vm0, %v8658_v17, -inf }
0x197a   : > { %8669 = vmax.xlane.f32.xlu1 %v8668_v3 }
0x197b   : > { %v13926_v39 = vpop.f32.mrb[172].mxu0 }
0x197c   : > { %8672 = vmax.xlane.f32.xlu0 %v8671_v9  ;;  %v8642_v61 = vpop.f32.mrb[173].mxu0  ;;  %v8663_v6 = vmul.f32 0.17677669, %v13926_v39 }
0x197d   : > { %v8661_v27 = vmul.f32 0.17677669, %v8642_v61  ;;  %v13927_v32 = vpop.f32.mrb[174].mxu0 }
0x197e   : > { %8675 = vmax.xlane.f32.xlu1 %v8674_v58  ;;  %v8645_v38 = vpop.f32.mrb[175].mxu0  ;;  %v8664_v60 = vmul.f32 0.17677669, %v13927_v32  ;;  %v8683_v63 = vsel %vm480_vm0, %v8663_v6, -inf }
0x197f   : > { %v8662_v34 = vmul.f32 0.17677669, %v8645_v38  ;;  %v8677_v2 = vsel %vm480_vm0, %v8661_v27, -inf }
0x1980   : > { %8678 = vmax.xlane.f32.xlu0 %v8677_v2  ;;  %v8686_v23 = vsel %vm480_vm0, %v8664_v60, -inf }
0x1981   : > { %v8680_v56 = vsel %vm480_vm0, %v8662_v34, -inf }
0x1982   : > { %8681 = vmax.xlane.f32.xlu1 %v8680_v56 }
0x1984   : > { %8684 = vmax.xlane.f32.xlu0 %v8683_v63 }
0x1986   : > { %8687 = vmax.xlane.f32.xlu1 %v8686_v23 }
0x1a05   : > { %v8667_v15 = vpop.xlane.xlu0 %8666 }
0x1a06   : > { %v8689_v28 = vsub.f32 %v8657_v33, %v8667_v15 }
0x1a07   : > { %v8670_v21 = vpop.xlane.xlu1 %8669 }
0x1a08   : > { %v8690_v42 = vsub.f32 %v8658_v17, %v8670_v21  ;;  %v8697_v36 = vmul.f32 1.442695, %v8689_v28 }
0x1a09   : > { %v8673_v5 = vpop.xlane.xlu0 %8672 }
0x1a0a   : > { %v8691_v46 = vsub.f32 %v8659_v54, %v8673_v5  ;;  %v8699_v7 = vmul.f32 1.442695, %v8690_v42 }
0x1a0b   : > { %v8676_v44 = vpop.xlane.xlu1 %8675 }
0x1a0c   : > { %v8701_v35 = vmul.f32 1.442695, %v8691_v46  ;;  %v8692_v51 = vsub.f32 %v8660_v59, %v8676_v44 }
0x1a0d   : > { %v8679_v52 = vpop.xlane.xlu0 %8678 }
0x1a0e   : > { %15218 = vpow2.f32 %v8701_v35  ;;  %v8703_v47 = vmul.f32 1.442695, %v8692_v51  ;;  %v8693_v8 = vsub.f32 %v8661_v27, %v8679_v52 }
0x1a0f   : > { %15220 = vpow2.f32 %v8697_v36  ;;  %v8682_v38 = vpop.xlane.xlu1 %8681 }
0x1a10   : > { %15222 = vpow2.f32 %v8703_v47  ;;  %v8705_v62 = vmul.f32 1.442695, %v8693_v8  ;;  %v8694_v56 = vsub.f32 %v8662_v34, %v8682_v38 }
0x1a11   : > { %v8685_v13 = vpop.xlane.xlu0 %8684  ;;  %15224 = vpow2.f32 %v8699_v7 }
0x1a12   : > { %v8695_v4 = vsub.f32 %v8663_v6, %v8685_v13  ;;  %v8707_v23 = vmul.f32 1.442695, %v8694_v56 }
0x1a13   : > { %v8688_v6 = vpop.xlane.xlu1 %8687 }
0x1a14   : > { %v8709_v33 = vmul.f32 1.442695, %v8695_v4  ;;  %v8696_v2 = vsub.f32 %v8664_v60, %v8688_v6 }
0x1a16   : > { %15226 = vpow2.f32 %v8709_v33  ;;  %v8711_v63 = vmul.f32 1.442695, %v8696_v2 }
0x1a17   : > { %15228 = vpow2.f32 %v8705_v62 }
0x1a18   : > { %v15219_v41 = vpop.eup %15218  ;;  %15230 = vpow2.f32 %v8711_v63 }
0x1a19   : > { %v15221_v54 = vpop.eup %15220  ;;  %v8719_v17 = vsel %vm480_vm0, %v15219_v41, 0.0  ;;  %15232 = vpow2.f32 %v8707_v23 }
0x1a1a   : > { %v15223_v22 = vpop.eup %15222  ;;  %8720 = vadd.xlane.f32.xlu0 %v8719_v17  ;;  %v8713_v39 = vsel %vm480_vm0, %v15221_v54, 0.0 }
0x1a1b   : > { %v8722_v59 = vsel %vm480_vm0, %v15223_v22, 0.0  ;;  %v15225_v3 = vpop.eup %15224 }
0x1a1c   : > { %8723 = vadd.xlane.f32.xlu1 %v8722_v59  ;;  %v8716_v9 = vsel %vm480_vm0, %v15225_v3, 0.0 }
0x1a1e   : > { %8714 = vadd.xlane.f32.xlu0 %v8713_v39 }
0x1a20   : > { %v19591_v61 = vpop.eup %15226  ;;  %8717 = vadd.xlane.f32.xlu1 %v8716_v9 }
0x1a21   : > { %v8731_v27 = vsel %vm480_vm0, %v19591_v61, 0.0  ;;  %v19595_v32 = vpop.eup %15228 }
0x1a22   : > { %8732 = vadd.xlane.f32.xlu0 %v8731_v27  ;;  %v8725_v58 = vsel %vm480_vm0, %v19595_v32, 0.0  ;;  %v15231_v15 = vpop.eup %15230 }
0x1a23   : > { %v8734_v28 = vsel %vm480_vm0, %v15231_v15, 0.0  ;;  %v15233_v21 = vpop.eup %15232 }
0x1a24   : > { %v8728_v5 = vsel %vm480_vm0, %v15233_v21, 0.0 }
0x1a26   : > { %8726 = vadd.xlane.f32.xlu0 %v8725_v58 }
0x1a31   : > { %8860 = vrot.lane.b32.xlu1 %v19520_v45, %s21042_s25 }
0x1a35   : > { %8862 = vrot.lane.b32.xlu1 %v19528_v30, %s21042_s25 }
0x1a3c   : > { %8858 = vrot.lane.b32.xlu0 %v19512_v18, %s21042_s25 }
0x1a40   : > { %8846 = vrot.lane.b32.xlu0 %v19489_v1, %s21042_s25 }
0x1a44   : > { %8850 = vrot.lane.b32.xlu0 %v19499_v20, %s21042_s25 }
0x1a59   : > { %8735 = vadd.xlane.f32.xlu1 %v8734_v28 }
0x1a5d   : > { %8729 = vadd.xlane.f32.xlu1 %v8728_v5 }
0x1a6e   : > { %8864 = vrot.lane.b32.xlu1 %v19536_v37, %s21042_s25 }
0x1a72   : > { %8848 = vrot.lane.b32.xlu1 %v19495_v50, %s21042_s25 }
0x1a76   : > { %8852 = vrot.lane.b32.xlu1 %v19503_v57, %s21042_s25 }
0x1aa7   : > { %v8721_v34 = vpop.xlane.xlu0 %8720 }
0x1aa9   : > { %v8724_v60 = vpop.xlane.xlu1 %8723 }
0x1aaa   : > { %15234 = vrcp.f32 %v8724_v60 }
0x1aab   : > { %v8715_v42 = vpop.xlane.xlu0 %8714 }
0x1aac   : > { %15236 = vrcp.f32 %v8715_v42 }
0x1aad   : > { %15238 = vrcp.f32 %v8721_v34  ;;  %v8718_v46 = vpop.xlane.xlu1 %8717 }
0x1aae   : > { %15240 = vrcp.f32 %v8718_v46 }
0x1aaf   : > { %v8733_v36 = vpop.xlane.xlu0 %8732 }
0x1ab1   : > { %v8861_v39 = vpop.permute.xlu1 %8860 }
0x1ab2   : > { %v8882_v9 = vsel %vm1429_vm1, %v8861_v39, 0 }
0x1ab3   : > { %v8727_v44 = vpop.xlane.xlu0 %8726 }
0x1ab4   : > { %v15235_v35 = vpop.eup %15234 }
0x1ab5   : > { %v8744_v8 = vmul.f32 %v15235_v35, %v15223_v22  ;;  %v8863_v22 = vpop.permute.xlu1 %8862 }
0x1ab6   : > { %v15237_v51 = vpop.eup %15236 }
0x1ab7   : > { %v15239_v52 = vpop.eup %15238  ;;  %v8859_v7 = vpop.permute.xlu0 %8858  ;;  %v8738_v13 = vmul.f32 %v15237_v51, %v15221_v54 }
0x1ab8   : > { %v15241_v47 = vpop.eup %15240  ;;  %14508 = vmatprep.subr.msk.bf16.mxu0 %vm1429_vm1, %v8859_v7  ;;  %v8742_v62 = vmul.f32 %v15239_v52, %v15219_v41  ;;  %v8879_v59 = vsel %vm1429_vm1, %v8859_v7, 0  ;;  %v8885_v41 = vsel %vm1429_vm1, %v8863_v22, 0 }
0x1ab9   : > { %v8740_v4 = vmul.f32 %v15241_v47, %v15225_v3 }
0x1aba   : > { %v8754_v17 = vpack.c.bf16 %v8744_v8, %v8742_v62 }
0x1abb   : > { %v8753_v33 = vpack.c.bf16 %v8740_v4, %v8738_v13  ;;  %v8847_v42 = vpop.permute.xlu0 %8846 }
0x1abd   : > { %13936 = vmatprep.mubr.msk.bf16.mxu0 %vm480_vm0, %v8753_v33 }
0x1abe   : > { %13937 = vmatmul.mubr.msk.bf16.vlgmr.msra.gmra.mrb[176].mxu0 %vm480_vm0, %v8754_v17 }
0x1abf   : > { %13945 = vmatpush3.bf16.xpose.msra.mxu0 %v8879_v59 }
0x1ac0   : > { %14509 = vmatprep.subr.msk.bf16.mxu0 %vm1429_vm1, %v8861_v39 }
0x1ac7   : > { %13947 = vmatpush3.bf16.xpose.msra.mxu0 %v8882_v9 }
0x1ac8   : > { %14510 = vmatprep.subr.msk.bf16.mxu0 %vm1429_vm1, %v8863_v22 }
0x1acf   : > { %13949 = vmatpush3.bf16.xpose.msra.mxu0 %v8885_v41 }
0x1ae6   : > { %v8736_v54 = vpop.xlane.xlu1 %8735 }
0x1ae7   : > { %15242 = vrcp.f32 %v8736_v54 }
0x1ae8   : > { %15244 = vrcp.f32 %v8727_v44 }
0x1ae9   : > { %15246 = vrcp.f32 %v8733_v36  ;;  %v8851_v36 = vpop.permute.xlu0 %8850 }
0x1aea   : > { %v8730_v3 = vpop.xlane.xlu1 %8729 }
0x1aeb   : > { %15248 = vrcp.f32 %v8730_v3 }
0x1aee   : > { %v8865_v27 = vpop.permute.xlu1 %8864 }
0x1aef   : > { %14511 = vmatprep.subr.msk.bf16.mxu0 %vm1429_vm1, %v8865_v27  ;;  %v8888_v58 = vsel %vm1429_vm1, %v8865_v27, 0 }
0x1af0   : > { %13951 = vmatpush3.bf16.xpose.msra.mxu0 %v8888_v58 }
0x1af1   : > { %v15243_v38 = vpop.eup %15242 }
0x1af2   : > { %v15245_v6 = vpop.eup %15244  ;;  %v8752_v63 = vmul.f32 %v15243_v38, %v15231_v15  ;;  %v8849_v46 = vpop.permute.xlu1 %8848 }
0x1af3   : > { %v15247_v2 = vpop.eup %15246  ;;  %v8746_v23 = vmul.f32 %v15245_v6, %v19595_v32  ;;  %v21043_v32 = vmov 0  }
0x1af4   : > { %v8750_v5 = vmul.f32 %v15247_v2, %v19591_v61 }
0x1af5   : > { %v15249_v56 = vpop.eup %15248 }
0x1af6   : > { %v8748_v28 = vmul.f32 %v15249_v56, %v15233_v21  ;;  %v8756_v60 = vpack.c.bf16 %v8752_v63, %v8750_v5  ;;  %v8853_v15 = vpop.permute.xlu1 %8852 }
0x1af8   : > { %v8755_v34 = vpack.c.bf16 %v8748_v28, %v8746_v23 }
0x1afa   : > { %13940 = vmatprep.mubr.msk.bf16.mxu0 %vm480_vm0, %v8755_v34 }
0x1afb   : > { %13941 = vmatmul.mubr.msk.bf16.gmra.mrb[180].mxu0 %vm480_vm0, %v8756_v60 }
0x1afc   : > { %13952 = vmatprep.mubr.msk.bf16.mxu0 %vm1429_vm1, %v8847_v42 }
0x1b03   : > { %13953 = vmatmul.mubr.msk.bf16.vlgmr.msra.gmra.mrb[184].mxu0 %vm1429_vm1, %v8849_v46 }
0x1b04   : > { %13956 = vmatprep.mubr.msk.bf16.mxu0 %vm1429_vm1, %v8851_v36 }
0x1b0b   : > { %13957 = vmatmul.mubr.msk.bf16.gmra.mrb[188].mxu0 %vm1429_vm1, %v8853_v15 }
0x1b0c   : > { %9220 = vmatprep.mubr.bf16.mxu0 %v21043_v32 }
0x1b91   : > { %v19636_v61 = vpop.f32.mrb[176].mxu0 }
0x1b92   : > { %v19638_v21 = vpop.f32.mrb[177].mxu0 }
0x1b93   : > { %v19640_v44 = vpop.f32.mrb[178].mxu0 }
0x1b94   : > { %v8839_v35 = vpack.c.bf16 %v19640_v44, %v19636_v61  ;;  %v19644_v51 = vpop.f32.mrb[179].mxu0 }
0x1b95   : > { %v8838_v52 = vpack.c.bf16 %v19644_v51, %v19638_v21 }
0x1bce   : > { %v19648_v7 = vpop.f32.mrb[180].mxu0 }
0x1bcf   : > { %v19650_v47 = vpop.f32.mrb[181].mxu0 }
0x1bd0   : > { %v19652_v8 = vpop.f32.mrb[182].mxu0 }
0x1bd1   : > { %v8841_v13 = vpack.c.bf16 %v19652_v8, %v19648_v7  ;;  %v19656_v4 = vpop.f32.mrb[183].mxu0 }
0x1bd2   : > { %v8840_v62 = vpack.c.bf16 %v19656_v4, %v19650_v47 }
0x1bd6   : > { %v13954_v33 = vpop.f32.mrb[184].mxu0 }
0x1bd7   : > { %v8957_v17 = vmul.f32 0.17677669, %v13954_v33  ;;  %v8924_v59 = vpop.f32.mrb[185].mxu0 }
0x1bd8   : > { %v13955_v39 = vpop.f32.mrb[186].mxu0  ;;  %v8955_v9 = vmul.f32 0.17677669, %v8924_v59 }
0x1bd9   : > { %v8927_v22 = vpop.f32.mrb[187].mxu0  ;;  %v8969_v41 = vsel %vm480_vm0, %v8957_v17, -inf  ;;  %v8958_v27 = vmul.f32 0.17677669, %v13955_v39 }
0x1bda   : > { %v8956_v54 = vmul.f32 0.17677669, %v8927_v22  ;;  %8970 = vmax.xlane.f32.xlu0 %v8969_v41  ;;  %v8963_v58 = vsel %vm480_vm0, %v8955_v9, -inf }
0x1bdb   : > { %v8972_v23 = vsel %vm480_vm0, %v8958_v27, -inf }
0x1bdc   : > { %v8966_v3 = vsel %vm480_vm0, %v8956_v54, -inf }
0x1bdd   : > { %8967 = vmax.xlane.f32.xlu1 %v8966_v3 }
0x1bde   : > { %8964 = vmax.xlane.f32.xlu0 %v8963_v58  ;;  %v13958_v38 = vpop.f32.mrb[188].mxu0 }
0x1bdf   : > { %v8940_v6 = vpop.f32.mrb[189].mxu0  ;;  %v8961_v56 = vmul.f32 0.17677669, %v13958_v38 }
0x1be0   : > { %v13959_v2 = vpop.f32.mrb[190].mxu0  ;;  %v8959_v28 = vmul.f32 0.17677669, %v8940_v6 }
0x1be1   : > { %v8943_v63 = vpop.f32.mrb[191].mxu0  ;;  %v8981_v5 = vsel %vm480_vm0, %v8961_v56, -inf  ;;  %v8962_v60 = vmul.f32 0.17677669, %v13959_v2 }
0x1be2   : > { %8973 = vmax.xlane.f32.xlu0 %v8972_v23  ;;  %v8975_v34 = vsel %vm480_vm0, %v8959_v28, -inf  ;;  %v19672_v42 = vmul.f32 0.17677669, %v8943_v63 }
0x1be3   : > { %v8984_v46 = vsel %vm480_vm0, %v8962_v60, -inf }
0x1be4   : > { %v8978_v36 = vsel %vm480_vm0, %v19672_v42, -inf }
0x1be6   : > { %8982 = vmax.xlane.f32.xlu0 %v8981_v5 }
0x1bea   : > { %8976 = vmax.xlane.f32.xlu0 %v8975_v34 }
0x1bee   : > { %9061 = vrot.lane.b32.xlu1 %v19561_v40, %s21042_s25 }
0x1bf2   : > { %9063 = vrot.lane.b32.xlu1 %v19567_v49, %s21042_s25 }
0x1c00   : > { %9059 = vrot.lane.b32.xlu0 %v19555_v48, %s21042_s25 }
0x1c16   : > { %8985 = vmax.xlane.f32.xlu1 %v8984_v46 }
0x1c1a   : > { %8979 = vmax.xlane.f32.xlu1 %v8978_v36 }
0x1c2b   : > { %9065 = vrot.lane.b32.xlu1 %v19573_v25, %s21042_s25 }
0x1c67   : > { %v8971_v15 = vpop.xlane.xlu0 %8970 }
0x1c68   : > { %v8989_v33 = vsub.f32 %v8957_v17, %v8971_v15 }
0x1c6a   : > { %v8999_v59 = vmul.f32 1.442695, %v8989_v33  ;;  %v8968_v39 = vpop.xlane.xlu1 %8967 }
0x1c6b   : > { %v8965_v22 = vpop.xlane.xlu0 %8964  ;;  %v8988_v3 = vsub.f32 %v8956_v54, %v8968_v39 }
0x1c6c   : > { %15250 = vpow2.f32 %v8999_v59  ;;  %v8987_v41 = vsub.f32 %v8955_v9, %v8965_v22 }
0x1c6d   : > { %v8997_v2 = vmul.f32 1.442695, %v8988_v3 }
0x1c6e   : > { %v8995_v58 = vmul.f32 1.442695, %v8987_v41 }
0x1c6f   : > { %v8974_v38 = vpop.xlane.xlu0 %8973 }
0x1c70   : > { %15252 = vpow2.f32 %v8995_v58  ;;  %v8990_v6 = vsub.f32 %v8958_v27, %v8974_v38  ;;  %v9062_v27 = vpop.permute.xlu1 %9061 }
0x1c72   : > { %v9001_v63 = vmul.f32 1.442695, %v8990_v6 }
0x1c73   : > { %v8983_v23 = vpop.xlane.xlu0 %8982 }
0x1c74   : > { %15254 = vpow2.f32 %v9001_v63  ;;  %v8993_v5 = vsub.f32 %v8961_v56, %v8983_v23 }
0x1c75   : > { %15256 = vpow2.f32 %v8997_v2 }
0x1c76   : > { %v19679_v34 = vpop.eup %15250  ;;  %v9007_v46 = vmul.f32 1.442695, %v8993_v5 }
0x1c77   : > { %v8977_v17 = vpop.xlane.xlu0 %8976  ;;  %v9017_v36 = vsel %vm480_vm0, %v19679_v34, 0.0 }
0x1c78   : > { %15258 = vpow2.f32 %v9007_v46  ;;  %v8991_v9 = vsub.f32 %v8959_v28, %v8977_v17  ;;  %9018 = vadd.xlane.f32.xlu0 %v9017_v36  ;;  %v9064_v28 = vpop.permute.xlu1 %9063 }
0x1c7a   : > { %v19683_v54 = vpop.eup %15252  ;;  %v9003_v15 = vmul.f32 1.442695, %v8991_v9 }
0x1c7b   : > { %v9060_v33 = vpop.permute.xlu0 %9059  ;;  %v9011_v59 = vsel %vm480_vm0, %v19683_v54, 0.0 }
0x1c7c   : > { %15260 = vpow2.f32 %v9003_v15  ;;  %9012 = vadd.xlane.f32.xlu0 %v9011_v59  ;;  %13960 = vmatprep.subr.bf16.mxu1 %v9060_v33 }
0x1c7d   : > { %13961 = vmatpush3.bf16.msra.mxu1 %v9060_v33 }
0x1c7e   : > { %v15255_v56 = vpop.eup %15254  ;;  %13962 = vmatprep.subr.bf16.mxu1 %v9062_v27 }
0x1c7f   : > { %v9020_v39 = vsel %vm480_vm0, %v15255_v56, 0.0  ;;  %v15257_v22 = vpop.eup %15256 }
0x1c80   : > { %9021 = vadd.xlane.f32.xlu1 %v9020_v39  ;;  %v9014_v58 = vsel %vm480_vm0, %v15257_v22, 0.0 }
0x1c81   : > { %13963 = vmatpush3.bf16.msra.mxu1 %v9062_v27 }
0x1c82   : > { %v19688_v41 = vpop.eup %15258  ;;  %13964 = vmatprep.subr.bf16.mxu1 %v9064_v28 }
0x1c83   : > { %v9029_v3 = vsel %vm480_vm0, %v19688_v41, 0.0 }
0x1c84   : > { %9030 = vadd.xlane.f32.xlu0 %v9029_v3  ;;  %9015 = vadd.xlane.f32.xlu1 %v9014_v58 }
0x1c85   : > { %13965 = vmatpush3.bf16.msra.mxu1 %v9064_v28 }
0x1c86   : > { %v19693_v38 = vpop.eup %15260 }
0x1c87   : > { %v9023_v6 = vsel %vm480_vm0, %v19693_v38, 0.0 }
0x1c88   : > { %9024 = vadd.xlane.f32.xlu0 %v9023_v6 }
0x1c95   : > { %9376 = vrot.lane.b32.xlu1 %v19520_v45, %s20992_s30 }
0x1c99   : > { %9378 = vrot.lane.b32.xlu1 %v19528_v30, %s20992_s30 }
0x1ca3   : > { %v8986_v2 = vpop.xlane.xlu1 %8985 }
0x1ca4   : > { %v8994_v63 = vsub.f32 %v8962_v60, %v8986_v2  ;;  %v9148_v60 = vld [vmem:[%s20950_s6 + $0x98] sm:$0xff] }
0x1ca6   : > { %v9009_v23 = vmul.f32 1.442695, %v8994_v63 }
0x1ca7   : > { %v8980_v5 = vpop.xlane.xlu1 %8979 }
0x1ca8   : > { %15262 = vpow2.f32 %v9009_v23  ;;  %v8992_v46 = vsub.f32 %v19672_v42, %v8980_v5  ;;  %v9149_v42 = vld [vmem:[%s20950_s6 + $0xb8] sm:$0xff] }
0x1ca9   : > { %v13219_v59 = vcombine.low %v9148_v60, %v9149_v42  ;;  %v13220_v39 = vcombine.high %v9148_v60, %v9149_v42 }
0x1caa   : > { %v9005_v17 = vmul.f32 1.442695, %v8992_v46 }
0x1cab   : > { %v9066_v36 = vpop.permute.xlu1 %9065  ;;  %9188 = vmatprep.subr.bf16.mxu0 %v13220_v39 }
0x1cac   : > { %13966 = vmatprep.subr.bf16.mxu1 %v9066_v36  ;;  %15264 = vpow2.f32 %v9005_v17  ;;  %9189 = vmatpush1.bf16.msra.mxu0 %v13219_v59 }
0x1cad   : > { %13967 = vmatpush3.bf16.msra.mxu1 %v9066_v36 }
0x1cb2   : > { %v15263_v9 = vpop.eup %15262 }
0x1cb3   : > { %v9032_v15 = vsel %vm480_vm0, %v15263_v9, 0.0 }
0x1cb4   : > { %9033 = vadd.xlane.f32.xlu0 %v9032_v15 }
0x1cb6   : > { %v15265_v27 = vpop.eup %15264 }
0x1cb7   : > { %v9026_v33 = vsel %vm480_vm0, %v15265_v27, 0.0 }
0x1cbd   : > { %9027 = vadd.xlane.f32.xlu1 %v9026_v33 }
0x1cca   : > { %9374 = vrot.lane.b32.xlu0 %v19512_v18, %s20992_s30 }
0x1cce   : > { %9366 = vrot.lane.b32.xlu0 %v19489_v1, %s20992_s30  ;;  %9380 = vrot.lane.b32.xlu1 %v19536_v37, %s20992_s30 }
0x1cd2   : > { %9370 = vrot.lane.b32.xlu0 %v19499_v20, %s20992_s30  ;;  %9368 = vrot.lane.b32.xlu1 %v19495_v50, %s20992_s30 }
0x1cd6   : > { %9372 = vrot.lane.b32.xlu1 %v19503_v57, %s20992_s30 }
0x1d05   : > { %v9019_v28 = vpop.xlane.xlu0 %9018 }
0x1d09   : > { %v9013_v58 = vpop.xlane.xlu0 %9012 }
0x1d0d   : > { %v9022_v3 = vpop.xlane.xlu1 %9021 }
0x1d0e   : > { %15266 = vrcp.f32 %v9022_v3 }
0x1d0f   : > { %15268 = vrcp.f32 %v9013_v58 }
0x1d10   : > { %15270 = vrcp.f32 %v9019_v28 }
0x1d11   : > { %v9016_v6 = vpop.xlane.xlu1 %9015  ;;  %v9031_v42 = vpop.xlane.xlu0 %9030 }
0x1d12   : > { %15272 = vrcp.f32 %v9016_v6 }
0x1d15   : > { %v9025_v59 = vpop.xlane.xlu0 %9024  ;;  %v9377_v39 = vpop.permute.xlu1 %9376 }
0x1d18   : > { %v15267_v2 = vpop.eup %15266 }
0x1d19   : > { %v15269_v63 = vpop.eup %15268  ;;  %v9042_v46 = vmul.f32 %v15267_v2, %v15255_v56  ;;  %v9379_v58 = vpop.permute.xlu1 %9378 }
0x1d1a   : > { %v15271_v23 = vpop.eup %15270  ;;  %v9036_v17 = vmul.f32 %v15269_v63, %v19683_v54  ;;  %v9398_v54 = vsel %vm1429_vm1, %v9377_v39, 0 }
0x1d1b   : > { %v9040_v15 = vmul.f32 %v15271_v23, %v19679_v34 }
0x1d1c   : > { %v15273_v5 = vpop.eup %15272 }
0x1d1d   : > { %v9038_v36 = vmul.f32 %v15273_v5, %v15257_v22  ;;  %v9052_v60 = vpack.c.bf16 %v9042_v46, %v9040_v15  ;;  %v9401_v5 = vsel %vm1429_vm1, %v9379_v58, 0 }
0x1d1f   : > { %v9051_v33 = vpack.c.bf16 %v9038_v36, %v9036_v17 }
0x1d21   : > { %13968 = vmatprep.mubr.msk.bf16.mxu1 %vm480_vm0, %v9051_v33 }
0x1d22   : > { %13969 = vmatmul.mubr.msk.bf16.vlgmr.msra.gmra.mrb[168].mxu1 %vm480_vm0, %v9052_v60 }
0x1d41   : > { %v9034_v28 = vpop.xlane.xlu0 %9033 }
0x1d42   : > { %15274 = vrcp.f32 %v9034_v28 }
0x1d43   : > { %15276 = vrcp.f32 %v9025_v59  ;;  %v9150_v59 = vld [vmem:[%s20950_s6 + $0xd8] sm:$0xff] }
0x1d44   : > { %15278 = vrcp.f32 %v9031_v42 }
0x1d45   : > { %v9375_v3 = vpop.permute.xlu0 %9374 }
0x1d46   : > { %14512 = vmatprep.subr.msk.bf16.mxu1 %vm1429_vm1, %v9375_v3  ;;  %v9395_v56 = vsel %vm1429_vm1, %v9375_v3, 0 }
0x1d47   : > { %13977 = vmatpush3.bf16.xpose.msra.mxu1 %v9395_v56  ;;  %v8835_v56 = vld [vmem:[%s20950_s6 + $0x38] sm:$0xff] }
0x1d48   : > { %14513 = vmatprep.subr.msk.bf16.mxu1 %vm1429_vm1, %v9377_v39  ;;  %v9151_v39 = vld [vmem:[%s20950_s6 + $0xf8] sm:$0xff] }
0x1d49   : > { %v9367_v42 = vpop.permute.xlu0 %9366  ;;  %v13221_v28 = vcombine.low %v9150_v59, %v9151_v39  ;;  %v13222_v3 = vcombine.high %v9150_v59, %v9151_v39 }
0x1d4a   : > { %v9028_v34 = vpop.xlane.xlu1 %9027 }
0x1d4b   : > { %15280 = vrcp.f32 %v9028_v34  ;;  %9190 = vmatprep.subr.bf16.mxu0 %v13222_v3 }
0x1d4c   : > { %v15275_v22 = vpop.eup %15274  ;;  %9191 = vmatpush1.bf16.msra.mxu0 %v13221_v28 }
0x1d4d   : > { %v15277_v6 = vpop.eup %15276  ;;  %v9050_v23 = vmul.f32 %v15275_v22, %v15263_v9 }
0x1d4e   : > { %v15279_v2 = vpop.eup %15278  ;;  %v9044_v46 = vmul.f32 %v15277_v6, %v19693_v38  ;;  %v9381_v36 = vpop.permute.xlu1 %9380  ;;  %v8836_v6 = vld [vmem:[%s20950_s6 + $0x58] sm:$0xff] }
0x1d4f   : > { %13979 = vmatpush3.bf16.xpose.msra.mxu1 %v9398_v54  ;;  %v9048_v15 = vmul.f32 %v15279_v2, %v19688_v41  ;;  %v9404_v9 = vsel %vm1429_vm1, %v9381_v36, 0  ;;  %v8837_v2 = vld [vmem:[%s20950_s6 + $0x78] sm:$0xff] }
0x1d50   : > { %14514 = vmatprep.subr.msk.bf16.mxu1 %vm1429_vm1, %v9379_v58  ;;  %v8834_v58 = vld [vmem:[%s20950_s6 + $0x18] sm:$0xff] }
0x1d51   : > { %v9054_v60 = vpack.c.bf16 %v9050_v23, %v9048_v15  ;;  %v13228_v34 = vcombine.high %v8834_v58, %v8835_v56  ;;  %v13229_v15 = vcombine.low %v8836_v6, %v8837_v2 }
0x1d52   : > { %v9369_v38 = vpop.permute.xlu1 %9368 }
0x1d53   : > { %9293 = vmatprep.subr.bf16.mxu0 %v13228_v34 }
0x1d55   : > { %v15281_v63 = vpop.eup %15280 }
0x1d56   : > { %v9046_v17 = vmul.f32 %v15281_v63, %v15265_v27  ;;  %v9371_v27 = vpop.permute.xlu0 %9370  ;;  %v9373_v41 = vpop.permute.xlu1 %9372 }
0x1d57   : > { %13981 = vmatpush3.bf16.xpose.msra.mxu1 %v9401_v5 }
0x1d58   : > { %14515 = vmatprep.subr.msk.bf16.mxu1 %vm1429_vm1, %v9381_v36  ;;  %v9053_v33 = vpack.c.bf16 %v9046_v17, %v9044_v46  ;;  %v13227_v46 = vcombine.low %v8834_v58, %v8835_v56  ;;  %v13230_v36 = vcombine.high %v8836_v6, %v8837_v2 }
0x1d5a   : > { %13972 = vmatprep.mubr.msk.bf16.mxu1 %vm480_vm0, %v9053_v33 }
0x1d5b   : > { %13973 = vmatmul.mubr.msk.bf16.gmra.mrb[172].mxu1 %vm480_vm0, %v9054_v60 }
0x1d5c   : > { %13984 = vmatprep.mubr.msk.bf16.mxu1 %vm1429_vm1, %v9367_v42 }
0x1d5f   : > { %13983 = vmatpush3.bf16.xpose.msra.mxu1 %v9404_v9 }
0x1d66   : > { %13985 = vmatmul.mubr.msk.bf16.vlgmr.msra.gmra.mrb[176].mxu1 %vm1429_vm1, %v9369_v38 }
0x1d67   : > { %13988 = vmatprep.mubr.msk.bf16.mxu1 %vm1429_vm1, %v9371_v27 }
0x1d6e   : > { %13989 = vmatmul.mubr.msk.bf16.gmra.mrb[180].mxu1 %vm1429_vm1, %v9373_v41 }
0x1df5   : > { %v13970_v54 = vpop.f32.mrb[168].mxu1 }
0x1df6   : > { %v9117_v22 = vpop.f32.mrb[169].mxu1 }
0x1df7   : > { %v13971_v63 = vpop.f32.mrb[170].mxu1 }
0x1df8   : > { %v9153_v23 = vpack.c.bf16 %v13971_v63, %v13970_v54  ;;  %v9120_v5 = vpop.f32.mrb[171].mxu1 }
0x1df9   : > { %v9152_v17 = vpack.c.bf16 %v9120_v5, %v9117_v22 }
0x1dfb   : > { %13223 = vmatmul.mubr.msk.bf16.vlgmr.msra.gmra.mrb[192].mxu0 %vm1429_vm1, %v9152_v17 }
0x1dfc   : > { %9230 = vmatprep.mubr.bf16.mxu0 %v21043_v32  ;;  %9294 = vmatpush1.bf16.msra.mxu0 %v13227_v46 }
0x1dfd   : > { %9295 = vmatprep.subr.bf16.mxu0 %v13230_v36 }
0x1e00   : > { %9296 = vmatpush1.bf16.msra.mxu0 %v13229_v15 }
0x1e03   : > { %13224 = vmatmul.mubr.msk.bf16.gmra.mrb[196].mxu0 %vm1429_vm1, %v9153_v23 }
0x1e04   : > { %9240 = vmatprep.mubr.bf16.mxu0 %v21043_v32 }
0x1e2e   : > { %v13974_v33 = vpop.f32.mrb[172].mxu1 }
0x1e2f   : > { %v9133_v60 = vpop.f32.mrb[173].mxu1 }
0x1e30   : > { %v13975_v42 = vpop.f32.mrb[174].mxu1 }
0x1e31   : > { %v9155_v9 = vpack.c.bf16 %v13975_v42, %v13974_v33  ;;  %v9136_v38 = vpop.f32.mrb[175].mxu1 }
0x1e32   : > { %v9154_v27 = vpack.c.bf16 %v9136_v38, %v9133_v60 }
0x1e34   : > { %13225 = vmatmul.mubr.msk.bf16.gmra.mrb[200].mxu0 %vm1429_vm1, %v9154_v27 }
0x1e35   : > { %9250 = vmatprep.mubr.bf16.mxu0 %v21043_v32 }
0x1e39   : > { %v13986_v41 = vpop.f32.mrb[176].mxu1 }
0x1e3a   : > { %v9473_v59 = vmul.f32 0.17677669, %v13986_v41  ;;  %v9440_v39 = vpop.f32.mrb[177].mxu1 }
0x1e3b   : > { %v13987_v28 = vpop.f32.mrb[178].mxu1  ;;  %v9471_v3 = vmul.f32 0.17677669, %v9440_v39 }
0x1e3c   : > { %13226 = vmatmul.mubr.msk.bf16.gmra.mrb[204].mxu0 %vm1429_vm1, %v9155_v9  ;;  %v9443_v58 = vpop.f32.mrb[179].mxu1  ;;  %v9485_v56 = vsel %vm480_vm0, %v9473_v59, -inf  ;;  %v9474_v22 = vmul.f32 0.17677669, %v13987_v28 }
0x1e3d   : > { %v9472_v34 = vmul.f32 0.17677669, %v9443_v58  ;;  %9486 = vmax.xlane.f32.xlu0 %v9485_v56  ;;  %9325 = vmatprep.mubr.bf16.mxu0 %v21043_v32  ;;  %v9479_v6 = vsel %vm480_vm0, %v9471_v3, -inf }
0x1e3e   : > { %v9488_v17 = vsel %vm480_vm0, %v9474_v22, -inf }
0x1e3f   : > { %v9482_v54 = vsel %vm480_vm0, %v9472_v34, -inf }
0x1e40   : > { %9483 = vmax.xlane.f32.xlu1 %v9482_v54 }
0x1e41   : > { %9480 = vmax.xlane.f32.xlu0 %v9479_v6  ;;  %v13990_v2 = vpop.f32.mrb[180].mxu1 }
0x1e42   : > { %v9456_v63 = vpop.f32.mrb[181].mxu1  ;;  %v9477_v5 = vmul.f32 0.17677669, %v13990_v2 }
0x1e43   : > { %v13991_v23 = vpop.f32.mrb[182].mxu1  ;;  %v9475_v36 = vmul.f32 0.17677669, %v9456_v63 }
0x1e44   : > { %13231 = vmatmul.mubr.msk.bf16.vlgmr.msra.gmra.mrb[192].mxu0 %vm1429_vm1, %v8838_v52  ;;  %v9459_v46 = vpop.f32.mrb[183].mxu1  ;;  %v9497_v15 = vsel %vm480_vm0, %v9477_v5, -inf  ;;  %v9478_v61 = vmul.f32 0.17677669, %v13991_v23 }
0x1e45   : > { %9489 = vmax.xlane.f32.xlu0 %v9488_v17  ;;  %9335 = vmatprep.mubr.bf16.mxu0 %v21043_v32  ;;  %v9491_v33 = vsel %vm480_vm0, %v9475_v36, -inf  ;;  %v19800_v21 = vmul.f32 0.17677669, %v9459_v46 }
0x1e46   : > { %v9500_v44 = vsel %vm480_vm0, %v9478_v61, -inf }
0x1e49   : > { %9498 = vmax.xlane.f32.xlu0 %v9497_v15 }
0x1e4c   : > { %13232 = vmatmul.mubr.msk.bf16.gmra.mrb[196].mxu0 %vm1429_vm1, %v8839_v35  ;;  %v9494_v35 = vsel %vm480_vm0, %v19800_v21, -inf }
0x1e4d   : > { %9492 = vmax.xlane.f32.xlu0 %v9491_v33  ;;  %9345 = vmatprep.mubr.bf16.mxu0 %v21043_v32 }
0x1e51   : > { %9573 = vrot.lane.b32.xlu1 %v19561_v40, %s20992_s30 }
0x1e54   : > { %13233 = vmatmul.mubr.msk.bf16.gmra.mrb[200].mxu0 %vm1429_vm1, %v8840_v62 }
0x1e55   : > { %9575 = vrot.lane.b32.xlu1 %v19567_v49, %s20992_s30  ;;  %9355 = vmatprep.mubr.bf16.mxu0 %v21043_v32 }
0x1e5c   : > { %13234 = vmatmul.mubr.msk.bf16.gmra.mrb[204].mxu0 %vm1429_vm1, %v8841_v13 }
0x1e5d   : > { %9732 = vmatprep.mubr.bf16.mxu0 %v21043_v32 }
0x1e63   : > { %9571 = vrot.lane.b32.xlu0 %v19555_v48, %s20992_s30 }
0x1e79   : > { %9501 = vmax.xlane.f32.xlu1 %v9500_v44 }
0x1e7d   : > { %9495 = vmax.xlane.f32.xlu1 %v9494_v35 }
0x1e8e   : > { %9577 = vrot.lane.b32.xlu1 %v19573_v25, %s20992_s30 }
0x1eca   : > { %v9487_v51 = vpop.xlane.xlu0 %9486 }
0x1ecb   : > { %v9505_v52 = vsub.f32 %v9473_v59, %v9487_v51 }
0x1ecd   : > { %v9515_v7 = vmul.f32 1.442695, %v9505_v52  ;;  %v9484_v47 = vpop.xlane.xlu1 %9483 }
0x1ece   : > { %v9481_v8 = vpop.xlane.xlu0 %9480  ;;  %v9504_v4 = vsub.f32 %v9472_v34, %v9484_v47 }
0x1ecf   : > { %15282 = vpow2.f32 %v9515_v7  ;;  %v9503_v13 = vsub.f32 %v9471_v3, %v9481_v8 }
0x1ed0   : > { %v9513_v9 = vmul.f32 1.442695, %v9504_v4 }
0x1ed1   : > { %v9511_v62 = vmul.f32 1.442695, %v9503_v13  ;;  %v9574_v54 = vpop.permute.xlu1 %9573 }
0x1ed2   : > { %v9490_v60 = vpop.xlane.xlu0 %9489 }
0x1ed3   : > { %15284 = vpow2.f32 %v9511_v62  ;;  %v9506_v42 = vsub.f32 %v9474_v22, %v9490_v60 }
0x1ed5   : > { %v9517_v38 = vmul.f32 1.442695, %v9506_v42 }
0x1ed6   : > { %v9499_v27 = vpop.xlane.xlu0 %9498 }
0x1ed7   : > { %15286 = vpow2.f32 %v9517_v38  ;;  %v9509_v41 = vsub.f32 %v9477_v5, %v9499_v27  ;;  %v9576_v5 = vpop.permute.xlu1 %9575 }
0x1ed8   : > { %15288 = vpow2.f32 %v9513_v9 }
0x1ed9   : > { %v19807_v39 = vpop.eup %15282  ;;  %v9523_v28 = vmul.f32 1.442695, %v9509_v41 }
0x1eda   : > { %v9493_v59 = vpop.xlane.xlu0 %9492  ;;  %v9533_v58 = vsel %vm480_vm0, %v19807_v39, 0.0 }
0x1edb   : > { %15290 = vpow2.f32 %v9523_v28  ;;  %v9507_v3 = vsub.f32 %v9475_v36, %v9493_v59  ;;  %9534 = vadd.xlane.f32.xlu0 %v9533_v58 }
0x1edd   : > { %v19811_v56 = vpop.eup %15284  ;;  %v9519_v34 = vmul.f32 1.442695, %v9507_v3 }
0x1ede   : > { %v9572_v22 = vpop.permute.xlu0 %9571  ;;  %v9527_v6 = vsel %vm480_vm0, %v19811_v56, 0.0 }
0x1edf   : > { %15292 = vpow2.f32 %v9519_v34  ;;  %9528 = vadd.xlane.f32.xlu0 %v9527_v6  ;;  %13992 = vmatprep.subr.bf16.mxu1 %v9572_v22 }
0x1ee0   : > { %13993 = vmatpush3.bf16.msra.mxu1 %v9572_v22 }
0x1ee1   : > { %v15287_v2 = vpop.eup %15286  ;;  %13994 = vmatprep.subr.bf16.mxu1 %v9574_v54 }
0x1ee2   : > { %v9536_v63 = vsel %vm480_vm0, %v15287_v2, 0.0  ;;  %v15289_v23 = vpop.eup %15288 }
0x1ee3   : > { %9537 = vadd.xlane.f32.xlu1 %v9536_v63  ;;  %v9530_v36 = vsel %vm480_vm0, %v15289_v23, 0.0 }
0x1ee4   : > { %13995 = vmatpush3.bf16.msra.mxu1 %v9574_v54 }
0x1ee5   : > { %v19816_v46 = vpop.eup %15290  ;;  %13996 = vmatprep.subr.bf16.mxu1 %v9576_v5 }
0x1ee6   : > { %v9545_v17 = vsel %vm480_vm0, %v19816_v46, 0.0 }
0x1ee7   : > { %9546 = vadd.xlane.f32.xlu0 %v9545_v17  ;;  %9531 = vadd.xlane.f32.xlu1 %v9530_v36 }
0x1ee8   : > { %13997 = vmatpush3.bf16.msra.mxu1 %v9576_v5 }
0x1ee9   : > { %v19821_v15 = vpop.eup %15292 }
0x1eea   : > { %v9539_v33 = vsel %vm480_vm0, %v19821_v15, 0.0 }
0x1eeb   : > { %9540 = vadd.xlane.f32.xlu0 %v9539_v33 }
0x1ef8   : > { %9799 = vrot.lane.b32.xlu1 %v19520_v45, %s21044_s21 }
0x1efc   : > { %9801 = vrot.lane.b32.xlu1 %v19528_v30, %s21044_s21  ;;  %v9660_v30 = vld [vmem:[%s20950_s6 + $0x118] sm:$0xff] }
0x1f06   : > { %v9502_v44 = vpop.xlane.xlu1 %9501 }
0x1f07   : > { %v9510_v35 = vsub.f32 %v9478_v61, %v9502_v44 }
0x1f09   : > { %v9525_v51 = vmul.f32 1.442695, %v9510_v35 }
0x1f0a   : > { %v9496_v52 = vpop.xlane.xlu1 %9495 }
0x1f0b   : > { %15294 = vpow2.f32 %v9525_v51  ;;  %v9508_v7 = vsub.f32 %v19800_v21, %v9496_v52 }
0x1f0d   : > { %v9521_v47 = vmul.f32 1.442695, %v9508_v7 }
0x1f0e   : > { %v9578_v8 = vpop.permute.xlu1 %9577 }
0x1f0f   : > { %13998 = vmatprep.subr.bf16.mxu1 %v9578_v8  ;;  %15296 = vpow2.f32 %v9521_v47 }
0x1f10   : > { %13999 = vmatpush3.bf16.msra.mxu1 %v9578_v8 }
0x1f15   : > { %v15295_v13 = vpop.eup %15294 }
0x1f16   : > { %v9548_v4 = vsel %vm480_vm0, %v15295_v13, 0.0 }
0x1f17   : > { %9549 = vadd.xlane.f32.xlu0 %v9548_v4 }
0x1f19   : > { %v15297_v45 = vpop.eup %15296 }
0x1f1a   : > { %v9542_v62 = vsel %vm480_vm0, %v15297_v45, 0.0 }
0x1f20   : > { %9543 = vadd.xlane.f32.xlu1 %v9542_v62  ;;  %v9662_v62 = vld [vmem:[%s20950_s6 + $0x158] sm:$0xff] }
0x1f2d   : > { %9797 = vrot.lane.b32.xlu0 %v19512_v18, %s21044_s21 }
0x1f31   : > { %9789 = vrot.lane.b32.xlu0 %v19489_v1, %s21044_s21  ;;  %9803 = vrot.lane.b32.xlu1 %v19536_v37, %s21044_s21  ;;  %v9661_v1 = vld [vmem:[%s20950_s6 + $0x138] sm:$0xff] }
0x1f32   : > { %v13243_v18 = vcombine.low %v9660_v30, %v9661_v1  ;;  %v13244_v61 = vcombine.high %v9660_v30, %v9661_v1  ;;  %v9663_v30 = vld [vmem:[%s20950_s6 + $0x178] sm:$0xff] }
0x1f33   : > { %v13245_v1 = vcombine.low %v9662_v62, %v9663_v30 }
0x1f34   : > { %9700 = vmatprep.subr.bf16.mxu0 %v13244_v61  ;;  %v10083_v61 = vld [vmem:[%s20950_s6 + $0x198] sm:$0xff] }
0x1f35   : > { %9793 = vrot.lane.b32.xlu0 %v19499_v20, %s21044_s21  ;;  %9791 = vrot.lane.b32.xlu1 %v19495_v50, %s21044_s21 }
0x1f36   : > { %9701 = vmatpush1.bf16.msra.mxu0 %v13243_v18  ;;  %v13246_v18 = vcombine.high %v9662_v62, %v9663_v30 }
0x1f38   : > { %9702 = vmatprep.subr.bf16.mxu0 %v13246_v18 }
0x1f39   : > { %9795 = vrot.lane.b32.xlu1 %v19503_v57, %s21044_s21 }
0x1f3a   : > { %9703 = vmatpush1.bf16.msra.mxu0 %v13245_v1 }
0x1f68   : > { %v9535_v37 = vpop.xlane.xlu0 %9534 }
0x1f6c   : > { %v9529_v21 = vpop.xlane.xlu0 %9528 }
0x1f70   : > { %v9538_v20 = vpop.xlane.xlu1 %9537 }
0x1f71   : > { %15298 = vrcp.f32 %v9538_v20 }
0x1f72   : > { %15300 = vrcp.f32 %v9529_v21 }
0x1f73   : > { %15302 = vrcp.f32 %v9535_v37  ;;  %v10084_v37 = vld [vmem:[%s20950_s6 + $0x1b8] sm:$0xff] }
0x1f74   : > { %v9532_v50 = vpop.xlane.xlu1 %9531  ;;  %v9547_v3 = vpop.xlane.xlu0 %9546  ;;  %v13259_v20 = vcombine.low %v10083_v61, %v10084_v37  ;;  %v13260_v21 = vcombine.high %v10083_v61, %v10084_v37 }
0x1f75   : > { %15304 = vrcp.f32 %v9532_v50 }
0x1f76   : > { %10123 = vmatprep.subr.bf16.mxu0 %v13260_v21 }
0x1f78   : > { %v9541_v34 = vpop.xlane.xlu0 %9540  ;;  %v9800_v54 = vpop.permute.xlu1 %9799 }
0x1f7b   : > { %v15299_v57 = vpop.eup %15298 }
0x1f7c   : > { %v15301_v60 = vpop.eup %15300  ;;  %v9558_v38 = vmul.f32 %v15299_v57, %v15287_v2  ;;  %v9802_v63 = vpop.permute.xlu1 %9801 }
0x1f7d   : > { %v15303_v42 = vpop.eup %15302  ;;  %v9552_v27 = vmul.f32 %v15301_v60, %v19811_v56  ;;  %v9821_v56 = vsel %vm1429_vm1, %v9800_v54, 0  ;;  %v9824_v44 = vsel %vm1429_vm1, %v9802_v63, 0  ;;  %v10085_v60 = vld [vmem:[%s20950_s6 + $0x1d8] sm:$0xff] }
0x1f7e   : > { %v9556_v28 = vmul.f32 %v15303_v42, %v19807_v39  ;;  %v10086_v42 = vld [vmem:[%s20950_s6 + $0x1f8] sm:$0xff] }
0x1f7f   : > { %v15305_v9 = vpop.eup %15304 }
0x1f80   : > { %v9554_v41 = vmul.f32 %v15305_v9, %v15289_v23  ;;  %v9568_v58 = vpack.c.bf16 %v9558_v38, %v9556_v28  ;;  %v13262_v28 = vcombine.high %v10085_v60, %v10086_v42 }
0x1f82   : > { %v9567_v59 = vpack.c.bf16 %v9554_v41, %v9552_v27 }
0x1f84   : > { %14000 = vmatprep.mubr.msk.bf16.mxu1 %vm480_vm0, %v9567_v59  ;;  %v13261_v59 = vcombine.low %v10085_v60, %v10086_v42 }
0x1f85   : > { %14001 = vmatmul.mubr.msk.bf16.vlgmr.msra.gmra.mrb[184].mxu1 %vm480_vm0, %v9568_v58 }
0x1fa4   : > { %v9550_v22 = vpop.xlane.xlu0 %9549 }
0x1fa5   : > { %15306 = vrcp.f32 %v9550_v22 }
0x1fa6   : > { %15308 = vrcp.f32 %v9541_v34 }
0x1fa7   : > { %15310 = vrcp.f32 %v9547_v3 }
0x1fa8   : > { %v9798_v6 = vpop.permute.xlu0 %9797 }
0x1fa9   : > { %14516 = vmatprep.subr.msk.bf16.mxu1 %vm1429_vm1, %v9798_v6  ;;  %v9818_v2 = vsel %vm1429_vm1, %v9798_v6, 0 }
0x1faa   : > { %14009 = vmatpush3.bf16.xpose.msra.mxu1 %v9818_v2 }
0x1fab   : > { %14517 = vmatprep.subr.msk.bf16.mxu1 %vm1429_vm1, %v9800_v54 }
0x1fac   : > { %v9790_v4 = vpop.permute.xlu0 %9789 }
0x1fad   : > { %v9544_v39 = vpop.xlane.xlu1 %9543 }
0x1fae   : > { %15312 = vrcp.f32 %v9544_v39 }
0x1faf   : > { %v15307_v23 = vpop.eup %15306 }
0x1fb0   : > { %v15309_v5 = vpop.eup %15308  ;;  %v9566_v33 = vmul.f32 %v15307_v23, %v15295_v13 }
0x1fb1   : > { %v15311_v17 = vpop.eup %15310  ;;  %v9560_v35 = vmul.f32 %v15309_v5, %v19821_v15  ;;  %v9804_v52 = vpop.permute.xlu1 %9803 }
0x1fb2   : > { %14011 = vmatpush3.bf16.xpose.msra.mxu1 %v9821_v56  ;;  %v9564_v7 = vmul.f32 %v15311_v17, %v19816_v46  ;;  %v9827_v13 = vsel %vm1429_vm1, %v9804_v52, 0 }
0x1fb3   : > { %14518 = vmatprep.subr.msk.bf16.mxu1 %vm1429_vm1, %v9802_v63 }
0x1fb4   : > { %v9570_v8 = vpack.c.bf16 %v9566_v33, %v9564_v7 }
0x1fb5   : > { %v9792_v15 = vpop.permute.xlu1 %9791 }
0x1fb8   : > { %v15313_v36 = vpop.eup %15312 }
0x1fb9   : > { %v9562_v51 = vmul.f32 %v15313_v36, %v15297_v45  ;;  %v9794_v45 = vpop.permute.xlu0 %9793  ;;  %v9796_v46 = vpop.permute.xlu1 %9795 }
0x1fba   : > { %14013 = vmatpush3.bf16.xpose.msra.mxu1 %v9824_v44 }
0x1fbb   : > { %14519 = vmatprep.subr.msk.bf16.mxu1 %vm1429_vm1, %v9804_v52  ;;  %v9569_v47 = vpack.c.bf16 %v9562_v51, %v9560_v35 }
0x1fbd   : > { %14004 = vmatprep.mubr.msk.bf16.mxu1 %vm480_vm0, %v9569_v47 }
0x1fbe   : > { %14005 = vmatmul.mubr.msk.bf16.gmra.mrb[188].mxu1 %vm480_vm0, %v9570_v8 }
0x1fbf   : > { %14016 = vmatprep.mubr.msk.bf16.mxu1 %vm1429_vm1, %v9790_v4 }
0x1fc2   : > { %14015 = vmatpush3.bf16.xpose.msra.mxu1 %v9827_v13 }
0x1fc9   : > { %14017 = vmatmul.mubr.msk.bf16.vlgmr.msra.gmra.mrb[192].mxu1 %vm1429_vm1, %v9792_v15 }
0x1fca   : > { %14020 = vmatprep.mubr.msk.bf16.mxu1 %vm1429_vm1, %v9794_v45 }
0x1fd1   : > { %14021 = vmatmul.mubr.msk.bf16.gmra.mrb[196].mxu1 %vm1429_vm1, %v9796_v46 }
0x2058   : > { %v14002_v50 = vpop.f32.mrb[184].mxu1 }
0x2059   : > { %v9629_v57 = vpop.f32.mrb[185].mxu1 }
0x205a   : > { %v14003_v9 = vpop.f32.mrb[186].mxu1 }
0x205b   : > { %v9665_v38 = vpack.c.bf16 %v14003_v9, %v14002_v50  ;;  %v9632_v27 = vpop.f32.mrb[187].mxu1 }
0x205c   : > { %v9664_v41 = vpack.c.bf16 %v9632_v27, %v9629_v57 }
0x205e   : > { %13247 = vmatmul.mubr.msk.bf16.vlgmr.msra.gmra.mrb[192].mxu0 %vm1429_vm1, %v9664_v41 }
0x205f   : > { %10124 = vmatpush1.bf16.msra.mxu0 %v13259_v20  ;;  %9742 = vmatprep.mubr.bf16.mxu0 %v21043_v32 }
0x2060   : > { %10125 = vmatprep.subr.bf16.mxu0 %v13262_v28 }
0x2063   : > { %10126 = vmatpush1.bf16.msra.mxu0 %v13261_v59 }
0x2064   : > { %14056 = vmatprep.subr.bf16.mxu0 %v19557_v24 }
0x2066   : > { %13248 = vmatmul.mubr.msk.bf16.gmra.mrb[196].mxu0 %vm1429_vm1, %v9665_v38 }
0x2067   : > { %9752 = vmatprep.mubr.bf16.mxu0 %v21043_v32 }
0x2091   : > { %v14006_v58 = vpop.f32.mrb[188].mxu1 }
0x2092   : > { %v9645_v3 = vpop.f32.mrb[189].mxu1 }
0x2093   : > { %v14007_v34 = vpop.f32.mrb[190].mxu1 }
0x2094   : > { %v9667_v54 = vpack.c.bf16 %v14007_v34, %v14006_v58  ;;  %v9648_v22 = vpop.f32.mrb[191].mxu1 }
0x2095   : > { %v9666_v6 = vpack.c.bf16 %v9648_v22, %v9645_v3 }
0x2097   : > { %13249 = vmatmul.mubr.msk.bf16.gmra.mrb[200].mxu0 %vm1429_vm1, %v9666_v6 }
0x2098   : > { %9762 = vmatprep.mubr.bf16.mxu0 %v21043_v32 }
0x209c   : > { %v14018_v63 = vpop.f32.mrb[192].mxu1 }
0x209d   : > { %v9896_v2 = vmul.f32 0.17677669, %v14018_v63  ;;  %v9863_v39 = vpop.f32.mrb[193].mxu1 }
0x209e   : > { %v14019_v56 = vpop.f32.mrb[194].mxu1  ;;  %v9894_v23 = vmul.f32 0.17677669, %v9863_v39 }
0x209f   : > { %13250 = vmatmul.mubr.msk.bf16.gmra.mrb[204].mxu0 %vm1429_vm1, %v9667_v54  ;;  %v9866_v5 = vpop.f32.mrb[195].mxu1  ;;  %v9908_v17 = vsel %vm480_vm0, %v9896_v2, -inf  ;;  %v9897_v44 = vmul.f32 0.17677669, %v14019_v56 }
0x20a0   : > { %v9895_v36 = vmul.f32 0.17677669, %v9866_v5  ;;  %9909 = vmax.xlane.f32.xlu0 %v9908_v17  ;;  %10155 = vmatprep.mubr.bf16.mxu0 %v21043_v32  ;;  %v9902_v35 = vsel %vm480_vm0, %v9894_v23, -inf }
0x20a1   : > { %v9911_v13 = vsel %vm480_vm0, %v9897_v44, -inf }
0x20a2   : > { %v9905_v33 = vsel %vm480_vm0, %v9895_v36, -inf }
0x20a3   : > { %9906 = vmax.xlane.f32.xlu1 %v9905_v33 }
0x20a4   : > { %9903 = vmax.xlane.f32.xlu0 %v9902_v35  ;;  %v14022_v51 = vpop.f32.mrb[196].mxu1 }
0x20a5   : > { %v9879_v52 = vpop.f32.mrb[197].mxu1  ;;  %v9900_v46 = vmul.f32 0.17677669, %v14022_v51 }
0x20a6   : > { %v14023_v7 = vpop.f32.mrb[198].mxu1  ;;  %v9898_v47 = vmul.f32 0.17677669, %v9879_v52 }
0x20a7   : > { %v9901_v8 = vmul.f32 0.17677669, %v14023_v7  ;;  %v9882_v4 = vpop.f32.mrb[199].mxu1  ;;  %v9920_v1 = vsel %vm480_vm0, %v9900_v46, -inf }
0x20a8   : > { %9912 = vmax.xlane.f32.xlu0 %v9911_v13  ;;  %v9899_v15 = vmul.f32 0.17677669, %v9882_v4  ;;  %v9914_v62 = vsel %vm480_vm0, %v9898_v47, -inf }
0x20a9   : > { %v9923_v45 = vsel %vm480_vm0, %v9901_v8, -inf }
0x20aa   : > { %9924 = vmax.xlane.f32.xlu1 %v9923_v45  ;;  %v9917_v30 = vsel %vm480_vm0, %v9899_v15, -inf }
0x20ac   : > { %9915 = vmax.xlane.f32.xlu0 %v9914_v62 }
0x20ae   : > { %9918 = vmax.xlane.f32.xlu1 %v9917_v30 }
0x20b0   : > { %9921 = vmax.xlane.f32.xlu0 %v9920_v1 }
0x20bf   : > { %9996 = vrot.lane.b32.xlu1 %v19561_v40, %s21044_s21 }
0x20c3   : > { %9998 = vrot.lane.b32.xlu1 %v19567_v49, %s21044_s21 }
0x212d   : > { %v9910_v18 = vpop.xlane.xlu0 %9909 }
0x212e   : > { %v9928_v61 = vsub.f32 %v9896_v2, %v9910_v18 }
0x2130   : > { %v9938_v37 = vmul.f32 1.442695, %v9928_v61  ;;  %v9907_v20 = vpop.xlane.xlu1 %9906 }
0x2131   : > { %v9904_v21 = vpop.xlane.xlu0 %9903  ;;  %v9927_v57 = vsub.f32 %v9895_v36, %v9907_v20 }
0x2132   : > { %15314 = vpow2.f32 %v9938_v37  ;;  %v9926_v50 = vsub.f32 %v9894_v23, %v9904_v21 }
0x2133   : > { %v9936_v38 = vmul.f32 1.442695, %v9927_v57 }
0x2134   : > { %v9934_v60 = vmul.f32 1.442695, %v9926_v50 }
0x2135   : > { %v9913_v42 = vpop.xlane.xlu0 %9912 }
0x2136   : > { %15316 = vpow2.f32 %v9934_v60  ;;  %v9929_v9 = vsub.f32 %v9897_v44, %v9913_v42 }
0x2137   : > { %v9925_v22 = vpop.xlane.xlu1 %9924 }
0x2138   : > { %v9940_v27 = vmul.f32 1.442695, %v9929_v9  ;;  %v9933_v23 = vsub.f32 %v9901_v8, %v9925_v22  ;;  %v10237_v9 = vsel %vm1429_vm1, %v19514_v0, 0 }
0x2139   : > { %v9916_v54 = vpop.xlane.xlu0 %9915 }
0x213a   : > { %15318 = vpow2.f32 %v9940_v27  ;;  %v9930_v6 = vsub.f32 %v9898_v47, %v9916_v54  ;;  %v9948_v36 = vmul.f32 1.442695, %v9933_v23  ;;  %v10243_v27 = vsel %vm1429_vm1, %v19530_v55, 0 }
0x213b   : > { %15320 = vpow2.f32 %v9936_v38  ;;  %v9919_v56 = vpop.xlane.xlu1 %9918  ;;  %v10240_v38 = vsel %vm1429_vm1, %v19522_v26, 0 }
0x213c   : > { %v19909_v41 = vpop.eup %15314  ;;  %v9942_v2 = vmul.f32 1.442695, %v9930_v6  ;;  %v9931_v5 = vsub.f32 %v9899_v15, %v9919_v56 }
0x213d   : > { %v9956_v40 = vsel %vm480_vm0, %v19909_v41, 0.0  ;;  %v9922_v63 = vpop.xlane.xlu0 %9921 }
0x213e   : > { %9957 = vadd.xlane.f32.xlu0 %v9956_v40  ;;  %v9932_v39 = vsub.f32 %v9900_v46, %v9922_v63  ;;  %15322 = vpow2.f32 %v9942_v2  ;;  %v9944_v33 = vmul.f32 1.442695, %v9931_v5 }
0x213f   : > { %v9997_v8 = vpop.permute.xlu1 %9996 }
0x2140   : > { %v19913_v49 = vpop.eup %15316  ;;  %v9946_v17 = vmul.f32 1.442695, %v9932_v39 }
0x2141   : > { %v9950_v28 = vsel %vm480_vm0, %v19913_v49, 0.0 }
0x2142   : > { %9951 = vadd.xlane.f32.xlu0 %v9950_v28  ;;  %15324 = vpow2.f32 %v9946_v17 }
0x2143   : > { %15326 = vpow2.f32 %v9948_v36  ;;  %v9999_v13 = vpop.permute.xlu1 %9998 }
0x2144   : > { %v19917_v59 = vpop.eup %15318  ;;  %15328 = vpow2.f32 %v9944_v33 }
0x2145   : > { %v9959_v58 = vsel %vm480_vm0, %v19917_v59, 0.0  ;;  %v19921_v3 = vpop.eup %15320 }
0x2146   : > { %9960 = vadd.xlane.f32.xlu1 %v9959_v58  ;;  %v9953_v34 = vsel %vm480_vm0, %v19921_v3, 0.0 }
0x214a   : > { %9954 = vadd.xlane.f32.xlu1 %v9953_v34 }
0x2158   : > { %9994 = vrot.lane.b32.xlu0 %v19555_v48, %s21044_s21  ;;  %v19929_v48 = vpop.eup %15322 }
0x2159   : > { %v19933_v44 = vpop.eup %15324 }
0x215a   : > { %v19935_v35 = vpop.eup %15326  ;;  %v9968_v51 = vsel %vm480_vm0, %v19933_v44, 0.0 }
0x215b   : > { %10000 = vrot.lane.b32.xlu1 %v19573_v25, %s21044_s21  ;;  %v9962_v25 = vsel %vm480_vm0, %v19929_v48, 0.0  ;;  %v19939_v52 = vpop.eup %15328  ;;  %v9971_v7 = vsel %vm480_vm0, %v19935_v35, 0.0 }
0x215c   : > { %v9965_v47 = vsel %vm480_vm0, %v19939_v52, 0.0 }
0x2177   : > { %9963 = vadd.xlane.f32.xlu0 %v9962_v25 }
0x217b   : > { %9969 = vadd.xlane.f32.xlu0 %v9968_v51 }
0x217f   : > { %9972 = vadd.xlane.f32.xlu0 %v9971_v7  ;;  %9966 = vadd.xlane.f32.xlu1 %v9965_v47 }
0x2190   : > { %10637 = vrot.lane.b32.xlu1 %v19522_v26, %s21042_s25 }
0x2194   : > { %10639 = vrot.lane.b32.xlu1 %v19530_v55, %s21042_s25 }
0x2195   : > { %10635 = vrot.lane.b32.xlu0 %v19514_v0, %s21042_s25 }
0x2198   : > { %10641 = vrot.lane.b32.xlu1 %v19538_v11, %s21042_s25 }
0x2199   : > { %10623 = vrot.lane.b32.xlu0 %v19491_v14, %s21042_s25 }
0x219c   : > { %10625 = vrot.lane.b32.xlu1 %v19497_v10, %s21042_s25 }
0x219d   : > { %10627 = vrot.lane.b32.xlu0 %v19501_v19, %s21042_s25 }
0x21a0   : > { %10629 = vrot.lane.b32.xlu1 %v19505_v29, %s21042_s25 }
0x21a1   : > { %10836 = vrot.lane.b32.xlu0 %v19557_v24, %s21042_s25 }
0x21a4   : > { %10838 = vrot.lane.b32.xlu1 %v19563_v53, %s21042_s25 }
0x21a8   : > { %10840 = vrot.lane.b32.xlu1 %v19569_v16, %s21042_s25 }
0x21ac   : > { %10842 = vrot.lane.b32.xlu1 %v19575_v43, %s21042_s25  ;;  %s373_s25 = sand.u32 1, %s15592_s14  }
0x21ad   : > { %s12608_s12 = sshll.u32 %s373_s25, 7 }
0x21ae   : > { %s20753_s28 = scalar_lea.vmem [#allocation2], %s12608_s12  ;;  %s15542_s12 = sshll.u32 %s15607_s17, 4  ;;  %s15543_s12 = int_to_ptr.vmem [resolvable:$false] %s15542_s12 }
0x21cb   : > { %v9958_v4 = vpop.xlane.xlu0 %9957 }
0x21cf   : > { %v9952_v15 = vpop.xlane.xlu0 %9951 }
0x21d3   : > { %v9995_v45 = vpop.permute.xlu0 %9994  ;;  %v9961_v46 = vpop.xlane.xlu1 %9960 }
0x21d4   : > { %14024 = vmatprep.subr.bf16.mxu1 %v9995_v45  ;;  %15330 = vrcp.f32 %v9961_v46 }
0x21d5   : > { %14025 = vmatpush3.bf16.msra.mxu1 %v9995_v45  ;;  %15332 = vrcp.f32 %v9952_v15 }
0x21d6   : > { %14026 = vmatprep.subr.bf16.mxu1 %v9997_v8  ;;  %15334 = vrcp.f32 %v9958_v4 }
0x21d7   : > { %v9955_v62 = vpop.xlane.xlu1 %9954 }
0x21d8   : > { %15336 = vrcp.f32 %v9955_v62 }
0x21d9   : > { %14027 = vmatpush3.bf16.msra.mxu1 %v9997_v8 }
0x21da   : > { %14028 = vmatprep.subr.bf16.mxu1 %v9999_v13 }
0x21db   : > { %v10001_v30 = vpop.permute.xlu1 %10000 }
0x21dd   : > { %14029 = vmatpush3.bf16.msra.mxu1 %v9999_v13 }
0x21de   : > { %14030 = vmatprep.subr.bf16.mxu1 %v10001_v30  ;;  %v15331_v1 = vpop.eup %15330 }
0x21df   : > { %v15333_v18 = vpop.eup %15332  ;;  %v9981_v20 = vmul.f32 %v15331_v1, %v19917_v59 }
0x21e0   : > { %v15335_v61 = vpop.eup %15334  ;;  %v9975_v21 = vmul.f32 %v15333_v18, %v19913_v49 }
0x21e1   : > { %14031 = vmatpush3.bf16.msra.mxu1 %v10001_v30  ;;  %v9979_v57 = vmul.f32 %v15335_v61, %v19909_v41  ;;  %v10246_v41 = vsel %vm1429_vm1, %v19538_v11, 0 }
0x21e2   : > { %v15337_v37 = vpop.eup %15336  ;;  %14520 = vmatprep.subr.msk.bf16.mxu1 %vm1429_vm1, %v19514_v0 }
0x21e3   : > { %v9977_v50 = vmul.f32 %v15337_v37, %v19921_v3  ;;  %v9991_v42 = vpack.c.bf16 %v9981_v20, %v9979_v57 }
0x21e5   : > { %v9990_v60 = vpack.c.bf16 %v9977_v50, %v9975_v21 }
0x21e7   : > { %14032 = vmatprep.mubr.msk.bf16.mxu1 %vm480_vm0, %v9990_v60 }
0x21e8   : > { %14033 = vmatmul.mubr.msk.bf16.vlgmr.msra.gmra.mrb[200].mxu1 %vm480_vm0, %v9991_v42 }
0x21ea   : > { %14041 = vmatpush3.bf16.xpose.msra.mxu1 %v10237_v9 }
0x21eb   : > { %14521 = vmatprep.subr.msk.bf16.mxu1 %vm1429_vm1, %v19522_v26 }
0x21f2   : > { %14043 = vmatpush3.bf16.xpose.msra.mxu1 %v10240_v38 }
0x21f3   : > { %14522 = vmatprep.subr.msk.bf16.mxu1 %vm1429_vm1, %v19530_v55 }
0x21fa   : > { %14045 = vmatpush3.bf16.xpose.msra.mxu1 %v10243_v27 }
0x21fb   : > { %14523 = vmatprep.subr.msk.bf16.mxu1 %vm1429_vm1, %v19538_v11 }
0x2202   : > { %14047 = vmatpush3.bf16.xpose.msra.mxu1 %v10246_v41 }
0x2204   : > { %v9964_v40 = vpop.xlane.xlu0 %9963 }
0x2208   : > { %v9970_v49 = vpop.xlane.xlu0 %9969 }
0x2209   : > { %15338 = vrcp.f32 %v9970_v49 }
0x220a   : > { %15340 = vrcp.f32 %v9964_v40 }
0x220c   : > { %v9973_v28 = vpop.xlane.xlu0 %9972  ;;  %v9967_v59 = vpop.xlane.xlu1 %9966 }
0x220d   : > { %15342 = vrcp.f32 %v9973_v28 }
0x220e   : > { %15344 = vrcp.f32 %v9967_v59 }
0x2210   : > { %v10636_v58 = vpop.permute.xlu0 %10635  ;;  %v10638_v5 = vpop.permute.xlu1 %10637 }
0x2211   : > { %14524 = vmatprep.subr.msk.bf16.mxu1 %vm1429_vm1, %v10636_v58  ;;  %v10656_v17 = vsel %vm1429_vm1, %v10636_v58, 0 }
0x2213   : > { %v15339_v3 = vpop.eup %15338 }
0x2214   : > { %v15341_v34 = vpop.eup %15340  ;;  %v9987_v6 = vmul.f32 %v15339_v3, %v19933_v44  ;;  %v10640_v36 = vpop.permute.xlu1 %10639 }
0x2215   : > { %v9983_v2 = vmul.f32 %v15341_v34, %v19929_v48  ;;  %v10624_v33 = vpop.permute.xlu0 %10623  ;;  %v10659_v48 = vsel %vm1429_vm1, %v10638_v5, 0  ;;  %v10662_v44 = vsel %vm1429_vm1, %v10640_v36, 0 }
0x2217   : > { %v15343_v54 = vpop.eup %15342 }
0x2218   : > { %v15345_v22 = vpop.eup %15344  ;;  %v9989_v63 = vmul.f32 %v15343_v54, %v19935_v35  ;;  %v10642_v25 = vpop.permute.xlu1 %10641 }
0x2219   : > { %v9985_v39 = vmul.f32 %v15345_v22, %v19939_v52  ;;  %v10628_v51 = vpop.permute.xlu0 %10627  ;;  %v10665_v7 = vsel %vm1429_vm1, %v10642_v25, 0 }
0x221a   : > { %v9993_v56 = vpack.c.bf16 %v9989_v63, %v9987_v6 }
0x221b   : > { %v9992_v23 = vpack.c.bf16 %v9985_v39, %v9983_v2 }
0x221c   : > { %v10626_v35 = vpop.permute.xlu1 %10625 }
0x221d   : > { %14036 = vmatprep.mubr.msk.bf16.mxu1 %vm480_vm0, %v9992_v23  ;;  %v10837_v47 = vpop.permute.xlu0 %10836 }
0x221e   : > { %14037 = vmatmul.mubr.msk.bf16.gmra.mrb[204].mxu1 %vm480_vm0, %v9993_v56 }
0x221f   : > { %14048 = vmatprep.mubr.msk.bf16.mxu1 %vm1429_vm1, %v19491_v14 }
0x2220   : > { %v10630_v52 = vpop.permute.xlu1 %10629 }
0x2224   : > { %v10839_v8 = vpop.permute.xlu1 %10838 }
0x2226   : > { %14049 = vmatmul.mubr.msk.bf16.vlgmr.msra.gmra.mrb[208].mxu1 %vm1429_vm1, %v19497_v10 }
0x2227   : > { %14073 = vmatpush3.bf16.xpose.msra.mxu1 %v10656_v17  ;;  %14052 = vmatprep.mubr.msk.bf16.mxu1 %vm1429_vm1, %v19501_v19 }
0x2228   : > { %14525 = vmatprep.subr.msk.bf16.mxu1 %vm1429_vm1, %v10638_v5  ;;  %v10841_v4 = vpop.permute.xlu1 %10840 }
0x222c   : > { %v10843_v13 = vpop.permute.xlu1 %10842 }
0x222e   : > { %14053 = vmatmul.mubr.msk.bf16.gmra.mrb[212].mxu1 %vm1429_vm1, %v19505_v29 }
0x222f   : > { %14075 = vmatpush3.bf16.xpose.msra.mxu1 %v10659_v48  ;;  %14080 = vmatprep.mubr.msk.bf16.mxu1 %vm1429_vm1, %v10624_v33 }
0x2230   : > { %14526 = vmatprep.subr.msk.bf16.mxu1 %vm1429_vm1, %v10640_v36 }
0x2237   : > { %14077 = vmatpush3.bf16.xpose.msra.mxu1 %v10662_v44 }
0x2238   : > { %14527 = vmatprep.subr.msk.bf16.mxu1 %vm1429_vm1, %v10642_v25 }
0x223f   : > { %14079 = vmatpush3.bf16.xpose.msra.mxu1 %v10665_v7 }
0x2240   : > { %14088 = vmatprep.subr.bf16.mxu1 %v10837_v47 }
0x2246   : > { %14081 = vmatmul.mubr.msk.bf16.vlgmr.msra.gmra.mrb[216].mxu1 %vm1429_vm1, %v10626_v35 }
0x2247   : > { %14084 = vmatprep.mubr.msk.bf16.mxu1 %vm1429_vm1, %v10628_v51  ;;  %14089 = vmatpush3.bf16.msra.mxu1 %v10837_v47 }
0x2248   : > { %14090 = vmatprep.subr.bf16.mxu1 %v10839_v8 }
0x224b   : > { %14091 = vmatpush3.bf16.msra.mxu1 %v10839_v8 }
0x224c   : > { %14092 = vmatprep.subr.bf16.mxu1 %v10841_v4 }
0x224e   : > { %14085 = vmatmul.mubr.msk.bf16.gmra.mrb[220].mxu1 %vm1429_vm1, %v10630_v52 }
0x224f   : > { %14093 = vmatpush3.bf16.msra.mxu1 %v10841_v4 }
0x2250   : > { %14094 = vmatprep.subr.bf16.mxu1 %v10843_v13 }
0x2253   : > { %14095 = vmatpush3.bf16.msra.mxu1 %v10843_v13 }
0x22bb   : > { %v14034_v15 = vpop.f32.mrb[200].mxu1 }
0x22bc   : > { %v10052_v45 = vpop.f32.mrb[201].mxu1 }
0x22bd   : > { %v14035_v46 = vpop.f32.mrb[202].mxu1 }
0x22be   : > { %v10088_v62 = vpack.c.bf16 %v14035_v46, %v14034_v15  ;;  %v10055_v30 = vpop.f32.mrb[203].mxu1 }
0x22bf   : > { %v10087_v1 = vpack.c.bf16 %v10055_v30, %v10052_v45 }
0x22c1   : > { %13263 = vmatmul.mubr.msk.bf16.vlgmr.msra.gmra.mrb[192].mxu0 %vm1429_vm1, %v10087_v1 }
0x22c2   : > { %14057 = vmatpush3.bf16.msra.mxu0 %v19557_v24  ;;  %10165 = vmatprep.mubr.bf16.mxu0 %v21043_v32 }
0x22c3   : > { %14058 = vmatprep.subr.bf16.mxu0 %v19563_v53 }
0x22c6   : > { %14059 = vmatpush3.bf16.msra.mxu0 %v19563_v53 }
0x22c7   : > { %14060 = vmatprep.subr.bf16.mxu0 %v19569_v16 }
0x22c9   : > { %13264 = vmatmul.mubr.msk.bf16.gmra.mrb[196].mxu0 %vm1429_vm1, %v10088_v62 }
0x22ca   : > { %14061 = vmatpush3.bf16.msra.mxu0 %v19569_v16  ;;  %10175 = vmatprep.mubr.bf16.mxu0 %v21043_v32 }
0x22cb   : > { %14062 = vmatprep.subr.bf16.mxu0 %v19575_v43 }
0x22ce   : > { %14063 = vmatpush3.bf16.msra.mxu0 %v19575_v43 }
0x22f1   : > { %v14038_v18 = vpop.f32.mrb[204].mxu1 }
0x22f2   : > { %v10068_v61 = vpop.f32.mrb[205].mxu1 }
0x22f3   : > { %v14039_v37 = vpop.f32.mrb[206].mxu1 }
0x22f4   : > { %v10090_v20 = vpack.c.bf16 %v14039_v37, %v14038_v18  ;;  %v10071_v21 = vpop.f32.mrb[207].mxu1 }
0x22f5   : > { %v10089_v50 = vpack.c.bf16 %v10071_v21, %v10068_v61 }
0x22f7   : > { %13265 = vmatmul.mubr.msk.bf16.gmra.mrb[200].mxu0 %vm1429_vm1, %v10089_v50 }
0x22f8   : > { %10185 = vmatprep.mubr.bf16.mxu0 %v21043_v32 }
0x22f9   : > { %v14050_v57 = vpop.f32.mrb[208].mxu1 }
0x22fa   : > { %v10282_v60 = vpop.f32.mrb[209].mxu1  ;;  %v20065_v8 = vmul.f32 0.17677669, %v14050_v57 }
0x22fb   : > { %v14051_v42 = vpop.f32.mrb[210].mxu1  ;;  %v20059_v52 = vmul.f32 0.17677669, %v10282_v60 }
0x22fc   : > { %v10285_v9 = vpop.f32.mrb[211].mxu1  ;;  %v20071_v15 = vmul.f32 0.17677669, %v14051_v42  ;;  %v10327_v45 = vsel %vm480_vm0, %v20065_v8, -inf }
0x22fd   : > { %v20053_v44 = vmul.f32 0.17677669, %v10285_v9  ;;  %v10321_v4 = vsel %vm480_vm0, %v20059_v52, -inf }
0x22fe   : > { %v10330_v46 = vsel %vm480_vm0, %v20071_v15, -inf }
0x22ff   : > { %13266 = vmatmul.mubr.msk.bf16.gmra.mrb[204].mxu0 %vm1429_vm1, %v10090_v20  ;;  %v10324_v51 = vsel %vm480_vm0, %v20053_v44, -inf }
0x2301   : > { %v20031_v38 = vpop.f32.mrb[212].mxu1 }
0x2302   : > { %v20033_v27 = vpop.f32.mrb[213].mxu1 }
0x2303   : > { %v20035_v41 = vpop.f32.mrb[214].mxu1 }
0x2304   : > { %v20037_v40 = vpop.f32.mrb[215].mxu1 }
0x2319   : > { %v14082_v49 = vpop.f32.mrb[216].mxu1 }
0x231a   : > { %v10734_v28 = vmul.f32 0.17677669, %v14082_v49  ;;  %v10701_v59 = vpop.f32.mrb[217].mxu1 }
0x231b   : > { %v14083_v58 = vpop.f32.mrb[218].mxu1  ;;  %v10732_v3 = vmul.f32 0.17677669, %v10701_v59 }
0x231c   : > { %v10704_v34 = vpop.f32.mrb[219].mxu1  ;;  %v10746_v54 = vsel %vm480_vm0, %v10734_v28, -inf  ;;  %v10735_v63 = vmul.f32 0.17677669, %v14083_v58 }
0x231d   : > { %v10733_v22 = vmul.f32 0.17677669, %v10704_v34  ;;  %10747 = vmax.xlane.f32.xlu0 %v10746_v54  ;;  %v10740_v2 = vsel %vm480_vm0, %v10732_v3, -inf }
0x231e   : > { %v10749_v36 = vsel %vm480_vm0, %v10735_v63, -inf }
0x231f   : > { %v10743_v6 = vsel %vm480_vm0, %v10733_v22, -inf }
0x2320   : > { %10744 = vmax.xlane.f32.xlu1 %v10743_v6 }
0x2321   : > { %10741 = vmax.xlane.f32.xlu0 %v10740_v2  ;;  %v14086_v39 = vpop.f32.mrb[220].mxu1 }
0x2322   : > { %v10717_v56 = vpop.f32.mrb[221].mxu1  ;;  %v10738_v5 = vmul.f32 0.17677669, %v14086_v39 }
0x2323   : > { %v14087_v23 = vpop.f32.mrb[222].mxu1  ;;  %v10736_v33 = vmul.f32 0.17677669, %v10717_v56 }
0x2324   : > { %v10720_v17 = vpop.f32.mrb[223].mxu1  ;;  %v10758_v48 = vsel %vm480_vm0, %v10738_v5, -inf  ;;  %v20055_v35 = vmul.f32 0.17677669, %v14087_v23 }
0x2325   : > { %10750 = vmax.xlane.f32.xlu0 %v10749_v36  ;;  %v10752_v25 = vsel %vm480_vm0, %v10736_v33, -inf  ;;  %v20061_v7 = vmul.f32 0.17677669, %v10720_v17 }
0x2326   : > { %v10761_v47 = vsel %vm480_vm0, %v20055_v35, -inf }
0x2327   : > { %v10755_v13 = vsel %vm480_vm0, %v20061_v7, -inf }
0x2329   : > { %10759 = vmax.xlane.f32.xlu0 %v10758_v48 }
0x232d   : > { %10753 = vmax.xlane.f32.xlu0 %v10752_v25 }
0x2331   : > { %11064 = vrot.lane.b32.xlu1 %v19522_v26, %s20992_s30 }
0x2335   : > { %11066 = vrot.lane.b32.xlu1 %v19530_v55, %s20992_s30 }
0x2339   : > { %11068 = vrot.lane.b32.xlu1 %v19538_v11, %s20992_s30 }
0x2343   : > { %11062 = vrot.lane.b32.xlu0 %v19514_v0, %s20992_s30 }
0x235d   : > { %10325 = vmax.xlane.f32.xlu1 %v10324_v51 }
0x2361   : > { %10762 = vmax.xlane.f32.xlu1 %v10761_v47 }
0x2362   : > { %10322 = vmax.xlane.f32.xlu0 %v10321_v4 }
0x2365   : > { %10756 = vmax.xlane.f32.xlu1 %v10755_v13 }
0x2366   : > { %10328 = vmax.xlane.f32.xlu0 %v10327_v45 }
0x236a   : > { %10331 = vmax.xlane.f32.xlu0 %v10330_v46 }
0x23aa   : > { %v10748_v62 = vpop.xlane.xlu0 %10747 }
0x23ab   : > { %v10766_v30 = vsub.f32 %v10734_v28, %v10748_v62 }
0x23ad   : > { %v10776_v1 = vmul.f32 1.442695, %v10766_v30  ;;  %v10745_v18 = vpop.xlane.xlu1 %10744 }
0x23ae   : > { %v10742_v61 = vpop.xlane.xlu0 %10741  ;;  %v10765_v20 = vsub.f32 %v10733_v22, %v10745_v18 }
0x23af   : > { %15346 = vpow2.f32 %v10776_v1  ;;  %v10764_v37 = vsub.f32 %v10732_v3, %v10742_v61 }
0x23b0   : > { %v10774_v60 = vmul.f32 1.442695, %v10765_v20 }
0x23b1   : > { %v10772_v21 = vmul.f32 1.442695, %v10764_v37  ;;  %v20107_v48 = vpop.permute.xlu1 %11064  ;;  %v20138_v37 = vmul.f32 0.17677669, %v20037_v40 }
0x23b2   : > { %v10751_v50 = vpop.xlane.xlu0 %10750 }
0x23b3   : > { %15348 = vpow2.f32 %v10772_v21  ;;  %v10767_v57 = vsub.f32 %v10735_v63, %v10751_v50  ;;  %v20143_v21 = vmul.f32 0.17677669, %v20035_v41 }
0x23b5   : > { %v10778_v42 = vmul.f32 1.442695, %v10767_v57  ;;  %v20111_v25 = vpop.permute.xlu1 %11066  ;;  %v10342_v40 = vsel %vm480_vm0, %v20143_v21, -inf }
0x23b6   : > { %v10760_v9 = vpop.xlane.xlu0 %10759 }
0x23b7   : > { %15350 = vpow2.f32 %v10778_v42  ;;  %v10770_v49 = vsub.f32 %v10738_v5, %v10760_v9 }
0x23b8   : > { %15352 = vpow2.f32 %v10774_v60 }
0x23b9   : > { %v20077_v59 = vpop.eup %15346  ;;  %v10784_v58 = vmul.f32 1.442695, %v10770_v49  ;;  %v20113_v51 = vpop.permute.xlu1 %11068 }
0x23ba   : > { %v10754_v28 = vpop.xlane.xlu0 %10753  ;;  %v10794_v34 = vsel %vm480_vm0, %v20077_v59, 0.0 }
0x23bb   : > { %15354 = vpow2.f32 %v10784_v58  ;;  %v10768_v3 = vsub.f32 %v10736_v33, %v10754_v28  ;;  %10795 = vadd.xlane.f32.xlu0 %v10794_v34 }
0x23bd   : > { %v20081_v54 = vpop.eup %15348  ;;  %v10780_v22 = vmul.f32 1.442695, %v10768_v3 }
0x23be   : > { %v20083_v6 = vpop.permute.xlu0 %11062  ;;  %v10788_v63 = vsel %vm480_vm0, %v20081_v54, 0.0 }
0x23bf   : > { %15356 = vpow2.f32 %v10780_v22  ;;  %10789 = vadd.xlane.f32.xlu0 %v10788_v63  ;;  %14528 = vmatprep.subr.msk.bf16.mxu1 %vm1429_vm1, %v20083_v6 }
0x23c1   : > { %v20089_v2 = vpop.eup %15350 }
0x23c2   : > { %v10797_v39 = vsel %vm480_vm0, %v20089_v2, 0.0  ;;  %v20093_v56 = vpop.eup %15352 }
0x23c3   : > { %10798 = vadd.xlane.f32.xlu1 %v10797_v39  ;;  %v10791_v17 = vsel %vm480_vm0, %v20093_v56, 0.0 }
0x23c5   : > { %v20095_v23 = vpop.eup %15354 }
0x23c6   : > { %v10806_v5 = vsel %vm480_vm0, %v20095_v23, 0.0 }
0x23c7   : > { %10807 = vadd.xlane.f32.xlu0 %v10806_v5  ;;  %10792 = vadd.xlane.f32.xlu1 %v10791_v17 }
0x23c9   : > { %v20101_v36 = vpop.eup %15356 }
0x23ca   : > { %v10800_v33 = vsel %vm480_vm0, %v20101_v36, 0.0 }
0x23cb   : > { %10801 = vadd.xlane.f32.xlu0 %v10800_v33 }
0x23d8   : > { %11056 = vrot.lane.b32.xlu1 %v19497_v10, %s20992_s30 }
0x23dc   : > { %11485 = vrot.lane.b32.xlu1 %v19514_v0, %s21044_s21 }
0x23ea   : > { %v20115_v47 = vpop.xlane.xlu1 %10325 }
0x23ee   : > { %v10763_v4 = vpop.xlane.xlu1 %10762 }
0x23ef   : > { %v10771_v13 = vsub.f32 %v20055_v35, %v10763_v4  ;;  %v20132_v35 = vmul.f32 0.17677669, %v20033_v27  ;;  %v10336_v27 = vsel %vm480_vm0, %v20138_v37, -inf  ;;  %v11092_v4 = vsel %vm1429_vm1, %v20113_v51, 0 }
0x23f1   : > { %v10786_v45 = vmul.f32 1.442695, %v10771_v13  ;;  %v10333_v20 = vsel %vm480_vm0, %v20132_v35, -inf }
0x23f2   : > { %v10757_v46 = vpop.xlane.xlu1 %10756 }
0x23f3   : > { %15358 = vpow2.f32 %v10786_v45  ;;  %v10769_v62 = vsub.f32 %v20061_v7, %v10757_v46  ;;  %v20135_v7 = vmul.f32 0.17677669, %v20031_v38  ;;  %v10323_v38 = vpop.xlane.xlu0 %10322 }
0x23f5   : > { %v10782_v30 = vmul.f32 1.442695, %v10769_v62 }
0x23f7   : > { %15360 = vpow2.f32 %v10782_v30  ;;  %v10329_v50 = vpop.xlane.xlu0 %10328 }
0x23fb   : > { %v10332_v57 = vpop.xlane.xlu0 %10331 }
0x23fc   : > { %v10348_v39 = vsub.f32 %v20071_v15, %v10332_v57 }
0x23fd   : > { %v20119_v1 = vpop.eup %15358 }
0x23fe   : > { %v10809_v0 = vsel %vm480_vm0, %v20119_v1, 0.0 }
0x23ff   : > { %10810 = vadd.xlane.f32.xlu0 %v10809_v0 }
0x2401   : > { %v20123_v18 = vpop.eup %15360 }
0x2402   : > { %v10803_v61 = vsel %vm480_vm0, %v20123_v18, 0.0 }
0x2403   : > { %10804 = vadd.xlane.f32.xlu1 %v10803_v61 }
0x2414   : > { %11487 = vrot.lane.b32.xlu1 %v19522_v26, %s21044_s21  ;;  %v10339_v26 = vsel %vm480_vm0, %v20135_v7, -inf }
0x2415   : > { %11054 = vrot.lane.b32.xlu0 %v19491_v14, %s20992_s30 }
0x2434   : > { %10334 = vmax.xlane.f32.xlu0 %v10333_v20 }
0x2438   : > { %10340 = vmax.xlane.f32.xlu0 %v10339_v26  ;;  %10337 = vmax.xlane.f32.xlu1 %v10336_v27 }
0x243c   : > { %10343 = vmax.xlane.f32.xlu0 %v10342_v40 }
0x2448   : > { %v10796_v41 = vpop.xlane.xlu0 %10795 }
0x2449   : > { %11060 = vrot.lane.b32.xlu1 %v19505_v29, %s20992_s30 }
0x244c   : > { %v10790_v42 = vpop.xlane.xlu0 %10789 }
0x244d   : > { %11489 = vrot.lane.b32.xlu1 %v19530_v55, %s21044_s21 }
0x2450   : > { %v10799_v60 = vpop.xlane.xlu1 %10798 }
0x2451   : > { %11491 = vrot.lane.b32.xlu1 %v19538_v11, %s21044_s21  ;;  %15362 = vrcp.f32 %v10799_v60 }
0x2452   : > { %11058 = vrot.lane.b32.xlu0 %v19501_v19, %s20992_s30  ;;  %15364 = vrcp.f32 %v10790_v42 }
0x2453   : > { %15366 = vrcp.f32 %v10796_v41 }
0x2454   : > { %v10793_v9 = vpop.xlane.xlu1 %10792  ;;  %v10808_v46 = vpop.xlane.xlu0 %10807 }
0x2455   : > { %11479 = vrot.lane.b32.xlu1 %v19497_v10, %s21044_s21  ;;  %15368 = vrcp.f32 %v10793_v9 }
0x2456   : > { %11477 = vrot.lane.b32.xlu0 %v19491_v14, %s21044_s21  ;;  %v10345_v14 = vsub.f32 %v20059_v52, %v10323_v38 }
0x2458   : > { %v11057_v33 = vpop.permute.xlu1 %11056  ;;  %v10802_v62 = vpop.xlane.xlu0 %10801 }
0x2459   : > { %11483 = vrot.lane.b32.xlu1 %v19505_v29, %s21044_s21  ;;  %v11083_v29 = vsel %vm1429_vm1, %v20083_v6, 0  ;;  %v11089_v6 = vsel %vm1429_vm1, %v20111_v25, 0 }
0x245a   : > { %11481 = vrot.lane.b32.xlu0 %v19501_v19, %s21044_s21  ;;  %v10346_v19 = vsub.f32 %v20053_v44, %v20115_v47  ;;  %v11086_v44 = vsel %vm1429_vm1, %v20107_v48, 0 }
0x245b   : > { %v15363_v55 = vpop.eup %15362 }
0x245c   : > { %v15365_v11 = vpop.eup %15364  ;;  %v10819_v28 = vmul.f32 %v15363_v55, %v20089_v2  ;;  %v10353_v2 = vmul.f32 1.442695, %v10345_v14  ;;  %v10355_v52 = vmul.f32 1.442695, %v10346_v19  ;;  %v11486_v13 = vpop.permute.xlu1 %11485 }
0x245d   : > { %v15367_v49 = vpop.eup %15366  ;;  %v10813_v34 = vmul.f32 %v15365_v11, %v20081_v54  ;;  %v10347_v54 = vsub.f32 %v20065_v8, %v10329_v50  ;;  %v11506_v42 = vsel %vm1429_vm1, %v11486_v13, 0 }
0x245e   : > { %v10817_v3 = vmul.f32 %v15367_v49, %v20077_v59  ;;  %15370 = vpow2.f32 %v10353_v2 }
0x245f   : > { %v15369_v58 = vpop.eup %15368  ;;  %v10357_v59 = vmul.f32 1.442695, %v10347_v54  ;;  %15372 = vpow2.f32 %v10355_v52 }
0x2460   : > { %v10815_v10 = vmul.f32 %v15369_v58, %v20093_v56  ;;  %v10829_v63 = vpack.c.bf16 %v10819_v28, %v10817_v3  ;;  %v10359_v56 = vmul.f32 1.442695, %v10348_v39 }
0x2461   : > { %15374 = vpow2.f32 %v10357_v59 }
0x2462   : > { %v10828_v22 = vpack.c.bf16 %v10815_v10, %v10813_v34  ;;  %15376 = vpow2.f32 %v10359_v56 }
0x2464   : > { %14096 = vmatprep.mubr.msk.bf16.mxu1 %vm480_vm0, %v10828_v22 }
0x2465   : > { %14097 = vmatmul.mubr.msk.bf16.vlgmr.msra.gmra.mrb[224].mxu1 %vm480_vm0, %v10829_v63 }
0x2466   : > { %14105 = vmatpush3.bf16.xpose.msra.mxu1 %v11083_v29 }
0x2467   : > { %14529 = vmatprep.subr.msk.bf16.mxu1 %vm1429_vm1, %v20107_v48 }
0x2468   : > { %v20186_v8 = vpop.eup %15370 }
0x2469   : > { %v20190_v5 = vpop.eup %15372  ;;  %v10369_v15 = vsel %vm480_vm0, %v20186_v8, 0.0 }
0x246a   : > { %v10372_v47 = vsel %vm480_vm0, %v20190_v5, 0.0 }
0x246b   : > { %v20196_v17 = vpop.eup %15374 }
0x246c   : > { %v10375_v48 = vsel %vm480_vm0, %v20196_v17, 0.0 }
0x246e   : > { %14107 = vmatpush3.bf16.xpose.msra.mxu1 %v11086_v44 }
0x246f   : > { %14530 = vmatprep.subr.msk.bf16.mxu1 %vm1429_vm1, %v20111_v25  ;;  %v20202_v25 = vpop.eup %15376 }
0x2470   : > { %v10378_v45 = vsel %vm480_vm0, %v20202_v25, 0.0 }
0x2476   : > { %14109 = vmatpush3.bf16.xpose.msra.mxu1 %v11089_v6 }
0x2477   : > { %14531 = vmatprep.subr.msk.bf16.mxu1 %vm1429_vm1, %v20113_v51 }
0x2479   : > { %10370 = vadd.xlane.f32.xlu0 %v10369_v15 }
0x247d   : > { %10376 = vadd.xlane.f32.xlu0 %v10375_v48  ;;  %10373 = vadd.xlane.f32.xlu1 %v10372_v47 }
0x247e   : > { %14111 = vmatpush3.bf16.xpose.msra.mxu1 %v11092_v4 }
0x247f   : > { %14532 = vmatprep.subr.msk.bf16.mxu1 %vm1429_vm1, %v11486_v13 }
0x2481   : > { %10379 = vadd.xlane.f32.xlu0 %v10378_v45 }
0x248c   : > { %v10811_v30 = vpop.xlane.xlu0 %10810 }
0x248d   : > { %15378 = vrcp.f32 %v10811_v30 }
0x248e   : > { %15380 = vrcp.f32 %v10802_v62 }
0x248f   : > { %15382 = vrcp.f32 %v10808_v46 }
0x2490   : > { %v10805_v0 = vpop.xlane.xlu1 %10804  ;;  %v11055_v60 = vpop.permute.xlu0 %11054 }
0x2491   : > { %15384 = vrcp.f32 %v10805_v0 }
0x2497   : > { %v15379_v61 = vpop.eup %15378 }
0x2498   : > { %v15381_v20 = vpop.eup %15380  ;;  %v10827_v27 = vmul.f32 %v15379_v61, %v20119_v1  ;;  %v11488_v1 = vpop.permute.xlu1 %11487 }
0x2499   : > { %v15383_v26 = vpop.eup %15382  ;;  %v10821_v38 = vmul.f32 %v15381_v20, %v20101_v36  ;;  %v11509_v36 = vsel %vm1429_vm1, %v11488_v1, 0 }
0x249a   : > { %v10825_v50 = vmul.f32 %v15383_v26, %v20095_v23 }
0x249b   : > { %v15385_v51 = vpop.eup %15384 }
0x249c   : > { %v10823_v40 = vmul.f32 %v15385_v51, %v20123_v18  ;;  %v10831_v41 = vpack.c.bf16 %v10827_v27, %v10825_v50 }
0x249e   : > { %v10830_v57 = vpack.c.bf16 %v10823_v40, %v10821_v38 }
0x24a0   : > { %14100 = vmatprep.mubr.msk.bf16.mxu1 %vm480_vm0, %v10830_v57  ;;  %v10491_v57 = vld [vmem:[%s20950_s6 + $0x238] sm:$0xff] }
0x24a1   : > { %14101 = vmatmul.mubr.msk.bf16.gmra.mrb[228].mxu1 %vm480_vm0, %v10831_v41 }
0x24a2   : > { %14112 = vmatprep.mubr.msk.bf16.mxu1 %vm1429_vm1, %v11055_v60 }
0x24a9   : > { %14113 = vmatmul.mubr.msk.bf16.vlgmr.msra.gmra.mrb[232].mxu1 %vm1429_vm1, %v11057_v33 }
0x24aa   : > { %14137 = vmatpush3.bf16.xpose.msra.mxu1 %v11506_v42 }
0x24ab   : > { %14533 = vmatprep.subr.msk.bf16.mxu1 %vm1429_vm1, %v11488_v1 }
0x24b2   : > { %14139 = vmatpush3.bf16.xpose.msra.mxu1 %v11509_v36 }
0x24c1   : > { %v10335_v23 = vpop.xlane.xlu0 %10334 }
0x24c2   : > { %v10349_v18 = vsub.f32 %v20132_v35, %v10335_v23 }
0x24c4   : > { %v10361_v9 = vmul.f32 1.442695, %v10349_v18 }
0x24c5   : > { %v10341_v55 = vpop.xlane.xlu0 %10340  ;;  %v10338_v11 = vpop.xlane.xlu1 %10337 }
0x24c6   : > { %15386 = vpow2.f32 %v10361_v9  ;;  %v10351_v49 = vsub.f32 %v20135_v7, %v10341_v55  ;;  %v10350_v58 = vsub.f32 %v20138_v37, %v10338_v11 }
0x24c8   : > { %v10365_v28 = vmul.f32 1.442695, %v10351_v49  ;;  %v10363_v34 = vmul.f32 1.442695, %v10350_v58 }
0x24c9   : > { %v10344_v10 = vpop.xlane.xlu0 %10343  ;;  %v11061_v3 = vpop.permute.xlu1 %11060 }
0x24ca   : > { %15388 = vpow2.f32 %v10365_v28  ;;  %v10352_v14 = vsub.f32 %v20143_v21, %v10344_v10  ;;  %v10492_v28 = vld [vmem:[%s20950_s6 + $0x258] sm:$0xff] }
0x24cb   : > { %15390 = vpow2.f32 %v10363_v34  ;;  %v10493_v34 = vld [vmem:[%s20950_s6 + $0x278] sm:$0xff] }
0x24cc   : > { %v10367_v22 = vmul.f32 1.442695, %v10352_v14  ;;  %v13278_v14 = vcombine.high %v10492_v28, %v10493_v34 }
0x24cd   : > { %v11059_v63 = vpop.permute.xlu0 %11058  ;;  %v11490_v19 = vpop.permute.xlu1 %11489 }
0x24ce   : > { %15392 = vpow2.f32 %v10367_v22  ;;  %v11512_v35 = vsel %vm1429_vm1, %v11490_v19, 0  ;;  %14116 = vmatprep.mubr.msk.bf16.mxu1 %vm1429_vm1, %v11059_v63  ;;  %14534 = vmatprep.subr.msk.bf16.mxu1 %vm1429_vm1, %v11490_v19 }
0x24cf   : > { %14117 = vmatmul.mubr.msk.bf16.gmra.mrb[236].mxu1 %vm1429_vm1, %v11061_v3  ;;  %v13277_v3 = vcombine.low %v10492_v28, %v10493_v34 }
0x24d0   : > { %v20228_v7 = vpop.eup %15386  ;;  %14141 = vmatpush3.bf16.xpose.msra.mxu1 %v11512_v35 }
0x24d1   : > { %v11478_v37 = vpop.permute.xlu0 %11477  ;;  %v11492_v29 = vpop.permute.xlu1 %11491  ;;  %v10381_v21 = vsel %vm480_vm0, %v20228_v7, 0.0 }
0x24d2   : > { %10382 = vadd.xlane.f32.xlu0 %v10381_v21  ;;  %14535 = vmatprep.subr.msk.bf16.mxu1 %vm1429_vm1, %v11492_v29  ;;  %v11515_v39 = vsel %vm1429_vm1, %v11492_v29, 0 }
0x24d3   : > { %14144 = vmatprep.mubr.msk.bf16.mxu1 %vm1429_vm1, %v11478_v37  ;;  %v20295_v37 = vld [vmem:[%s20950_s6 + $0x2b8] sm:$0xff] }
0x24d4   : > { %v20234_v2 = vpop.eup %15388 }
0x24d5   : > { %v15391_v54 = vpop.eup %15390  ;;  %v10387_v52 = vsel %vm480_vm0, %v20234_v2, 0.0  ;;  %v11480_v6 = vpop.permute.xlu1 %11479 }
0x24d6   : > { %10388 = vadd.xlane.f32.xlu0 %v10387_v52  ;;  %v10384_v59 = vsel %vm480_vm0, %v15391_v54, 0.0  ;;  %v11482_v15 = vpop.permute.xlu0 %11481 }
0x24d7   : > { %10385 = vadd.xlane.f32.xlu1 %v10384_v59 }
0x24d8   : > { %v20240_v44 = vpop.eup %15392  ;;  %14143 = vmatpush3.bf16.xpose.msra.mxu1 %v11515_v39 }
0x24d9   : > { %v10390_v56 = vsel %vm480_vm0, %v20240_v44, 0.0  ;;  %v11484_v33 = vpop.permute.xlu1 %11483 }
0x24db   : > { %10391 = vadd.xlane.f32.xlu1 %v10390_v56 }
0x24df   : > { %14145 = vmatmul.mubr.msk.bf16.vlgmr.msra.gmra.mrb[240].mxu1 %vm1429_vm1, %v11480_v6 }
0x24e0   : > { %14148 = vmatprep.mubr.msk.bf16.mxu1 %vm1429_vm1, %v11482_v15 }
0x24e7   : > { %14149 = vmatmul.mubr.msk.bf16.gmra.mrb[244].mxu1 %vm1429_vm1, %v11484_v33 }
0x24ec   : > { %11259 = vrot.lane.b32.xlu0 %v19557_v24, %s20992_s30 }
0x2506   : > { %v10371_v48 = vpop.xlane.xlu0 %10370 }
0x2507   : > { %15394 = vrcp.f32 %v10371_v48 }
0x250a   : > { %v10377_v47 = vpop.xlane.xlu0 %10376  ;;  %v10374_v4 = vpop.xlane.xlu1 %10373 }
0x250b   : > { %15396 = vrcp.f32 %v10374_v4 }
0x250c   : > { %15398 = vrcp.f32 %v10377_v47 }
0x250e   : > { %v10380_v13 = vpop.xlane.xlu0 %10379 }
0x250f   : > { %15400 = vrcp.f32 %v10380_v13 }
0x2511   : > { %v15395_v45 = vpop.eup %15394 }
0x2512   : > { %v10394_v30 = vmul.f32 %v15395_v45, %v20186_v8 }
0x2515   : > { %v15397_v46 = vpop.eup %15396 }
0x2516   : > { %v15399_v62 = vpop.eup %15398  ;;  %v10396_v0 = vmul.f32 %v15397_v46, %v20190_v5 }
0x2517   : > { %v10398_v26 = vmul.f32 %v15399_v62, %v20196_v17 }
0x2518   : > { %v10409_v20 = vpack.c.bf16 %v10396_v0, %v10394_v30 }
0x2519   : > { %v15401_v61 = vpop.eup %15400 }
0x251a   : > { %v10400_v51 = vmul.f32 %v15401_v61, %v20202_v25  ;;  %14064 = vmatprep.mubr.msk.bf16.mxu0 %vm480_vm0, %v10409_v20  ;;  %v10490_v25 = vld [vmem:[%s20950_s6 + $0x218] sm:$0xff] }
0x251b   : > { %v13275_v41 = vcombine.low %v10490_v25, %v10491_v57  ;;  %v13276_v60 = vcombine.high %v10490_v25, %v10491_v57 }
0x251c   : > { %v10410_v27 = vpack.c.bf16 %v10400_v51, %v10398_v26 }
0x251d   : > { %10530 = vmatprep.subr.bf16.mxu0 %v13276_v60 }
0x251e   : > { %14065 = vmatmul.mubr.msk.bf16.vlgmr.msra.gmra.mrb[208].mxu0 %vm480_vm0, %v10410_v27 }
0x251f   : > { %10531 = vmatpush1.bf16.msra.mxu0 %v13275_v41 }
0x2520   : > { %10532 = vmatprep.subr.bf16.mxu0 %v13278_v14 }
0x2523   : > { %10533 = vmatpush1.bf16.msra.mxu0 %v13277_v3 }
0x2538   : > { %v20255_v38 = vpop.f32.mrb[224].mxu1 }
0x2539   : > { %v20257_v40 = vpop.f32.mrb[225].mxu1 }
0x253a   : > { %v20259_v50 = vpop.f32.mrb[226].mxu1 }
0x253b   : > { %v10930_v8 = vpack.c.bf16 %v20259_v50, %v20255_v38  ;;  %v20263_v5 = vpop.f32.mrb[227].mxu1  ;;  %v11348_v38 = vld [vmem:[%s20950_s6 + $0x318] sm:$0xff] }
0x253c   : > { %v10929_v17 = vpack.c.bf16 %v20263_v5, %v20257_v40  ;;  %v11349_v50 = vld [vmem:[%s20950_s6 + $0x338] sm:$0xff] }
0x255f   : > { %v10383_v42 = vpop.xlane.xlu0 %10382 }
0x2560   : > { %15402 = vrcp.f32 %v10383_v42 }
0x2563   : > { %v10389_v1 = vpop.xlane.xlu0 %10388 }
0x2564   : > { %v10386_v36 = vpop.xlane.xlu1 %10385 }
0x2565   : > { %15404 = vrcp.f32 %v10386_v36 }
0x2566   : > { %15406 = vrcp.f32 %v10389_v1 }
0x2568   : > { %v10392_v23 = vpop.xlane.xlu1 %10391 }
0x2569   : > { %15408 = vrcp.f32 %v10392_v23 }
0x256a   : > { %v15403_v18 = vpop.eup %15402 }
0x256b   : > { %v10402_v55 = vmul.f32 %v15403_v18, %v20228_v7  ;;  %v20290_v7 = vld [vmem:[%s20950_s6 + $0x298] sm:$0xff] }
0x256f   : > { %v15405_v9 = vpop.eup %15404 }
0x2570   : > { %v10404_v11 = vmul.f32 %v15405_v9, %v15391_v54  ;;  %v15407_v49 = vpop.eup %15406  ;;  %v13292_v54 = vcombine.high %v20290_v7, %v20295_v37 }
0x2571   : > { %v10406_v63 = vmul.f32 %v15407_v49, %v20234_v2  ;;  %v13291_v2 = vcombine.low %v20290_v7, %v20295_v37 }
0x2572   : > { %v10411_v58 = vpack.c.bf16 %v10404_v11, %v10402_v55  ;;  %10965 = vmatprep.subr.bf16.mxu0 %v13292_v54 }
0x2573   : > { %v15409_v10 = vpop.eup %15408 }
0x2574   : > { %14068 = vmatprep.mubr.msk.bf16.mxu0 %vm480_vm0, %v10411_v58  ;;  %v20281_v22 = vpop.f32.mrb[228].mxu1  ;;  %v10408_v19 = vmul.f32 %v15409_v10, %v20240_v44 }
0x2575   : > { %v20285_v35 = vpop.f32.mrb[229].mxu1 }
0x2576   : > { %v20297_v29 = vpop.f32.mrb[230].mxu1  ;;  %v10412_v21 = vpack.c.bf16 %v10408_v19, %v10406_v63 }
0x2577   : > { %v10932_v52 = vpack.c.bf16 %v20297_v29, %v20281_v22  ;;  %v20305_v59 = vpop.f32.mrb[231].mxu1 }
0x2578   : > { %14069 = vmatmul.mubr.msk.bf16.gmra.mrb[212].mxu0 %vm480_vm0, %v10412_v21  ;;  %v10931_v39 = vpack.c.bf16 %v20305_v59, %v20285_v35 }
0x2579   : > { %10562 = vmatprep.mubr.bf16.mxu0 %v21043_v32 }
0x257c   : > { %v14114_v44 = vpop.f32.mrb[232].mxu1 }
0x257d   : > { %v20311_v56 = vmul.f32 0.17677669, %v14114_v44  ;;  %v11128_v6 = vpop.f32.mrb[233].mxu1 }
0x257e   : > { %v14115_v15 = vpop.f32.mrb[234].mxu1  ;;  %v20313_v33 = vmul.f32 0.17677669, %v11128_v6 }
0x257f   : > { %v20315_v48 = vmul.f32 0.17677669, %v14115_v15  ;;  %v11131_v47 = vpop.f32.mrb[235].mxu1  ;;  %v11173_v4 = vsel %vm480_vm0, %v20311_v56, -inf }
0x2580   : > { %11174 = vmax.xlane.f32.xlu0 %v11173_v4  ;;  %v20319_v13 = vmul.f32 0.17677669, %v11131_v47  ;;  %v11167_v46 = vsel %vm480_vm0, %v20313_v33, -inf }
0x2581   : > { %v11176_v45 = vsel %vm480_vm0, %v20315_v48, -inf }
0x2582   : > { %11177 = vmax.xlane.f32.xlu1 %v11176_v45  ;;  %v11170_v62 = vsel %vm480_vm0, %v20319_v13, -inf }
0x2584   : > { %11168 = vmax.xlane.f32.xlu0 %v11167_v46 }
0x2586   : > { %11171 = vmax.xlane.f32.xlu1 %v11170_v62 }
0x25a2   : > { %v14118_v30 = vpop.f32.mrb[236].mxu1 }
0x25a3   : > { %v20327_v0 = vmul.f32 0.17677669, %v14118_v30  ;;  %v11144_v61 = vpop.f32.mrb[237].mxu1  ;;  %v10927_v30 = vld [vmem:[%s20950_s6 + $0x2d8] sm:$0xff] }
0x25a4   : > { %v14119_v20 = vpop.f32.mrb[238].mxu1  ;;  %v20329_v26 = vmul.f32 0.17677669, %v11144_v61  ;;  %v10928_v61 = vld [vmem:[%s20950_s6 + $0x2f8] sm:$0xff] }
0x25a5   : > { %v20331_v51 = vmul.f32 0.17677669, %v14119_v20  ;;  %v11147_v27 = vpop.f32.mrb[239].mxu1  ;;  %v11185_v25 = vsel %vm480_vm0, %v20327_v0, -inf }
0x25a6   : > { %11186 = vmax.xlane.f32.xlu0 %v11185_v25  ;;  %v20335_v57 = vmul.f32 0.17677669, %v11147_v27  ;;  %v11179_v60 = vsel %vm480_vm0, %v20329_v26, -inf }
0x25a7   : > { %v11188_v41 = vsel %vm480_vm0, %v20331_v51, -inf }
0x25a8   : > { %11189 = vmax.xlane.f32.xlu1 %v11188_v41  ;;  %v11182_v42 = vsel %vm480_vm0, %v20335_v57, -inf }
0x25aa   : > { %11180 = vmax.xlane.f32.xlu0 %v11179_v60  ;;  %v13294_v60 = vcombine.high %v10927_v30, %v10928_v61 }
0x25ac   : > { %11183 = vmax.xlane.f32.xlu1 %v11182_v42  ;;  %v13293_v42 = vcombine.low %v10927_v30, %v10928_v61 }
0x25b2   : > { %v14146_v1 = vpop.f32.mrb[240].mxu1 }
0x25b3   : > { %v20343_v36 = vmul.f32 0.17677669, %v14146_v1  ;;  %v11551_v23 = vpop.f32.mrb[241].mxu1  ;;  %v20392_v1 = vpop.permute.xlu0 %11259 }
0x25b4   : > { %v14147_v18 = vpop.f32.mrb[242].mxu1  ;;  %v20345_v9 = vmul.f32 0.17677669, %v11551_v23 }
0x25b5   : > { %v20347_v55 = vmul.f32 0.17677669, %v14147_v18  ;;  %v11554_v11 = vpop.f32.mrb[243].mxu1  ;;  %v11596_v49 = vsel %vm480_vm0, %v20343_v36, -inf }
0x25b6   : > { %11597 = vmax.xlane.f32.xlu0 %v11596_v49  ;;  %v20351_v58 = vmul.f32 0.17677669, %v11554_v11  ;;  %v11590_v34 = vsel %vm480_vm0, %v20345_v9, -inf }
0x25b7   : > { %v11599_v28 = vsel %vm480_vm0, %v20347_v55, -inf }
0x25b8   : > { %11600 = vmax.xlane.f32.xlu1 %v11599_v28  ;;  %v11593_v63 = vsel %vm480_vm0, %v20351_v58, -inf }
0x25ba   : > { %11591 = vmax.xlane.f32.xlu0 %v11590_v34  ;;  %v14150_v10 = vpop.f32.mrb[244].mxu1 }
0x25bb   : > { %v20357_v3 = vmul.f32 0.17677669, %v14150_v10  ;;  %v11567_v14 = vpop.f32.mrb[245].mxu1 }
0x25bc   : > { %11594 = vmax.xlane.f32.xlu1 %v11593_v63  ;;  %v14151_v19 = vpop.f32.mrb[246].mxu1  ;;  %v20361_v21 = vmul.f32 0.17677669, %v11567_v14 }
0x25bd   : > { %v20363_v54 = vmul.f32 0.17677669, %v14151_v19  ;;  %v11570_v44 = vpop.f32.mrb[247].mxu1  ;;  %v11608_v6 = vsel %vm480_vm0, %v20357_v3, -inf }
0x25be   : > { %11609 = vmax.xlane.f32.xlu0 %v11608_v6  ;;  %v20367_v15 = vmul.f32 0.17677669, %v11570_v44  ;;  %v11602_v4 = vsel %vm480_vm0, %v20361_v21, -inf }
0x25bf   : > { %v11611_v47 = vsel %vm480_vm0, %v20363_v54, -inf }
0x25c0   : > { %11612 = vmax.xlane.f32.xlu1 %v11611_v47  ;;  %v11605_v45 = vsel %vm480_vm0, %v20367_v15, -inf }
0x25c2   : > { %11603 = vmax.xlane.f32.xlu0 %v11602_v4 }
0x25c4   : > { %11606 = vmax.xlane.f32.xlu1 %v11605_v45 }
0x25d5   : > { %11261 = vrot.lane.b32.xlu1 %v19563_v53, %s20992_s30 }
0x25d8   : > { %11263 = vrot.lane.b32.xlu0 %v19569_v16, %s20992_s30 }
0x25dc   : > { %11265 = vrot.lane.b32.xlu0 %v19575_v43, %s20992_s30  ;;  %s12505_s30 = sshll.u32 %s20753_s28, 4  ;;  %s20870_s30 = int_to_ptr.vmem [resolvable:$true] %s12505_s30 }
0x25dd   : > { %s15538_s26 = scalar_lea.vmem %s20870_s30, 2048  ;;  %p15545_p0 = scmp.lt.s32.totalorder %s20870_s30, %s15543_s12 }
0x25de   : > { %p15539_p11 = scmp.ne.s32.totalorder %s20870_s30, %s15538_s26 }
0x25e0   : > { %p15540_p12 = pnand %p15539_p11, %p15703_p5 }
0x25e2   : > { %p15541_p13 = pneg %p15540_p12 }
0x25f1   : > { %v14066_v46 = vpop.f32.mrb[208].mxu0 }
0x25f2   : > { %v10459_v62 = vpop.f32.mrb[209].mxu0 }
0x25f3   : > { %v14067_v20 = vpop.f32.mrb[210].mxu0 }
0x25f4   : > { %v10495_v27 = vpack.c.bf16 %v14067_v20, %v14066_v46  ;;  %v10462_v25 = vpop.f32.mrb[211].mxu0 }
0x25f5   : > { %v10494_v41 = vpack.c.bf16 %v10462_v25, %v10459_v62 }
0x25f7   : > { %13279 = vmatmul.mubr.msk.bf16.vlgmr.msra.gmra.mrb[192].mxu0 %vm1429_vm1, %v10494_v41 }
0x25f8   : > { %10966 = vmatpush1.bf16.msra.mxu0 %v13291_v2  ;;  %10572 = vmatprep.mubr.bf16.mxu0 %v21043_v32 }
0x25f9   : > { %10967 = vmatprep.subr.bf16.mxu0 %v13294_v60 }
0x25fc   : > { %10968 = vmatpush1.bf16.msra.mxu0 %v13293_v42 }
0x25fd   : > { %14120 = vmatprep.subr.bf16.mxu0 %v20392_v1 }
0x25ff   : > { %13280 = vmatmul.mubr.msk.bf16.gmra.mrb[196].mxu0 %vm1429_vm1, %v10495_v27 }
0x2600   : > { %10582 = vmatprep.mubr.bf16.mxu0 %v21043_v32 }
0x260d   : > { %v11175_v23 = vpop.xlane.xlu0 %11174 }
0x260e   : > { %v11193_v18 = vsub.f32 %v20311_v56, %v11175_v23 }
0x260f   : > { %v11178_v11 = vpop.xlane.xlu1 %11177 }
0x2610   : > { %v11203_v49 = vmul.f32 1.442695, %v11193_v18  ;;  %v11194_v7 = vsub.f32 %v20315_v48, %v11178_v11 }
0x2611   : > { %v11169_v37 = vpop.xlane.xlu0 %11168 }
0x2612   : > { %15410 = vpow2.f32 %v11203_v49  ;;  %v11205_v2 = vmul.f32 1.442695, %v11194_v7  ;;  %v11191_v28 = vsub.f32 %v20313_v33, %v11169_v37 }
0x2613   : > { %v11172_v34 = vpop.xlane.xlu1 %11171 }
0x2614   : > { %15412 = vpow2.f32 %v11205_v2  ;;  %v11199_v10 = vmul.f32 1.442695, %v11191_v28  ;;  %v11192_v14 = vsub.f32 %v20319_v13, %v11172_v34 }
0x2616   : > { %15414 = vpow2.f32 %v11199_v10  ;;  %v11201_v63 = vmul.f32 1.442695, %v11192_v14 }
0x2618   : > { %15416 = vpow2.f32 %v11201_v63 }
0x261c   : > { %v20401_v19 = vpop.eup %15410 }
0x261d   : > { %v11221_v56 = vsel %vm480_vm0, %v20401_v19, 0.0 }
0x261e   : > { %v20405_v44 = vpop.eup %15412  ;;  %11222 = vadd.xlane.f32.xlu0 %v11221_v56 }
0x261f   : > { %v11224_v48 = vsel %vm480_vm0, %v20405_v44, 0.0 }
0x2620   : > { %v20409_v33 = vpop.eup %15414  ;;  %11225 = vadd.xlane.f32.xlu1 %v11224_v48 }
0x2621   : > { %v11215_v13 = vsel %vm480_vm0, %v20409_v33, 0.0 }
0x2622   : > { %v20413_v6 = vpop.eup %15416  ;;  %11216 = vadd.xlane.f32.xlu0 %v11215_v13 }
0x2623   : > { %v11218_v47 = vsel %vm480_vm0, %v20413_v6, 0.0 }
0x2624   : > { %11219 = vadd.xlane.f32.xlu1 %v11218_v47 }
0x2633   : > { %v11187_v4 = vpop.xlane.xlu0 %11186 }
0x2634   : > { %v11197_v45 = vsub.f32 %v20327_v0, %v11187_v4 }
0x2635   : > { %v11190_v46 = vpop.xlane.xlu1 %11189 }
0x2636   : > { %v11211_v62 = vmul.f32 1.442695, %v11197_v45  ;;  %v11198_v30 = vsub.f32 %v20331_v51, %v11190_v46 }
0x2637   : > { %v11181_v61 = vpop.xlane.xlu0 %11180 }
0x2638   : > { %15418 = vpow2.f32 %v11211_v62  ;;  %v11195_v20 = vsub.f32 %v20329_v26, %v11181_v61  ;;  %11682 = vrot.lane.b32.xlu0 %v19557_v24, %s21044_s21  ;;  %v11213_v25 = vmul.f32 1.442695, %v11198_v30 }
0x2639   : > { %v11184_v27 = vpop.xlane.xlu1 %11183 }
0x263a   : > { %v11207_v41 = vmul.f32 1.442695, %v11195_v20  ;;  %v11196_v60 = vsub.f32 %v20335_v57, %v11184_v27 }
0x263c   : > { %15420 = vpow2.f32 %v11207_v41  ;;  %v11209_v42 = vmul.f32 1.442695, %v11196_v60 }
0x263d   : > { %15422 = vpow2.f32 %v11213_v25 }
0x263e   : > { %15424 = vpow2.f32 %v11209_v42 }
0x2642   : > { %v20423_v0 = vpop.eup %15418 }
0x2643   : > { %v11598_v23 = vpop.xlane.xlu0 %11597  ;;  %v11233_v51 = vsel %vm480_vm0, %v20423_v0, 0.0 }
0x2644   : > { %v11616_v26 = vsub.f32 %v20343_v36, %v11598_v23  ;;  %11234 = vadd.xlane.f32.xlu1 %v11233_v51 }
0x2645   : > { %v11601_v18 = vpop.xlane.xlu1 %11600 }
0x2646   : > { %v20428_v24 = vpop.eup %15420  ;;  %v11626_v11 = vmul.f32 1.442695, %v11616_v26  ;;  %v11617_v2 = vsub.f32 %v20347_v55, %v11601_v18 }
0x2647   : > { %v11592_v49 = vpop.xlane.xlu0 %11591  ;;  %v11227_v57 = vsel %vm480_vm0, %v20428_v24, 0.0  ;;  %v20432_v7 = vpop.eup %15422 }
0x2648   : > { %v11614_v37 = vsub.f32 %v20345_v9, %v11592_v49  ;;  %11228 = vadd.xlane.f32.xlu1 %v11227_v57  ;;  %15426 = vpow2.f32 %v11626_v11  ;;  %v11236_v63 = vsel %vm480_vm0, %v20432_v7, 0.0  ;;  %v20439_v56 = vpop.eup %15424  ;;  %v11628_v9 = vmul.f32 1.442695, %v11617_v2 }
0x2649   : > { %v11595_v28 = vpop.xlane.xlu1 %11594  ;;  %v11230_v61 = vsel %vm480_vm0, %v20439_v56, 0.0 }
0x264a   : > { %v11622_v34 = vmul.f32 1.442695, %v11614_v37  ;;  %v11615_v36 = vsub.f32 %v20351_v58, %v11595_v28 }
0x264b   : > { %v11610_v10 = vpop.xlane.xlu0 %11609  ;;  %v14070_v14 = vpop.f32.mrb[212].mxu0 }
0x264c   : > { %v11624_v48 = vmul.f32 1.442695, %v11615_v36  ;;  %v11620_v13 = vsub.f32 %v20357_v3, %v11610_v10  ;;  %v10475_v47 = vpop.f32.mrb[213].mxu0  ;;  %11237 = vadd.xlane.f32.xlu1 %v11236_v63  ;;  %15428 = vpow2.f32 %v11622_v34 }
0x264d   : > { %v14071_v4 = vpop.f32.mrb[214].mxu0  ;;  %v11613_v55 = vpop.xlane.xlu1 %11612 }
0x264e   : > { %15430 = vpow2.f32 %v11624_v48  ;;  %v11634_v45 = vmul.f32 1.442695, %v11620_v13  ;;  %v10497_v46 = vpack.c.bf16 %v14071_v4, %v14070_v14  ;;  %v10478_v58 = vpop.f32.mrb[215].mxu0  ;;  %v11621_v20 = vsub.f32 %v20363_v54, %v11613_v55 }
0x264f   : > { %v10496_v62 = vpack.c.bf16 %v10478_v58, %v10475_v47  ;;  %v11604_v30 = vpop.xlane.xlu0 %11603  ;;  %v13307_v47 = vcombine.low %v11348_v38, %v11349_v50 }
0x2650   : > { %15432 = vpow2.f32 %v11634_v45  ;;  %v11618_v3 = vsub.f32 %v20361_v21, %v11604_v30  ;;  %11231 = vadd.xlane.f32.xlu1 %v11230_v61  ;;  %v11636_v60 = vmul.f32 1.442695, %v11621_v20 }
0x2651   : > { %15434 = vpow2.f32 %v11628_v9  ;;  %13281 = vmatmul.mubr.msk.bf16.gmra.mrb[200].mxu0 %vm1429_vm1, %v10496_v62  ;;  %v11607_v27 = vpop.xlane.xlu1 %11606 }
0x2652   : > { %v11630_v25 = vmul.f32 1.442695, %v11618_v3  ;;  %10592 = vmatprep.mubr.bf16.mxu0 %v21043_v32  ;;  %v20448_v41 = vpop.eup %15426  ;;  %v11619_v42 = vsub.f32 %v20367_v15, %v11607_v27 }
0x2653   : > { %v11644_v23 = vsel %vm480_vm0, %v20448_v41, 0.0  ;;  %v11264_v36 = vpop.permute.xlu0 %11263 }
0x2654   : > { %15436 = vpow2.f32 %v11630_v25  ;;  %v11632_v51 = vmul.f32 1.442695, %v11619_v42 }
0x2655   : > { %15438 = vpow2.f32 %v11636_v60  ;;  %v11262_v34 = vpop.permute.xlu1 %11261 }
0x2656   : > { %v20453_v54 = vpop.eup %15428  ;;  %15440 = vpow2.f32 %v11632_v51 }
0x2657   : > { %11645 = vadd.xlane.f32.xlu0 %v11644_v23  ;;  %v11638_v15 = vsel %vm480_vm0, %v20453_v54, 0.0  ;;  %v11266_v5 = vpop.permute.xlu0 %11265 }
0x2658   : > { %v20455_v21 = vpop.eup %15430 }
0x2659   : > { %13282 = vmatmul.mubr.msk.bf16.gmra.mrb[204].mxu0 %vm1429_vm1, %v10497_v46  ;;  %v11641_v26 = vsel %vm480_vm0, %v20455_v21, 0.0 }
0x265a   : > { %v20460_v18 = vpop.eup %15432  ;;  %11642 = vadd.xlane.f32.xlu1 %v11641_v26  ;;  %10997 = vmatprep.mubr.bf16.mxu0 %v21043_v32 }
0x265b   : > { %v20465_v11 = vpop.eup %15434  ;;  %11639 = vadd.xlane.f32.xlu0 %v11638_v15  ;;  %v11656_v49 = vsel %vm480_vm0, %v20460_v18, 0.0 }
0x265c   : > { %v11647_v37 = vsel %vm480_vm0, %v20465_v11, 0.0 }
0x265e   : > { %v20469_v57 = vpop.eup %15436  ;;  %11657 = vadd.xlane.f32.xlu1 %v11656_v49 }
0x265f   : > { %11648 = vadd.xlane.f32.xlu0 %v11647_v37  ;;  %v11650_v2 = vsel %vm480_vm0, %v20469_v57, 0.0  ;;  %v20479_v28 = vpop.eup %15438 }
0x2660   : > { %v11659_v10 = vsel %vm480_vm0, %v20479_v28, 0.0  ;;  %v20485_v14 = vpop.eup %15440 }
0x2661   : > { %13295 = vmatmul.mubr.msk.bf16.vlgmr.msra.gmra.mrb[192].mxu0 %vm1429_vm1, %v10929_v17  ;;  %v11653_v40 = vsel %vm480_vm0, %v20485_v14, 0.0 }
0x2662   : > { %14121 = vmatpush3.bf16.msra.mxu0 %v20392_v1  ;;  %11651 = vadd.xlane.f32.xlu1 %v11650_v2 }
0x2663   : > { %14122 = vmatprep.subr.bf16.mxu0 %v11262_v34  ;;  %11007 = vmatprep.mubr.bf16.mxu0 %v21043_v32 }
0x2666   : > { %14123 = vmatpush3.bf16.msra.mxu0 %v11262_v34  ;;  %11660 = vadd.xlane.f32.xlu1 %v11659_v10 }
0x2667   : > { %14124 = vmatprep.subr.bf16.mxu0 %v11264_v36 }
0x2669   : > { %13296 = vmatmul.mubr.msk.bf16.gmra.mrb[196].mxu0 %vm1429_vm1, %v10930_v8 }
0x266a   : > { %14125 = vmatpush3.bf16.msra.mxu0 %v11264_v36  ;;  %11654 = vadd.xlane.f32.xlu1 %v11653_v40 }
0x266b   : > { %14126 = vmatprep.subr.bf16.mxu0 %v11266_v5  ;;  %11017 = vmatprep.mubr.bf16.mxu0 %v21043_v32 }
0x266e   : > { %14127 = vmatpush3.bf16.msra.mxu0 %v11266_v5 }
0x2671   : > { %13297 = vmatmul.mubr.msk.bf16.gmra.mrb[200].mxu0 %vm1429_vm1, %v10931_v39 }
0x2672   : > { %11027 = vmatprep.mubr.bf16.mxu0 %v21043_v32 }
0x2675   : > { %11686 = vrot.lane.b32.xlu0 %v19569_v16, %s21044_s21  ;;  %v13308_v16 = vcombine.high %v11348_v38, %v11349_v50 }
0x2677   : > { %11388 = vmatprep.subr.bf16.mxu0 %v13308_v16 }
0x2679   : > { %13298 = vmatmul.mubr.msk.bf16.gmra.mrb[204].mxu0 %vm1429_vm1, %v10932_v52  ;;  %11688 = vrot.lane.b32.xlu0 %v19575_v43, %s21044_s21 }
0x267b   : > { %11684 = vrot.lane.b32.xlu1 %v19563_v53, %s21044_s21  ;;  %s20874_s21 = scalar_lea.sflag [#allocation3], %s373_s25 }
0x26ab   : > { %v11223_v8 = vpop.xlane.xlu0 %11222 }
0x26ad   : > { %v11226_v17 = vpop.xlane.xlu1 %11225 }
0x26ae   : > { %15442 = vrcp.f32 %v11226_v17 }
0x26af   : > { %v11217_v22 = vpop.xlane.xlu0 %11216 }
0x26b0   : > { %15444 = vrcp.f32 %v11217_v22 }
0x26b1   : > { %15446 = vrcp.f32 %v11223_v8  ;;  %v11220_v43 = vpop.xlane.xlu1 %11219 }
0x26b2   : > { %15448 = vrcp.f32 %v11220_v43 }
0x26b3   : > { %v11683_v35 = vpop.permute.xlu0 %11682 }
0x26b4   : > { %14152 = vmatprep.subr.bf16.mxu1 %v11683_v35 }
0x26b5   : > { %14153 = vmatpush3.bf16.msra.mxu1 %v11683_v35 }
0x26b8   : > { %v15443_v53 = vpop.eup %15442 }
0x26b9   : > { %v11246_v39 = vmul.f32 %v15443_v53, %v20405_v44 }
0x26ba   : > { %v15445_v29 = vpop.eup %15444 }
0x26bb   : > { %v15447_v52 = vpop.eup %15446  ;;  %v11240_v1 = vmul.f32 %v15445_v29, %v20409_v33 }
0x26bc   : > { %v15449_v59 = vpop.eup %15448  ;;  %v11244_v48 = vmul.f32 %v15447_v52, %v20401_v19 }
0x26bd   : > { %v11242_v63 = vmul.f32 %v15449_v59, %v20413_v6 }
0x26be   : > { %v11256_v9 = vpack.c.bf16 %v11246_v39, %v11244_v48 }
0x26bf   : > { %v11255_v13 = vpack.c.bf16 %v11242_v63, %v11240_v1  ;;  %v11773_v1 = vld [vmem:[%s20950_s6 + $0x3d8] sm:$0xff] }
0x26c0   : > { %v11774_v63 = vld [vmem:[%s20950_s6 + $0x3f8] sm:$0xff] }
0x26c1   : > { %14128 = vmatprep.mubr.msk.bf16.mxu0 %vm480_vm0, %v11255_v13 }
0x26c2   : > { %14129 = vmatmul.mubr.msk.bf16.vlgmr.msra.gmra.mrb[216].mxu0 %vm480_vm0, %v11256_v9 }
0x26c3   : > { %11389 = vmatpush1.bf16.msra.mxu0 %v13307_v47 }
0x26d1   : > { %v11235_v4 = vpop.xlane.xlu1 %11234 }
0x26d5   : > { %v11229_v55 = vpop.xlane.xlu1 %11228 }
0x26d9   : > { %v11238_v45 = vpop.xlane.xlu1 %11237 }
0x26da   : > { %15450 = vrcp.f32 %v11238_v45 }
0x26db   : > { %15452 = vrcp.f32 %v11229_v55  ;;  %v13325_v55 = vcombine.low %v11773_v1, %v11774_v63 }
0x26dc   : > { %15454 = vrcp.f32 %v11235_v4  ;;  %v13326_v4 = vcombine.high %v11773_v1, %v11774_v63 }
0x26dd   : > { %v11232_v44 = vpop.xlane.xlu1 %11231 }
0x26de   : > { %15456 = vrcp.f32 %v11232_v44 }
0x26e4   : > { %v11646_v33 = vpop.xlane.xlu0 %11645  ;;  %v15451_v6 = vpop.eup %15450 }
0x26e5   : > { %v15453_v46 = vpop.eup %15452  ;;  %v11254_v61 = vmul.f32 %v15451_v6, %v20432_v7 }
0x26e6   : > { %v15455_v19 = vpop.eup %15454  ;;  %v11248_v20 = vmul.f32 %v15453_v46, %v20428_v24 }
0x26e7   : > { %v11643_v58 = vpop.xlane.xlu1 %11642  ;;  %v11252_v27 = vmul.f32 %v15455_v19, %v20423_v0 }
0x26e8   : > { %v15457_v62 = vpop.eup %15456  ;;  %15458 = vrcp.f32 %v11643_v58  ;;  %v11640_v30 = vpop.xlane.xlu0 %11639 }
0x26e9   : > { %15460 = vrcp.f32 %v11640_v30  ;;  %v11250_v3 = vmul.f32 %v15457_v62, %v20439_v56  ;;  %v11258_v42 = vpack.c.bf16 %v11254_v61, %v11252_v27 }
0x26eb   : > { %v11658_v25 = vpop.xlane.xlu1 %11657  ;;  %v11257_v60 = vpack.c.bf16 %v11250_v3, %v11248_v20 }
0x26ec   : > { %v11649_v26 = vpop.xlane.xlu0 %11648 }
0x26ed   : > { %14132 = vmatprep.mubr.msk.bf16.mxu0 %vm480_vm0, %v11257_v60  ;;  %15462 = vrcp.f32 %v11649_v26 }
0x26ee   : > { %14133 = vmatmul.mubr.msk.bf16.gmra.mrb[220].mxu0 %vm480_vm0, %v11258_v42  ;;  %15464 = vrcp.f32 %v11646_v33 }
0x26ef   : > { %v11652_v23 = vpop.xlane.xlu1 %11651  ;;  %11420 = vmatprep.mubr.bf16.mxu0 %v21043_v32 }
0x26f0   : > { %15466 = vrcp.f32 %v11652_v23  ;;  %v11687_v37 = vpop.permute.xlu0 %11686 }
0x26f2   : > { %v15459_v51 = vpop.eup %15458 }
0x26f3   : > { %v15461_v7 = vpop.eup %15460  ;;  %v11661_v15 = vpop.xlane.xlu1 %11660  ;;  %v11665_v56 = vmul.f32 %v15459_v51, %v20455_v21 }
0x26f4   : > { %v11663_v24 = vmul.f32 %v15461_v7, %v20453_v54  ;;  %v11689_v10 = vpop.permute.xlu0 %11688 }
0x26f6   : > { %v11678_v0 = vpack.c.bf16 %v11665_v56, %v11663_v24  ;;  %v11900_v56 = vld [vmem:[%s20952_s8 + $0x22] sm:$0x3] }
0x26f7   : > { %v11655_v49 = vpop.xlane.xlu1 %11654  ;;  %v15463_v34 = vpop.eup %15462 }
0x26f8   : > { %15468 = vrcp.f32 %v11655_v49  ;;  %14160 = vmatprep.mubr.msk.bf16.mxu1 %vm480_vm0, %v11678_v0  ;;  %v15465_v36 = vpop.eup %15464  ;;  %v11669_v40 = vmul.f32 %v15463_v34, %v20465_v11  ;;  %v11905_v0 = vrot.slane %v11900_v56, %v21032_v31  ;;  %v11909_v49 = vrot.slane %v11900_v56, %v21033_v12 }
0x26f9   : > { %15470 = vrcp.f32 %v11661_v15  ;;  %v11667_v38 = vmul.f32 %v15465_v36, %v20448_v41  ;;  %v11350_v41 = vld [vmem:[%s20950_s6 + $0x358] sm:$0xff] }
0x26fa   : > { %15472 = vrcp.f32 %v11658_v25  ;;  %v15467_v54 = vpop.eup %15466 }
0x26fb   : > { %v11685_v2 = vpop.permute.xlu1 %11684  ;;  %v11671_v50 = vmul.f32 %v15467_v54, %v20469_v57  ;;  %v11679_v16 = vpack.c.bf16 %v11669_v40, %v11667_v38  ;;  %v11351_v57 = vld [vmem:[%s20950_s6 + $0x378] sm:$0xff] }
0x26fc   : > { %14154 = vmatprep.subr.bf16.mxu1 %v11685_v2  ;;  %v13310_v53 = vcombine.high %v11350_v41, %v11351_v57 }
0x26fd   : > { %14155 = vmatpush3.bf16.msra.mxu1 %v11685_v2 }
0x26fe   : > { %14156 = vmatprep.subr.bf16.mxu1 %v11687_v37  ;;  %11390 = vmatprep.subr.bf16.mxu0 %v13310_v53 }
0x2701   : > { %14157 = vmatpush3.bf16.msra.mxu1 %v11687_v37 }
0x2702   : > { %v15469_v21 = vpop.eup %15468  ;;  %14158 = vmatprep.subr.bf16.mxu1 %v11689_v10 }
0x2703   : > { %v11673_v5 = vmul.f32 %v15469_v21, %v20485_v14  ;;  %v15471_v8 = vpop.eup %15470  ;;  %v13309_v14 = vcombine.low %v11350_v41, %v11351_v57 }
0x2704   : > { %v15473_v22 = vpop.eup %15472  ;;  %v11677_v43 = vmul.f32 %v15471_v8, %v20479_v28  ;;  %v11771_v28 = vld [vmem:[%s20950_s6 + $0x398] sm:$0xff] }
0x2705   : > { %14159 = vmatpush3.bf16.msra.mxu1 %v11689_v10  ;;  %v11680_v17 = vpack.c.bf16 %v11673_v5, %v11671_v50  ;;  %v11675_v11 = vmul.f32 %v15473_v22, %v20460_v18  ;;  %11391 = vmatpush1.bf16.msra.mxu0 %v13309_v14  ;;  %v11772_v18 = vld [vmem:[%s20950_s6 + $0x3b8] sm:$0xff] }
0x2706   : > { %v13323_v29 = vcombine.low %v11771_v28, %v11772_v18  ;;  %v13324_v52 = vcombine.high %v11771_v28, %v11772_v18 }
0x2707   : > { %v11681_v35 = vpack.c.bf16 %v11677_v43, %v11675_v11 }
0x2708   : > { %14161 = vmatmul.mubr.msk.bf16.vlgmr.msra.gmra.mrb[248].mxu1 %vm480_vm0, %v11679_v16  ;;  %11811 = vmatprep.subr.bf16.mxu0 %v13324_v52 }
0x2709   : > { %14164 = vmatprep.mubr.msk.bf16.mxu1 %vm480_vm0, %v11680_v17 }
0x2710   : > { %14165 = vmatmul.mubr.msk.bf16.gmra.mrb[252].mxu1 %vm480_vm0, %v11681_v35 }
0x2795   : > { %v14130_v59 = vpop.f32.mrb[216].mxu0 }
0x2796   : > { %v11317_v39 = vpop.f32.mrb[217].mxu0 }
0x2797   : > { %v14131_v48 = vpop.f32.mrb[218].mxu0 }
0x2798   : > { %v11353_v13 = vpack.c.bf16 %v14131_v48, %v14130_v59  ;;  %v11320_v47 = vpop.f32.mrb[219].mxu0 }
0x2799   : > { %v11352_v9 = vpack.c.bf16 %v11320_v47, %v11317_v39 }
0x279b   : > { %13311 = vmatmul.mubr.msk.bf16.vlgmr.msra.gmra.mrb[192].mxu0 %vm1429_vm1, %v11352_v9 }
0x279c   : > { %11430 = vmatprep.mubr.bf16.mxu0 %v21043_v32  ;;  %11812 = vmatpush1.bf16.msra.mxu0 %v13323_v29 }
0x279d   : > { %11813 = vmatprep.subr.bf16.mxu0 %v13326_v4 }
0x27a0   : > { %11814 = vmatpush1.bf16.msra.mxu0 %v13325_v55  ;;  %v14786_v55 = vld [vmem:[%s20951_s7 + $0x40] sm:$0xff]  }
0x27a1   : > { %14168 = vmatprep.subr.bf16.mxu1 %v14786_v55  ;;  %13616 = vmatprep.subr.bf16.mxu0 %v14786_v55  ;;  %v14792_v55 = vld [vmem:[%s20951_s7 + $0x58] sm:$0xff]  }
0x27a3   : > { %13312 = vmatmul.mubr.msk.bf16.gmra.mrb[196].mxu0 %vm1429_vm1, %v11353_v13 }
0x27a4   : > { %11440 = vmatprep.mubr.bf16.mxu0 %v21043_v32 }
0x27c1   : > { %v14134_v45 = vpop.f32.mrb[220].mxu0 }
0x27c2   : > { %v11333_v44 = vpop.f32.mrb[221].mxu0 }
0x27c3   : > { %v14135_v33 = vpop.f32.mrb[222].mxu0 }
0x27c4   : > { %v11355_v6 = vpack.c.bf16 %v14135_v33, %v14134_v45  ;;  %v11336_v46 = vpop.f32.mrb[223].mxu0  ;;  %v14787_v45 = vld [vmem:[%s20951_s7] sm:$0xff]   ;;  %v14789_v33 = vld [vmem:[%s20951_s7 + $0x8] sm:$0xff]  }
0x27c5   : > { %v11354_v19 = vpack.c.bf16 %v11336_v46, %v11333_v44  ;;  %v14788_v44 = vld [vmem:[%s20951_s7 + $0x48] sm:$0xff]   ;;  %14176 = vmatpush3.bf16.msra.mxu1 %v14787_v45 }
0x27c6   : > { %14169 = vmatprep.subr.bf16.mxu1 %v14788_v44 }
0x27c7   : > { %13313 = vmatmul.mubr.msk.bf16.gmra.mrb[200].mxu0 %vm1429_vm1, %v11354_v19 }
0x27c8   : > { %11450 = vmatprep.mubr.bf16.mxu0 %v21043_v32 }
0x27c9   : > { %14177 = vmatpush3.bf16.msra.mxu1 %v14789_v33 }
0x27cf   : > { %13314 = vmatmul.mubr.msk.bf16.gmra.mrb[204].mxu0 %vm1429_vm1, %v11355_v6 }
0x27d0   : > { %11843 = vmatprep.mubr.bf16.mxu0 %v21043_v32 }
0x27db   : > { %v14162_v58 = vpop.f32.mrb[248].mxu1 }
0x27dc   : > { %v11740_v62 = vpop.f32.mrb[249].mxu1 }
0x27dd   : > { %v14163_v30 = vpop.f32.mrb[250].mxu1 }
0x27de   : > { %v11776_v61 = vpack.c.bf16 %v14163_v30, %v14162_v58  ;;  %v11743_v20 = vpop.f32.mrb[251].mxu1 }
0x27df   : > { %v11775_v3 = vpack.c.bf16 %v11743_v20, %v11740_v62 }
0x27e1   : > { %13327 = vmatmul.mubr.msk.bf16.vlgmr.msra.gmra.mrb[192].mxu0 %vm1429_vm1, %v11775_v3 }
0x27e2   : > { %11853 = vmatprep.mubr.bf16.mxu0 %v21043_v32  ;;  %13617 = vmatpush3.bf16.msra.mxu0 %v14787_v45  ;;  %v14793_v45 = vld [vmem:[%s20951_s7 + $0x18] sm:$0xff]  }
0x27e3   : > { %v14166_v27 = vpop.f32.mrb[252].mxu1  ;;  %13618 = vmatprep.subr.bf16.mxu0 %v14788_v44  ;;  %v14794_v44 = vld [vmem:[%s20951_s7 + $0x60] sm:$0xff]  }
0x27e4   : > { %v11756_v25 = vpop.f32.mrb[253].mxu1 }
0x27e5   : > { %v14167_v60 = vpop.f32.mrb[254].mxu1 }
0x27e6   : > { %v11778_v42 = vpack.c.bf16 %v14167_v60, %v14166_v27  ;;  %v11759_v23 = vpop.f32.mrb[255].mxu1  ;;  %13619 = vmatpush3.bf16.msra.mxu0 %v14789_v33  ;;  %v14795_v33 = vld [vmem:[%s20951_s7 + $0x20] sm:$0xff]  }
0x27e7   : > { %v11777_v51 = vpack.c.bf16 %v11759_v23, %v11756_v25 }
0x27e9   : > { %13328 = vmatmul.mubr.msk.bf16.gmra.mrb[196].mxu0 %vm1429_vm1, %v11776_v61 }
0x27ea   : > { %11863 = vmatprep.mubr.bf16.mxu0 %v21043_v32 }
0x27f1   : > { %13329 = vmatmul.mubr.msk.bf16.gmra.mrb[200].mxu0 %vm1429_vm1, %v11777_v51 }
0x27f2   : > { %11873 = vmatprep.mubr.bf16.mxu0 %v21043_v32 }
0x27f9   : > { %13330 = vmatmul.mubr.msk.bf16.gmra.mrb[204].mxu0 %vm1429_vm1, %v11778_v42 }
0x28b4   : > { %v11845_v26 = vpop.f32.mrb[192].mxu0 }
0x28b5   : > { %v11847_v7 = vpop.f32.mrb[193].mxu0  ;;  %v20584_v53 = vadd.f32 %v11905_v0, %v11845_v26 }
0x28b6   : > { %v11849_v15 = vpop.f32.mrb[194].mxu0  ;;  %v20586_v28 = vadd.f32 %v11909_v49, %v11847_v7 }
0x28b7   : > { %v11851_v24 = vpop.f32.mrb[195].mxu0  ;;  %v20578_v5 = vadd.f32 %v11905_v0, %v11849_v15 }
0x28b8   : > { %v20580_v38 = vadd.f32 %v11909_v49, %v11851_v24  ;;  %v11928_v63 = vadd.f32 %v20586_v28, %v20584_v53 }
0x28ba   : > { %v11931_v22 = vadd.f32 %v20580_v38, %v20578_v5 }
0x28bc   : > { %v11855_v37 = vpop.f32.mrb[196].mxu0 }
0x28bd   : > { %v11916_v2 = vadd.f32 %v11905_v0, %v11855_v37  ;;  %v11857_v34 = vpop.f32.mrb[197].mxu0 }
0x28be   : > { %v11917_v36 = vadd.f32 %v11909_v49, %v11857_v34  ;;  %v11859_v54 = vpop.f32.mrb[198].mxu0 }
0x28bf   : > { %v11918_v32 = vadd.f32 %v11905_v0, %v11859_v54  ;;  %v11861_v10 = vpop.f32.mrb[199].mxu0 }
0x28c0   : > { %v11934_v21 = vadd.f32 %v11917_v36, %v11916_v2  ;;  %v11919_v40 = vadd.f32 %v11909_v49, %v11861_v10 }
0x28c2   : > { %v11937_v50 = vadd.f32 %v11919_v40, %v11918_v32  ;;  %11935 = vadd.xlane.f32.xlu0 %v11934_v21 }
0x28c4   : > { %11938 = vadd.xlane.f32.xlu1 %v11937_v50  ;;  %v11865_v16 = vpop.f32.mrb[200].mxu0 }
0x28c5   : > { %v11920_v8 = vadd.f32 %v11905_v0, %v11865_v16  ;;  %v11867_v17 = vpop.f32.mrb[201].mxu0 }
0x28c6   : > { %v11921_v43 = vadd.f32 %v11909_v49, %v11867_v17  ;;  %v11869_v11 = vpop.f32.mrb[202].mxu0 }
0x28c7   : > { %v11871_v35 = vpop.f32.mrb[203].mxu0  ;;  %v11922_v57 = vadd.f32 %v11905_v0, %v11869_v11 }
0x28c8   : > { %v11940_v41 = vadd.f32 %v11921_v43, %v11920_v8  ;;  %v11923_v14 = vadd.f32 %v11909_v49, %v11871_v35  ;;  %11932 = vadd.xlane.f32.xlu1 %v11931_v22 }
0x28ca   : > { %11941 = vadd.xlane.f32.xlu0 %v11940_v41  ;;  %v11943_v18 = vadd.f32 %v11923_v14, %v11922_v57 }
0x28cc   : > { %v11875_v29 = vpop.f32.mrb[204].mxu0 }
0x28cd   : > { %v11877_v52 = vpop.f32.mrb[205].mxu0  ;;  %v20592_v48 = vadd.f32 %v11905_v0, %v11875_v29 }
0x28ce   : > { %11944 = vadd.xlane.f32.xlu0 %v11943_v18  ;;  %v11879_v59 = vpop.f32.mrb[206].mxu0  ;;  %v20594_v13 = vadd.f32 %v11909_v49, %v11877_v52 }
0x28cf   : > { %v20588_v39 = vadd.f32 %v11905_v0, %v11879_v59  ;;  %v11881_v1 = vpop.f32.mrb[207].mxu0 }
0x28d0   : > { %v20596_v47 = vadd.f32 %v11909_v49, %v11881_v1  ;;  %v11946_v4 = vadd.f32 %v20594_v13, %v20592_v48 }
0x28d2   : > { %v11949_v9 = vadd.f32 %v20596_v47, %v20588_v39  ;;  %11929 = vadd.xlane.f32.xlu0 %v11928_v63 }
0x28d4   : > { %11950 = vadd.xlane.f32.xlu1 %v11949_v9 }
0x28d6   : > { %11947 = vadd.xlane.f32.xlu0 %v11946_v4 }
0x294f   : > { %v11936_v6 = vpop.xlane.xlu0 %11935 }
0x2950   : > { %v11954_v46 = vmul.f32 0.00390625, %v11936_v6  ;;  %v14796_v6 = vld [vmem:[%s20951_s7 + $0x68] sm:$0xff]  }
0x2951   : > { %v11939_v19 = vpop.xlane.xlu1 %11938 }
0x2952   : > { %v20614_v58 = vsub.f32 %v11916_v2, %v11954_v46  ;;  %v20616_v62 = vsub.f32 %v11917_v36, %v11954_v46  ;;  %v11955_v30 = vmul.f32 0.00390625, %v11939_v19  ;;  %v14797_v46 = vld [vmem:[%s20951_s7 + $0x28] sm:$0xff]   ;;  %v14798_v19 = vld [vmem:[%s20951_s7 + $0x70] sm:$0xff]  }
0x2954   : > { %v11980_v61 = vmul.f32 %v20614_v58, %v20614_v58  ;;  %v11981_v20 = vmul.f32 %v20616_v62, %v20616_v62  ;;  %v20622_v3 = vsub.f32 %v11918_v32, %v11955_v30  ;;  %v20624_v27 = vsub.f32 %v11919_v40, %v11955_v30  ;;  %v14799_v30 = vld [vmem:[%s20951_s7 + $0x30] sm:$0xff]  }
0x2955   : > { %v11933_v42 = vpop.xlane.xlu1 %11932 }
0x2956   : > { %v11982_v25 = vmul.f32 %v20622_v3, %v20622_v3  ;;  %v11983_v60 = vmul.f32 %v20624_v27, %v20624_v27  ;;  %v11998_v23 = vadd.f32 %v11981_v20, %v11980_v61  ;;  %v11953_v15 = vmul.f32 0.00390625, %v11933_v42  ;;  %v14800_v61 = vld [vmem:[%s20951_s7 + $0x78] sm:$0xff]  }
0x2957   : > { %v11942_v51 = vpop.xlane.xlu0 %11941  ;;  %v14801_v20 = vld [vmem:[%s20951_s7 + $0x38] sm:$0xff]  }
0x2958   : > { %v11956_v26 = vmul.f32 0.00390625, %v11942_v51  ;;  %11999 = vadd.xlane.f32.xlu0 %v11998_v23  ;;  %v12001_v7 = vadd.f32 %v11983_v60, %v11982_v25  ;;  %v20639_v34 = vsub.f32 %v20578_v5, %v11953_v15  ;;  %v20642_v36 = vsub.f32 %v20580_v38, %v11953_v15 }
0x295a   : > { %v20630_v24 = vsub.f32 %v11920_v8, %v11956_v26  ;;  %v20632_v56 = vsub.f32 %v11921_v43, %v11956_v26  ;;  %12002 = vadd.xlane.f32.xlu1 %v12001_v7  ;;  %v11978_v5 = vmul.f32 %v20639_v34, %v20639_v34  ;;  %v11979_v38 = vmul.f32 %v20642_v36, %v20642_v36 }
0x295b   : > { %v11945_v0 = vpop.xlane.xlu0 %11944 }
0x295c   : > { %v11984_v49 = vmul.f32 %v20630_v24, %v20630_v24  ;;  %v11985_v37 = vmul.f32 %v20632_v56, %v20632_v56  ;;  %v11957_v2 = vmul.f32 0.00390625, %v11945_v0  ;;  %v11995_v59 = vadd.f32 %v11979_v38, %v11978_v5  ;;  %v12056_v0 = vld [vmem:[%s20952_s8 + $0x24] sm:$0x3] }
0x295e   : > { %v20644_v54 = vsub.f32 %v11922_v57, %v11957_v2  ;;  %v20646_v32 = vsub.f32 %v11923_v14, %v11957_v2  ;;  %v12004_v10 = vadd.f32 %v11985_v37, %v11984_v49  ;;  %v12084_v2 = vld [vmem:[%s20952_s8 + $0x26] sm:$0x3] }
0x295f   : > { %v11930_v21 = vpop.xlane.xlu0 %11929  ;;  %v20736_v5 = vrot.slane %v12084_v2, %v21032_v31 }
0x2960   : > { %v11986_v40 = vmul.f32 %v20644_v54, %v20644_v54  ;;  %v11987_v50 = vmul.f32 %v20646_v32, %v20646_v32  ;;  %v11952_v16 = vmul.f32 0.00390625, %v11930_v21  ;;  %12005 = vadd.xlane.f32.xlu0 %v12004_v10  ;;  %v20730_v21 = vrot.slane %v12056_v0, %v21032_v31 }
0x2961   : > { %v11951_v8 = vpop.xlane.xlu1 %11950 }
0x2962   : > { %v20657_v17 = vsub.f32 %v20584_v53, %v11952_v16  ;;  %v20660_v22 = vsub.f32 %v20586_v28, %v11952_v16  ;;  %v11959_v43 = vmul.f32 0.00390625, %v11951_v8  ;;  %v12007_v11 = vadd.f32 %v11987_v50, %v11986_v40 }
0x2963   : > { %v11948_v35 = vpop.xlane.xlu0 %11947  ;;  %v20733_v40 = vrot.slane %v12056_v0, %v21033_v12 }
0x2964   : > { %v11976_v41 = vmul.f32 %v20657_v17, %v20657_v17  ;;  %v11977_v57 = vmul.f32 %v20660_v22, %v20660_v22  ;;  %v20667_v14 = vsub.f32 %v20588_v39, %v11959_v43  ;;  %v20670_v18 = vsub.f32 %v20596_v47, %v11959_v43  ;;  %12008 = vadd.xlane.f32.xlu1 %v12007_v11 }
0x2965   : > { %v11958_v53 = vmul.f32 0.00390625, %v11948_v35  ;;  %v20743_v35 = vrot.slane %v12084_v2, %v21033_v12 }
0x2966   : > { %v11990_v28 = vmul.f32 %v20667_v14, %v20667_v14  ;;  %v11991_v29 = vmul.f32 %v20670_v18, %v20670_v18  ;;  %v11992_v52 = vadd.f32 %v11977_v57, %v11976_v41 }
0x2967   : > { %v20677_v1 = vsub.f32 %v20592_v48, %v11958_v53  ;;  %v20680_v63 = vsub.f32 %v20594_v13, %v11958_v53  ;;  %v14790_v48 = vld [vmem:[%s20951_s7 + $0x50] sm:$0xff]  }
0x2968   : > { %11993 = vadd.xlane.f32.xlu0 %v11992_v52  ;;  %11996 = vadd.xlane.f32.xlu1 %v11995_v59  ;;  %v12013_v9 = vadd.f32 %v11991_v29, %v11990_v28  ;;  %v14791_v13 = vld [vmem:[%s20951_s7 + $0x10] sm:$0xff]  }
0x2969   : > { %v11988_v39 = vmul.f32 %v20677_v1, %v20677_v1  ;;  %v11989_v47 = vmul.f32 %v20680_v63, %v20680_v63  ;;  %14170 = vmatprep.subr.bf16.mxu1 %v14790_v48  ;;  %13620 = vmatprep.subr.bf16.mxu0 %v14790_v48 }
0x296a   : > { %14178 = vmatpush3.bf16.msra.mxu1 %v14791_v13  ;;  %13621 = vmatpush3.bf16.msra.mxu0 %v14791_v13 }
0x296b   : > { %v12010_v4 = vadd.f32 %v11989_v47, %v11988_v39  ;;  %14171 = vmatprep.subr.bf16.mxu1 %v14792_v55  ;;  %13622 = vmatprep.subr.bf16.mxu0 %v14792_v55 }
0x296c   : > { %12014 = vadd.xlane.f32.xlu1 %v12013_v9 }
0x296d   : > { %12011 = vadd.xlane.f32.xlu0 %v12010_v4 }
0x296e   : > { %14179 = vmatpush3.bf16.msra.mxu1 %v14793_v45  ;;  %13623 = vmatpush3.bf16.msra.mxu0 %v14793_v45 }
0x296f   : > { %14172 = vmatprep.subr.bf16.mxu1 %v14794_v44  ;;  %13624 = vmatprep.subr.bf16.mxu0 %v14794_v44 }
0x2972   : > { %14180 = vmatpush3.bf16.msra.mxu1 %v14795_v33  ;;  %13625 = vmatpush3.bf16.msra.mxu0 %v14795_v33 }
0x2973   : > { %14173 = vmatprep.subr.bf16.mxu1 %v14796_v6  ;;  %13626 = vmatprep.subr.bf16.mxu0 %v14796_v6 }
0x2976   : > { %14181 = vmatpush3.bf16.msra.mxu1 %v14797_v46  ;;  %13627 = vmatpush3.bf16.msra.mxu0 %v14797_v46 }
0x2977   : > { %14174 = vmatprep.subr.bf16.mxu1 %v14798_v19  ;;  %13628 = vmatprep.subr.bf16.mxu0 %v14798_v19 }
0x297a   : > { %14182 = vmatpush3.bf16.msra.mxu1 %v14799_v30  ;;  %13629 = vmatpush3.bf16.msra.mxu0 %v14799_v30 }
0x297b   : > { %14175 = vmatprep.subr.bf16.mxu1 %v14800_v61  ;;  %13630 = vmatprep.subr.bf16.mxu0 %v14800_v61 }
0x297e   : > { %14183 = vmatpush3.bf16.msra.mxu1 %v14801_v20  ;;  %13631 = vmatpush3.bf16.msra.mxu0 %v14801_v20 }
0x29e5   : > { %v12000_v25 = vpop.xlane.xlu0 %11999 }
0x29e6   : > { %v12018_v60 = vmul.f32 0.00390625, %v12000_v25 }
0x29e7   : > { %v12003_v42 = vpop.xlane.xlu1 %12002 }
0x29e8   : > { %v12026_v23 = vadd.f32 1e-05, %v12018_v60  ;;  %v12019_v51 = vmul.f32 0.00390625, %v12003_v42 }
0x29ea   : > { %15474 = vrsqrt.f32 %v12026_v23  ;;  %v12027_v26 = vadd.f32 1e-05, %v12019_v51 }
0x29ec   : > { %15476 = vrsqrt.f32 %v12027_v26 }
0x29ed   : > { %v12006_v7 = vpop.xlane.xlu0 %12005 }
0x29ee   : > { %v12020_v15 = vmul.f32 0.00390625, %v12006_v7 }
0x29f0   : > { %v12028_v49 = vadd.f32 1e-05, %v12020_v15 }
0x29f1   : > { %v12009_v37 = vpop.xlane.xlu1 %12008 }
0x29f2   : > { %15478 = vrsqrt.f32 %v12028_v49  ;;  %v12021_v10 = vmul.f32 0.00390625, %v12009_v37 }
0x29f4   : > { %v15475_v50 = vpop.eup %15474  ;;  %v12029_v16 = vadd.f32 1e-05, %v12021_v10 }
0x29f5   : > { %v12044_v38 = vmul.f32 %v15475_v50, %v20614_v58  ;;  %v11994_v8 = vpop.xlane.xlu0 %11993  ;;  %v11997_v43 = vpop.xlane.xlu1 %11996  ;;  %v12045_v11 = vmul.f32 %v15475_v50, %v20616_v62 }
0x29f6   : > { %v15477_v41 = vpop.eup %15476  ;;  %15480 = vrsqrt.f32 %v12029_v16  ;;  %v12016_v57 = vmul.f32 0.00390625, %v11994_v8  ;;  %v12017_v53 = vmul.f32 0.00390625, %v11997_v43 }
0x29f7   : > { %v12072_v28 = vmul.f32 %v20730_v21, %v12044_v38  ;;  %v12046_v31 = vmul.f32 %v15477_v41, %v20622_v3  ;;  %v12047_v29 = vmul.f32 %v15477_v41, %v20624_v27  ;;  %v12073_v52 = vmul.f32 %v20733_v40, %v12045_v11 }
0x29f8   : > { %v12024_v58 = vadd.f32 1e-05, %v12016_v57  ;;  %v12025_v59 = vadd.f32 1e-05, %v12017_v53 }
0x29f9   : > { %v12100_v39 = vadd.f32 %v20736_v5, %v12072_v28  ;;  %v12074_v62 = vmul.f32 %v20730_v21, %v12046_v31  ;;  %v12015_v12 = vpop.xlane.xlu1 %12014  ;;  %v12075_v47 = vmul.f32 %v20733_v40, %v12047_v29  ;;  %v12101_v9 = vadd.f32 %v20743_v35, %v12073_v52 }
0x29fa   : > { %15482 = vrsqrt.f32 %v12024_v58  ;;  %v12012_v4 = vpop.xlane.xlu0 %12011  ;;  %v12023_v48 = vmul.f32 0.00390625, %v12015_v12 }
0x29fb   : > { %12116 = vst [vmem:[%s20753_s28 + $0x20] sm:$0xff] %v12100_v39  ;;  %v12102_v3 = vadd.f32 %v20736_v5, %v12074_v62  ;;  %15484 = vrsqrt.f32 %v12025_v59  ;;  %v12022_v27 = vmul.f32 0.00390625, %v12012_v4  ;;  %v12103_v13 = vadd.f32 %v20743_v35, %v12075_v47  ;;  %12117 = vst [vmem:[%s20753_s28 + $0x28] sm:$0xff] %v12101_v9 }
0x29fc   : > { %v15479_v55 = vpop.eup %15478  ;;  %v12031_v45 = vadd.f32 1e-05, %v12023_v48 }
0x29fd   : > { %12118 = vst [vmem:[%s20753_s28 + $0x30] sm:$0xff] %v12102_v3  ;;  %v12130_v44 = vpack.c.bf16 %v12102_v3, %v12100_v39  ;;  %v12048_v33 = vmul.f32 %v15479_v55, %v20630_v24  ;;  %v12030_v6 = vadd.f32 1e-05, %v12022_v27  ;;  %12119 = vst [vmem:[%s20753_s28 + $0x38] sm:$0xff] %v12103_v13  ;;  %v12131_v46 = vpack.c.bf16 %v12103_v13, %v12101_v9 }
0x29fe   : > { %15486 = vrsqrt.f32 %v12031_v45  ;;  %v12049_v19 = vmul.f32 %v15479_v55, %v20632_v56  ;;  %v21045_v13 = vlaneseq }
0x29ff   : > { %v12076_v30 = vmul.f32 %v20730_v21, %v12048_v33  ;;  %15488 = vrsqrt.f32 %v12030_v6  ;;  %12311 = vmatprep.mubr.bf16.mxu1 %v12131_v46 }
0x2a00   : > { %v15481_v61 = vpop.eup %15480  ;;  %12312 = vmatmul.mubr.bf16.vlgmr.msra.gmra.mrb[0].mxu1 %v12130_v44  ;;  %v12077_v20 = vmul.f32 %v20733_v40, %v12049_v19  ;;  %v12337_v55 = vand.u32 127, %v21045_v13  ;;  %v13331_v19 = vld [vmem:[%s20952_s8 + $0x28] ss:$0 sm:$0xff] }
0x2a01   : > { %v12104_v25 = vadd.f32 %v20736_v5, %v12076_v30  ;;  %v12050_v24 = vmul.f32 %v15481_v61, %v20644_v54  ;;  %v12051_v60 = vmul.f32 %v15481_v61, %v20646_v32 }
0x2a02   : > { %v12105_v42 = vadd.f32 %v20743_v35, %v12077_v20  ;;  %vm12338_vm2 = vcmp.lt.s32.totalorder %v12337_v55, 3 }
0x2a03   : > { %12120 = vst [vmem:[%s20753_s28 + $0x40] sm:$0xff] %v12104_v25  ;;  %v12078_v56 = vmul.f32 %v20730_v21, %v12050_v24  ;;  %v12079_v23 = vmul.f32 %v20733_v40, %v12051_v60  ;;  %v15606_v60 = vmov 0.0  }
0x2a04   : > { %v15483_v51 = vpop.eup %15482  ;;  %12121 = vst [vmem:[%s20753_s28 + $0x48] sm:$0xff] %v12105_v42 }
0x2a05   : > { %v15485_v26 = vpop.eup %15484  ;;  %v12106_v7 = vadd.f32 %v20736_v5, %v12078_v56  ;;  %v12040_v15 = vmul.f32 %v15483_v51, %v20657_v17  ;;  %v12107_v0 = vadd.f32 %v20743_v35, %v12079_v23  ;;  %v12041_v54 = vmul.f32 %v15483_v51, %v20660_v22 }
0x2a06   : > { %v12042_v32 = vmul.f32 %v15485_v26, %v20639_v34  ;;  %v12043_v49 = vmul.f32 %v15485_v26, %v20642_v36 }
0x2a07   : > { %12122 = vst [vmem:[%s20753_s28 + $0x50] sm:$0xff] %v12106_v7  ;;  %v12132_v37 = vpack.c.bf16 %v12106_v7, %v12104_v25  ;;  %v12068_v2 = vmul.f32 %v20730_v21, %v12040_v15  ;;  %12123 = vst [vmem:[%s20753_s28 + $0x58] sm:$0xff] %v12107_v0  ;;  %v12133_v10 = vpack.c.bf16 %v12107_v0, %v12105_v42  ;;  %v20813_v42 = vsel %vm12338_vm2, 1.0, %v15606_v60 }
0x2a08   : > { %v12069_v50 = vmul.f32 %v20733_v40, %v12041_v54  ;;  %v15487_v16 = vpop.eup %15486  ;;  %v12070_v17 = vmul.f32 %v20730_v21, %v12042_v32  ;;  %v12071_v38 = vmul.f32 %v20733_v40, %v12043_v49 }
0x2a09   : > { %v15489_v22 = vpop.eup %15488  ;;  %v12054_v34 = vmul.f32 %v15487_v16, %v20667_v14  ;;  %12319 = vmatprep.mubr.bf16.mxu1 %v12133_v10  ;;  %v12096_v8 = vadd.f32 %v20736_v5, %v12068_v2  ;;  %v12055_v43 = vmul.f32 %v15487_v16, %v20670_v18 }
0x2a0a   : > { %v12097_v36 = vadd.f32 %v20743_v35, %v12069_v50  ;;  %v12052_v11 = vmul.f32 %v15489_v22, %v20677_v1  ;;  %12320 = vmatmul.mubr.bf16.gmra.mrb[4].mxu1 %v12132_v37  ;;  %v12099_v41 = vadd.f32 %v20743_v35, %v12071_v38  ;;  %v12098_v57 = vadd.f32 %v20736_v5, %v12070_v17 }
0x2a0b   : > { %v12053_v53 = vmul.f32 %v15489_v22, %v20680_v63  ;;  %v12082_v14 = vmul.f32 %v20730_v21, %v12054_v34  ;;  %12112 = vst [vmem:[%s20753_s28] sm:$0xff] %v12096_v8  ;;  %v12083_v28 = vmul.f32 %v20733_v40, %v12055_v43 }
0x2a0c   : > { %12113 = vst [vmem:[%s20753_s28 + $0x8] sm:$0xff] %v12097_v36  ;;  %v12080_v18 = vmul.f32 %v20730_v21, %v12052_v11  ;;  %12115 = vst [vmem:[%s20753_s28 + $0x18] sm:$0xff] %v12099_v41  ;;  %v12129_v1 = vpack.c.bf16 %v12099_v41, %v12097_v36  ;;  %v12128_v31 = vpack.c.bf16 %v12098_v57, %v12096_v8 }
0x2a0d   : > { %12114 = vst [vmem:[%s20753_s28 + $0x10] sm:$0xff] %v12098_v57  ;;  %v12081_v29 = vmul.f32 %v20733_v40, %v12053_v53  ;;  %v12110_v63 = vadd.f32 %v20736_v5, %v12082_v14  ;;  %v12111_v52 = vadd.f32 %v20743_v35, %v12083_v28 }
0x2a0e   : > { %v12108_v58 = vadd.f32 %v20736_v5, %v12080_v18  ;;  %12303 = vmatprep.mubr.bf16.mxu0 %v12129_v1 }
0x2a0f   : > { %v12109_v59 = vadd.f32 %v20743_v35, %v12081_v29  ;;  %12126 = vst [vmem:[%s20753_s28 + $0x70] sm:$0xff] %v12110_v63  ;;  %12304 = vmatmul.mubr.bf16.vlgmr.msra.gmra.mrb[224].mxu0 %v12128_v31  ;;  %12127 = vst [vmem:[%s20753_s28 + $0x78] sm:$0xff] %v12111_v52 }
0x2a10   : > { %12124 = vst [vmem:[%s20753_s28 + $0x60] sm:$0xff] %v12108_v58  ;;  %v12134_v21 = vpack.c.bf16 %v12110_v63, %v12108_v58 }
0x2a11   : > { %12125 = vst [vmem:[%s20753_s28 + $0x68] sm:$0xff] %v12109_v59  ;;  %v12135_v39 = vpack.c.bf16 %v12111_v52, %v12109_v59  ;;  %s15544_s28 = scalar_lea.vmem %s15543_s12, 4096 }
0x2a12   : > { %p15546_p1 = scmp.lt.s32.totalorder %s15544_s28, %s15538_s26 }
0x2a13   : > { %12327 = vmatprep.mubr.bf16.mxu1 %v12135_v39 }
0x2a14   : > { %12328 = vmatmul.mubr.bf16.gmra.mrb[8].mxu1 %v12134_v21  ;;  %p15547_p2 = por %p15546_p1, %p15545_p0 }
0x2a16   : > { %p15548_p3 = pnand %p15547_p2, %p15541_p13 }
0x2ad3   : > { %v13638_v62 = vpop.f32.mrb[0].mxu1 }
0x2ad4   : > { %v13639_v40 = vpop.f32.mrb[1].mxu1 }
0x2ad5   : > { %v13640_v12 = vadd.f32 %v13639_v40, %v13638_v62  ;;  %v13641_v47 = vpop.f32.mrb[2].mxu1 }
0x2ad6   : > { %v13642_v9 = vpop.f32.mrb[3].mxu1 }
0x2ad7   : > { %v13643_v4 = vadd.f32 %v13642_v9, %v13641_v47  ;;  %v12314_v56 = vadd.f32 %v13640_v12, %v13331_v19 }
0x2ad9   : > { %v12317_v0 = vadd.f32 %v13643_v4, %v13331_v19  ;;  %v12343_v37 = vmul.f32 %v20813_v42, %v12314_v56 }
0x2adb   : > { %v12344_v10 = vmul.f32 %v20813_v42, %v12317_v0 }
0x2add   : > { %v13644_v48 = vpop.f32.mrb[4].mxu1 }
0x2ade   : > { %v13645_v5 = vpop.f32.mrb[5].mxu1 }
0x2adf   : > { %v13646_v3 = vadd.f32 %v13645_v5, %v13644_v48  ;;  %v13647_v27 = vpop.f32.mrb[6].mxu1 }
0x2ae0   : > { %v13648_v35 = vpop.f32.mrb[7].mxu1 }
0x2ae1   : > { %v13649_v45 = vadd.f32 %v13648_v35, %v13647_v27  ;;  %v12322_v49 = vadd.f32 %v13646_v3, %v13331_v19 }
0x2ae2   : > { %v13632_v44 = vpop.f32.mrb[224].mxu0 }
0x2ae3   : > { %v13633_v33 = vpop.f32.mrb[225].mxu0  ;;  %v12325_v2 = vadd.f32 %v13649_v45, %v13331_v19  ;;  %v12345_v16 = vmul.f32 %v20813_v42, %v12322_v49 }
0x2ae4   : > { %v13634_v6 = vadd.f32 %v13633_v33, %v13632_v44  ;;  %v13635_v46 = vpop.f32.mrb[226].mxu0 }
0x2ae5   : > { %v13636_v30 = vpop.f32.mrb[227].mxu0  ;;  %v12346_v38 = vmul.f32 %v20813_v42, %v12325_v2 }
0x2ae6   : > { %v12306_v61 = vadd.f32 %v13634_v6, %v13331_v19  ;;  %v13637_v20 = vadd.f32 %v13636_v30, %v13635_v46 }
0x2ae7   : > { %v13650_v25 = vpop.f32.mrb[8].mxu1 }
0x2ae8   : > { %v13651_v24 = vpop.f32.mrb[9].mxu1  ;;  %v12309_v23 = vadd.f32 %v13637_v20, %v13331_v19  ;;  %v12341_v7 = vmul.f32 %v20813_v42, %v12306_v61 }
0x2ae9   : > { %v13652_v51 = vadd.f32 %v13651_v24, %v13650_v25  ;;  %v13653_v26 = vpop.f32.mrb[10].mxu1 }
0x2aea   : > { %v13654_v15 = vpop.f32.mrb[11].mxu1  ;;  %12349 = vadd.xlane.f32.xlu0 %v12341_v7  ;;  %v12342_v32 = vmul.f32 %v20813_v42, %v12309_v23 }
0x2aeb   : > { %v13655_v54 = vadd.f32 %v13654_v15, %v13653_v26  ;;  %v12330_v50 = vadd.f32 %v13652_v51, %v13331_v19 }
0x2aec   : > { %12351 = vadd.xlane.f32.xlu1 %v12342_v32 }
0x2aed   : > { %v12333_v17 = vadd.f32 %v13655_v54, %v13331_v19  ;;  %v12347_v22 = vmul.f32 %v20813_v42, %v12330_v50 }
0x2aee   : > { %12353 = vadd.xlane.f32.xlu0 %v12343_v37 }
0x2aef   : > { %v12348_v34 = vmul.f32 %v20813_v42, %v12333_v17 }
0x2af0   : > { %12355 = vadd.xlane.f32.xlu1 %v12344_v10 }
0x2af2   : > { %12357 = vadd.xlane.f32.xlu0 %v12345_v16 }
0x2af4   : > { %12359 = vadd.xlane.f32.xlu1 %v12346_v38 }
0x2af6   : > { %12361 = vadd.xlane.f32.xlu0 %v12347_v22 }
0x2af8   : > { %12363 = vadd.xlane.f32.xlu1 %v12348_v34 }
0x2b77   : > { %v12350_v36 = vpop.xlane.xlu0 %12349 }
0x2b78   : > { %v12365_v8 = vmul.f32 0.33333334, %v12350_v36 }
0x2b79   : > { %v12352_v43 = vpop.xlane.xlu1 %12351 }
0x2b7a   : > { %v12373_v11 = vsub.f32 %v12306_v61, %v12365_v8  ;;  %v12366_v41 = vmul.f32 0.33333334, %v12352_v43 }
0x2b7b   : > { %v12354_v57 = vpop.xlane.xlu0 %12353 }
0x2b7c   : > { %v20824_v53 = vmul.f32 %v20813_v42, %v12373_v11  ;;  %v12374_v14 = vsub.f32 %v12309_v23, %v12366_v41  ;;  %v12367_v28 = vmul.f32 0.33333334, %v12354_v57 }
0x2b7d   : > { %v12356_v18 = vpop.xlane.xlu1 %12355 }
0x2b7e   : > { %v20827_v1 = vmul.f32 %v20813_v42, %v12374_v14  ;;  %v12375_v31 = vsub.f32 %v12314_v56, %v12367_v28  ;;  %v12368_v29 = vmul.f32 0.33333334, %v12356_v18  ;;  %v12389_v63 = vmul.f32 %v20824_v53, %v20824_v53 }
0x2b7f   : > { %v12358_v52 = vpop.xlane.xlu0 %12357 }
0x2b80   : > { %v20832_v58 = vmul.f32 %v20813_v42, %v12375_v31  ;;  %v12376_v59 = vsub.f32 %v12317_v0, %v12368_v29  ;;  %v12369_v21 = vmul.f32 0.33333334, %v12358_v52  ;;  %12397 = vadd.xlane.f32.xlu0 %v12389_v63  ;;  %v12390_v39 = vmul.f32 %v20827_v1, %v20827_v1 }
0x2b81   : > { %v12360_v62 = vpop.xlane.xlu1 %12359 }
0x2b82   : > { %v20837_v40 = vmul.f32 %v20813_v42, %v12376_v59  ;;  %v12377_v12 = vsub.f32 %v12322_v49, %v12369_v21  ;;  %v12370_v47 = vmul.f32 0.33333334, %v12360_v62  ;;  %12399 = vadd.xlane.f32.xlu1 %v12390_v39  ;;  %v12391_v9 = vmul.f32 %v20832_v58, %v20832_v58 }
0x2b83   : > { %v12362_v4 = vpop.xlane.xlu0 %12361 }
0x2b84   : > { %v20842_v48 = vmul.f32 %v20813_v42, %v12377_v12  ;;  %v12378_v5 = vsub.f32 %v12325_v2, %v12370_v47  ;;  %v12371_v3 = vmul.f32 0.33333334, %v12362_v4  ;;  %12401 = vadd.xlane.f32.xlu0 %v12391_v9  ;;  %v12392_v27 = vmul.f32 %v20837_v40, %v20837_v40 }
0x2b85   : > { %v12364_v35 = vpop.xlane.xlu1 %12363 }
0x2b86   : > { %v20847_v13 = vmul.f32 %v20813_v42, %v12378_v5  ;;  %v12379_v55 = vsub.f32 %v12330_v50, %v12371_v3  ;;  %v12372_v45 = vmul.f32 0.33333334, %v12364_v35  ;;  %12403 = vadd.xlane.f32.xlu1 %v12392_v27  ;;  %v12393_v44 = vmul.f32 %v20842_v48, %v20842_v48 }
0x2b88   : > { %v20852_v33 = vmul.f32 %v20813_v42, %v12379_v55  ;;  %v12380_v6 = vsub.f32 %v12333_v17, %v12372_v45  ;;  %12405 = vadd.xlane.f32.xlu0 %v12393_v44  ;;  %v12394_v46 = vmul.f32 %v20847_v13, %v20847_v13 }
0x2b8a   : > { %v20857_v19 = vmul.f32 %v20813_v42, %v12380_v6  ;;  %12407 = vadd.xlane.f32.xlu1 %v12394_v46  ;;  %v12395_v30 = vmul.f32 %v20852_v33, %v20852_v33 }
0x2b8c   : > { %12409 = vadd.xlane.f32.xlu0 %v12395_v30  ;;  %v12396_v61 = vmul.f32 %v20857_v19, %v20857_v19 }
0x2b8e   : > { %12411 = vadd.xlane.f32.xlu1 %v12396_v61 }
0x2b8f   : > { %15551 = shalt.err (!%p15548_p3)
}
0x2b90   : > { %s15552_s25 = scalar_lea.hbm %s20868_s20, 2048  ;;  %s15556_s22 = scalar_lea.hbm %s20954_s10, 4096 }
0x2b91   : > { %p15553_p4 = scmp.ne.s32.totalorder %s20868_s20, %s15552_s25  ;;  %p15557_p9 = scmp.lt.u32.totalorder %s20868_s20, %s20954_s10 }
0x2b92   : > { %p15558_p10 = scmp.lt.u32.totalorder %s15556_s22, %s15552_s25  ;;  %p15560_p12 = scmp.lt.u32.totalorder %s15552_s25, %s20868_s20 }
0x2b93   : > { %p15554_p7 = pnand %p15553_p4, %p15703_p5 }
0x2b94   : > { %p15559_p11 = por %p15558_p10, %p15557_p9 }
0x2b95   : > { %p15555_p8 = pneg %p15554_p7 }
0x2b96   : > { %p15561_p13 = por %p15560_p12, %p15559_p11 }
0x2b98   : > { %p15562_p0 = pnand %p15561_p13, %p15555_p8 }
0x2b9a   : > { %15565 = shalt.err (!%p15562_p0)
}
0x2b9b   : > { %s15608_s26 = smov 256   ;;  %s15609_s17 = smov 16   ;;  %v13349_v22 = vld [vmem:[%s20952_s8 + $0x29] ss:$0 sm:$0xff]  ;;  %v13350_v11 = vld [vmem:[%s20952_s8 + $0x2a] ss:$0 sm:$0xff] }
0x2b9c   : > { %14536 = dma.vmem_to_hbm [thread:$0]  (%p15703_p5), %s20870_s30, 2048, %s20868_s20, %s20874_s21, %s15608_s26, %s15608_s26, %s15609_s17  }
0x2b9d   : > { %s21046_s12 = sshll.u32 %s15725_s11, 6 }
0x2b9e   : > { %s20911_s0 = scalar_lea.vmem %s20953_s9, %s21046_s12 }
0x2c0d   : > { %v12398_v20 = vpop.xlane.xlu0 %12397 }
0x2c0e   : > { %v12413_v25 = vmul.f32 0.33333334, %v12398_v20 }
0x2c0f   : > { %v12400_v24 = vpop.xlane.xlu1 %12399 }
0x2c10   : > { %v12421_v60 = vadd.f32 1e-05, %v12413_v25  ;;  %v12414_v42 = vmul.f32 0.33333334, %v12400_v24 }
0x2c11   : > { %v12402_v56 = vpop.xlane.xlu0 %12401 }
0x2c12   : > { %15490 = vrsqrt.f32 %v12421_v60  ;;  %v12422_v23 = vadd.f32 1e-05, %v12414_v42  ;;  %v12415_v51 = vmul.f32 0.33333334, %v12402_v56 }
0x2c13   : > { %v12404_v26 = vpop.xlane.xlu1 %12403 }
0x2c14   : > { %15492 = vrsqrt.f32 %v12422_v23  ;;  %v12423_v7 = vadd.f32 1e-05, %v12415_v51  ;;  %v12416_v15 = vmul.f32 0.33333334, %v12404_v26 }
0x2c15   : > { %v12406_v0 = vpop.xlane.xlu0 %12405 }
0x2c16   : > { %15494 = vrsqrt.f32 %v12423_v7  ;;  %v12424_v54 = vadd.f32 1e-05, %v12416_v15  ;;  %v12417_v32 = vmul.f32 0.33333334, %v12406_v0 }
0x2c17   : > { %v12408_v49 = vpop.xlane.xlu1 %12407 }
0x2c18   : > { %15496 = vrsqrt.f32 %v12424_v54  ;;  %v12425_v37 = vadd.f32 1e-05, %v12417_v32  ;;  %v12418_v2 = vmul.f32 0.33333334, %v12408_v49 }
0x2c19   : > { %v12410_v10 = vpop.xlane.xlu0 %12409 }
0x2c1a   : > { %15498 = vrsqrt.f32 %v12425_v37  ;;  %v12426_v50 = vadd.f32 1e-05, %v12418_v2  ;;  %v12419_v16 = vmul.f32 0.33333334, %v12410_v10 }
0x2c1b   : > { %v12412_v17 = vpop.xlane.xlu1 %12411 }
0x2c1c   : > { %v15491_v38 = vpop.eup %15490  ;;  %15500 = vrsqrt.f32 %v12426_v50  ;;  %v12427_v34 = vadd.f32 1e-05, %v12419_v16  ;;  %v12420_v36 = vmul.f32 0.33333334, %v12412_v17 }
0x2c1d   : > { %v12437_v8 = vmul.f32 %v15491_v38, %v20824_v53 }
0x2c1e   : > { %v15493_v43 = vpop.eup %15492  ;;  %15502 = vrsqrt.f32 %v12427_v34  ;;  %v12428_v41 = vadd.f32 1e-05, %v12420_v36 }
0x2c1f   : > { %v12452_v57 = vmul.f32 %v13349_v22, %v12437_v8  ;;  %v12438_v14 = vmul.f32 %v15493_v43, %v20827_v1 }
0x2c20   : > { %v15495_v28 = vpop.eup %15494  ;;  %15504 = vrsqrt.f32 %v12428_v41 }
0x2c21   : > { %v12467_v53 = vadd.f32 %v13350_v11, %v12452_v57  ;;  %v12453_v18 = vmul.f32 %v13349_v22, %v12438_v14  ;;  %v12439_v31 = vmul.f32 %v15495_v28, %v20832_v58 }
0x2c22   : > { %v15497_v29 = vpop.eup %15496 }
0x2c23   : > { %12475 = vst [vmem:[%s20911_s0] sm:$0xff] %v12467_v53  ;;  %v12468_v63 = vadd.f32 %v13350_v11, %v12453_v18  ;;  %v12454_v1 = vmul.f32 %v13349_v22, %v12439_v31  ;;  %v12440_v52 = vmul.f32 %v15497_v29, %v20837_v40 }
0x2c24   : > { %v15499_v59 = vpop.eup %15498 }
0x2c25   : > { %12476 = vst [vmem:[%s20911_s0 + $0x8] sm:$0xff] %v12468_v63  ;;  %v12469_v21 = vadd.f32 %v13350_v11, %v12454_v1  ;;  %v12455_v39 = vmul.f32 %v13349_v22, %v12440_v52  ;;  %v12441_v62 = vmul.f32 %v15499_v59, %v20842_v48 }
0x2c26   : > { %v15501_v12 = vpop.eup %15500 }
0x2c27   : > { %12477 = vst [vmem:[%s20911_s0 + $0x10] sm:$0xff] %v12469_v21  ;;  %v12470_v47 = vadd.f32 %v13350_v11, %v12455_v39  ;;  %v12456_v58 = vmul.f32 %v13349_v22, %v12441_v62  ;;  %v12442_v9 = vmul.f32 %v15501_v12, %v20847_v13 }
0x2c28   : > { %v15503_v4 = vpop.eup %15502 }
0x2c29   : > { %12478 = vst [vmem:[%s20911_s0 + $0x18] sm:$0xff] %v12470_v47  ;;  %v12471_v5 = vadd.f32 %v13350_v11, %v12456_v58  ;;  %v12457_v40 = vmul.f32 %v13349_v22, %v12442_v9  ;;  %v12443_v3 = vmul.f32 %v15503_v4, %v20852_v33 }
0x2c2a   : > { %v15505_v27 = vpop.eup %15504 }
0x2c2b   : > { %12479 = vst [vmem:[%s20911_s0 + $0x20] sm:$0xff] %v12471_v5  ;;  %v12472_v35 = vadd.f32 %v13350_v11, %v12457_v40  ;;  %v12458_v55 = vmul.f32 %v13349_v22, %v12443_v3  ;;  %v12444_v48 = vmul.f32 %v15505_v27, %v20857_v19 }
0x2c2d   : > { %12480 = vst [vmem:[%s20911_s0 + $0x28] sm:$0xff] %v12472_v35  ;;  %v12473_v45 = vadd.f32 %v13350_v11, %v12458_v55  ;;  %v12459_v44 = vmul.f32 %v13349_v22, %v12444_v48 }
0x2c2f   : > { %12481 = vst [vmem:[%s20911_s0 + $0x30] sm:$0xff] %v12473_v45  ;;  %v12474_v6 = vadd.f32 %v13350_v11, %v12459_v44 }
0x2c31   : > { %12482 = vst [vmem:[%s20911_s0 + $0x38] sm:$0xff] %v12474_v6 }
0x2c32 PF: > { %p14542_p5 = scmp.ge.s32.totalorder %s15600_s16, 2  ;;  %s12528_s11 = sand.u32 1, %s15588_s13  }
0x2c33   : > { %s12529_s29 = scalar_lea.sflag [#allocation3], %s12528_s11 }
0x2c34   : > { %p14539_p1 = pnand %p14542_p5, %p15707_p6 }
0x2c36   : > { %15583 = dma.done.wait (!%p14539_p1), %s12529_s29, 2048  }
0x2c37   : > { %15585 = vsyncadd (!%p14539_p1), %s12529_s29, 4294965248  ;;  %s21047_s22 = sld [smem:[#allocation5_spill]]  ;;  %p21_p2 = scmp.ge.s32.totalorder %s15690_s19, 4  }
0x2c38   : > { %s21048_s13 = smov %s15592_s14  ;;  %s21049_s14 = smov %s15596_s15 }
0x2c39   : > { %s21051_s16 = smov %s15690_s19  ;;  %23 = sbr.rel (!%p21_p2) target bundleno = 5 (0x5), region = 106 }
0x2c3d   : > { %s21050_s15 = smov %s21047_s22 }
0x2c40   :  { %12534 = vsyncpa [#allocation3], 1 }
0x2c41   :  { %12536 = vsyncpa [#allocation3 + $0x1], 1 }

</bundles_post_ra>
